<compile_context>
chip_gen: v7x
topology: tpu7x:2x2x1
jax: 0.10.0
libtpu: 0.0.40
codegen_flags: <defaults>
</compile_context>

<pallas_src>
import math

import numpy as np

import jax
import jax.numpy as jnp
from jax import lax
from jax.experimental import pallas as pl
from jax.experimental.pallas import tpu as pltpu

C_OUT = 6              # conv1 output channels
K = 5                  # conv1 kernel size
IMG = 28               # input spatial size (forced by Linear(6*12*12, 120))
IMGP = 32              # image row padded 28 -> 32 (aligned, static sublane offsets)
CONV = IMG - K + 1     # 24: conv output size
POOL = CONV // 2       # 12: pooled output size
FLAT = C_OUT * POOL * POOL       # 864 (torch flatten size)
H1, H2, N_OUT = 120, 84, 10
H1P, H2P, OUTP = 128, 128, 16    # padded MLP dims
BT = 128               # batch tile; batch lives in the lane dimension
ROWS72 = C_OUT * POOL  # 72: rows per pool phase, index = c*12 + q
SLAB = 6 * IMGP        # 192: six padded image rows feed one pooled output row
TM = 4 * ROWS72        # 288: Toeplitz LHS rows (4 pool phases stacked in M)


def fused_net_kernel(t_ref, bcv_ref, x_ref, w1_ref, b1_ref, w2_ref, b2_ref,
                     w3_ref, b3_ref, out_ref, h1_ref):
    # t_ref  : VMEM (288, 192)    conv1 as Toeplitz matrix; row = phase*72 + c*12 + q,
    #                             col = (dy+kh)*32 + 2q+dx+kw holds W[c,kh,kw]
    # bcv_ref: VMEM (72, 1)       conv1 bias broadcast to rows c*12+q
    # x_ref  : VMEM (896, BT)     input tile, row = h*32 + w, batch in lanes
    # w1_ref : VMEM (12, 128, 72) linear1 weight chunked per pooled row p (zero pads)
    # b1_ref : VMEM (128, 1)      linear1 bias (zero padded)
    # w2_ref : VMEM (128, 128)    linear2 weight (zero padded)
    # b2_ref : VMEM (128, 1)
    # w3_ref : VMEM (16, 128)     linear3 weight (zero padded)
    # b3_ref : VMEM (16, 1)
    # out_ref: VMEM (16, BT)      rows 0..9 = the 10 logits, batch in lanes
    # h1_ref : VMEM scratch (128, BT)  linear1 accumulator

    for p in range(POOL):
        # Image rows 2p..2p+5, contiguous and statically aligned (stride 32 rows).
        slab = x_ref[p * 2 * IMGP:(p * 2 + 6) * IMGP, :]                  # (192, BT)

        # conv1 for all 6 channels, both conv rows (dy) and both conv cols (dx) of
        # this pooled row, in a single MXU matmul.
        cp = jnp.dot(t_ref[...], slab, preferred_element_type=jnp.float32)  # (288, BT)

        # 2x2/2 max-pool = elementwise max over the 4 stacked pool phases.
        m = jnp.maximum(jnp.maximum(cp[0:ROWS72], cp[ROWS72:2 * ROWS72]),
                        jnp.maximum(cp[2 * ROWS72:3 * ROWS72], cp[3 * ROWS72:4 * ROWS72]))
        # Bias is constant over the window: max(relu(s + b)) == relu(max(s) + b).
        pooled = jnp.maximum(m + bcv_ref[...], 0.0)                       # (72, BT)

        # Fused linear1: accumulate this pooled row's contribution on the MXU.
        d = jnp.dot(w1_ref[p], pooled, preferred_element_type=jnp.float32)  # (128, BT)
        if p == 0:
            h1_ref[...] = d
        else:
            h1_ref[...] += d

    # Remaining MLP, batch in lanes: h = W @ act + b (native (out, in) weight layout).
    h = jnp.maximum(h1_ref[...] + b1_ref[...], 0.0)                       # (128, BT)
    h = jnp.maximum(jnp.dot(w2_ref[...], h, preferred_element_type=jnp.float32)
                    + b2_ref[...], 0.0)                                   # (128, BT)
    out_ref[...] = (jnp.dot(w3_ref[...], h, preferred_element_type=jnp.float32)
                    + b3_ref[...])                                        # (16, BT)


def prepare_params(params):
    """One-time packing/padding of PyTorch-layout weights for the fused kernel."""
    wc, bc, w1, b1, w2, b2, w3, b3 = (np.asarray(p, np.float32) for p in params)

    # conv1 (6,1,5,5) -> Toeplitz matrix T (288, 192):
    #   T[(dy*2+dx)*72 + c*12 + q, (dy+kh)*32 + 2q+dx+kw] = W[c, kh, kw]
    wcr = wc.reshape(C_OUT, K, K)
    t = np.zeros((TM, SLAB), np.float32)
    for dy in range(2):
        for dx in range(2):
            for c in range(C_OUT):
                for q in range(POOL):
                    row = (dy * 2 + dx) * ROWS72 + c * POOL + q
                    for kh in range(K):
                        for kw in range(K):
                            t[row, (dy + kh) * IMGP + 2 * q + dx + kw] += wcr[c, kh, kw]
    bcv = np.repeat(bc, POOL).reshape(ROWS72, 1)

    # linear1 (120, 864): torch flat index c*144 + p*12 + q  ->  chunk p, column c*12+q.
    w1r = w1.reshape(H1, C_OUT, POOL, POOL).transpose(2, 0, 1, 3).reshape(POOL, H1, ROWS72)
    w1p = np.zeros((POOL, H1P, ROWS72), np.float32)
    w1p[:, :H1, :] = w1r
    b1p = np.zeros((H1P, 1), np.float32); b1p[:H1, 0] = b1
    w2p = np.zeros((H2P, H1P), np.float32); w2p[:H2, :H1] = w2
    b2p = np.zeros((H2P, 1), np.float32); b2p[:H2, 0] = b2
    w3p = np.zeros((OUTP, H2P), np.float32); w3p[:N_OUT, :H2] = w3
    b3p = np.zeros((OUTP, 1), np.float32); b3p[:N_OUT, 0] = b3
    return tuple(jnp.asarray(a) for a in (t, bcv, w1p, b1p, w2p, b2p, w3p, b3p))


def net_forward(x, prep):
    t, bcv, w1p, b1p, w2p, b2p, w3p, b3p = prep
    B = x.shape[0]
    n_tiles = -(-B // BT)
    b_pad = n_tiles * BT

    # Layout glue: pad batch to a tile multiple, pad rows 28->32, move batch to lanes.
    x2 = x[:, 0, :, :].astype(jnp.float32)                         # (B, 28, 28)
    x2 = jnp.pad(x2, ((0, b_pad - B), (0, 0), (0, IMGP - IMG)))    # (b_pad, 28, 32)
    xt = jnp.transpose(x2, (1, 2, 0)).reshape(IMG * IMGP, b_pad)   # (896, b_pad)

    out = pl.pallas_call(
        fused_net_kernel,
        out_shape=jax.ShapeDtypeStruct((OUTP, b_pad), jnp.float32),
        grid=(n_tiles,),
        in_specs=[
            pl.BlockSpec((TM, SLAB), lambda i: (0, 0)),                 # Toeplitz conv weight
            pl.BlockSpec((ROWS72, 1), lambda i: (0, 0)),                # conv bias vector
            pl.BlockSpec((IMG * IMGP, BT), lambda i: (0, i)),           # input tile
            pl.BlockSpec((POOL, H1P, ROWS72), lambda i: (0, 0, 0)),     # w1 chunks
            pl.BlockSpec((H1P, 1), lambda i: (0, 0)),                   # b1
            pl.BlockSpec((H2P, H1P), lambda i: (0, 0)),                 # w2
            pl.BlockSpec((H2P, 1), lambda i: (0, 0)),                   # b2
            pl.BlockSpec((OUTP, H2P), lambda i: (0, 0)),                # w3
            pl.BlockSpec((OUTP, 1), lambda i: (0, 0)),                  # b3
        ],
        out_specs=pl.BlockSpec((OUTP, BT), lambda i: (0, i)),
        scratch_shapes=[pltpu.VMEM((H1P, BT), jnp.float32)],
        compiler_params=pltpu.CompilerParams(dimension_semantics=("parallel",)),
    )(t, bcv, xt, w1p, b1p, w2p, b2p, w3p, b3p)

    return out[:N_OUT, :B].T                                       # (B, 10)


def reference_forward(x, params):
    wc, bc, w1, b1, w2, b2, w3, b3 = params
    conv = lax.conv_general_dilated(x, wc, (1, 1), "VALID",
                                    dimension_numbers=("NCHW", "OIHW", "NCHW"))
    conv = conv + bc.reshape(1, C_OUT, 1, 1)
    r = jnp.maximum(conv, 0.0)
    pooled = lax.reduce_window(r, -jnp.inf, lax.max,
                               (1, 1, 2, 2), (1, 1, 2, 2), "VALID")
    flat = pooled.reshape(x.shape[0], -1)
    h = jnp.maximum(flat @ w1.T + b1, 0.0)
    h = jnp.maximum(h @ w2.T + b2, 0.0)
    return h @ w3.T + b3


def init_params(key):
    ks = jax.random.split(key, 8)
    wc = 0.1 * jax.random.normal(ks[0], (C_OUT, 1, K, K), jnp.float32)
    bc = 0.1 * jax.random.normal(ks[1], (C_OUT,), jnp.float32)
    w1 = jax.random.normal(ks[2], (H1, FLAT), jnp.float32) / math.sqrt(FLAT)
    b1 = 0.1 * jax.random.normal(ks[3], (H1,), jnp.float32)
    w2 = jax.random.normal(ks[4], (H2, H1), jnp.float32) / math.sqrt(float(H1))
    b2 = 0.1 * jax.random.normal(ks[5], (H2,), jnp.float32)
    w3 = jax.random.normal(ks[6], (N_OUT, H2), jnp.float32) / math.sqrt(float(H2))
    b3 = 0.1 * jax.random.normal(ks[7], (N_OUT,), jnp.float32)
    return (wc, bc, w1, b1, w2, b2, w3, b3)


if __name__ == "__main__":
    key = jax.random.PRNGKey(0)
    kx, kp = jax.random.split(key)
    B = 2
    x = jax.random.normal(kx, (B, 1, IMG, IMG), jnp.float32)     # NCHW, MNIST-sized
    params = init_params(kp)
    prep = prepare_params(params)        # one-time weight packing (hoisted out of forward)

    out = jax.jit(net_forward)(x, prep)
    out = jax.block_until_ready(out)
    assert out.shape == (B, N_OUT) and out.dtype == jnp.float32

    ref = jax.block_until_ready(reference_forward(x, params))
    if not np.allclose(np.asarray(out), np.asarray(ref), atol=2e-2, rtol=2e-2):
        raise AssertionError("Pallas kernel output mismatch vs JAX reference")

    print("KERNEL_OK")
</pallas_src>

<mosaic_0001>
module attributes {stable_mosaic.version = 11 : i64} {
  func.func @fused_net_kernel(%arg0: i32, %arg1: memref<288x192xf32, #tpu.memory_space<vmem>>, %arg2: memref<72x1xf32, #tpu.memory_space<vmem>>, %arg3: memref<896x128xf32, #tpu.memory_space<vmem>>, %arg4: memref<12x128x72xf32, #tpu.memory_space<vmem>>, %arg5: memref<128x1xf32, #tpu.memory_space<vmem>>, %arg6: memref<128x128xf32, #tpu.memory_space<vmem>>, %arg7: memref<128x1xf32, #tpu.memory_space<vmem>>, %arg8: memref<16x128xf32, #tpu.memory_space<vmem>>, %arg9: memref<16x1xf32, #tpu.memory_space<vmem>>, %arg10: memref<16x128xf32, #tpu.memory_space<vmem>>, %arg11: memref<128x128xf32, #tpu.memory_space<vmem>>) attributes {dimension_semantics = [#tpu.dimension_semantics<parallel>], iteration_bounds = array<i64: 1>, scalar_prefetch = 0 : i64, scratch_operands = 1 : i64, tpu.core_type = #tpu.core_type<tc>, window_params = [{pipeline_mode = #tpu.pipeline_mode<synchronous>, transform_indices = @transform_0, window_bounds = array<i64: 288, 192>}, {pipeline_mode = #tpu.pipeline_mode<synchronous>, transform_indices = @transform_1, window_bounds = array<i64: 72, 1>}, {transform_indices = @transform_2, window_bounds = array<i64: 896, 128>}, {pipeline_mode = #tpu.pipeline_mode<synchronous>, transform_indices = @transform_3, window_bounds = array<i64: 12, 128, 72>}, {pipeline_mode = #tpu.pipeline_mode<synchronous>, transform_indices = @transform_4, window_bounds = array<i64: 128, 1>}, {pipeline_mode = #tpu.pipeline_mode<synchronous>, transform_indices = @transform_5, window_bounds = array<i64: 128, 128>}, {pipeline_mode = #tpu.pipeline_mode<synchronous>, transform_indices = @transform_6, window_bounds = array<i64: 128, 1>}, {pipeline_mode = #tpu.pipeline_mode<synchronous>, transform_indices = @transform_7, window_bounds = array<i64: 16, 128>}, {pipeline_mode = #tpu.pipeline_mode<synchronous>, transform_indices = @transform_8, window_bounds = array<i64: 16, 1>}, {transform_indices = @transform_9, window_bounds = array<i64: 16, 128>}]} {
    %c0 = arith.constant 0 : index
    %c0_0 = arith.constant 0 : index
    %0 = vector.load %arg3[%c0, %c0_0] : memref<896x128xf32, #tpu.memory_space<vmem>>, vector<192x128xf32>
    %c0_1 = arith.constant 0 : index
    %c0_2 = arith.constant 0 : index
    %1 = vector.load %arg1[%c0_1, %c0_2] : memref<288x192xf32, #tpu.memory_space<vmem>>, vector<288x192xf32>
    %cst = arith.constant dense<0.000000e+00> : vector<288x128xf32>
    %2 = tpu.matmul %1, %0, %cst {dimension_numbers = #tpu.dot_dimension_numbers<[1], [0], [0], [1], [0, 0, 1, 1], [], []>} : vector<288x192xf32>, vector<192x128xf32>, vector<288x128xf32> -> vector<288x128xf32>
    %3 = vector.extract_strided_slice %2 {offsets = [0, 0], sizes = [72, 128], strides = [1, 1]} : vector<288x128xf32> to vector<72x128xf32>
    %4 = vector.extract_strided_slice %2 {offsets = [72, 0], sizes = [72, 128], strides = [1, 1]} : vector<288x128xf32> to vector<72x128xf32>
    %5 = arith.maximumf %3, %4 : vector<72x128xf32>
    %6 = vector.extract_strided_slice %2 {offsets = [144, 0], sizes = [72, 128], strides = [1, 1]} : vector<288x128xf32> to vector<72x128xf32>
    %7 = vector.extract_strided_slice %2 {offsets = [216, 0], sizes = [72, 128], strides = [1, 1]} : vector<288x128xf32> to vector<72x128xf32>
    %8 = arith.maximumf %6, %7 : vector<72x128xf32>
    %9 = arith.maximumf %5, %8 : vector<72x128xf32>
    %c0_3 = arith.constant 0 : index
    %c0_4 = arith.constant 0 : index
    %10 = vector.load %arg2[%c0_3, %c0_4] : memref<72x1xf32, #tpu.memory_space<vmem>>, vector<72x1xf32>
    %11 = vector.broadcast %10 : vector<72x1xf32> to vector<72x128xf32>
    %12 = arith.addf %9, %11 : vector<72x128xf32>
    %cst_5 = arith.constant 0.000000e+00 : f32
    %13 = vector.broadcast %cst_5 : f32 to vector<72x128xf32>
    %14 = arith.maximumf %12, %13 : vector<72x128xf32>
    %c0_6 = arith.constant 0 : index
    %c0_7 = arith.constant 0 : index
    %c0_8 = arith.constant 0 : index
    %15 = vector.load %arg4[%c0_6, %c0_7, %c0_8] : memref<12x128x72xf32, #tpu.memory_space<vmem>>, vector<1x128x72xf32>
    %16 = vector.shape_cast %15 : vector<1x128x72xf32> to vector<128x72xf32>
    %cst_9 = arith.constant dense<0.000000e+00> : vector<128x128xf32>
    %17 = tpu.matmul %16, %14, %cst_9 {dimension_numbers = #tpu.dot_dimension_numbers<[1], [0], [0], [1], [0, 0, 1, 1], [], []>} : vector<128x72xf32>, vector<72x128xf32>, vector<128x128xf32> -> vector<128x128xf32>
    %c0_10 = arith.constant 0 : index
    %c0_11 = arith.constant 0 : index
    %18 = vector.load %arg11[%c0_10, %c0_11] : memref<128x128xf32, #tpu.memory_space<vmem>>, vector<128x128xf32>
    tpu.vector_store %arg11[%c0_10, %c0_11], %17 {strides = array<i32>} : memref<128x128xf32, #tpu.memory_space<vmem>>, vector<128x128xf32>,
    %c64 = arith.constant 64 : index
    %c0_12 = arith.constant 0 : index
    %19 = vector.load %arg3[%c64, %c0_12] : memref<896x128xf32, #tpu.memory_space<vmem>>, vector<192x128xf32>
    %c0_13 = arith.constant 0 : index
    %c0_14 = arith.constant 0 : index
    %20 = vector.load %arg1[%c0_13, %c0_14] : memref<288x192xf32, #tpu.memory_space<vmem>>, vector<288x192xf32>
    %cst_15 = arith.constant dense<0.000000e+00> : vector<288x128xf32>
    %21 = tpu.matmul %20, %19, %cst_15 {dimension_numbers = #tpu.dot_dimension_numbers<[1], [0], [0], [1], [0, 0, 1, 1], [], []>} : vector<288x192xf32>, vector<192x128xf32>, vector<288x128xf32> -> vector<288x128xf32>
    %22 = vector.extract_strided_slice %21 {offsets = [0, 0], sizes = [72, 128], strides = [1, 1]} : vector<288x128xf32> to vector<72x128xf32>
    %23 = vector.extract_strided_slice %21 {offsets = [72, 0], sizes = [72, 128], strides = [1, 1]} : vector<288x128xf32> to vector<72x128xf32>
    %24 = arith.maximumf %22, %23 : vector<72x128xf32>
    %25 = vector.extract_strided_slice %21 {offsets = [144, 0], sizes = [72, 128], strides = [1, 1]} : vector<288x128xf32> to vector<72x128xf32>
    %26 = vector.extract_strided_slice %21 {offsets = [216, 0], sizes = [72, 128], strides = [1, 1]} : vector<288x128xf32> to vector<72x128xf32>
    %27 = arith.maximumf %25, %26 : vector<72x128xf32>
    %28 = arith.maximumf %24, %27 : vector<72x128xf32>
    %c0_16 = arith.constant 0 : index
    %c0_17 = arith.constant 0 : index
    %29 = vector.load %arg2[%c0_16, %c0_17] : memref<72x1xf32, #tpu.memory_space<vmem>>, vector<72x1xf32>
    %30 = vector.broadcast %29 : vector<72x1xf32> to vector<72x128xf32>
    %31 = arith.addf %28, %30 : vector<72x128xf32>
    %cst_18 = arith.constant 0.000000e+00 : f32
    %32 = vector.broadcast %cst_18 : f32 to vector<72x128xf32>
    %33 = arith.maximumf %31, %32 : vector<72x128xf32>
    %c1 = arith.constant 1 : index
    %c0_19 = arith.constant 0 : index
    %c0_20 = arith.constant 0 : index
    %34 = vector.load %arg4[%c1, %c0_19, %c0_20] : memref<12x128x72xf32, #tpu.memory_space<vmem>>, vector<1x128x72xf32>
    %35 = vector.shape_cast %34 : vector<1x128x72xf32> to vector<128x72xf32>
    %cst_21 = arith.constant dense<0.000000e+00> : vector<128x128xf32>
    %36 = tpu.matmul %35, %33, %cst_21 {dimension_numbers = #tpu.dot_dimension_numbers<[1], [0], [0], [1], [0, 0, 1, 1], [], []>} : vector<128x72xf32>, vector<72x128xf32>, vector<128x128xf32> -> vector<128x128xf32>
    %c0_22 = arith.constant 0 : index
    %c0_23 = arith.constant 0 : index
    %37 = vector.load %arg11[%c0_22, %c0_23] : memref<128x128xf32, #tpu.memory_space<vmem>>, vector<128x128xf32>
    %38 = arith.addf %37, %36 : vector<128x128xf32>
    %c0_24 = arith.constant 0 : index
    %c0_25 = arith.constant 0 : index
    %39 = vector.load %arg11[%c0_24, %c0_25] : memref<128x128xf32, #tpu.memory_space<vmem>>, vector<128x128xf32>
    tpu.vector_store %arg11[%c0_24, %c0_25], %38 {strides = array<i32>} : memref<128x128xf32, #tpu.memory_space<vmem>>, vector<128x128xf32>,
    %c128 = arith.constant 128 : index
    %c0_26 = arith.constant 0 : index
    %40 = vector.load %arg3[%c128, %c0_26] : memref<896x128xf32, #tpu.memory_space<vmem>>, vector<192x128xf32>
    %c0_27 = arith.constant 0 : index
    %c0_28 = arith.constant 0 : index
    %41 = vector.load %arg1[%c0_27, %c0_28] : memref<288x192xf32, #tpu.memory_space<vmem>>, vector<288x192xf32>
    %cst_29 = arith.constant dense<0.000000e+00> : vector<288x128xf32>
    %42 = tpu.matmul %41, %40, %cst_29 {dimension_numbers = #tpu.dot_dimension_numbers<[1], [0], [0], [1], [0, 0, 1, 1], [], []>} : vector<288x192xf32>, vector<192x128xf32>, vector<288x128xf32> -> vector<288x128xf32>
    %43 = vector.extract_strided_slice %42 {offsets = [0, 0], sizes = [72, 128], strides = [1, 1]} : vector<288x128xf32> to vector<72x128xf32>
    %44 = vector.extract_strided_slice %42 {offsets = [72, 0], sizes = [72, 128], strides = [1, 1]} : vector<288x128xf32> to vector<72x128xf32>
    %45 = arith.maximumf %43, %44 : vector<72x128xf32>
    %46 = vector.extract_strided_slice %42 {offsets = [144, 0], sizes = [72, 128], strides = [1, 1]} : vector<288x128xf32> to vector<72x128xf32>
    %47 = vector.extract_strided_slice %42 {offsets = [216, 0], sizes = [72, 128], strides = [1, 1]} : vector<288x128xf32> to vector<72x128xf32>
    %48 = arith.maximumf %46, %47 : vector<72x128xf32>
    %49 = arith.maximumf %45, %48 : vector<72x128xf32>
    %c0_30 = arith.constant 0 : index
    %c0_31 = arith.constant 0 : index
    %50 = vector.load %arg2[%c0_30, %c0_31] : memref<72x1xf32, #tpu.memory_space<vmem>>, vector<72x1xf32>
    %51 = vector.broadcast %50 : vector<72x1xf32> to vector<72x128xf32>
    %52 = arith.addf %49, %51 : vector<72x128xf32>
    %cst_32 = arith.constant 0.000000e+00 : f32
    %53 = vector.broadcast %cst_32 : f32 to vector<72x128xf32>
    %54 = arith.maximumf %52, %53 : vector<72x128xf32>
    %c2 = arith.constant 2 : index
    %c0_33 = arith.constant 0 : index
    %c0_34 = arith.constant 0 : index
    %55 = vector.load %arg4[%c2, %c0_33, %c0_34] : memref<12x128x72xf32, #tpu.memory_space<vmem>>, vector<1x128x72xf32>
    %56 = vector.shape_cast %55 : vector<1x128x72xf32> to vector<128x72xf32>
    %cst_35 = arith.constant dense<0.000000e+00> : vector<128x128xf32>
    %57 = tpu.matmul %56, %54, %cst_35 {dimension_numbers = #tpu.dot_dimension_numbers<[1], [0], [0], [1], [0, 0, 1, 1], [], []>} : vector<128x72xf32>, vector<72x128xf32>, vector<128x128xf32> -> vector<128x128xf32>
    %c0_36 = arith.constant 0 : index
    %c0_37 = arith.constant 0 : index
    %58 = vector.load %arg11[%c0_36, %c0_37] : memref<128x128xf32, #tpu.memory_space<vmem>>, vector<128x128xf32>
    %59 = arith.addf %58, %57 : vector<128x128xf32>
    %c0_38 = arith.constant 0 : index
    %c0_39 = arith.constant 0 : index
    %60 = vector.load %arg11[%c0_38, %c0_39] : memref<128x128xf32, #tpu.memory_space<vmem>>, vector<128x128xf32>
    tpu.vector_store %arg11[%c0_38, %c0_39], %59 {strides = array<i32>} : memref<128x128xf32, #tpu.memory_space<vmem>>, vector<128x128xf32>,
    %c192 = arith.constant 192 : index
    %c0_40 = arith.constant 0 : index
    %61 = vector.load %arg3[%c192, %c0_40] : memref<896x128xf32, #tpu.memory_space<vmem>>, vector<192x128xf32>
    %c0_41 = arith.constant 0 : index
    %c0_42 = arith.constant 0 : index
    %62 = vector.load %arg1[%c0_41, %c0_42] : memref<288x192xf32, #tpu.memory_space<vmem>>, vector<288x192xf32>
    %cst_43 = arith.constant dense<0.000000e+00> : vector<288x128xf32>
    %63 = tpu.matmul %62, %61, %cst_43 {dimension_numbers = #tpu.dot_dimension_numbers<[1], [0], [0], [1], [0, 0, 1, 1], [], []>} : vector<288x192xf32>, vector<192x128xf32>, vector<288x128xf32> -> vector<288x128xf32>
    %64 = vector.extract_strided_slice %63 {offsets = [0, 0], sizes = [72, 128], strides = [1, 1]} : vector<288x128xf32> to vector<72x128xf32>
    %65 = vector.extract_strided_slice %63 {offsets = [72, 0], sizes = [72, 128], strides = [1, 1]} : vector<288x128xf32> to vector<72x128xf32>
    %66 = arith.maximumf %64, %65 : vector<72x128xf32>
    %67 = vector.extract_strided_slice %63 {offsets = [144, 0], sizes = [72, 128], strides = [1, 1]} : vector<288x128xf32> to vector<72x128xf32>
    %68 = vector.extract_strided_slice %63 {offsets = [216, 0], sizes = [72, 128], strides = [1, 1]} : vector<288x128xf32> to vector<72x128xf32>
    %69 = arith.maximumf %67, %68 : vector<72x128xf32>
    %70 = arith.maximumf %66, %69 : vector<72x128xf32>
    %c0_44 = arith.constant 0 : index
    %c0_45 = arith.constant 0 : index
    %71 = vector.load %arg2[%c0_44, %c0_45] : memref<72x1xf32, #tpu.memory_space<vmem>>, vector<72x1xf32>
    %72 = vector.broadcast %71 : vector<72x1xf32> to vector<72x128xf32>
    %73 = arith.addf %70, %72 : vector<72x128xf32>
    %cst_46 = arith.constant 0.000000e+00 : f32
    %74 = vector.broadcast %cst_46 : f32 to vector<72x128xf32>
    %75 = arith.maximumf %73, %74 : vector<72x128xf32>
    %c3 = arith.constant 3 : index
    %c0_47 = arith.constant 0 : index
    %c0_48 = arith.constant 0 : index
    %76 = vector.load %arg4[%c3, %c0_47, %c0_48] : memref<12x128x72xf32, #tpu.memory_space<vmem>>, vector<1x128x72xf32>
    %77 = vector.shape_cast %76 : vector<1x128x72xf32> to vector<128x72xf32>
    %cst_49 = arith.constant dense<0.000000e+00> : vector<128x128xf32>
    %78 = tpu.matmul %77, %75, %cst_49 {dimension_numbers = #tpu.dot_dimension_numbers<[1], [0], [0], [1], [0, 0, 1, 1], [], []>} : vector<128x72xf32>, vector<72x128xf32>, vector<128x128xf32> -> vector<128x128xf32>
    %c0_50 = arith.constant 0 : index
    %c0_51 = arith.constant 0 : index
    %79 = vector.load %arg11[%c0_50, %c0_51] : memref<128x128xf32, #tpu.memory_space<vmem>>, vector<128x128xf32>
    %80 = arith.addf %79, %78 : vector<128x128xf32>
    %c0_52 = arith.constant 0 : index
    %c0_53 = arith.constant 0 : index
    %81 = vector.load %arg11[%c0_52, %c0_53] : memref<128x128xf32, #tpu.memory_space<vmem>>, vector<128x128xf32>
    tpu.vector_store %arg11[%c0_52, %c0_53], %80 {strides = array<i32>} : memref<128x128xf32, #tpu.memory_space<vmem>>, vector<128x128xf32>,
    %c256 = arith.constant 256 : index
    %c0_54 = arith.constant 0 : index
    %82 = vector.load %arg3[%c256, %c0_54] : memref<896x128xf32, #tpu.memory_space<vmem>>, vector<192x128xf32>
    %c0_55 = arith.constant 0 : index
    %c0_56 = arith.constant 0 : index
    %83 = vector.load %arg1[%c0_55, %c0_56] : memref<288x192xf32, #tpu.memory_space<vmem>>, vector<288x192xf32>
    %cst_57 = arith.constant dense<0.000000e+00> : vector<288x128xf32>
    %84 = tpu.matmul %83, %82, %cst_57 {dimension_numbers = #tpu.dot_dimension_numbers<[1], [0], [0], [1], [0, 0, 1, 1], [], []>} : vector<288x192xf32>, vector<192x128xf32>, vector<288x128xf32> -> vector<288x128xf32>
    %85 = vector.extract_strided_slice %84 {offsets = [0, 0], sizes = [72, 128], strides = [1, 1]} : vector<288x128xf32> to vector<72x128xf32>
    %86 = vector.extract_strided_slice %84 {offsets = [72, 0], sizes = [72, 128], strides = [1, 1]} : vector<288x128xf32> to vector<72x128xf32>
    %87 = arith.maximumf %85, %86 : vector<72x128xf32>
    %88 = vector.extract_strided_slice %84 {offsets = [144, 0], sizes = [72, 128], strides = [1, 1]} : vector<288x128xf32> to vector<72x128xf32>
    %89 = vector.extract_strided_slice %84 {offsets = [216, 0], sizes = [72, 128], strides = [1, 1]} : vector<288x128xf32> to vector<72x128xf32>
    %90 = arith.maximumf %88, %89 : vector<72x128xf32>
    %91 = arith.maximumf %87, %90 : vector<72x128xf32>
    %c0_58 = arith.constant 0 : index
    %c0_59 = arith.constant 0 : index
    %92 = vector.load %arg2[%c0_58, %c0_59] : memref<72x1xf32, #tpu.memory_space<vmem>>, vector<72x1xf32>
    %93 = vector.broadcast %92 : vector<72x1xf32> to vector<72x128xf32>
    %94 = arith.addf %91, %93 : vector<72x128xf32>
    %cst_60 = arith.constant 0.000000e+00 : f32
    %95 = vector.broadcast %cst_60 : f32 to vector<72x128xf32>
    %96 = arith.maximumf %94, %95 : vector<72x128xf32>
    %c4 = arith.constant 4 : index
    %c0_61 = arith.constant 0 : index
    %c0_62 = arith.constant 0 : index
    %97 = vector.load %arg4[%c4, %c0_61, %c0_62] : memref<12x128x72xf32, #tpu.memory_space<vmem>>, vector<1x128x72xf32>
    %98 = vector.shape_cast %97 : vector<1x128x72xf32> to vector<128x72xf32>
    %cst_63 = arith.constant dense<0.000000e+00> : vector<128x128xf32>
    %99 = tpu.matmul %98, %96, %cst_63 {dimension_numbers = #tpu.dot_dimension_numbers<[1], [0], [0], [1], [0, 0, 1, 1], [], []>} : vector<128x72xf32>, vector<72x128xf32>, vector<128x128xf32> -> vector<128x128xf32>
    %c0_64 = arith.constant 0 : index
    %c0_65 = arith.constant 0 : index
    %100 = vector.load %arg11[%c0_64, %c0_65] : memref<128x128xf32, #tpu.memory_space<vmem>>, vector<128x128xf32>
    %101 = arith.addf %100, %99 : vector<128x128xf32>
    %c0_66 = arith.constant 0 : index
    %c0_67 = arith.constant 0 : index
    %102 = vector.load %arg11[%c0_66, %c0_67] : memref<128x128xf32, #tpu.memory_space<vmem>>, vector<128x128xf32>
    tpu.vector_store %arg11[%c0_66, %c0_67], %101 {strides = array<i32>} : memref<128x128xf32, #tpu.memory_space<vmem>>, vector<128x128xf32>,
    %c320 = arith.constant 320 : index
    %c0_68 = arith.constant 0 : index
    %103 = vector.load %arg3[%c320, %c0_68] : memref<896x128xf32, #tpu.memory_space<vmem>>, vector<192x128xf32>
    %c0_69 = arith.constant 0 : index
    %c0_70 = arith.constant 0 : index
    %104 = vector.load %arg1[%c0_69, %c0_70] : memref<288x192xf32, #tpu.memory_space<vmem>>, vector<288x192xf32>
    %cst_71 = arith.constant dense<0.000000e+00> : vector<288x128xf32>
    %105 = tpu.matmul %104, %103, %cst_71 {dimension_numbers = #tpu.dot_dimension_numbers<[1], [0], [0], [1], [0, 0, 1, 1], [], []>} : vector<288x192xf32>, vector<192x128xf32>, vector<288x128xf32> -> vector<288x128xf32>
    %106 = vector.extract_strided_slice %105 {offsets = [0, 0], sizes = [72, 128], strides = [1, 1]} : vector<288x128xf32> to vector<72x128xf32>
    %107 = vector.extract_strided_slice %105 {offsets = [72, 0], sizes = [72, 128], strides = [1, 1]} : vector<288x128xf32> to vector<72x128xf32>
    %108 = arith.maximumf %106, %107 : vector<72x128xf32>
    %109 = vector.extract_strided_slice %105 {offsets = [144, 0], sizes = [72, 128], strides = [1, 1]} : vector<288x128xf32> to vector<72x128xf32>
    %110 = vector.extract_strided_slice %105 {offsets = [216, 0], sizes = [72, 128], strides = [1, 1]} : vector<288x128xf32> to vector<72x128xf32>
    %111 = arith.maximumf %109, %110 : vector<72x128xf32>
    %112 = arith.maximumf %108, %111 : vector<72x128xf32>
    %c0_72 = arith.constant 0 : index
    %c0_73 = arith.constant 0 : index
    %113 = vector.load %arg2[%c0_72, %c0_73] : memref<72x1xf32, #tpu.memory_space<vmem>>, vector<72x1xf32>
    %114 = vector.broadcast %113 : vector<72x1xf32> to vector<72x128xf32>
    %115 = arith.addf %112, %114 : vector<72x128xf32>
    %cst_74 = arith.constant 0.000000e+00 : f32
    %116 = vector.broadcast %cst_74 : f32 to vector<72x128xf32>
    %117 = arith.maximumf %115, %116 : vector<72x128xf32>
    %c5 = arith.constant 5 : index
    %c0_75 = arith.constant 0 : index
    %c0_76 = arith.constant 0 : index
    %118 = vector.load %arg4[%c5, %c0_75, %c0_76] : memref<12x128x72xf32, #tpu.memory_space<vmem>>, vector<1x128x72xf32>
    %119 = vector.shape_cast %118 : vector<1x128x72xf32> to vector<128x72xf32>
    %cst_77 = arith.constant dense<0.000000e+00> : vector<128x128xf32>
    %120 = tpu.matmul %119, %117, %cst_77 {dimension_numbers = #tpu.dot_dimension_numbers<[1], [0], [0], [1], [0, 0, 1, 1], [], []>} : vector<128x72xf32>, vector<72x128xf32>, vector<128x128xf32> -> vector<128x128xf32>
    %c0_78 = arith.constant 0 : index
    %c0_79 = arith.constant 0 : index
    %121 = vector.load %arg11[%c0_78, %c0_79] : memref<128x128xf32, #tpu.memory_space<vmem>>, vector<128x128xf32>
    %122 = arith.addf %121, %120 : vector<128x128xf32>
    %c0_80 = arith.constant 0 : index
    %c0_81 = arith.constant 0 : index
    %123 = vector.load %arg11[%c0_80, %c0_81] : memref<128x128xf32, #tpu.memory_space<vmem>>, vector<128x128xf32>
    tpu.vector_store %arg11[%c0_80, %c0_81], %122 {strides = array<i32>} : memref<128x128xf32, #tpu.memory_space<vmem>>, vector<128x128xf32>,
    %c384 = arith.constant 384 : index
    %c0_82 = arith.constant 0 : index
    %124 = vector.load %arg3[%c384, %c0_82] : memref<896x128xf32, #tpu.memory_space<vmem>>, vector<192x128xf32>
    %c0_83 = arith.constant 0 : index
    %c0_84 = arith.constant 0 : index
    %125 = vector.load %arg1[%c0_83, %c0_84] : memref<288x192xf32, #tpu.memory_space<vmem>>, vector<288x192xf32>
    %cst_85 = arith.constant dense<0.000000e+00> : vector<288x128xf32>
    %126 = tpu.matmul %125, %124, %cst_85 {dimension_numbers = #tpu.dot_dimension_numbers<[1], [0], [0], [1], [0, 0, 1, 1], [], []>} : vector<288x192xf32>, vector<192x128xf32>, vector<288x128xf32> -> vector<288x128xf32>
    %127 = vector.extract_strided_slice %126 {offsets = [0, 0], sizes = [72, 128], strides = [1, 1]} : vector<288x128xf32> to vector<72x128xf32>
    %128 = vector.extract_strided_slice %126 {offsets = [72, 0], sizes = [72, 128], strides = [1, 1]} : vector<288x128xf32> to vector<72x128xf32>
    %129 = arith.maximumf %127, %128 : vector<72x128xf32>
    %130 = vector.extract_strided_slice %126 {offsets = [144, 0], sizes = [72, 128], strides = [1, 1]} : vector<288x128xf32> to vector<72x128xf32>
    %131 = vector.extract_strided_slice %126 {offsets = [216, 0], sizes = [72, 128], strides = [1, 1]} : vector<288x128xf32> to vector<72x128xf32>
    %132 = arith.maximumf %130, %131 : vector<72x128xf32>
    %133 = arith.maximumf %129, %132 : vector<72x128xf32>
    %c0_86 = arith.constant 0 : index
    %c0_87 = arith.constant 0 : index
    %134 = vector.load %arg2[%c0_86, %c0_87] : memref<72x1xf32, #tpu.memory_space<vmem>>, vector<72x1xf32>
    %135 = vector.broadcast %134 : vector<72x1xf32> to vector<72x128xf32>
    %136 = arith.addf %133, %135 : vector<72x128xf32>
    %cst_88 = arith.constant 0.000000e+00 : f32
    %137 = vector.broadcast %cst_88 : f32 to vector<72x128xf32>
    %138 = arith.maximumf %136, %137 : vector<72x128xf32>
    %c6 = arith.constant 6 : index
    %c0_89 = arith.constant 0 : index
    %c0_90 = arith.constant 0 : index
    %139 = vector.load %arg4[%c6, %c0_89, %c0_90] : memref<12x128x72xf32, #tpu.memory_space<vmem>>, vector<1x128x72xf32>
    %140 = vector.shape_cast %139 : vector<1x128x72xf32> to vector<128x72xf32>
    %cst_91 = arith.constant dense<0.000000e+00> : vector<128x128xf32>
    %141 = tpu.matmul %140, %138, %cst_91 {dimension_numbers = #tpu.dot_dimension_numbers<[1], [0], [0], [1], [0, 0, 1, 1], [], []>} : vector<128x72xf32>, vector<72x128xf32>, vector<128x128xf32> -> vector<128x128xf32>
    %c0_92 = arith.constant 0 : index
    %c0_93 = arith.constant 0 : index
    %142 = vector.load %arg11[%c0_92, %c0_93] : memref<128x128xf32, #tpu.memory_space<vmem>>, vector<128x128xf32>
    %143 = arith.addf %142, %141 : vector<128x128xf32>
    %c0_94 = arith.constant 0 : index
    %c0_95 = arith.constant 0 : index
    %144 = vector.load %arg11[%c0_94, %c0_95] : memref<128x128xf32, #tpu.memory_space<vmem>>, vector<128x128xf32>
    tpu.vector_store %arg11[%c0_94, %c0_95], %143 {strides = array<i32>} : memref<128x128xf32, #tpu.memory_space<vmem>>, vector<128x128xf32>,
    %c448 = arith.constant 448 : index
    %c0_96 = arith.constant 0 : index
    %145 = vector.load %arg3[%c448, %c0_96] : memref<896x128xf32, #tpu.memory_space<vmem>>, vector<192x128xf32>
    %c0_97 = arith.constant 0 : index
    %c0_98 = arith.constant 0 : index
    %146 = vector.load %arg1[%c0_97, %c0_98] : memref<288x192xf32, #tpu.memory_space<vmem>>, vector<288x192xf32>
    %cst_99 = arith.constant dense<0.000000e+00> : vector<288x128xf32>
    %147 = tpu.matmul %146, %145, %cst_99 {dimension_numbers = #tpu.dot_dimension_numbers<[1], [0], [0], [1], [0, 0, 1, 1], [], []>} : vector<288x192xf32>, vector<192x128xf32>, vector<288x128xf32> -> vector<288x128xf32>
    %148 = vector.extract_strided_slice %147 {offsets = [0, 0], sizes = [72, 128], strides = [1, 1]} : vector<288x128xf32> to vector<72x128xf32>
    %149 = vector.extract_strided_slice %147 {offsets = [72, 0], sizes = [72, 128], strides = [1, 1]} : vector<288x128xf32> to vector<72x128xf32>
    %150 = arith.maximumf %148, %149 : vector<72x128xf32>
    %151 = vector.extract_strided_slice %147 {offsets = [144, 0], sizes = [72, 128], strides = [1, 1]} : vector<288x128xf32> to vector<72x128xf32>
    %152 = vector.extract_strided_slice %147 {offsets = [216, 0], sizes = [72, 128], strides = [1, 1]} : vector<288x128xf32> to vector<72x128xf32>
    %153 = arith.maximumf %151, %152 : vector<72x128xf32>
    %154 = arith.maximumf %150, %153 : vector<72x128xf32>
    %c0_100 = arith.constant 0 : index
    %c0_101 = arith.constant 0 : index
    %155 = vector.load %arg2[%c0_100, %c0_101] : memref<72x1xf32, #tpu.memory_space<vmem>>, vector<72x1xf32>
    %156 = vector.broadcast %155 : vector<72x1xf32> to vector<72x128xf32>
    %157 = arith.addf %154, %156 : vector<72x128xf32>
    %cst_102 = arith.constant 0.000000e+00 : f32
    %158 = vector.broadcast %cst_102 : f32 to vector<72x128xf32>
    %159 = arith.maximumf %157, %158 : vector<72x128xf32>
    %c7 = arith.constant 7 : index
    %c0_103 = arith.constant 0 : index
    %c0_104 = arith.constant 0 : index
    %160 = vector.load %arg4[%c7, %c0_103, %c0_104] : memref<12x128x72xf32, #tpu.memory_space<vmem>>, vector<1x128x72xf32>
    %161 = vector.shape_cast %160 : vector<1x128x72xf32> to vector<128x72xf32>
    %cst_105 = arith.constant dense<0.000000e+00> : vector<128x128xf32>
    %162 = tpu.matmul %161, %159, %cst_105 {dimension_numbers = #tpu.dot_dimension_numbers<[1], [0], [0], [1], [0, 0, 1, 1], [], []>} : vector<128x72xf32>, vector<72x128xf32>, vector<128x128xf32> -> vector<128x128xf32>
    %c0_106 = arith.constant 0 : index
    %c0_107 = arith.constant 0 : index
    %163 = vector.load %arg11[%c0_106, %c0_107] : memref<128x128xf32, #tpu.memory_space<vmem>>, vector<128x128xf32>
    %164 = arith.addf %163, %162 : vector<128x128xf32>
    %c0_108 = arith.constant 0 : index
    %c0_109 = arith.constant 0 : index
    %165 = vector.load %arg11[%c0_108, %c0_109] : memref<128x128xf32, #tpu.memory_space<vmem>>, vector<128x128xf32>
    tpu.vector_store %arg11[%c0_108, %c0_109], %164 {strides = array<i32>} : memref<128x128xf32, #tpu.memory_space<vmem>>, vector<128x128xf32>,
    %c512 = arith.constant 512 : index
    %c0_110 = arith.constant 0 : index
    %166 = vector.load %arg3[%c512, %c0_110] : memref<896x128xf32, #tpu.memory_space<vmem>>, vector<192x128xf32>
    %c0_111 = arith.constant 0 : index
    %c0_112 = arith.constant 0 : index
    %167 = vector.load %arg1[%c0_111, %c0_112] : memref<288x192xf32, #tpu.memory_space<vmem>>, vector<288x192xf32>
    %cst_113 = arith.constant dense<0.000000e+00> : vector<288x128xf32>
    %168 = tpu.matmul %167, %166, %cst_113 {dimension_numbers = #tpu.dot_dimension_numbers<[1], [0], [0], [1], [0, 0, 1, 1], [], []>} : vector<288x192xf32>, vector<192x128xf32>, vector<288x128xf32> -> vector<288x128xf32>
    %169 = vector.extract_strided_slice %168 {offsets = [0, 0], sizes = [72, 128], strides = [1, 1]} : vector<288x128xf32> to vector<72x128xf32>
    %170 = vector.extract_strided_slice %168 {offsets = [72, 0], sizes = [72, 128], strides = [1, 1]} : vector<288x128xf32> to vector<72x128xf32>
    %171 = arith.maximumf %169, %170 : vector<72x128xf32>
    %172 = vector.extract_strided_slice %168 {offsets = [144, 0], sizes = [72, 128], strides = [1, 1]} : vector<288x128xf32> to vector<72x128xf32>
    %173 = vector.extract_strided_slice %168 {offsets = [216, 0], sizes = [72, 128], strides = [1, 1]} : vector<288x128xf32> to vector<72x128xf32>
    %174 = arith.maximumf %172, %173 : vector<72x128xf32>
    %175 = arith.maximumf %171, %174 : vector<72x128xf32>
    %c0_114 = arith.constant 0 : index
    %c0_115 = arith.constant 0 : index
    %176 = vector.load %arg2[%c0_114, %c0_115] : memref<72x1xf32, #tpu.memory_space<vmem>>, vector<72x1xf32>
    %177 = vector.broadcast %176 : vector<72x1xf32> to vector<72x128xf32>
    %178 = arith.addf %175, %177 : vector<72x128xf32>
    %cst_116 = arith.constant 0.000000e+00 : f32
    %179 = vector.broadcast %cst_116 : f32 to vector<72x128xf32>
    %180 = arith.maximumf %178, %179 : vector<72x128xf32>
    %c8 = arith.constant 8 : index
    %c0_117 = arith.constant 0 : index
    %c0_118 = arith.constant 0 : index
    %181 = vector.load %arg4[%c8, %c0_117, %c0_118] : memref<12x128x72xf32, #tpu.memory_space<vmem>>, vector<1x128x72xf32>
    %182 = vector.shape_cast %181 : vector<1x128x72xf32> to vector<128x72xf32>
    %cst_119 = arith.constant dense<0.000000e+00> : vector<128x128xf32>
    %183 = tpu.matmul %182, %180, %cst_119 {dimension_numbers = #tpu.dot_dimension_numbers<[1], [0], [0], [1], [0, 0, 1, 1], [], []>} : vector<128x72xf32>, vector<72x128xf32>, vector<128x128xf32> -> vector<128x128xf32>
    %c0_120 = arith.constant 0 : index
    %c0_121 = arith.constant 0 : index
    %184 = vector.load %arg11[%c0_120, %c0_121] : memref<128x128xf32, #tpu.memory_space<vmem>>, vector<128x128xf32>
    %185 = arith.addf %184, %183 : vector<128x128xf32>
    %c0_122 = arith.constant 0 : index
    %c0_123 = arith.constant 0 : index
    %186 = vector.load %arg11[%c0_122, %c0_123] : memref<128x128xf32, #tpu.memory_space<vmem>>, vector<128x128xf32>
    tpu.vector_store %arg11[%c0_122, %c0_123], %185 {strides = array<i32>} : memref<128x128xf32, #tpu.memory_space<vmem>>, vector<128x128xf32>,
    %c576 = arith.constant 576 : index
    %c0_124 = arith.constant 0 : index
    %187 = vector.load %arg3[%c576, %c0_124] : memref<896x128xf32, #tpu.memory_space<vmem>>, vector<192x128xf32>
    %c0_125 = arith.constant 0 : index
    %c0_126 = arith.constant 0 : index
    %188 = vector.load %arg1[%c0_125, %c0_126] : memref<288x192xf32, #tpu.memory_space<vmem>>, vector<288x192xf32>
    %cst_127 = arith.constant dense<0.000000e+00> : vector<288x128xf32>
    %189 = tpu.matmul %188, %187, %cst_127 {dimension_numbers = #tpu.dot_dimension_numbers<[1], [0], [0], [1], [0, 0, 1, 1], [], []>} : vector<288x192xf32>, vector<192x128xf32>, vector<288x128xf32> -> vector<288x128xf32>
    %190 = vector.extract_strided_slice %189 {offsets = [0, 0], sizes = [72, 128], strides = [1, 1]} : vector<288x128xf32> to vector<72x128xf32>
    %191 = vector.extract_strided_slice %189 {offsets = [72, 0], sizes = [72, 128], strides = [1, 1]} : vector<288x128xf32> to vector<72x128xf32>
    %192 = arith.maximumf %190, %191 : vector<72x128xf32>
    %193 = vector.extract_strided_slice %189 {offsets = [144, 0], sizes = [72, 128], strides = [1, 1]} : vector<288x128xf32> to vector<72x128xf32>
    %194 = vector.extract_strided_slice %189 {offsets = [216, 0], sizes = [72, 128], strides = [1, 1]} : vector<288x128xf32> to vector<72x128xf32>
    %195 = arith.maximumf %193, %194 : vector<72x128xf32>
    %196 = arith.maximumf %192, %195 : vector<72x128xf32>
    %c0_128 = arith.constant 0 : index
    %c0_129 = arith.constant 0 : index
    %197 = vector.load %arg2[%c0_128, %c0_129] : memref<72x1xf32, #tpu.memory_space<vmem>>, vector<72x1xf32>
    %198 = vector.broadcast %197 : vector<72x1xf32> to vector<72x128xf32>
    %199 = arith.addf %196, %198 : vector<72x128xf32>
    %cst_130 = arith.constant 0.000000e+00 : f32
    %200 = vector.broadcast %cst_130 : f32 to vector<72x128xf32>
    %201 = arith.maximumf %199, %200 : vector<72x128xf32>
    %c9 = arith.constant 9 : index
    %c0_131 = arith.constant 0 : index
    %c0_132 = arith.constant 0 : index
    %202 = vector.load %arg4[%c9, %c0_131, %c0_132] : memref<12x128x72xf32, #tpu.memory_space<vmem>>, vector<1x128x72xf32>
    %203 = vector.shape_cast %202 : vector<1x128x72xf32> to vector<128x72xf32>
    %cst_133 = arith.constant dense<0.000000e+00> : vector<128x128xf32>
    %204 = tpu.matmul %203, %201, %cst_133 {dimension_numbers = #tpu.dot_dimension_numbers<[1], [0], [0], [1], [0, 0, 1, 1], [], []>} : vector<128x72xf32>, vector<72x128xf32>, vector<128x128xf32> -> vector<128x128xf32>
    %c0_134 = arith.constant 0 : index
    %c0_135 = arith.constant 0 : index
    %205 = vector.load %arg11[%c0_134, %c0_135] : memref<128x128xf32, #tpu.memory_space<vmem>>, vector<128x128xf32>
    %206 = arith.addf %205, %204 : vector<128x128xf32>
    %c0_136 = arith.constant 0 : index
    %c0_137 = arith.constant 0 : index
    %207 = vector.load %arg11[%c0_136, %c0_137] : memref<128x128xf32, #tpu.memory_space<vmem>>, vector<128x128xf32>
    tpu.vector_store %arg11[%c0_136, %c0_137], %206 {strides = array<i32>} : memref<128x128xf32, #tpu.memory_space<vmem>>, vector<128x128xf32>,
    %c640 = arith.constant 640 : index
    %c0_138 = arith.constant 0 : index
    %208 = vector.load %arg3[%c640, %c0_138] : memref<896x128xf32, #tpu.memory_space<vmem>>, vector<192x128xf32>
    %c0_139 = arith.constant 0 : index
    %c0_140 = arith.constant 0 : index
    %209 = vector.load %arg1[%c0_139, %c0_140] : memref<288x192xf32, #tpu.memory_space<vmem>>, vector<288x192xf32>
    %cst_141 = arith.constant dense<0.000000e+00> : vector<288x128xf32>
    %210 = tpu.matmul %209, %208, %cst_141 {dimension_numbers = #tpu.dot_dimension_numbers<[1], [0], [0], [1], [0, 0, 1, 1], [], []>} : vector<288x192xf32>, vector<192x128xf32>, vector<288x128xf32> -> vector<288x128xf32>
    %211 = vector.extract_strided_slice %210 {offsets = [0, 0], sizes = [72, 128], strides = [1, 1]} : vector<288x128xf32> to vector<72x128xf32>
    %212 = vector.extract_strided_slice %210 {offsets = [72, 0], sizes = [72, 128], strides = [1, 1]} : vector<288x128xf32> to vector<72x128xf32>
    %213 = arith.maximumf %211, %212 : vector<72x128xf32>
    %214 = vector.extract_strided_slice %210 {offsets = [144, 0], sizes = [72, 128], strides = [1, 1]} : vector<288x128xf32> to vector<72x128xf32>
    %215 = vector.extract_strided_slice %210 {offsets = [216, 0], sizes = [72, 128], strides = [1, 1]} : vector<288x128xf32> to vector<72x128xf32>
    %216 = arith.maximumf %214, %215 : vector<72x128xf32>
    %217 = arith.maximumf %213, %216 : vector<72x128xf32>
    %c0_142 = arith.constant 0 : index
    %c0_143 = arith.constant 0 : index
    %218 = vector.load %arg2[%c0_142, %c0_143] : memref<72x1xf32, #tpu.memory_space<vmem>>, vector<72x1xf32>
    %219 = vector.broadcast %218 : vector<72x1xf32> to vector<72x128xf32>
    %220 = arith.addf %217, %219 : vector<72x128xf32>
    %cst_144 = arith.constant 0.000000e+00 : f32
    %221 = vector.broadcast %cst_144 : f32 to vector<72x128xf32>
    %222 = arith.maximumf %220, %221 : vector<72x128xf32>
    %c10 = arith.constant 10 : index
    %c0_145 = arith.constant 0 : index
    %c0_146 = arith.constant 0 : index
    %223 = vector.load %arg4[%c10, %c0_145, %c0_146] : memref<12x128x72xf32, #tpu.memory_space<vmem>>, vector<1x128x72xf32>
    %224 = vector.shape_cast %223 : vector<1x128x72xf32> to vector<128x72xf32>
    %cst_147 = arith.constant dense<0.000000e+00> : vector<128x128xf32>
    %225 = tpu.matmul %224, %222, %cst_147 {dimension_numbers = #tpu.dot_dimension_numbers<[1], [0], [0], [1], [0, 0, 1, 1], [], []>} : vector<128x72xf32>, vector<72x128xf32>, vector<128x128xf32> -> vector<128x128xf32>
    %c0_148 = arith.constant 0 : index
    %c0_149 = arith.constant 0 : index
    %226 = vector.load %arg11[%c0_148, %c0_149] : memref<128x128xf32, #tpu.memory_space<vmem>>, vector<128x128xf32>
    %227 = arith.addf %226, %225 : vector<128x128xf32>
    %c0_150 = arith.constant 0 : index
    %c0_151 = arith.constant 0 : index
    %228 = vector.load %arg11[%c0_150, %c0_151] : memref<128x128xf32, #tpu.memory_space<vmem>>, vector<128x128xf32>
    tpu.vector_store %arg11[%c0_150, %c0_151], %227 {strides = array<i32>} : memref<128x128xf32, #tpu.memory_space<vmem>>, vector<128x128xf32>,
    %c704 = arith.constant 704 : index
    %c0_152 = arith.constant 0 : index
    %229 = vector.load %arg3[%c704, %c0_152] : memref<896x128xf32, #tpu.memory_space<vmem>>, vector<192x128xf32>
    %c0_153 = arith.constant 0 : index
    %c0_154 = arith.constant 0 : index
    %230 = vector.load %arg1[%c0_153, %c0_154] : memref<288x192xf32, #tpu.memory_space<vmem>>, vector<288x192xf32>
    %cst_155 = arith.constant dense<0.000000e+00> : vector<288x128xf32>
    %231 = tpu.matmul %230, %229, %cst_155 {dimension_numbers = #tpu.dot_dimension_numbers<[1], [0], [0], [1], [0, 0, 1, 1], [], []>} : vector<288x192xf32>, vector<192x128xf32>, vector<288x128xf32> -> vector<288x128xf32>
    %232 = vector.extract_strided_slice %231 {offsets = [0, 0], sizes = [72, 128], strides = [1, 1]} : vector<288x128xf32> to vector<72x128xf32>
    %233 = vector.extract_strided_slice %231 {offsets = [72, 0], sizes = [72, 128], strides = [1, 1]} : vector<288x128xf32> to vector<72x128xf32>
    %234 = arith.maximumf %232, %233 : vector<72x128xf32>
    %235 = vector.extract_strided_slice %231 {offsets = [144, 0], sizes = [72, 128], strides = [1, 1]} : vector<288x128xf32> to vector<72x128xf32>
    %236 = vector.extract_strided_slice %231 {offsets = [216, 0], sizes = [72, 128], strides = [1, 1]} : vector<288x128xf32> to vector<72x128xf32>
    %237 = arith.maximumf %235, %236 : vector<72x128xf32>
    %238 = arith.maximumf %234, %237 : vector<72x128xf32>
    %c0_156 = arith.constant 0 : index
    %c0_157 = arith.constant 0 : index
    %239 = vector.load %arg2[%c0_156, %c0_157] : memref<72x1xf32, #tpu.memory_space<vmem>>, vector<72x1xf32>
    %240 = vector.broadcast %239 : vector<72x1xf32> to vector<72x128xf32>
    %241 = arith.addf %238, %240 : vector<72x128xf32>
    %cst_158 = arith.constant 0.000000e+00 : f32
    %242 = vector.broadcast %cst_158 : f32 to vector<72x128xf32>
    %243 = arith.maximumf %241, %242 : vector<72x128xf32>
    %c11 = arith.constant 11 : index
    %c0_159 = arith.constant 0 : index
    %c0_160 = arith.constant 0 : index
    %244 = vector.load %arg4[%c11, %c0_159, %c0_160] : memref<12x128x72xf32, #tpu.memory_space<vmem>>, vector<1x128x72xf32>
    %245 = vector.shape_cast %244 : vector<1x128x72xf32> to vector<128x72xf32>
    %cst_161 = arith.constant dense<0.000000e+00> : vector<128x128xf32>
    %246 = tpu.matmul %245, %243, %cst_161 {dimension_numbers = #tpu.dot_dimension_numbers<[1], [0], [0], [1], [0, 0, 1, 1], [], []>} : vector<128x72xf32>, vector<72x128xf32>, vector<128x128xf32> -> vector<128x128xf32>
    %c0_162 = arith.constant 0 : index
    %c0_163 = arith.constant 0 : index
    %247 = vector.load %arg11[%c0_162, %c0_163] : memref<128x128xf32, #tpu.memory_space<vmem>>, vector<128x128xf32>
    %248 = arith.addf %247, %246 : vector<128x128xf32>
    %c0_164 = arith.constant 0 : index
    %c0_165 = arith.constant 0 : index
    %249 = vector.load %arg11[%c0_164, %c0_165] : memref<128x128xf32, #tpu.memory_space<vmem>>, vector<128x128xf32>
    tpu.vector_store %arg11[%c0_164, %c0_165], %248 {strides = array<i32>} : memref<128x128xf32, #tpu.memory_space<vmem>>, vector<128x128xf32>,
    %c0_166 = arith.constant 0 : index
    %c0_167 = arith.constant 0 : index
    %250 = vector.load %arg11[%c0_166, %c0_167] : memref<128x128xf32, #tpu.memory_space<vmem>>, vector<128x128xf32>
    %c0_168 = arith.constant 0 : index
    %c0_169 = arith.constant 0 : index
    %251 = vector.load %arg5[%c0_168, %c0_169] : memref<128x1xf32, #tpu.memory_space<vmem>>, vector<128x1xf32>
    %252 = vector.broadcast %251 : vector<128x1xf32> to vector<128x128xf32>
    %253 = arith.addf %250, %252 : vector<128x128xf32>
    %cst_170 = arith.constant 0.000000e+00 : f32
    %254 = vector.broadcast %cst_170 : f32 to vector<128x128xf32>
    %255 = arith.maximumf %253, %254 : vector<128x128xf32>
    %c0_171 = arith.constant 0 : index
    %c0_172 = arith.constant 0 : index
    %256 = vector.load %arg6[%c0_171, %c0_172] : memref<128x128xf32, #tpu.memory_space<vmem>>, vector<128x128xf32>
    %cst_173 = arith.constant dense<0.000000e+00> : vector<128x128xf32>
    %257 = tpu.matmul %256, %255, %cst_173 {dimension_numbers = #tpu.dot_dimension_numbers<[1], [0], [0], [1], [0, 0, 1, 1], [], []>} : vector<128x128xf32>, vector<128x128xf32>, vector<128x128xf32> -> vector<128x128xf32>
    %c0_174 = arith.constant 0 : index
    %c0_175 = arith.constant 0 : index
    %258 = vector.load %arg7[%c0_174, %c0_175] : memref<128x1xf32, #tpu.memory_space<vmem>>, vector<128x1xf32>
    %259 = vector.broadcast %258 : vector<128x1xf32> to vector<128x128xf32>
    %260 = arith.addf %257, %259 : vector<128x128xf32>
    %cst_176 = arith.constant 0.000000e+00 : f32
    %261 = vector.broadcast %cst_176 : f32 to vector<128x128xf32>
    %262 = arith.maximumf %260, %261 : vector<128x128xf32>
    %c0_177 = arith.constant 0 : index
    %c0_178 = arith.constant 0 : index
    %263 = vector.load %arg8[%c0_177, %c0_178] : memref<16x128xf32, #tpu.memory_space<vmem>>, vector<16x128xf32>
    %cst_179 = arith.constant dense<0.000000e+00> : vector<16x128xf32>
    %264 = tpu.matmul %263, %262, %cst_179 {dimension_numbers = #tpu.dot_dimension_numbers<[1], [0], [0], [1], [0, 0, 1, 1], [], []>} : vector<16x128xf32>, vector<128x128xf32>, vector<16x128xf32> -> vector<16x128xf32>
    %c0_180 = arith.constant 0 : index
    %c0_181 = arith.constant 0 : index
    %265 = vector.load %arg9[%c0_180, %c0_181] : memref<16x1xf32, #tpu.memory_space<vmem>>, vector<16x1xf32>
    %266 = vector.broadcast %265 : vector<16x1xf32> to vector<16x128xf32>
    %267 = arith.addf %264, %266 : vector<16x128xf32>
    %c0_182 = arith.constant 0 : index
    %c0_183 = arith.constant 0 : index
    %268 = vector.load %arg10[%c0_182, %c0_183] : memref<16x128xf32, #tpu.memory_space<vmem>>, vector<16x128xf32>
    tpu.vector_store %arg10[%c0_182, %c0_183], %267 {strides = array<i32>} : memref<16x128xf32, #tpu.memory_space<vmem>>, vector<16x128xf32>,
    return
  }
  func.func @transform_0(%arg0: i32) -> (i32, i32) {
    %c0_i32 = arith.constant 0 : i32
    %c0_i32_0 = arith.constant 0 : i32
    %c0_i32_1 = arith.constant 0 : i32
    return %c0_i32, %c0_i32_0 : i32, i32
  }
  func.func @transform_1(%arg0: i32) -> (i32, i32) {
    %c0_i32 = arith.constant 0 : i32
    %c0_i32_0 = arith.constant 0 : i32
    %c0_i32_1 = arith.constant 0 : i32
    return %c0_i32, %c0_i32_0 : i32, i32
  }
  func.func @transform_2(%arg0: i32) -> (i32, i32) {
    %c0_i32 = arith.constant 0 : i32
    %c0_i32_0 = arith.constant 0 : i32
    return %c0_i32, %arg0 : i32, i32
  }
  func.func @transform_3(%arg0: i32) -> (i32, i32, i32) {
    %c0_i32 = arith.constant 0 : i32
    %c0_i32_0 = arith.constant 0 : i32
    %c0_i32_1 = arith.constant 0 : i32
    %c0_i32_2 = arith.constant 0 : i32
    return %c0_i32, %c0_i32_0, %c0_i32_1 : i32, i32, i32
  }
  func.func @transform_4(%arg0: i32) -> (i32, i32) {
    %c0_i32 = arith.constant 0 : i32
    %c0_i32_0 = arith.constant 0 : i32
    %c0_i32_1 = arith.constant 0 : i32
    return %c0_i32, %c0_i32_0 : i32, i32
  }
  func.func @transform_5(%arg0: i32) -> (i32, i32) {
    %c0_i32 = arith.constant 0 : i32
    %c0_i32_0 = arith.constant 0 : i32
    %c0_i32_1 = arith.constant 0 : i32
    return %c0_i32, %c0_i32_0 : i32, i32
  }
  func.func @transform_6(%arg0: i32) -> (i32, i32) {
    %c0_i32 = arith.constant 0 : i32
    %c0_i32_0 = arith.constant 0 : i32
    %c0_i32_1 = arith.constant 0 : i32
    return %c0_i32, %c0_i32_0 : i32, i32
  }
  func.func @transform_7(%arg0: i32) -> (i32, i32) {
    %c0_i32 = arith.constant 0 : i32
    %c0_i32_0 = arith.constant 0 : i32
    %c0_i32_1 = arith.constant 0 : i32
    return %c0_i32, %c0_i32_0 : i32, i32
  }
  func.func @transform_8(%arg0: i32) -> (i32, i32) {
    %c0_i32 = arith.constant 0 : i32
    %c0_i32_0 = arith.constant 0 : i32
    %c0_i32_1 = arith.constant 0 : i32
    return %c0_i32, %c0_i32_0 : i32, i32
  }
  func.func @transform_9(%arg0: i32) -> (i32, i32) {
    %c0_i32 = arith.constant 0 : i32
    %c0_i32_0 = arith.constant 0 : i32
    return %c0_i32, %arg0 : i32, i32
  }
}

</mosaic_0001>

<bundles_post_ra>
// kernel: net_forward.1
= control target key start
LH: loop header
LB: loop body
LE: loop exit
PB: predicated region body
PF: predicated region fallthrough
CT: control target
= control target key end

     0   :  { %v12822_v0 = vmov 0   ;;  %v19504_v6 = vmov 0.0|0.0   ;;  %vm128_vm0 = vcmask 523264   ;;  %vm597_vm1 = vcmask 588800   ;;  %s19494_s1 = inlined_call_operand.vmem [shape: f32[72,1], index: 1, kind: input, shape index: {}]   ;;  %s19495_s2 = inlined_call_operand.vmem [shape: f32[896,128], index: 2, kind: input, shape index: {}]   ;;  %s19496_s0 = inlined_call_operand.vmem [shape: f32[288,192], index: 0, kind: input, shape index: {}]   ;;  %s19497_s4 = inlined_call_operand.vmem [shape: f32[128,1], index: 4, kind: input, shape index: {}]   ;;  %s19498_s6 = inlined_call_operand.vmem [shape: f32[128,1], index: 6, kind: input, shape index: {}]   ;;  %s19499_s8 = inlined_call_operand.vmem [shape: f32[16,1], index: 8, kind: input, shape index: {}]   ;;  %s19500_s3 = inlined_call_operand.vmem [shape: f32[12,128,72], index: 3, kind: input, shape index: {}]   ;;  %s19501_s5 = inlined_call_operand.vmem [shape: f32[128,128], index: 5, kind: input, shape index: {}]   ;;  %s19502_s7 = inlined_call_operand.vmem [shape: f32[16,128], index: 7, kind: input, shape index: {}]   ;;  %s19503_s9 = inlined_call_operand.vmem [shape: f32[16,128], index: 9, kind: output, shape index: {}]  }
   0x1   :  { %12821 = vset.pattern.permute.xlu1 %v12822_v0  ;;  %12820 = vset.pattern.permute.xlu0 %v12822_v0  ;;  %v12877_v1 = vld [vmem:[%s19494_s1 + $0x10] sm:$0xff]  ;;  %v12882_v2 = vld [vmem:[%s19494_s1] sm:$0xff]  ;;  %v33_v4 = vld [vmem:[%s19495_s2 + $0x8] sm:$0xff] }
   0x2   :  { %v32_v3 = vld [vmem:[%s19495_s2] sm:$0xff]  ;;  %530 = vperm.xlu1 %12821, %v12877_v1   ;;  %520 = vperm.xlu0 %12820, %v12882_v2   ;;  %v12895_v5 = vld [vmem:[%s19494_s1 + $0x18] sm:$0xff]  ;;  %v12901_v8 = vld [vmem:[%s19494_s1 + $0x8] sm:$0xff] }
   0x3   :  { %11930 = vmatprep.subr.bf16.mxu0 %v19504_v6  ;;  %v11931_v7 = vpack.c.bf16 %v33_v4, %v32_v3  ;;  %v34_v9 = vld [vmem:[%s19495_s2 + $0x10] sm:$0xff]  ;;  %v35_v10 = vld [vmem:[%s19495_s2 + $0x18] sm:$0xff]  ;;  %v36_v12 = vld [vmem:[%s19495_s2 + $0x20] sm:$0xff] }
   0x4   :  { %v11934_v11 = vpack.c.bf16 %v35_v10, %v34_v9  ;;  %v37_v13 = vld [vmem:[%s19495_s2 + $0x28] sm:$0xff]  ;;  %v12926_v15 = vld [vmem:[%s19494_s1 + $0x20] sm:$0xff]  ;;  %v38_v17 = vld [vmem:[%s19495_s2 + $0x30] sm:$0xff] }
   0x5   :  { %11932 = vmatpush1.bf16.msra.mxu0 %v11931_v7  ;;  %v12921_v14 = vld [vmem:[%s19494_s1 + $0x28] sm:$0xff]  ;;  %v11937_v16 = vpack.c.bf16 %v37_v13, %v36_v12  ;;  %v39_v18 = vld [vmem:[%s19495_s2 + $0x38] sm:$0xff]  ;;  %v12945_v20 = vld [vmem:[%s19494_s1 + $0x30] sm:$0xff] }
   0x6   :  { %535 = vperm.xlu1 %12821, %v12895_v5   ;;  %525 = vperm.xlu0 %12820, %v12901_v8   ;;  %v12940_v19 = vld [vmem:[%s19494_s1 + $0x38] sm:$0xff]  ;;  %v12950_v21 = vld [vmem:[%s19496_s0 + $0x8] sm:$0xff]  ;;  %v11940_v22 = vpack.c.bf16 %v39_v18, %v38_v17  ;;  %v40_v23 = vld [vmem:[%s19495_s2 + $0x40] sm:$0xff] }
   0x7   :  { %11933 = vmatprep.subr.bf16.mxu0 %v19504_v6  ;;  %10185 = vmatprep.mubr.msk.f32.mxu0 %vm128_vm0, %v12950_v21  ;;  %v41_v24 = vld [vmem:[%s19495_s2 + $0x48] sm:$0xff]  ;;  %v12966_v25 = vld [vmem:[%s19494_s1 + $0x40] sm:$0xff]  ;;  %v42_v27 = vld [vmem:[%s19495_s2 + $0x50] sm:$0xff] }
   0x8   :  { %v12968_v26 = vpack.c.bf16 %v41_v24, %v40_v23  ;;  %v43_v28 = vld [vmem:[%s19495_s2 + $0x58] sm:$0xff]  ;;  %v44_v30 = vld [vmem:[%s19495_s2 + $0x60] sm:$0xff]  ;;  %v45_v31 = vld [vmem:[%s19495_s2 + $0x68] sm:$0xff] }
   0x9   :  { %11935 = vmatpush1.bf16.msra.mxu0 %v11934_v11  ;;  %v12980_v29 = vpack.c.bf16 %v43_v28, %v42_v27  ;;  %v12992_v32 = vpack.c.bf16 %v45_v31, %v44_v30  ;;  %v46_v33 = vld [vmem:[%s19495_s2 + $0x70] sm:$0xff]  ;;  %v47_v34 = vld [vmem:[%s19495_s2 + $0x78] sm:$0xff]  ;;  %v48_v36 = vld [vmem:[%s19495_s2 + $0x80] sm:$0xff] }
   0xa   :  { %545 = vperm.xlu1 %12821, %v12921_v14   ;;  %540 = vperm.xlu0 %12820, %v12926_v15   ;;  %19776 = vst [vmem:[#allocation3_spill] sm:$0xff] %v12968_v26  ;;  %v13004_v35 = vpack.c.bf16 %v47_v34, %v46_v33  ;;  %v49_v37 = vld [vmem:[%s19495_s2 + $0x88] sm:$0xff]  ;;  %v50_v39 = vld [vmem:[%s19495_s2 + $0x90] sm:$0xff]  ;;  %v51_v40 = vld [vmem:[%s19495_s2 + $0x98] sm:$0xff] }
   0xb   :  { %11936 = vmatprep.subr.bf16.mxu0 %v19504_v6  ;;  %19777 = vst [vmem:[#allocation4_spill] sm:$0xff] %v12980_v29  ;;  %19778 = vst [vmem:[#allocation5_spill] sm:$0xff] %v12992_v32  ;;  %v13016_v38 = vpack.c.bf16 %v49_v37, %v48_v36  ;;  %v13028_v41 = vpack.c.bf16 %v51_v40, %v50_v39  ;;  %v52_v42 = vld [vmem:[%s19495_s2 + $0xa0] sm:$0xff]  ;;  %v53_v43 = vld [vmem:[%s19495_s2 + $0xa8] sm:$0xff] }
   0xc   :  { %19779 = vst [vmem:[#allocation6_spill] sm:$0xff] %v13004_v35  ;;  %v13040_v44 = vpack.c.bf16 %v53_v43, %v52_v42  ;;  %v54_v45 = vld [vmem:[%s19495_s2 + $0xb0] sm:$0xff]  ;;  %v55_v46 = vld [vmem:[%s19495_s2 + $0xb8] sm:$0xff]  ;;  %v13061_v48 = vld [vmem:[%s19496_s0] sm:$0xff] }
   0xd   :  { %11938 = vmatpush1.bf16.msra.mxu0 %v11937_v16  ;;  %19780 = vst [vmem:[#allocation7_spill] sm:$0xff] %v13016_v38  ;;  %19781 = vst [vmem:[#allocation8_spill] sm:$0xff] %v13028_v41  ;;  %v13052_v47 = vpack.c.bf16 %v55_v46, %v54_v45  ;;  %v13068_v49 = vld [vmem:[%s19496_s0 + $0x18] sm:$0xff]  ;;  %v13077_v50 = vld [vmem:[%s19496_s0 + $0x10] sm:$0xff] }
   0xe   :  { %555 = vperm.xlu1 %12821, %v12940_v19   ;;  %550 = vperm.xlu0 %12820, %v12945_v20   ;;  %19782 = vst [vmem:[#allocation9_spill] sm:$0xff] %v13040_v44  ;;  %v13085_v51 = vld [vmem:[%s19496_s0 + $0x28] sm:$0xff]  ;;  %v13094_v52 = vld [vmem:[%s19496_s0 + $0x20] sm:$0xff]  ;;  %v13102_v53 = vld [vmem:[%s19496_s0 + $0x38] sm:$0xff] }
   0xf   :  { %11939 = vmatprep.subr.bf16.mxu0 %v19504_v6  ;;  %19783 = vst [vmem:[#allocation10_spill] sm:$0xff] %v13052_v47  ;;  %v13111_v54 = vld [vmem:[%s19496_s0 + $0x30] sm:$0xff]  ;;  %v13119_v55 = vld [vmem:[%s19496_s0 + $0x48] sm:$0xff]  ;;  %v13128_v56 = vld [vmem:[%s19496_s0 + $0x40] sm:$0xff] }
  0x10   :  { %v13136_v57 = vld [vmem:[%s19496_s0 + $0x58] sm:$0xff]  ;;  %v13145_v58 = vld [vmem:[%s19496_s0 + $0x50] sm:$0xff]  ;;  %v13153_v59 = vld [vmem:[%s19496_s0 + $0x68] sm:$0xff] }
  0x11   :  { %11941 = vmatpush1.bf16.msra.mxu0 %v11940_v22  ;;  %v13162_v60 = vld [vmem:[%s19496_s0 + $0x60] sm:$0xff]  ;;  %v13170_v61 = vld [vmem:[%s19496_s0 + $0x78] sm:$0xff]  ;;  %v13179_v62 = vld [vmem:[%s19496_s0 + $0x70] sm:$0xff] }
  0x12   :  { %1294 = vperm.xlu1 %12821, %v12882_v2   ;;  %560 = vperm.xlu0 %12820, %v12966_v25   ;;  %v13187_v63 = vld [vmem:[%s19496_s0 + $0x88] sm:$0xff]  ;;  %v823_v0 = vld [vmem:[%s19495_s2 + $0xc0] sm:$0xff]  ;;  %v13212_v9 = vld [vmem:[%s19496_s0 + $0x98] sm:$0xff] }
  0x13   :  { %11942 = vmatprep.subr.bf16.mxu0 %v19504_v6  ;;  %v824_v3 = vld [vmem:[%s19495_s2 + $0xc8] sm:$0xff]  ;;  %v13202_v4 = vld [vmem:[%s19496_s0 + $0x80] sm:$0xff]  ;;  %v825_v10 = vld [vmem:[%s19495_s2 + $0xd0] sm:$0xff] }
  0x14   :  { %v13205_v7 = vpack.c.bf16 %v824_v3, %v823_v0  ;;  %v826_v11 = vld [vmem:[%s19495_s2 + $0xd8] sm:$0xff]  ;;  %v13227_v12 = vld [vmem:[%s19496_s0 + $0x90] sm:$0xff]  ;;  %v13237_v16 = vld [vmem:[%s19496_s0 + $0xa8] sm:$0xff] }
  0x15   :  { %11944 = vmatpush1.bf16.msra.mxu0 %v12968_v26  ;;  %v13230_v13 = vpack.c.bf16 %v826_v11, %v825_v10  ;;  %v827_v17 = vld [vmem:[%s19495_s2 + $0xe0] sm:$0xff]  ;;  %v828_v18 = vld [vmem:[%s19495_s2 + $0xe8] sm:$0xff]  ;;  %v13262_v24 = vld [vmem:[%s19496_s0 + $0xb8] sm:$0xff] }
  0x16   :  { %1304 = vperm.xlu1 %12821, %v12877_v1   ;;  %1299 = vperm.xlu0 %12820, %v12901_v8   ;;  %19784 = vst [vmem:[#allocation11_spill] sm:$0xff] %v13205_v7  ;;  %v13252_v22 = vld [vmem:[%s19496_s0 + $0xa0] sm:$0xff]  ;;  %v13255_v23 = vpack.c.bf16 %v828_v18, %v827_v17  ;;  %v829_v27 = vld [vmem:[%s19495_s2 + $0xf0] sm:$0xff]  ;;  %v830_v28 = vld [vmem:[%s19495_s2 + $0xf8] sm:$0xff] }
  0x17   :  { %11945 = vmatprep.subr.bf16.mxu0 %v19504_v6  ;;  %19785 = vst [vmem:[#allocation12_spill] sm:$0xff] %v13230_v13  ;;  %v13277_v30 = vld [vmem:[%s19496_s0 + $0xb0] sm:$0xff]  ;;  %v13280_v31 = vpack.c.bf16 %v830_v28, %v829_v27  ;;  %v13287_v33 = vld [vmem:[%s19496_s0 + $0xc8] sm:$0xff]  ;;  %v13296_v34 = vld [vmem:[%s19496_s0 + $0xc0] sm:$0xff] }
  0x18   :  { %19786 = vst [vmem:[#allocation13_spill] sm:$0xff] %v13255_v23  ;;  %v83_v36 = vld [vmem:[%s19496_s0 + $0xd8] sm:$0xff]  ;;  %v82_v37 = vld [vmem:[%s19496_s0 + $0xd0] sm:$0xff]  ;;  %v85_v39 = vld [vmem:[%s19496_s0 + $0xe8] sm:$0xff] }
  0x19   :  { %11947 = vmatpush1.bf16.msra.mxu0 %v12980_v29  ;;  %19787 = vst [vmem:[#allocation14_spill] sm:$0xff] %v13280_v31  ;;  %v84_v40 = vld [vmem:[%s19496_s0 + $0xe0] sm:$0xff]  ;;  %v87_v42 = vld [vmem:[%s19496_s0 + $0xf8] sm:$0xff]  ;;  %v86_v43 = vld [vmem:[%s19496_s0 + $0xf0] sm:$0xff] }
  0x1a   :  { %1314 = vperm.xlu1 %12821, %v12926_v15   ;;  %1309 = vperm.xlu0 %12820, %v12895_v5   ;;  %v89_v45 = vld [vmem:[%s19496_s0 + $0x108] sm:$0xff]  ;;  %v88_v46 = vld [vmem:[%s19496_s0 + $0x100] sm:$0xff]  ;;  %v91_v0 = vld [vmem:[%s19496_s0 + $0x118] sm:$0xff] }
  0x1b   :  { %11948 = vmatprep.subr.bf16.mxu0 %v19504_v6  ;;  %v90_v3 = vld [vmem:[%s19496_s0 + $0x110] sm:$0xff]  ;;  %v93_v10 = vld [vmem:[%s19496_s0 + $0x128] sm:$0xff]  ;;  %v92_v11 = vld [vmem:[%s19496_s0 + $0x120] sm:$0xff] }
  0x1c   :  { %v95_v17 = vld [vmem:[%s19496_s0 + $0x138] sm:$0xff]  ;;  %v94_v18 = vld [vmem:[%s19496_s0 + $0x130] sm:$0xff]  ;;  %v97_v27 = vld [vmem:[%s19496_s0 + $0x148] sm:$0xff] }
  0x1d   :  { %11950 = vmatpush1.bf16.msra.mxu0 %v12992_v32  ;;  %v96_v28 = vld [vmem:[%s19496_s0 + $0x140] sm:$0xff] }
  0x1e   :  { %1324 = vperm.xlu1 %12821, %v12945_v20   ;;  %1319 = vperm.xlu0 %12820, %v12921_v14  }
  0x1f   :  { %11951 = vmatprep.subr.bf16.mxu0 %v19504_v6 }
  0x21   :  { %11953 = vmatpush1.bf16.msra.mxu0 %v13004_v35 }
  0x22   :  { %1334 = vperm.xlu1 %12821, %v12966_v25   ;;  %1329 = vperm.xlu0 %12820, %v12940_v19  }
  0x23   :  { %11954 = vmatprep.subr.bf16.mxu0 %v19504_v6 }
  0x25   :  { %11956 = vmatpush1.bf16.msra.mxu0 %v13016_v38 }
  0x26   :  { %2105 = vperm.xlu1 %12821, %v12901_v8   ;;  %2100 = vperm.xlu0 %12820, %v12882_v2  }
  0x27   :  { %11957 = vmatprep.subr.bf16.mxu0 %v19504_v6 }
  0x29   :  { %11959 = vmatpush1.bf16.msra.mxu0 %v13028_v41 }
  0x2a   :  { %2115 = vperm.xlu1 %12821, %v12895_v5   ;;  %2110 = vperm.xlu0 %12820, %v12877_v1  }
  0x2b   :  { %11960 = vmatprep.subr.bf16.mxu0 %v19504_v6 }
  0x2d   :  { %11962 = vmatpush1.bf16.msra.mxu0 %v13040_v44 }
  0x2e   :  { %2125 = vperm.xlu1 %12821, %v12921_v14   ;;  %2120 = vperm.xlu0 %12820, %v12926_v15  }
  0x2f   :  { %11963 = vmatprep.subr.bf16.mxu0 %v19504_v6 }
  0x31   :  { %11965 = vmatpush1.bf16.msra.mxu0 %v13052_v47 }
  0x32   :  { %2135 = vperm.xlu1 %12821, %v12940_v19   ;;  %2130 = vperm.xlu0 %12820, %v12945_v20  }
  0x33   :  { %11982 = vmatprep.subr.bf16.mxu0 %v19504_v6 }
  0x34   :  { %302 = vmatmul.mubr.f32.vlgmr.msra.gmra.mrb[0].mxu0 %v13061_v48 }
  0x35   :  { %10186 = vmatprep.mubr.msk.f32.mxu0 %vm128_vm0, %v13068_v49  ;;  %11984 = vmatpush1.bf16.msra.mxu0 %v12968_v26 }
  0x36   :  { %2906 = vperm.xlu1 %12821, %v12882_v2   ;;  %2140 = vperm.xlu0 %12820, %v12966_v25  }
  0x37   :  { %11985 = vmatprep.subr.bf16.mxu0 %v19504_v6 }
  0x38   :  { %307 = vmatmul.mubr.f32.gmra.mrb[2].mxu0 %v13077_v50 }
  0x39   :  { %10187 = vmatprep.mubr.msk.f32.mxu0 %vm128_vm0, %v13085_v51  ;;  %11987 = vmatpush1.bf16.msra.mxu0 %v12980_v29 }
  0x3a   :  { %2916 = vperm.xlu1 %12821, %v12877_v1   ;;  %2911 = vperm.xlu0 %12820, %v12901_v8  }
  0x3b   :  { %11988 = vmatprep.subr.bf16.mxu0 %v19504_v6 }
  0x3c   :  { %312 = vmatmul.mubr.f32.gmra.mrb[4].mxu0 %v13094_v52 }
  0x3d   :  { %10188 = vmatprep.mubr.msk.f32.mxu0 %vm128_vm0, %v13102_v53  ;;  %11990 = vmatpush1.bf16.msra.mxu0 %v12992_v32 }
  0x3e   :  { %2926 = vperm.xlu1 %12821, %v12926_v15   ;;  %2921 = vperm.xlu0 %12820, %v12895_v5  }
  0x3f   :  { %11991 = vmatprep.subr.bf16.mxu0 %v19504_v6 }
  0x40   :  { %317 = vmatmul.mubr.f32.gmra.mrb[6].mxu0 %v13111_v54 }
  0x41   :  { %10189 = vmatprep.mubr.msk.f32.mxu0 %vm128_vm0, %v13119_v55  ;;  %11993 = vmatpush1.bf16.msra.mxu0 %v13004_v35 }
  0x42   :  { %2936 = vperm.xlu1 %12821, %v12945_v20   ;;  %2931 = vperm.xlu0 %12820, %v12921_v14  }
  0x43   :  { %11994 = vmatprep.subr.bf16.mxu0 %v19504_v6 }
  0x44   :  { %322 = vmatmul.mubr.f32.gmra.mrb[8].mxu0 %v13128_v56 }
  0x45   :  { %10190 = vmatprep.mubr.msk.f32.mxu0 %vm128_vm0, %v13136_v57  ;;  %11996 = vmatpush1.bf16.msra.mxu0 %v13016_v38 }
  0x46   :  { %2946 = vperm.xlu1 %12821, %v12966_v25   ;;  %2941 = vperm.xlu0 %12820, %v12940_v19  }
  0x47   :  { %11997 = vmatprep.subr.bf16.mxu0 %v19504_v6 }
  0x48   :  { %327 = vmatmul.mubr.f32.gmra.mrb[10].mxu0 %v13145_v58 }
  0x49   :  { %10191 = vmatprep.mubr.msk.f32.mxu0 %vm128_vm0, %v13153_v59  ;;  %11999 = vmatpush1.bf16.msra.mxu0 %v13028_v41 }
  0x4a   :  { %3717 = vperm.xlu1 %12821, %v12901_v8   ;;  %3712 = vperm.xlu0 %12820, %v12882_v2  }
  0x4b   :  { %12000 = vmatprep.subr.bf16.mxu0 %v19504_v6 }
  0x4c   :  { %332 = vmatmul.mubr.f32.gmra.mrb[12].mxu0 %v13162_v60 }
  0x4d   :  { %10192 = vmatprep.mubr.msk.f32.mxu0 %vm128_vm0, %v13170_v61  ;;  %12002 = vmatpush1.bf16.msra.mxu0 %v13040_v44 }
  0x4e   :  { %3727 = vperm.xlu1 %12821, %v12895_v5   ;;  %3722 = vperm.xlu0 %12820, %v12877_v1  }
  0x4f   :  { %12003 = vmatprep.subr.bf16.mxu0 %v19504_v6 }
  0x50   :  { %337 = vmatmul.mubr.f32.gmra.mrb[14].mxu0 %v13179_v62 }
  0x51   :  { %10193 = vmatprep.mubr.msk.f32.mxu0 %vm128_vm0, %v13187_v63  ;;  %12005 = vmatpush1.bf16.msra.mxu0 %v13052_v47 }
  0x52   :  { %3737 = vperm.xlu1 %12821, %v12921_v14   ;;  %3732 = vperm.xlu0 %12820, %v12926_v15  }
  0x53   :  { %12006 = vmatprep.subr.bf16.mxu0 %v19504_v6 }
  0x54   :  { %342 = vmatmul.mubr.f32.gmra.mrb[16].mxu0 %v13202_v4 }
  0x55   :  { %10194 = vmatprep.mubr.msk.f32.mxu0 %vm128_vm0, %v13212_v9  ;;  %12008 = vmatpush1.bf16.msra.mxu0 %v13205_v7 }
  0x56   :  { %3747 = vperm.xlu1 %12821, %v12940_v19   ;;  %3742 = vperm.xlu0 %12820, %v12945_v20  }
  0x57   :  { %12009 = vmatprep.subr.bf16.mxu0 %v19504_v6 }
  0x58   :  { %347 = vmatmul.mubr.f32.gmra.mrb[18].mxu0 %v13227_v12 }
  0x59   :  { %10195 = vmatprep.mubr.msk.f32.mxu0 %vm128_vm0, %v13237_v16  ;;  %12011 = vmatpush1.bf16.msra.mxu0 %v13230_v13 }
  0x5a   :  { %4518 = vperm.xlu1 %12821, %v12882_v2   ;;  %3752 = vperm.xlu0 %12820, %v12966_v25  }
  0x5b   :  { %12012 = vmatprep.subr.bf16.mxu0 %v19504_v6 }
  0x5c   :  { %352 = vmatmul.mubr.f32.gmra.mrb[20].mxu0 %v13252_v22 }
  0x5d   :  { %10196 = vmatprep.mubr.msk.f32.mxu0 %vm128_vm0, %v13262_v24  ;;  %12014 = vmatpush1.bf16.msra.mxu0 %v13255_v23 }
  0x5e   :  { %4528 = vperm.xlu1 %12821, %v12877_v1   ;;  %4523 = vperm.xlu0 %12820, %v12901_v8  }
  0x5f   :  { %12015 = vmatprep.subr.bf16.mxu0 %v19504_v6 }
  0x60   :  { %357 = vmatmul.mubr.f32.gmra.mrb[22].mxu0 %v13277_v30 }
  0x61   :  { %10197 = vmatprep.mubr.msk.f32.mxu0 %vm128_vm0, %v13287_v33  ;;  %12017 = vmatpush1.bf16.msra.mxu0 %v13280_v31 }
  0x62   :  { %4538 = vperm.xlu1 %12821, %v12926_v15   ;;  %4533 = vperm.xlu0 %12820, %v12895_v5  }
  0x63   :  { %12034 = vmatprep.subr.bf16.mxu0 %v19504_v6 }
  0x64   :  { %362 = vmatmul.mubr.f32.gmra.mrb[24].mxu0 %v13296_v34 }
  0x65   :  { %10198 = vmatprep.mubr.msk.f32.mxu0 %vm128_vm0, %v83_v36  ;;  %v99_v36 = vld [vmem:[%s19496_s0 + $0x158] sm:$0xff] }
  0x66   :  { %4548 = vperm.xlu1 %12821, %v12945_v20   ;;  %4543 = vperm.xlu0 %12820, %v12921_v14  }
  0x68   :  { %367 = vmatmul.mubr.f32.gmra.mrb[26].mxu0 %v82_v37  ;;  %v98_v37 = vld [vmem:[%s19496_s0 + $0x150] sm:$0xff] }
  0x69   :  { %10199 = vmatprep.mubr.msk.f32.mxu0 %vm128_vm0, %v85_v39  ;;  %v101_v39 = vld [vmem:[%s19496_s0 + $0x168] sm:$0xff] }
  0x6a   :  { %4558 = vperm.xlu1 %12821, %v12966_v25   ;;  %4553 = vperm.xlu0 %12820, %v12940_v19  }
  0x6c   :  { %372 = vmatmul.mubr.f32.gmra.mrb[28].mxu0 %v84_v40  ;;  %v100_v40 = vld [vmem:[%s19496_s0 + $0x160] sm:$0xff] }
  0x6d   :  { %10200 = vmatprep.mubr.msk.f32.mxu0 %vm128_vm0, %v87_v42  ;;  %v103_v42 = vld [vmem:[%s19496_s0 + $0x178] sm:$0xff] }
  0x6e   :  { %5329 = vperm.xlu1 %12821, %v12901_v8   ;;  %5324 = vperm.xlu0 %12820, %v12882_v2  }
  0x70   :  { %377 = vmatmul.mubr.f32.gmra.mrb[30].mxu0 %v86_v43  ;;  %v102_v43 = vld [vmem:[%s19496_s0 + $0x170] sm:$0xff] }
  0x71   :  { %10201 = vmatprep.mubr.msk.f32.mxu0 %vm128_vm0, %v89_v45  ;;  %v105_v45 = vld [vmem:[%s19496_s0 + $0x188] sm:$0xff] }
  0x72   :  { %5339 = vperm.xlu1 %12821, %v12895_v5   ;;  %5334 = vperm.xlu0 %12820, %v12877_v1  }
  0x74   :  { %382 = vmatmul.mubr.f32.gmra.mrb[32].mxu0 %v88_v46  ;;  %v104_v46 = vld [vmem:[%s19496_s0 + $0x180] sm:$0xff] }
  0x75   :  { %10202 = vmatprep.mubr.msk.f32.mxu0 %vm128_vm0, %v91_v0  ;;  %v107_v0 = vld [vmem:[%s19496_s0 + $0x198] sm:$0xff] }
  0x76   :  { %5349 = vperm.xlu1 %12821, %v12921_v14   ;;  %5344 = vperm.xlu0 %12820, %v12926_v15  }
  0x78   :  { %387 = vmatmul.mubr.f32.gmra.mrb[34].mxu0 %v90_v3  ;;  %v106_v3 = vld [vmem:[%s19496_s0 + $0x190] sm:$0xff] }
  0x79   :  { %10203 = vmatprep.mubr.msk.f32.mxu0 %vm128_vm0, %v93_v10  ;;  %v109_v10 = vld [vmem:[%s19496_s0 + $0x1a8] sm:$0xff] }
  0x7a   :  { %5359 = vperm.xlu1 %12821, %v12940_v19   ;;  %5354 = vperm.xlu0 %12820, %v12945_v20  }
  0x7c   :  { %392 = vmatmul.mubr.f32.gmra.mrb[36].mxu0 %v92_v11  ;;  %v108_v11 = vld [vmem:[%s19496_s0 + $0x1a0] sm:$0xff] }
  0x7d   :  { %10204 = vmatprep.mubr.msk.f32.mxu0 %vm128_vm0, %v95_v17  ;;  %v111_v17 = vld [vmem:[%s19496_s0 + $0x1b8] sm:$0xff] }
  0x7e   :  { %6130 = vperm.xlu1 %12821, %v12882_v2   ;;  %5364 = vperm.xlu0 %12820, %v12966_v25  }
  0x80   :  { %397 = vmatmul.mubr.f32.gmra.mrb[38].mxu0 %v94_v18 }
  0x81   :  { %10205 = vmatprep.mubr.msk.f32.mxu0 %vm128_vm0, %v97_v27  ;;  %v13432_v18 = vpop.permute.xlu1 %530  ;;  %v13434_v27 = vpop.permute.xlu0 %520 }
  0x82   :  { %6140 = vperm.xlu1 %12821, %v12877_v1   ;;  %6135 = vperm.xlu0 %12820, %v12901_v8  }
  0x84   :  { %402 = vmatmul.mubr.f32.gmra.mrb[40].mxu0 %v96_v28  ;;  %v110_v28 = vld [vmem:[%s19496_s0 + $0x1b0] sm:$0xff] }
  0x85   :  { %10206 = vmatprep.mubr.msk.f32.mxu0 %vm128_vm0, %v99_v36  ;;  %v113_v36 = vld [vmem:[%s19496_s0 + $0x1c8] sm:$0xff] }
  0x86   :  { %6150 = vperm.xlu1 %12821, %v12926_v15   ;;  %6145 = vperm.xlu0 %12820, %v12895_v5  }
  0x88   :  { %407 = vmatmul.mubr.f32.gmra.mrb[42].mxu0 %v98_v37  ;;  %v13445_v37 = vpop.permute.xlu1 %535 }
  0x89   :  { %10207 = vmatprep.mubr.msk.f32.mxu0 %vm128_vm0, %v101_v39  ;;  %v112_v39 = vld [vmem:[%s19496_s0 + $0x1c0] sm:$0xff] }
  0x8a   :  { %6160 = vperm.xlu1 %12821, %v12945_v20   ;;  %6155 = vperm.xlu0 %12820, %v12921_v14  }
  0x8c   :  { %412 = vmatmul.mubr.f32.gmra.mrb[44].mxu0 %v100_v40  ;;  %v13451_v40 = vpop.permute.xlu0 %525 }
  0x8d   :  { %10208 = vmatprep.mubr.msk.f32.mxu0 %vm128_vm0, %v103_v42  ;;  %v115_v42 = vld [vmem:[%s19496_s0 + $0x1d8] sm:$0xff] }
  0x8e   :  { %6170 = vperm.xlu1 %12821, %v12966_v25   ;;  %6165 = vperm.xlu0 %12820, %v12940_v19  }
  0x90   :  { %417 = vmatmul.mubr.f32.gmra.mrb[46].mxu0 %v102_v43  ;;  %v114_v43 = vld [vmem:[%s19496_s0 + $0x1d0] sm:$0xff] }
  0x91   :  { %10209 = vmatprep.mubr.msk.f32.mxu0 %vm128_vm0, %v105_v45  ;;  %v117_v45 = vld [vmem:[%s19496_s0 + $0x1e8] sm:$0xff] }
  0x92   :  { %6941 = vperm.xlu1 %12821, %v12901_v8   ;;  %6936 = vperm.xlu0 %12820, %v12882_v2  }
  0x94   :  { %422 = vmatmul.mubr.f32.gmra.mrb[48].mxu0 %v104_v46  ;;  %v13467_v46 = vpop.permute.xlu1 %545 }
  0x95   :  { %10210 = vmatprep.mubr.msk.f32.mxu0 %vm128_vm0, %v107_v0  ;;  %v13469_v0 = vpop.permute.xlu0 %540 }
  0x96   :  { %6951 = vperm.xlu1 %12821, %v12895_v5   ;;  %6946 = vperm.xlu0 %12820, %v12877_v1  }
  0x98   :  { %427 = vmatmul.mubr.f32.gmra.mrb[50].mxu0 %v106_v3  ;;  %v116_v3 = vld [vmem:[%s19496_s0 + $0x1e0] sm:$0xff] }
  0x99   :  { %10211 = vmatprep.mubr.msk.f32.mxu0 %vm128_vm0, %v109_v10  ;;  %v119_v10 = vld [vmem:[%s19496_s0 + $0x1f8] sm:$0xff] }
  0x9a   :  { %6961 = vperm.xlu1 %12821, %v12921_v14   ;;  %6956 = vperm.xlu0 %12820, %v12926_v15  }
  0x9c   :  { %432 = vmatmul.mubr.f32.gmra.mrb[52].mxu0 %v108_v11  ;;  %v13480_v11 = vpop.permute.xlu1 %555 }
  0x9d   :  { %10212 = vmatprep.mubr.msk.f32.mxu0 %vm128_vm0, %v111_v17  ;;  %v118_v17 = vld [vmem:[%s19496_s0 + $0x1f0] sm:$0xff] }
  0x9e   :  { %6971 = vperm.xlu1 %12821, %v12940_v19   ;;  %6966 = vperm.xlu0 %12820, %v12945_v20  }
  0xa0   :  { %437 = vmatmul.mubr.f32.gmra.mrb[54].mxu0 %v110_v28  ;;  %v13486_v28 = vpop.permute.xlu0 %550 }
  0xa1   :  { %10213 = vmatprep.mubr.msk.f32.mxu0 %vm128_vm0, %v113_v36  ;;  %v121_v36 = vld [vmem:[%s19496_s0 + $0x208] sm:$0xff] }
  0xa2   :  { %7742 = vperm.xlu1 %12821, %v12882_v2   ;;  %6976 = vperm.xlu0 %12820, %v12966_v25  }
  0xa4   :  { %442 = vmatmul.mubr.f32.gmra.mrb[56].mxu0 %v112_v39  ;;  %v120_v39 = vld [vmem:[%s19496_s0 + $0x200] sm:$0xff] }
  0xa5   :  { %10214 = vmatprep.mubr.msk.f32.mxu0 %vm128_vm0, %v115_v42  ;;  %v123_v42 = vld [vmem:[%s19496_s0 + $0x218] sm:$0xff] }
  0xa6   :  { %7752 = vperm.xlu1 %12821, %v12877_v1   ;;  %7747 = vperm.xlu0 %12820, %v12901_v8  }
  0xa8   :  { %447 = vmatmul.mubr.f32.gmra.mrb[58].mxu0 %v114_v43  ;;  %v13502_v43 = vpop.permute.xlu1 %1294 }
  0xa9   :  { %10215 = vmatprep.mubr.msk.f32.mxu0 %vm128_vm0, %v117_v45  ;;  %19788 = vst [vmem:[#allocation15_spill] sm:$0xff] %v13502_v43  ;;  %v13504_v45 = vpop.permute.xlu0 %560  ;;  %v3242_v43 = vld [vmem:[%s19495_s2 + $0x188] sm:$0xff] }
  0xaa   :  { %7762 = vperm.xlu1 %12821, %v12926_v15   ;;  %7757 = vperm.xlu0 %12820, %v12895_v5  }
  0xac   :  { %452 = vmatmul.mubr.f32.gmra.mrb[60].mxu0 %v116_v3  ;;  %v122_v3 = vld [vmem:[%s19496_s0 + $0x210] sm:$0xff] }
  0xad   :  { %10216 = vmatprep.mubr.msk.f32.mxu0 %vm128_vm0, %v119_v10  ;;  %v125_v10 = vld [vmem:[%s19496_s0 + $0x228] sm:$0xff] }
  0xae   :  { %7772 = vperm.xlu1 %12821, %v12945_v20   ;;  %7767 = vperm.xlu0 %12820, %v12921_v14  }
  0xb0   :  { %457 = vmatmul.mubr.f32.gmra.mrb[62].mxu0 %v118_v17  ;;  %v13515_v17 = vpop.permute.xlu1 %1304 }
  0xb1   :  { %10217 = vmatprep.mubr.msk.f32.mxu0 %vm128_vm0, %v121_v36  ;;  %19789 = vst [vmem:[#allocation16_spill] sm:$0xff] %v13515_v17  ;;  %v124_v36 = vld [vmem:[%s19496_s0 + $0x220] sm:$0xff] }
  0xb2   :  { %7782 = vperm.xlu1 %12821, %v12966_v25   ;;  %7777 = vperm.xlu0 %12820, %v12940_v19  }
  0xb4   :  { %462 = vmatmul.mubr.f32.gmra.mrb[64].mxu0 %v120_v39  ;;  %v13521_v39 = vpop.permute.xlu0 %1299 }
  0xb5   :  { %10218 = vmatprep.mubr.msk.f32.mxu0 %vm128_vm0, %v123_v42  ;;  %19790 = vst [vmem:[#allocation17_spill] sm:$0xff] %v13521_v39  ;;  %v127_v42 = vld [vmem:[%s19496_s0 + $0x238] sm:$0xff]  ;;  %v3241_v39 = vld [vmem:[%s19495_s2 + $0x180] sm:$0xff] }
  0xb6   :  { %8553 = vperm.xlu1 %12821, %v12901_v8   ;;  %8548 = vperm.xlu0 %12820, %v12882_v2  }
  0xb8   :  { %467 = vmatmul.mubr.f32.gmra.mrb[66].mxu0 %v122_v3  ;;  %v126_v3 = vld [vmem:[%s19496_s0 + $0x230] sm:$0xff] }
  0xb9   :  { %10219 = vmatprep.mubr.msk.f32.mxu0 %vm128_vm0, %v125_v10  ;;  %v13534_v10 = vpop.permute.xlu1 %1314 }
  0xba   :  { %8563 = vperm.xlu1 %12821, %v12895_v5   ;;  %8558 = vperm.xlu0 %12820, %v12877_v1   ;;  %19791 = vst [vmem:[#allocation18_spill] sm:$0xff] %v13534_v10  ;;  %v13536_v5 = vpop.permute.xlu0 %1309  ;;  %v3240_v10 = vld [vmem:[%s19495_s2 + $0x178] sm:$0xff] }
  0xbb   :  { %19792 = vst [vmem:[#allocation19_spill] sm:$0xff] %v13536_v5 }
  0xbc   :  { %472 = vmatmul.mubr.f32.gmra.mrb[68].mxu0 %v124_v36  ;;  %v1630_v36 = vld [vmem:[%s19495_s2 + $0x108] sm:$0xff] }
  0xbd   :  { %10220 = vmatprep.mubr.msk.f32.mxu0 %vm128_vm0, %v127_v42  ;;  %v13543_v1 = vpop.permute.xlu1 %1324 }
  0xbe   :  { %8573 = vperm.xlu1 %12821, %v12921_v14   ;;  %8568 = vperm.xlu0 %12820, %v12926_v15   ;;  %19793 = vst [vmem:[#allocation20_spill] sm:$0xff] %v13543_v1  ;;  %v13548_v14 = vpop.permute.xlu0 %1319 }
  0xbf   :  { %19794 = vst [vmem:[#allocation21_spill] sm:$0xff] %v13548_v14  ;;  %v3239_v14 = vld [vmem:[%s19495_s2 + $0x170] sm:$0xff] }
  0xc0   :  { %477 = vmatmul.mubr.f32.gmra.mrb[70].mxu0 %v126_v3  ;;  %v1631_v3 = vld [vmem:[%s19495_s2 + $0x110] sm:$0xff]  ;;  %v13951_v17 = vpack.c.bf16 %v3240_v10, %v3239_v14  ;;  %v9848_v10 = vld [vmem:[%s19498_s6 + $0x78] sm:$0xff] }
  0xc1   :  { %10237 = vmatprep.mubr.msk.f32.mxu0 %vm128_vm0, %v12950_v21  ;;  %v9847_v14 = vld [vmem:[%s19498_s6 + $0x70] sm:$0xff] }
  0xc2   :  { %8583 = vperm.xlu1 %12821, %v12940_v19   ;;  %8578 = vperm.xlu0 %12820, %v12945_v20   ;;  %v9345_v19 = vld [vmem:[%s19494_s1 + $0x10] sm:$0xff]  ;;  %v13561_v20 = vpop.permute.xlu1 %1334  ;;  %v13567_v21 = vpop.permute.xlu0 %1329 }
  0xc3   :  { %19795 = vst [vmem:[#allocation22_spill] sm:$0xff] %v13561_v20  ;;  %19796 = vst [vmem:[#allocation23_spill] sm:$0xff] %v13567_v21  ;;  %v13915_v20 = vld [vmem:[%s19496_s0 + $0x60] sm:$0xff] }
  0xc4   :  { %1076 = vmatmul.mubr.f32.vlgmr.msra.gmra.mrb[72].mxu0 %v13061_v48  ;;  %19819 = vst [vmem:[#allocation45_spill] sm:$0xff] %v13915_v20 }
  0xc5   :  { %10238 = vmatprep.mubr.msk.f32.mxu0 %vm128_vm0, %v13068_v49  ;;  %12036 = vmatpush1.bf16.msra.mxu0 %v13016_v38  ;;  %v9351_v49 = vld [vmem:[%s19494_s1 + $0x40] sm:$0xff] }
  0xc6   :  { %9354 = vperm.xlu1 %12821, %v12882_v2   ;;  %8588 = vperm.xlu0 %12820, %v12966_v25   ;;  %v9346_v2 = vld [vmem:[%s19494_s1 + $0x18] sm:$0xff]  ;;  %v9348_v25 = vld [vmem:[%s19494_s1 + $0x28] sm:$0xff]  ;;  %v13582_v48 = vpop.permute.xlu1 %2105 }
  0xc7   :  { %12037 = vmatprep.subr.bf16.mxu0 %v19504_v6  ;;  %19797 = vst [vmem:[#allocation24_spill] sm:$0xff] %v13582_v48 }
  0xc8   :  { %1081 = vmatmul.mubr.f32.gmra.mrb[74].mxu0 %v13077_v50  ;;  %v9350_v50 = vld [vmem:[%s19494_s1 + $0x38] sm:$0xff] }
  0xc9   :  { %10239 = vmatprep.mubr.msk.f32.mxu0 %vm128_vm0, %v13085_v51  ;;  %12039 = vmatpush1.bf16.msra.mxu0 %v13028_v41 }
  0xca   :  { %9364 = vperm.xlu1 %12821, %v9345_v19   ;;  %9359 = vperm.xlu0 %12820, %v12901_v8   ;;  %v9349_v8 = vld [vmem:[%s19494_s1 + $0x30] sm:$0xff]  ;;  %v13600_v51 = vpop.permute.xlu1 %2115  ;;  %v1632_v19 = vld [vmem:[%s19495_s2 + $0x118] sm:$0xff] }
  0xcb   :  { %12040 = vmatprep.subr.bf16.mxu0 %v19504_v6  ;;  %19799 = vst [vmem:[#allocation26_spill] sm:$0xff] %v13600_v51  ;;  %v3245_v51 = vld [vmem:[%s19495_s2 + $0x1a0] sm:$0xff] }
  0xcc   :  { %1086 = vmatmul.mubr.f32.gmra.mrb[76].mxu0 %v13094_v52  ;;  %v9690_v52 = vld [vmem:[%s19497_s4 + $0x8] sm:$0xff] }
  0xcd   :  { %10240 = vmatprep.mubr.msk.f32.mxu0 %vm128_vm0, %v13102_v53  ;;  %12042 = vmatpush1.bf16.msra.mxu0 %v13040_v44  ;;  %v9689_v53 = vld [vmem:[%s19497_s4] sm:$0xff] }
  0xce   :  { %9374 = vperm.xlu1 %12821, %v12926_v15   ;;  %9369 = vperm.xlu0 %12820, %v9346_v2   ;;  %v13587_v15 = vpop.permute.xlu0 %2100 }
  0xcf   :  { %12043 = vmatprep.subr.bf16.mxu0 %v19504_v6  ;;  %19798 = vst [vmem:[#allocation25_spill] sm:$0xff] %v13587_v15  ;;  %v14072_v15 = vld [vmem:[%s19496_s0 + $0xb0] sm:$0xff] }
  0xd0   :  { %1091 = vmatmul.mubr.f32.gmra.mrb[78].mxu0 %v13111_v54  ;;  %19836 = vst [vmem:[#allocation62_spill] sm:$0xff] %v14072_v15 }
  0xd1   :  { %10241 = vmatprep.mubr.msk.f32.mxu0 %vm128_vm0, %v13119_v55  ;;  %12045 = vmatpush1.bf16.msra.mxu0 %v13052_v47  ;;  %v9692_v55 = vld [vmem:[%s19497_s4 + $0x18] sm:$0xff]  ;;  %v14113_v47 = vld [vmem:[%s19496_s0 + $0xe8] sm:$0xff] }
  0xd2   :  { %9384 = vperm.xlu1 %12821, %v9349_v8   ;;  %9379 = vperm.xlu0 %12820, %v9348_v25   ;;  %v13609_v54 = vpop.permute.xlu0 %2110  ;;  %v13670_v25 = vpack.c.bf16 %v1632_v19, %v1631_v3  ;;  %v9701_v3 = vld [vmem:[%s19497_s4 + $0x60] sm:$0xff]  ;;  %v9704_v19 = vld [vmem:[%s19497_s4 + $0x78] sm:$0xff]  ;;  %19842 = vst [vmem:[#allocation68_spill] sm:$0xff] %v14113_v47 }
  0xd3   :  { %12046 = vmatprep.subr.bf16.mxu0 %v19504_v6  ;;  %19800 = vst [vmem:[#allocation27_spill] sm:$0xff] %v13609_v54  ;;  %v3248_v54 = vld [vmem:[%s19495_s2 + $0x1b8] sm:$0xff] }
  0xd4   :  { %1096 = vmatmul.mubr.f32.gmra.mrb[80].mxu0 %v13128_v56  ;;  %v9691_v56 = vld [vmem:[%s19497_s4 + $0x10] sm:$0xff] }
  0xd5   :  { %10242 = vmatprep.mubr.msk.f32.mxu0 %vm128_vm0, %v13136_v57  ;;  %12048 = vmatpush1.bf16.msra.mxu0 %v13205_v7  ;;  %v13623_v57 = vpop.permute.xlu1 %2125  ;;  %v14108_v7 = vld [vmem:[%s19496_s0 + $0xd0] sm:$0xff] }
  0xd6   :  { %9394 = vperm.xlu1 %12821, %v9351_v49   ;;  %9389 = vperm.xlu0 %12820, %v9350_v50   ;;  %19801 = vst [vmem:[#allocation28_spill] sm:$0xff] %v13623_v57  ;;  %v1633_v49 = vld [vmem:[%s19495_s2 + $0x120] sm:$0xff]  ;;  %v1634_v50 = vld [vmem:[%s19495_s2 + $0x128] sm:$0xff]  ;;  %19841 = vst [vmem:[#allocation67_spill] sm:$0xff] %v14108_v7 }
  0xd7   :  { %12049 = vmatprep.subr.bf16.mxu0 %v19504_v6 }
  0xd8   :  { %1101 = vmatmul.mubr.f32.gmra.mrb[82].mxu0 %v13145_v58  ;;  %v13628_v58 = vpop.permute.xlu0 %2120 }
  0xd9   :  { %10243 = vmatprep.mubr.msk.f32.mxu0 %vm128_vm0, %v13153_v59  ;;  %12051 = vmatpush1.bf16.msra.mxu0 %v13230_v13  ;;  %19802 = vst [vmem:[#allocation29_spill] sm:$0xff] %v13628_v58  ;;  %v1629_v59 = vld [vmem:[%s19495_s2 + $0x100] sm:$0xff]  ;;  %v13655_v2 = vpop.permute.xlu1 %2135 }
  0xda   :  { %9712 = vperm.xlu1 %12821, %v9690_v52   ;;  %9707 = vperm.xlu0 %12820, %v9689_v53   ;;  %v13647_v42 = vpack.c.bf16 %v1630_v36, %v1629_v59  ;;  %19803 = vst [vmem:[#allocation30_spill] sm:$0xff] %v13655_v2  ;;  %v13691_v53 = vpack.c.bf16 %v1634_v50, %v1633_v49  ;;  %v9699_v59 = vld [vmem:[%s19497_s4 + $0x50] sm:$0xff]  ;;  %v13756_v49 = vld [vmem:[%s19496_s0 + $0x18] sm:$0xff]  ;;  %v9833_v50 = vld [vmem:[%s19498_s6] sm:$0xff] }
  0xdb   :  { %12052 = vmatprep.subr.bf16.mxu0 %v19504_v6 }
  0xdc   :  { %1106 = vmatmul.mubr.f32.gmra.mrb[84].mxu0 %v13162_v60  ;;  %v9694_v60 = vld [vmem:[%s19497_s4 + $0x28] sm:$0xff]  ;;  %v13664_v8 = vpop.permute.xlu0 %2130 }
  0xdd   :  { %10244 = vmatprep.mubr.msk.f32.mxu0 %vm128_vm0, %v13170_v61  ;;  %12054 = vmatpush1.bf16.msra.mxu0 %v13255_v23  ;;  %v9693_v61 = vld [vmem:[%s19497_s4 + $0x20] sm:$0xff]  ;;  %19804 = vst [vmem:[#allocation31_spill] sm:$0xff] %v13664_v8  ;;  %v13686_v52 = vpop.permute.xlu1 %2906 }
  0xde   :  { %9722 = vperm.xlu1 %12821, %v9692_v55   ;;  %9717 = vperm.xlu0 %12820, %v9691_v56   ;;  %19805 = vst [vmem:[#allocation32_spill] sm:$0xff] %v13686_v52  ;;  %v1635_v56 = vld [vmem:[%s19495_s2 + $0x130] sm:$0xff]  ;;  %v3238_v52 = vld [vmem:[%s19495_s2 + $0x168] sm:$0xff] }
  0xdf   :  { %12055 = vmatprep.subr.bf16.mxu0 %v19504_v6 }
  0xe0   :  { %1111 = vmatmul.mubr.f32.gmra.mrb[86].mxu0 %v13179_v62  ;;  %v9696_v62 = vld [vmem:[%s19497_s4 + $0x38] sm:$0xff]  ;;  %v13693_v55 = vpop.permute.xlu0 %2140 }
  0xe1   :  { %10245 = vmatprep.mubr.msk.f32.mxu0 %vm128_vm0, %v13187_v63  ;;  %12057 = vmatpush1.bf16.msra.mxu0 %v13280_v31  ;;  %v9695_v63 = vld [vmem:[%s19497_s4 + $0x30] sm:$0xff]  ;;  %19806 = vst [vmem:[#allocation33_spill] sm:$0xff] %v13693_v55 }
  0xe2   :  { %9732 = vperm.xlu1 %12821, %v9694_v60   ;;  %9727 = vperm.xlu0 %12820, %v9693_v61   ;;  %v13714_v60 = vpop.permute.xlu1 %2916  ;;  %v9702_v61 = vld [vmem:[%s19497_s4 + $0x68] sm:$0xff] }
  0xe3   :  { %12058 = vmatprep.subr.bf16.mxu0 %v19504_v6  ;;  %19807 = vst [vmem:[#allocation34_spill] sm:$0xff] %v13714_v60 }
  0xe4   :  { %1116 = vmatmul.mubr.f32.gmra.mrb[88].mxu0 %v13202_v4  ;;  %v9698_v4 = vld [vmem:[%s19497_s4 + $0x48] sm:$0xff] }
  0xe5   :  { %10246 = vmatprep.mubr.msk.f32.mxu0 %vm128_vm0, %v13212_v9  ;;  %12060 = vmatpush1.bf16.msra.mxu0 %v13647_v42  ;;  %v9697_v9 = vld [vmem:[%s19497_s4 + $0x40] sm:$0xff] }
  0xe6   :  { %9742 = vperm.xlu1 %12821, %v9696_v62   ;;  %9737 = vperm.xlu0 %12820, %v9695_v63   ;;  %v13749_v62 = vld [vmem:[%s19496_s0] sm:$0xff] }
  0xe7   :  { %12061 = vmatprep.subr.bf16.mxu0 %v19504_v6 }
  0xe8   :  { %1121 = vmatmul.mubr.f32.gmra.mrb[90].mxu0 %v13227_v12  ;;  %v1636_v12 = vld [vmem:[%s19495_s2 + $0x138] sm:$0xff] }
  0xe9   :  { %10247 = vmatprep.mubr.msk.f32.mxu0 %vm128_vm0, %v13237_v16  ;;  %12063 = vmatpush1.bf16.msra.mxu0 %v13670_v25  ;;  %v9700_v16 = vld [vmem:[%s19497_s4 + $0x58] sm:$0xff]  ;;  %v13712_v36 = vpack.c.bf16 %v1636_v12, %v1635_v56 }
  0xea   :  { %9752 = vperm.xlu1 %12821, %v9698_v4   ;;  %9747 = vperm.xlu0 %12820, %v9697_v9   ;;  %v13770_v4 = vld [vmem:[%s19496_s0 + $0x10] sm:$0xff]  ;;  %v13776_v9 = vld [vmem:[%s19496_s0 + $0x28] sm:$0xff]  ;;  %v9836_v12 = vld [vmem:[%s19498_s6 + $0x18] sm:$0xff] }
  0xeb   :  { %12064 = vmatprep.subr.bf16.mxu0 %v19504_v6 }
  0xec   :  { %1126 = vmatmul.mubr.f32.gmra.mrb[92].mxu0 %v13252_v22  ;;  %v13723_v22 = vpop.permute.xlu0 %2911 }
  0xed   :  { %10248 = vmatprep.mubr.msk.f32.mxu0 %vm128_vm0, %v13262_v24  ;;  %12066 = vmatpush1.bf16.msra.mxu0 %v13691_v53  ;;  %19808 = vst [vmem:[#allocation35_spill] sm:$0xff] %v13723_v22  ;;  %v13732_v24 = vld [vmem:[%s19496_s0 + $0x8] sm:$0xff]  ;;  %v3237_v22 = vld [vmem:[%s19495_s2 + $0x160] sm:$0xff] }
  0xee   :  { %9762 = vperm.xlu1 %12821, %v9700_v16   ;;  %9757 = vperm.xlu0 %12820, %v9699_v59   ;;  %v9835_v16 = vld [vmem:[%s19498_s6 + $0x10] sm:$0xff]  ;;  %v13795_v59 = vld [vmem:[%s19496_s0 + $0x20] sm:$0xff]  ;;  %v13918_v21 = vpack.c.bf16 %v3238_v52, %v3237_v22  ;;  %v9846_v52 = vld [vmem:[%s19498_s6 + $0x68] sm:$0xff] }
  0xef   :  { %12067 = vmatprep.subr.bf16.mxu0 %v19504_v6  ;;  %v9845_v22 = vld [vmem:[%s19498_s6 + $0x60] sm:$0xff] }
  0xf0   :  { %1131 = vmatmul.mubr.f32.gmra.mrb[94].mxu0 %v13277_v30  ;;  %v9703_v30 = vld [vmem:[%s19497_s4 + $0x70] sm:$0xff]  ;;  %v13751_v63 = vpop.permute.xlu0 %2921 }
  0xf1   :  { %10249 = vmatprep.mubr.msk.f32.mxu0 %vm128_vm0, %v13287_v33  ;;  %12069 = vmatpush1.bf16.msra.mxu0 %v13712_v36  ;;  %v13742_v33 = vpop.permute.xlu1 %2926  ;;  %19810 = vst [vmem:[#allocation37_spill] sm:$0xff] %v13751_v63  ;;  %v13882_v63 = vld [vmem:[%s19496_s0 + $0x50] sm:$0xff] }
  0xf2   :  { %9772 = vperm.xlu1 %12821, %v9702_v61   ;;  %9767 = vperm.xlu0 %12820, %v9701_v3   ;;  %19809 = vst [vmem:[#allocation36_spill] sm:$0xff] %v13742_v33  ;;  %v13801_v61 = vld [vmem:[%s19496_s0 + $0x38] sm:$0xff]  ;;  %v9838_v3 = vld [vmem:[%s19498_s6 + $0x28] sm:$0xff] }
  0xf3   :  { %12138 = vmatprep.subr.bf16.mxu0 %v19504_v6 }
  0xf4   :  { %1136 = vmatmul.mubr.f32.gmra.mrb[96].mxu0 %v13296_v34  ;;  %v9834_v34 = vld [vmem:[%s19498_s6 + $0x8] sm:$0xff] }
  0xf5   :  { %10305 = vmatprep.mubr.msk.f32.mxu0 %vm128_vm0, %v13732_v24  ;;  %v13778_v56 = vpop.permute.xlu1 %2936 }
  0xf6   :  { %9782 = vperm.xlu1 %12821, %v9704_v19   ;;  %9777 = vperm.xlu0 %12820, %v9703_v30   ;;  %19811 = vst [vmem:[#allocation38_spill] sm:$0xff] %v13778_v56  ;;  %v9837_v19 = vld [vmem:[%s19498_s6 + $0x20] sm:$0xff]  ;;  %v13818_v30 = vld [vmem:[%s19496_s0 + $0x30] sm:$0xff]  ;;  %v3236_v56 = vld [vmem:[%s19495_s2 + $0x158] sm:$0xff] }
  0xf8   :  { %1882 = vmatmul.mubr.f32.vlgmr.msra.gmra.mrb[98].mxu0 %v13749_v62 }
  0xf9   :  { %10306 = vmatprep.mubr.msk.f32.mxu0 %vm128_vm0, %v13756_v49  ;;  %12140 = vmatpush1.bf16.msra.mxu0 %v13647_v42  ;;  %v13787_v42 = vpop.permute.xlu0 %2931 }
  0xfa   :  { %9856 = vperm.xlu1 %12821, %v9834_v34   ;;  %9851 = vperm.xlu0 %12820, %v9833_v50   ;;  %19812 = vst [vmem:[#allocation39_spill] sm:$0xff] %v13787_v42  ;;  %v13826_v50 = vld [vmem:[%s19496_s0 + $0x48] sm:$0xff] }
  0xfb   :  { %12141 = vmatprep.subr.bf16.mxu0 %v19504_v6 }
  0xfc   :  { %1887 = vmatmul.mubr.f32.gmra.mrb[100].mxu0 %v13770_v4 }
  0xfd   :  { %10307 = vmatprep.mubr.msk.f32.mxu0 %vm128_vm0, %v13776_v9  ;;  %12143 = vmatpush1.bf16.msra.mxu0 %v13670_v25  ;;  %v13811_v25 = vpop.permute.xlu1 %2946  ;;  %v13821_v34 = vpop.permute.xlu0 %2941 }
  0xfe   :  { %9866 = vperm.xlu1 %12821, %v9836_v12   ;;  %9861 = vperm.xlu0 %12820, %v9835_v16   ;;  %19813 = vst [vmem:[#allocation40_spill] sm:$0xff] %v13811_v25  ;;  %19814 = vst [vmem:[#allocation41_spill] sm:$0xff] %v13821_v34  ;;  %v3233_v12 = vld [vmem:[%s19495_s2 + $0x140] sm:$0xff]  ;;  %v3234_v16 = vld [vmem:[%s19495_s2 + $0x148] sm:$0xff] }
  0xff   :  { %12144 = vmatprep.subr.bf16.mxu0 %v19504_v6  ;;  %v13850_v25 = vpack.c.bf16 %v3234_v16, %v3233_v12  ;;  %v3235_v34 = vld [vmem:[%s19495_s2 + $0x150] sm:$0xff]  ;;  %v9842_v12 = vld [vmem:[%s19498_s6 + $0x48] sm:$0xff]  ;;  %v9841_v16 = vld [vmem:[%s19498_s6 + $0x40] sm:$0xff] }
 0x100   :  { %1892 = vmatmul.mubr.f32.gmra.mrb[102].mxu0 %v13795_v59  ;;  %v13885_v60 = vpack.c.bf16 %v3236_v56, %v3235_v34  ;;  %v9844_v56 = vld [vmem:[%s19498_s6 + $0x58] sm:$0xff]  ;;  %v9843_v34 = vld [vmem:[%s19498_s6 + $0x50] sm:$0xff] }
 0x101   :  { %10308 = vmatprep.mubr.msk.f32.mxu0 %vm128_vm0, %v13801_v61  ;;  %12146 = vmatpush1.bf16.msra.mxu0 %v13691_v53  ;;  %v9840_v53 = vld [vmem:[%s19498_s6 + $0x38] sm:$0xff]  ;;  %v13863_v42 = vpop.permute.xlu1 %3717 }
 0x102   :  { %9876 = vperm.xlu1 %12821, %v9838_v3   ;;  %9871 = vperm.xlu0 %12820, %v9837_v19   ;;  %v9839_v3 = vld [vmem:[%s19498_s6 + $0x30] sm:$0xff]  ;;  %v13847_v19 = vld [vmem:[%s19496_s0 + $0x40] sm:$0xff]  ;;  %19815 = vst [vmem:[#allocation42_spill] sm:$0xff] %v13863_v42  ;;  %v13986_v42 = vpack.c.bf16 %v3242_v43, %v3241_v39  ;;  %v10093_v43 = vld [vmem:[%s19499_s8 + $0x8] sm:$0xff] }
 0x103   :  { %12147 = vmatprep.subr.bf16.mxu0 %v19504_v6  ;;  %v13855_v6 = vld [vmem:[%s19496_s0 + $0x58] sm:$0xff]  ;;  %v10092_v39 = vld [vmem:[%s19499_s8] sm:$0xff] }
 0x104   :  { %1897 = vmatmul.mubr.f32.gmra.mrb[104].mxu0 %v13818_v30 }
 0x105   :  { %10309 = vmatprep.mubr.msk.f32.mxu0 %vm128_vm0, %v13826_v50  ;;  %12149 = vmatpush1.bf16.msra.mxu0 %v13712_v36 }
 0x106   :  { %9886 = vperm.xlu1 %12821, %v9840_v53   ;;  %9881 = vperm.xlu0 %12820, %v9839_v3   ;;  %v19816_v53 = vmov 0.0|0.0   ;;  %v13874_v3 = vpop.permute.xlu0 %3712 }
 0x107   :  { %v13865_v36 = vpop.f32.mrb[0].mxu0  ;;  %12150 = vmatprep.subr.bf16.mxu0 %v19816_v53  ;;  %19817 = vst [vmem:[#allocation43_spill] sm:$0xff] %v13874_v3  ;;  %v3244_v3 = vld [vmem:[%s19495_s2 + $0x198] sm:$0xff] }
 0x108   :  { %v305_v33 = vpop.f32.mrb[1].mxu0  ;;  %1902 = vmatmul.mubr.f32.gmra.mrb[106].mxu0 %v13847_v19 }
 0x109   :  { %10310 = vmatprep.mubr.msk.f32.mxu0 %vm128_vm0, %v13855_v6  ;;  %12152 = vmatpush1.bf16.msra.mxu0 %v13850_v25  ;;  %v13890_v33 = vld [vmem:[%s19496_s0 + $0x68] sm:$0xff] }
 0x10a   :  { %9896 = vperm.xlu1 %12821, %v9842_v12   ;;  %9891 = vperm.xlu0 %12820, %v9841_v16   ;;  %v13908_v16 = vpop.permute.xlu1 %3727  ;;  %v13920_v1 = vpop.permute.xlu0 %3722 }
 0x10b   :  { %v13898_v55 = vpop.f32.mrb[2].mxu0  ;;  %12153 = vmatprep.subr.bf16.mxu0 %v19816_v53  ;;  %19818 = vst [vmem:[#allocation44_spill] sm:$0xff] %v13908_v16  ;;  %19820 = vst [vmem:[#allocation46_spill] sm:$0xff] %v13920_v1 }
 0x10c   :  { %v310_v12 = vpop.f32.mrb[3].mxu0  ;;  %1907 = vmatmul.mubr.f32.gmra.mrb[108].mxu0 %v13882_v63 }
 0x10d   :  { %10311 = vmatprep.mubr.msk.f32.mxu0 %vm128_vm0, %v13890_v33  ;;  %12155 = vmatpush1.bf16.msra.mxu0 %v13885_v60  ;;  %v13925_v12 = vld [vmem:[%s19496_s0 + $0x78] sm:$0xff] }
 0x10e   :  { %9906 = vperm.xlu1 %12821, %v9844_v56   ;;  %9901 = vperm.xlu0 %12820, %v9843_v34   ;;  %19821 = vst [vmem:[#allocation47_spill] sm:$0xff] %v13925_v12  ;;  %v13948_v34 = vld [vmem:[%s19496_s0 + $0x70] sm:$0xff]  ;;  %v13964_v16 = vpop.permute.xlu1 %3737 }
 0x10f   :  { %v13933_v5 = vpop.f32.mrb[4].mxu0  ;;  %12156 = vmatprep.subr.bf16.mxu0 %v19816_v53  ;;  %19822 = vst [vmem:[#allocation48_spill] sm:$0xff] %v13948_v34  ;;  %19824 = vst [vmem:[#allocation50_spill] sm:$0xff] %v13964_v16  ;;  %v13983_v16 = vld [vmem:[%s19496_s0 + $0x80] sm:$0xff] }
 0x110   :  { %v315_v56 = vpop.f32.mrb[5].mxu0  ;;  %1912 = vmatmul.mubr.f32.gmra.mrb[110].mxu0 %v13915_v20  ;;  %19826 = vst [vmem:[#allocation52_spill] sm:$0xff] %v13983_v16 }
 0x111   :  { %10312 = vmatprep.mubr.msk.f32.mxu0 %vm128_vm0, %v13925_v12  ;;  %12158 = vmatpush1.bf16.msra.mxu0 %v13918_v21  ;;  %v13956_v56 = vld [vmem:[%s19496_s0 + $0x88] sm:$0xff] }
 0x112   :  { %9916 = vperm.xlu1 %12821, %v9846_v52   ;;  %9911 = vperm.xlu0 %12820, %v9845_v22   ;;  %19823 = vst [vmem:[#allocation49_spill] sm:$0xff] %v13956_v56  ;;  %v13975_v52 = vpop.permute.xlu0 %3732  ;;  %v14019_v57 = vpop.permute.xlu1 %3747 }
 0x113   :  { %v13966_v1 = vpop.f32.mrb[6].mxu0  ;;  %12159 = vmatprep.subr.bf16.mxu0 %v19816_v53  ;;  %19825 = vst [vmem:[#allocation51_spill] sm:$0xff] %v13975_v52  ;;  %v3243_v52 = vld [vmem:[%s19495_s2 + $0x190] sm:$0xff]  ;;  %19830 = vst [vmem:[#allocation56_spill] sm:$0xff] %v14019_v57 }
 0x114   :  { %v320_v22 = vpop.f32.mrb[7].mxu0  ;;  %1917 = vmatmul.mubr.f32.gmra.mrb[112].mxu0 %v13948_v34  ;;  %v14017_v8 = vpack.c.bf16 %v3244_v3, %v3243_v52  ;;  %v3246_v3 = vld [vmem:[%s19495_s2 + $0x1a8] sm:$0xff] }
 0x115   :  { %10313 = vmatprep.mubr.msk.f32.mxu0 %vm128_vm0, %v13956_v56  ;;  %12161 = vmatpush1.bf16.msra.mxu0 %v13951_v17  ;;  %v13991_v22 = vld [vmem:[%s19496_s0 + $0x98] sm:$0xff] }
 0x116   :  { %9926 = vperm.xlu1 %12821, %v9848_v10   ;;  %9921 = vperm.xlu0 %12820, %v9847_v14   ;;  %19827 = vst [vmem:[#allocation53_spill] sm:$0xff] %v13991_v22  ;;  %v14014_v14 = vld [vmem:[%s19496_s0 + $0x90] sm:$0xff]  ;;  %19829 = vst [vmem:[#allocation55_spill] sm:$0xff] %v14017_v8  ;;  %v14021_v58 = vpop.permute.xlu0 %3742 }
 0x117   :  { %v13999_v2 = vpop.f32.mrb[8].mxu0  ;;  %12162 = vmatprep.subr.bf16.mxu0 %v19816_v53  ;;  %19828 = vst [vmem:[#allocation54_spill] sm:$0xff] %v14014_v14  ;;  %19831 = vst [vmem:[#allocation57_spill] sm:$0xff] %v14021_v58  ;;  %v14051_v58 = vld [vmem:[%s19496_s0 + $0xb8] sm:$0xff] }
 0x118   :  { %v325_v10 = vpop.f32.mrb[9].mxu0  ;;  %1922 = vmatmul.mubr.f32.gmra.mrb[114].mxu0 %v13983_v16  ;;  %19835 = vst [vmem:[#allocation61_spill] sm:$0xff] %v14051_v58 }
 0x119   :  { %10314 = vmatprep.mubr.msk.f32.mxu0 %vm128_vm0, %v13991_v22  ;;  %12164 = vmatpush1.bf16.msra.mxu0 %v13986_v42  ;;  %v14026_v10 = vld [vmem:[%s19496_s0 + $0xa8] sm:$0xff] }
 0x11a   :  { %10101 = vperm.xlu1 %12821, %v10093_v43   ;;  %10096 = vperm.xlu0 %12820, %v10092_v39   ;;  %19832 = vst [vmem:[#allocation58_spill] sm:$0xff] %v14026_v10  ;;  %v14043_v43 = vld [vmem:[%s19496_s0 + $0xa0] sm:$0xff]  ;;  %v14046_v39 = vpack.c.bf16 %v3246_v3, %v3245_v51 }
 0x11b   :  { %v14034_v52 = vpop.f32.mrb[10].mxu0  ;;  %12165 = vmatprep.subr.bf16.mxu0 %v19816_v53  ;;  %19833 = vst [vmem:[#allocation59_spill] sm:$0xff] %v14043_v43  ;;  %v581_v51 = vld [vmem:[%s19500_s3] sm:$0xff] }
 0x11c   :  { %v330_v57 = vpop.f32.mrb[11].mxu0  ;;  %1927 = vmatmul.mubr.f32.gmra.mrb[116].mxu0 %v14014_v14  ;;  %19834 = vst [vmem:[#allocation60_spill] sm:$0xff] %v14046_v39  ;;  %11353 = vmatprep.mubr.msk.f32.mxu1 %vm597_vm1, %v581_v51 }
 0x11d   :  { %10315 = vmatprep.mubr.msk.f32.mxu0 %vm128_vm0, %v14026_v10  ;;  %12167 = vmatpush1.bf16.msra.mxu0 %v14017_v8  ;;  %v3247_v57 = vld [vmem:[%s19495_s2 + $0x1b0] sm:$0xff]  ;;  %v14415_v8 = vld [vmem:[%s19496_s0 + $0x218] sm:$0xff] }
 0x11e   :  { %12168 = vmatprep.subr.bf16.mxu0 %v19816_v53  ;;  %v14075_v31 = vpack.c.bf16 %v3248_v54, %v3247_v57  ;;  %v14091_v54 = vld [vmem:[%s19496_s0 + $0xc0] sm:$0xff]  ;;  %v14097_v57 = vld [vmem:[%s19496_s0 + $0xd8] sm:$0xff]  ;;  %19879 = vst [vmem:[#allocation104_spill] sm:$0xff] %v14415_v8 }
 0x11f   :  { %v14060_v48 = vpop.f32.mrb[12].mxu0  ;;  %19839 = vst [vmem:[#allocation65_spill] sm:$0xff] %v14091_v54  ;;  %19840 = vst [vmem:[#allocation66_spill] sm:$0xff] %v14097_v57 }
 0x120   :  { %v335_v3 = vpop.f32.mrb[13].mxu0  ;;  %1932 = vmatmul.mubr.f32.gmra.mrb[118].mxu0 %v14043_v43  ;;  %19837 = vst [vmem:[#allocation63_spill] sm:$0xff] %v14075_v31 }
 0x121   :  { %10316 = vmatprep.mubr.msk.f32.mxu0 %vm128_vm0, %v14051_v58  ;;  %12170 = vmatpush1.bf16.msra.mxu0 %v14046_v39  ;;  %v14080_v3 = vld [vmem:[%s19496_s0 + $0xc8] sm:$0xff] }
 0x122   :  { %19838 = vst [vmem:[#allocation64_spill] sm:$0xff] %v14080_v3  ;;  %12171 = vmatprep.subr.bf16.mxu0 %v19816_v53 }
 0x123   :  { %v14083_v51 = vpop.f32.mrb[14].mxu0 }
 0x124   :  { %v340_v23 = vpop.f32.mrb[15].mxu0  ;;  %1937 = vmatmul.mubr.f32.gmra.mrb[120].mxu0 %v14072_v15 }
 0x125   :  { %10317 = vmatprep.mubr.msk.f32.mxu0 %vm128_vm0, %v14080_v3  ;;  %12173 = vmatpush1.bf16.msra.mxu0 %v14075_v31 }
 0x126   :  { %12190 = vmatprep.subr.bf16.mxu0 %v19816_v53 }
 0x127   :  { %v14100_v23 = vpop.f32.mrb[16].mxu0 }
 0x128   :  { %v345_v13 = vpop.f32.mrb[17].mxu0  ;;  %1942 = vmatmul.mubr.f32.gmra.mrb[122].mxu0 %v14091_v54  ;;  %v14130_v54 = vld [vmem:[%s19496_s0 + $0xf8] sm:$0xff] }
 0x129   :  { %10318 = vmatprep.mubr.msk.f32.mxu0 %vm128_vm0, %v14097_v57  ;;  %v14125_v57 = vld [vmem:[%s19496_s0 + $0xe0] sm:$0xff]  ;;  %19844 = vst [vmem:[#allocation70_spill] sm:$0xff] %v14130_v54 }
 0x12a   :  { %19843 = vst [vmem:[#allocation69_spill] sm:$0xff] %v14125_v57 }
 0x12b   :  { %v14115_v44 = vpop.f32.mrb[18].mxu0 }
 0x12c   :  { %v350_v41 = vpop.f32.mrb[19].mxu0  ;;  %1947 = vmatmul.mubr.f32.gmra.mrb[124].mxu0 %v14108_v7  ;;  %v14147_v7 = vld [vmem:[%s19496_s0 + $0x108] sm:$0xff] }
 0x12d   :  { %10319 = vmatprep.mubr.msk.f32.mxu0 %vm128_vm0, %v14113_v47  ;;  %v14142_v47 = vld [vmem:[%s19496_s0 + $0xf0] sm:$0xff]  ;;  %19846 = vst [vmem:[#allocation72_spill] sm:$0xff] %v14147_v7 }
 0x12e   :  { %19845 = vst [vmem:[#allocation71_spill] sm:$0xff] %v14142_v47 }
 0x12f   :  { %v14132_v3 = vpop.f32.mrb[20].mxu0 }
 0x130   :  { %v355_v13 = vpop.f32.mrb[21].mxu0  ;;  %1952 = vmatmul.mubr.f32.gmra.mrb[126].mxu0 %v14125_v57  ;;  %v14164_v57 = vld [vmem:[%s19496_s0 + $0x118] sm:$0xff] }
 0x131   :  { %10320 = vmatprep.mubr.msk.f32.mxu0 %vm128_vm0, %v14130_v54  ;;  %v14159_v54 = vld [vmem:[%s19496_s0 + $0x100] sm:$0xff]  ;;  %19848 = vst [vmem:[#allocation74_spill] sm:$0xff] %v14164_v57 }
 0x132   :  { %19847 = vst [vmem:[#allocation73_spill] sm:$0xff] %v14159_v54 }
 0x133   :  { %v14149_v15 = vpop.f32.mrb[22].mxu0 }
 0x134   :  { %v360_v41 = vpop.f32.mrb[23].mxu0  ;;  %1957 = vmatmul.mubr.f32.gmra.mrb[128].mxu0 %v14142_v47  ;;  %v14181_v47 = vld [vmem:[%s19496_s0 + $0x128] sm:$0xff] }
 0x135   :  { %10321 = vmatprep.mubr.msk.f32.mxu0 %vm128_vm0, %v14147_v7  ;;  %v14176_v7 = vld [vmem:[%s19496_s0 + $0x110] sm:$0xff]  ;;  %19850 = vst [vmem:[#allocation76_spill] sm:$0xff] %v14181_v47 }
 0x136   :  { %19849 = vst [vmem:[#allocation75_spill] sm:$0xff] %v14176_v7 }
 0x137   :  { %v14166_v38 = vpop.f32.mrb[24].mxu0 }
 0x138   :  { %v365_v13 = vpop.f32.mrb[25].mxu0  ;;  %1962 = vmatmul.mubr.f32.gmra.mrb[130].mxu0 %v14159_v54  ;;  %v14198_v54 = vld [vmem:[%s19496_s0 + $0x138] sm:$0xff] }
 0x139   :  { %10322 = vmatprep.mubr.msk.f32.mxu0 %vm128_vm0, %v14164_v57  ;;  %v14193_v57 = vld [vmem:[%s19496_s0 + $0x120] sm:$0xff]  ;;  %19852 = vst [vmem:[#allocation78_spill] sm:$0xff] %v14198_v54 }
 0x13a   :  { %19851 = vst [vmem:[#allocation77_spill] sm:$0xff] %v14193_v57 }
 0x13b   :  { %v14183_v58 = vpop.f32.mrb[26].mxu0 }
 0x13c   :  { %v370_v41 = vpop.f32.mrb[27].mxu0  ;;  %1967 = vmatmul.mubr.f32.gmra.mrb[132].mxu0 %v14176_v7  ;;  %v14215_v7 = vld [vmem:[%s19496_s0 + $0x148] sm:$0xff] }
 0x13d   :  { %10323 = vmatprep.mubr.msk.f32.mxu0 %vm128_vm0, %v14181_v47  ;;  %v14210_v47 = vld [vmem:[%s19496_s0 + $0x130] sm:$0xff]  ;;  %19854 = vst [vmem:[#allocation80_spill] sm:$0xff] %v14215_v7 }
 0x13e   :  { %19853 = vst [vmem:[#allocation79_spill] sm:$0xff] %v14210_v47 }
 0x13f   :  { %v14200_v43 = vpop.f32.mrb[28].mxu0 }
 0x140   :  { %v375_v13 = vpop.f32.mrb[29].mxu0  ;;  %1972 = vmatmul.mubr.f32.gmra.mrb[134].mxu0 %v14193_v57  ;;  %v14232_v57 = vld [vmem:[%s19496_s0 + $0x158] sm:$0xff] }
 0x141   :  { %10324 = vmatprep.mubr.msk.f32.mxu0 %vm128_vm0, %v14198_v54  ;;  %v14227_v54 = vld [vmem:[%s19496_s0 + $0x140] sm:$0xff]  ;;  %19856 = vst [vmem:[#allocation82_spill] sm:$0xff] %v14232_v57 }
 0x142   :  { %19855 = vst [vmem:[#allocation81_spill] sm:$0xff] %v14227_v54 }
 0x143   :  { %v14217_v35 = vpop.f32.mrb[30].mxu0 }
 0x144   :  { %v380_v41 = vpop.f32.mrb[31].mxu0  ;;  %1977 = vmatmul.mubr.f32.gmra.mrb[136].mxu0 %v14210_v47  ;;  %v14249_v47 = vld [vmem:[%s19496_s0 + $0x168] sm:$0xff] }
 0x145   :  { %10325 = vmatprep.mubr.msk.f32.mxu0 %vm128_vm0, %v14215_v7  ;;  %v14244_v7 = vld [vmem:[%s19496_s0 + $0x150] sm:$0xff]  ;;  %19858 = vst [vmem:[#allocation84_spill] sm:$0xff] %v14249_v47 }
 0x146   :  { %19857 = vst [vmem:[#allocation83_spill] sm:$0xff] %v14244_v7 }
 0x147   :  { %v14234_v10 = vpop.f32.mrb[32].mxu0 }
 0x148   :  { %v385_v13 = vpop.f32.mrb[33].mxu0  ;;  %1982 = vmatmul.mubr.f32.gmra.mrb[138].mxu0 %v14227_v54  ;;  %v14266_v54 = vld [vmem:[%s19496_s0 + $0x178] sm:$0xff] }
 0x149   :  { %10326 = vmatprep.mubr.msk.f32.mxu0 %vm128_vm0, %v14232_v57  ;;  %v14261_v57 = vld [vmem:[%s19496_s0 + $0x160] sm:$0xff]  ;;  %19860 = vst [vmem:[#allocation86_spill] sm:$0xff] %v14266_v54  ;;  %v14279_v13 = vld [vmem:[%s19496_s0 + $0x188] sm:$0xff] }
 0x14a   :  { %19859 = vst [vmem:[#allocation85_spill] sm:$0xff] %v14261_v57  ;;  %19862 = vst [vmem:[#allocation88_spill] sm:$0xff] %v14279_v13 }
 0x14b   :  { %v14251_v14 = vpop.f32.mrb[34].mxu0 }
 0x14c   :  { %v390_v41 = vpop.f32.mrb[35].mxu0  ;;  %1987 = vmatmul.mubr.f32.gmra.mrb[140].mxu0 %v14244_v7 }
 0x14d   :  { %10327 = vmatprep.mubr.msk.f32.mxu0 %vm128_vm0, %v14249_v47  ;;  %v14274_v41 = vld [vmem:[%s19496_s0 + $0x170] sm:$0xff] }
 0x14e   :  { %19861 = vst [vmem:[#allocation87_spill] sm:$0xff] %v14274_v41 }
 0x14f   :  { %v393_v32 = vpop.f32.mrb[36].mxu0 }
 0x150   :  { %v395_v22 = vpop.f32.mrb[37].mxu0  ;;  %1992 = vmatmul.mubr.f32.gmra.mrb[142].mxu0 %v14261_v57 }
 0x151   :  { %10328 = vmatprep.mubr.msk.f32.mxu0 %vm128_vm0, %v14266_v54  ;;  %v14289_v22 = vld [vmem:[%s19496_s0 + $0x180] sm:$0xff]  ;;  %v14294_v54 = vld [vmem:[%s19496_s0 + $0x198] sm:$0xff] }
 0x152   :  { %19863 = vst [vmem:[#allocation89_spill] sm:$0xff] %v14289_v22  ;;  %19864 = vst [vmem:[#allocation90_spill] sm:$0xff] %v14294_v54 }
 0x153   :  { %v14281_v47 = vpop.f32.mrb[38].mxu0 }
 0x154   :  { %v400_v7 = vpop.f32.mrb[39].mxu0  ;;  %1997 = vmatmul.mubr.f32.gmra.mrb[144].mxu0 %v14274_v41 }
 0x155   :  { %10329 = vmatprep.mubr.msk.f32.mxu0 %vm128_vm0, %v14279_v13  ;;  %v14304_v7 = vld [vmem:[%s19496_s0 + $0x190] sm:$0xff]  ;;  %v14309_v13 = vld [vmem:[%s19496_s0 + $0x1a8] sm:$0xff] }
 0x156   :  { %19865 = vst [vmem:[#allocation91_spill] sm:$0xff] %v14304_v7  ;;  %19866 = vst [vmem:[#allocation92_spill] sm:$0xff] %v14309_v13 }
 0x157   :  { %v14296_v57 = vpop.f32.mrb[40].mxu0 }
 0x158   :  { %v405_v16 = vpop.f32.mrb[41].mxu0  ;;  %2002 = vmatmul.mubr.f32.gmra.mrb[146].mxu0 %v14289_v22 }
 0x159   :  { %10330 = vmatprep.mubr.msk.f32.mxu0 %vm128_vm0, %v14294_v54  ;;  %v14319_v16 = vld [vmem:[%s19496_s0 + $0x1a0] sm:$0xff]  ;;  %v14324_v54 = vld [vmem:[%s19496_s0 + $0x1b8] sm:$0xff] }
 0x15a   :  { %19867 = vst [vmem:[#allocation93_spill] sm:$0xff] %v14319_v16  ;;  %19868 = vst [vmem:[#allocation94_spill] sm:$0xff] %v14324_v54 }
 0x15b   :  { %v14311_v41 = vpop.f32.mrb[42].mxu0 }
 0x15c   :  { %v410_v31 = vpop.f32.mrb[43].mxu0  ;;  %2007 = vmatmul.mubr.f32.gmra.mrb[148].mxu0 %v14304_v7 }
 0x15d   :  { %10331 = vmatprep.mubr.msk.f32.mxu0 %vm128_vm0, %v14309_v13  ;;  %v14334_v31 = vld [vmem:[%s19496_s0 + $0x1b0] sm:$0xff]  ;;  %v14339_v13 = vld [vmem:[%s19496_s0 + $0x1c8] sm:$0xff] }
 0x15e   :  { %19869 = vst [vmem:[#allocation95_spill] sm:$0xff] %v14334_v31  ;;  %19870 = vst [vmem:[#allocation96_spill] sm:$0xff] %v14339_v13 }
 0x15f   :  { %v14326_v22 = vpop.f32.mrb[44].mxu0 }
 0x160   :  { %v415_v29 = vpop.f32.mrb[45].mxu0  ;;  %2012 = vmatmul.mubr.f32.gmra.mrb[150].mxu0 %v14319_v16 }
 0x161   :  { %10332 = vmatprep.mubr.msk.f32.mxu0 %vm128_vm0, %v14324_v54  ;;  %v14349_v29 = vld [vmem:[%s19496_s0 + $0x1c0] sm:$0xff]  ;;  %v14354_v54 = vld [vmem:[%s19496_s0 + $0x1d8] sm:$0xff] }
 0x162   :  { %19871 = vst [vmem:[#allocation97_spill] sm:$0xff] %v14349_v29  ;;  %19872 = vst [vmem:[#allocation98_spill] sm:$0xff] %v14354_v54 }
 0x163   :  { %v14341_v7 = vpop.f32.mrb[46].mxu0 }
 0x164   :  { %v420_v56 = vpop.f32.mrb[47].mxu0  ;;  %2017 = vmatmul.mubr.f32.gmra.mrb[152].mxu0 %v14334_v31 }
 0x165   :  { %10333 = vmatprep.mubr.msk.f32.mxu0 %vm128_vm0, %v14339_v13  ;;  %v14364_v56 = vld [vmem:[%s19496_s0 + $0x1d0] sm:$0xff]  ;;  %v14369_v13 = vld [vmem:[%s19496_s0 + $0x1e8] sm:$0xff] }
 0x166   :  { %19873 = vst [vmem:[#allocation99_spill] sm:$0xff] %v14364_v56  ;;  %19874 = vst [vmem:[#allocation100_spill] sm:$0xff] %v14369_v13 }
 0x167   :  { %v14356_v16 = vpop.f32.mrb[48].mxu0 }
 0x168   :  { %v425_v34 = vpop.f32.mrb[49].mxu0  ;;  %2022 = vmatmul.mubr.f32.gmra.mrb[154].mxu0 %v14349_v29 }
 0x169   :  { %10334 = vmatprep.mubr.msk.f32.mxu0 %vm128_vm0, %v14354_v54  ;;  %v14379_v34 = vld [vmem:[%s19496_s0 + $0x1e0] sm:$0xff]  ;;  %v14384_v54 = vld [vmem:[%s19496_s0 + $0x1f8] sm:$0xff] }
 0x16a   :  { %19875 = vst [vmem:[#allocation101_spill] sm:$0xff] %v14379_v34  ;;  %19876 = vst [vmem:[#allocation102_spill] sm:$0xff] %v14384_v54 }
 0x16b   :  { %v14371_v31 = vpop.f32.mrb[50].mxu0 }
 0x16c   :  { %v430_v39 = vpop.f32.mrb[51].mxu0  ;;  %2027 = vmatmul.mubr.f32.gmra.mrb[156].mxu0 %v14364_v56 }
 0x16d   :  { %10335 = vmatprep.mubr.msk.f32.mxu0 %vm128_vm0, %v14369_v13  ;;  %v14394_v39 = vld [vmem:[%s19496_s0 + $0x1f0] sm:$0xff]  ;;  %v14399_v13 = vld [vmem:[%s19496_s0 + $0x208] sm:$0xff] }
 0x16e   :  { %19877 = vst [vmem:[#allocation103_spill] sm:$0xff] %v14399_v13 }
 0x16f   :  { %v14386_v29 = vpop.f32.mrb[52].mxu0 }
 0x170   :  { %v435_v26 = vpop.f32.mrb[53].mxu0  ;;  %2032 = vmatmul.mubr.f32.gmra.mrb[158].mxu0 %v14379_v34 }
 0x171   :  { %10336 = vmatprep.mubr.msk.f32.mxu0 %vm128_vm0, %v14384_v54  ;;  %v14407_v26 = vld [vmem:[%s19496_s0 + $0x200] sm:$0xff]  ;;  %v19878_v54 = vmax.f32 %v13865_v36, %v14115_v44  ;;  %v19880_v44 = vmax.f32 %v13898_v55, %v14132_v3  ;;  %v19881_v3 = vmax.f32 %v13933_v5, %v14149_v15  ;;  %v14460_v5 = vld [vmem:[%s19496_s0 + $0x230] sm:$0xff]  ;;  %v19882_v15 = vmax.f32 %v13966_v1, %v14166_v38 }
 0x172   :  { %v14443_v55 = vld [vmem:[%s19496_s0 + $0x220] sm:$0xff] }
 0x173   :  { %v438_v56 = vpop.f32.mrb[54].mxu0 }
 0x174   :  { %v491_v12 = vmax.f32 %v393_v32, %v438_v56  ;;  %v440_v20 = vpop.f32.mrb[55].mxu0  ;;  %2037 = vmatmul.mubr.f32.gmra.mrb[160].mxu0 %v14394_v39 }
 0x175   :  { %10337 = vmatprep.mubr.msk.f32.mxu0 %vm128_vm0, %v14399_v13  ;;  %v14424_v13 = vld [vmem:[%s19496_s0 + $0x210] sm:$0xff] }
 0x176   :  { %v500_v34 = vmax.f32 %v19878_v54, %v491_v12  ;;  %v14432_v12 = vld [vmem:[%s19496_s0 + $0x228] sm:$0xff] }
 0x177   :  { %v443_v32 = vpop.f32.mrb[56].mxu0 }
 0x178   :  { %v492_v20 = vmax.f32 %v14281_v47, %v443_v32  ;;  %v445_v56 = vpop.f32.mrb[57].mxu0  ;;  %2042 = vmatmul.mubr.f32.gmra.mrb[162].mxu0 %v14407_v26  ;;  %v563_v47 = vadd.f32 %v13434_v27, %v500_v34 }
 0x179   :  { %10338 = vmatprep.mubr.msk.f32.mxu0 %vm128_vm0, %v14415_v8 }
 0x17a   :  { %v501_v36 = vmax.f32 %v19880_v44, %v492_v20  ;;  %v572_v34 = vmax.f32 %v563_v47, 0.0 }
 0x17b   :  { %v448_v54 = vpop.f32.mrb[58].mxu0 }
 0x17c   :  { %v493_v32 = vmax.f32 %v14296_v57, %v448_v54  ;;  %v450_v56 = vpop.f32.mrb[59].mxu0  ;;  %2047 = vmatmul.mubr.f32.gmra.mrb[164].mxu0 %v14424_v13  ;;  %v564_v8 = vadd.f32 %v13451_v40, %v501_v36  ;;  %v14451_v57 = vld [vmem:[%s19496_s0 + $0x238] sm:$0xff] }
 0x17d   :  { %10339 = vmatprep.mubr.msk.f32.mxu0 %vm128_vm0, %v14432_v12 }
 0x17e   :  { %v502_v27 = vmax.f32 %v19881_v3, %v493_v32  ;;  %v573_v20 = vmax.f32 %v564_v8, 0.0 }
 0x17f   :  { %v453_v40 = vpop.f32.mrb[60].mxu0 }
 0x180   :  { %v494_v44 = vmax.f32 %v14311_v41, %v453_v40  ;;  %v455_v36 = vpop.f32.mrb[61].mxu0  ;;  %2052 = vmatmul.mubr.f32.gmra.mrb[166].mxu0 %v14443_v55  ;;  %v11966_v54 = vpack.c.bf16 %v573_v20, %v572_v34  ;;  %v565_v47 = vadd.f32 %v13432_v18, %v502_v27  ;;  %v19883_v34 = vmax.f32 %v13999_v2, %v14183_v58 }
 0x181   :  { %10340 = vmatprep.mubr.msk.f32.mxu0 %vm128_vm0, %v14451_v57 }
 0x182   :  { %v503_v8 = vmax.f32 %v19882_v15, %v494_v44  ;;  %11967 = vmatprep.subr.bf16.mxu1 %v11966_v54  ;;  %v574_v1 = vmax.f32 %v565_v47, 0.0  ;;  %v584_v15 = vld [vmem:[%s19500_s3 + $0x18] sm:$0xff] }
 0x183   :  { %v458_v41 = vpop.f32.mrb[62].mxu0  ;;  %11969 = vmatpush3.bf16.msra.mxu1 %v11966_v54  ;;  %v19894_v54 = vld [vmem:[#allocation3_spill] sm:$0xff] }
 0x184   :  { %v495_v32 = vmax.f32 %v14326_v22, %v458_v41  ;;  %v460_v56 = vpop.f32.mrb[63].mxu0  ;;  %2057 = vmatmul.mubr.f32.gmra.mrb[168].mxu0 %v14460_v5  ;;  %v566_v3 = vadd.f32 %v13445_v37, %v503_v8  ;;  %v19884_v37 = vmax.f32 %v14034_v52, %v14200_v43  ;;  %v585_v8 = vld [vmem:[%s19500_s3 + $0x20] sm:$0xff]  ;;  %v19896_v41 = vld [vmem:[#allocation60_spill] sm:$0xff] }
 0x185   :  { %10441 = vmatprep.mubr.msk.f32.mxu0 %vm128_vm0, %v13732_v24 }
 0x186   :  { %v504_v38 = vmax.f32 %v19883_v34, %v495_v32  ;;  %v575_v20 = vmax.f32 %v566_v3, 0.0  ;;  %v19897_v32 = vld [vmem:[#allocation48_spill] sm:$0xff]  ;;  %v4047_v3 = vld [vmem:[%s19495_s2 + $0x1c0] sm:$0xff] }
 0x187   :  { %v463_v40 = vpop.f32.mrb[64].mxu0  ;;  %v4048_v34 = vld [vmem:[%s19495_s2 + $0x1c8] sm:$0xff] }
 0x188   :  { %v496_v18 = vmax.f32 %v14341_v7, %v463_v40  ;;  %v465_v27 = vpop.f32.mrb[65].mxu0  ;;  %3494 = vmatmul.mubr.f32.vlgmr.msra.gmra.mrb[170].mxu0 %v13749_v62  ;;  %v11970_v22 = vpack.c.bf16 %v575_v20, %v574_v1  ;;  %v567_v58 = vadd.f32 %v13469_v0, %v504_v38  ;;  %v19898_v38 = vld [vmem:[#allocation49_spill] sm:$0xff]  ;;  %v19899_v1 = vld [vmem:[#allocation4_spill] sm:$0xff] }
 0x189   :  { %10442 = vmatprep.mubr.msk.f32.mxu0 %vm128_vm0, %v13756_v49  ;;  %12192 = vmatpush1.bf16.msra.mxu0 %v13850_v25  ;;  %v19885_v25 = vmax.f32 %v14060_v48, %v14217_v35  ;;  %v19886_v35 = vmax.f32 %v14083_v51, %v14234_v10  ;;  %v586_v20 = vld [vmem:[%s19500_s3 + $0x28] sm:$0xff]  ;;  %v587_v40 = vld [vmem:[%s19500_s3 + $0x30] sm:$0xff]  ;;  %v19900_v27 = vld [vmem:[#allocation63_spill] sm:$0xff] }
 0x18a   :  { %v505_v24 = vmax.f32 %v19884_v37, %v496_v18  ;;  %11971 = vmatprep.subr.bf16.mxu1 %v11970_v22  ;;  %12193 = vmatprep.subr.bf16.mxu0 %v19816_v53  ;;  %v576_v52 = vmax.f32 %v567_v58, 0.0  ;;  %v19901_v37 = vld [vmem:[#allocation52_spill] sm:$0xff]  ;;  %v4049_v58 = vld [vmem:[%s19495_s2 + $0x1d0] sm:$0xff] }
 0x18b   :  { %v468_v2 = vpop.f32.mrb[66].mxu0  ;;  %11973 = vmatpush3.bf16.msra.mxu1 %v11970_v22  ;;  %v14577_v22 = vpack.c.bf16 %v4048_v34, %v4047_v3  ;;  %v19919_v3 = vld [vmem:[#allocation67_spill] sm:$0xff]  ;;  %v14975_v34 = vld [vmem:[%s19496_s0 + $0x210] sm:$0xff] }
 0x18c   :  { %v497_v7 = vmax.f32 %v14356_v16, %v468_v2  ;;  %v470_v62 = vpop.f32.mrb[67].mxu0  ;;  %3499 = vmatmul.mubr.f32.gmra.mrb[172].mxu0 %v13770_v4  ;;  %v568_v49 = vadd.f32 %v13467_v46, %v505_v24  ;;  %v4050_v2 = vld [vmem:[%s19495_s2 + $0x1d8] sm:$0xff] }
 0x18d   :  { %10443 = vmatprep.mubr.msk.f32.mxu0 %vm128_vm0, %v13776_v9  ;;  %12195 = vmatpush1.bf16.msra.mxu0 %v13885_v60  ;;  %v19903_v62 = vld [vmem:[#allocation5_spill] sm:$0xff] }
 0x18e   :  { %v506_v0 = vmax.f32 %v19885_v25, %v497_v7  ;;  %v577_v43 = vmax.f32 %v568_v49, 0.0  ;;  %12196 = vmatprep.subr.bf16.mxu0 %v19816_v53  ;;  %v19902_v7 = vld [vmem:[#allocation53_spill] sm:$0xff]  ;;  %v588_v49 = vld [vmem:[%s19500_s3 + $0x38] sm:$0xff]  ;;  %v589_v25 = vld [vmem:[%s19500_s3 + $0x40] sm:$0xff] }
 0x18f   :  { %v473_v44 = vpop.f32.mrb[68].mxu0 }
 0x190   :  { %v498_v16 = vmax.f32 %v14371_v31, %v473_v44  ;;  %v475_v36 = vpop.f32.mrb[69].mxu0  ;;  %3504 = vmatmul.mubr.f32.gmra.mrb[174].mxu0 %v13795_v59  ;;  %v11974_v46 = vpack.c.bf16 %v577_v43, %v576_v52  ;;  %v569_v60 = vadd.f32 %v13486_v28, %v506_v0  ;;  %v14602_v52 = vpack.c.bf16 %v4050_v2, %v4049_v58  ;;  %v19904_v43 = vld [vmem:[#allocation54_spill] sm:$0xff]  ;;  %v19925_v2 = vld [vmem:[#allocation11_spill] sm:$0xff] }
 0x191   :  { %10444 = vmatprep.mubr.msk.f32.mxu0 %vm128_vm0, %v13801_v61  ;;  %12198 = vmatpush1.bf16.msra.mxu0 %v13918_v21  ;;  %v19887_v21 = vmax.f32 %v14100_v23, %v14251_v14  ;;  %v19893_v23 = vld [vmem:[#allocation47_spill] sm:$0xff]  ;;  %v4052_v36 = vld [vmem:[%s19495_s2 + $0x1e8] sm:$0xff]  ;;  %v19924_v58 = vld [vmem:[#allocation70_spill] sm:$0xff] }
 0x192   :  { %v507_v48 = vmax.f32 %v19886_v35, %v498_v16  ;;  %11975 = vmatprep.subr.bf16.mxu1 %v11974_v46  ;;  %12199 = vmatprep.subr.bf16.mxu0 %v19816_v53  ;;  %v578_v10 = vmax.f32 %v569_v60, 0.0  ;;  %v4051_v16 = vld [vmem:[%s19495_s2 + $0x1e0] sm:$0xff]  ;;  %v19906_v35 = vld [vmem:[#allocation6_spill] sm:$0xff]  ;;  %v591_v60 = vld [vmem:[%s19500_s3 + $0x50] sm:$0xff] }
 0x193   :  { %v478_v4 = vpop.f32.mrb[70].mxu0  ;;  %11977 = vmatpush3.bf16.msra.mxu1 %v11974_v46  ;;  %v19905_v46 = vld [vmem:[#allocation58_spill] sm:$0xff] }
 0x194   :  { %v499_v9 = vmax.f32 %v14386_v29, %v478_v4  ;;  %3509 = vmatmul.mubr.f32.gmra.mrb[176].mxu0 %v13818_v30  ;;  %v480_v59 = vpop.f32.mrb[71].mxu0  ;;  %v570_v61 = vadd.f32 %v13480_v11, %v507_v48  ;;  %v590_v48 = vld [vmem:[%s19500_s3 + $0x48] sm:$0xff] }
 0x195   :  { %10445 = vmatprep.mubr.msk.f32.mxu0 %vm128_vm0, %v13826_v50  ;;  %12201 = vmatpush1.bf16.msra.mxu0 %v13951_v17  ;;  %v19907_v59 = vld [vmem:[#allocation59_spill] sm:$0xff] }
 0x196   :  { %v508_v28 = vmax.f32 %v19887_v21, %v499_v9  ;;  %v579_v51 = vmax.f32 %v570_v61, 0.0  ;;  %12202 = vmatprep.subr.bf16.mxu0 %v19816_v53  ;;  %v14627_v9 = vpack.c.bf16 %v4052_v36, %v4051_v16  ;;  %v4053_v21 = vld [vmem:[%s19495_s2 + $0x1f0] sm:$0xff] }
 0x197   :  { %v14514_v31 = vpop.f32.mrb[72].mxu0  ;;  %v19931_v36 = vld [vmem:[#allocation73_spill] sm:$0xff] }
 0x198   :  { %19888 = vst [vmem:[#allocation105_spill] sm:$0xff] %v14514_v31  ;;  %3514 = vmatmul.mubr.f32.gmra.mrb[178].mxu0 %v13847_v19  ;;  %v11978_v30 = vpack.c.bf16 %v579_v51, %v578_v10  ;;  %v571_v11 = vadd.f32 %v13504_v45, %v508_v28  ;;  %v1079_v29 = vpop.f32.mrb[73].mxu0  ;;  %v19890_v45 = vld [vmem:[#allocation55_spill] sm:$0xff]  ;;  %v4054_v28 = vld [vmem:[%s19495_s2 + $0x1f8] sm:$0xff]  ;;  %v19908_v10 = vld [vmem:[#allocation61_spill] sm:$0xff] }
 0x199   :  { %10446 = vmatprep.mubr.msk.f32.mxu0 %vm128_vm0, %v13855_v6  ;;  %12204 = vmatpush1.bf16.msra.mxu0 %v13986_v42  ;;  %v582_v6 = vld [vmem:[%s19500_s3 + $0x8] sm:$0xff]  ;;  %v583_v42 = vld [vmem:[%s19500_s3 + $0x10] sm:$0xff]  ;;  %v19909_v51 = vld [vmem:[#allocation7_spill] sm:$0xff] }
 0x19a   :  { %11979 = vmatprep.subr.bf16.mxu1 %v11978_v30  ;;  %v580_v17 = vmax.f32 %v571_v11, 0.0  ;;  %12205 = vmatprep.subr.bf16.mxu0 %v19816_v53  ;;  %v593_v11 = vld [vmem:[%s19500_s3 + $0x60] sm:$0xff]  ;;  %v5658_v31 = vld [vmem:[%s19495_s2 + $0x238] sm:$0xff] }
 0x19b   :  { %11981 = vmatpush3.bf16.msra.mxu1 %v11978_v30  ;;  %v14522_v50 = vpop.f32.mrb[74].mxu0  ;;  %v592_v30 = vld [vmem:[%s19500_s3 + $0x58] sm:$0xff] }
 0x19c   :  { %19889 = vst [vmem:[#allocation106_spill] sm:$0xff] %v14522_v50  ;;  %11351 = vmatprep.subr.mxu1 %v580_v17  ;;  %3519 = vmatmul.mubr.f32.gmra.mrb[180].mxu0 %v13882_v63  ;;  %v1084_v19 = vpop.f32.mrb[75].mxu0  ;;  %v19892_v63 = vld [vmem:[#allocation45_spill] sm:$0xff] }
 0x19d   :  { %10447 = vmatprep.mubr.msk.f32.mxu0 %vm128_vm0, %v13890_v33  ;;  %12207 = vmatpush1.bf16.msra.mxu0 %v19890_v45  ;;  %v19911_v19 = vld [vmem:[#allocation62_spill] sm:$0xff] }
 0x19e   :  { %12208 = vmatprep.subr.bf16.mxu0 %v19816_v53 }
 0x19f   :  { %11352 = vmatpush3.msra.mxu1 %v580_v17  ;;  %v14535_v14 = vpop.f32.mrb[76].mxu0  ;;  %v14652_v17 = vpack.c.bf16 %v4054_v28, %v4053_v21  ;;  %v19935_v28 = vld [vmem:[#allocation76_spill] sm:$0xff] }
 0x1a0   :  { %19891 = vst [vmem:[#allocation55_spill] sm:$0xff] %v14535_v14  ;;  %12618 = vmatprep.subr.bf16.mxu1 %v19816_v53  ;;  %3524 = vmatmul.mubr.f32.gmra.mrb[182].mxu0 %v19892_v63  ;;  %v1089_v33 = vpop.f32.mrb[77].mxu0  ;;  %v594_v63 = vld [vmem:[%s19500_s3 + $0x68] sm:$0xff] }
 0x1a1   :  { %11354 = vmatmul.mubr.msk.f32.vlgmr.msra.gmra.mrb[0].mxu1 %vm597_vm1, %v582_v6  ;;  %10448 = vmatprep.mubr.msk.f32.mxu0 %vm128_vm0, %v19893_v23  ;;  %v19912_v6 = vld [vmem:[#allocation64_spill] sm:$0xff]  ;;  %v595_v33 = vld [vmem:[%s19500_s3 + $0x70] sm:$0xff] }
 0x1a2   :  { %12630 = vmatpush1.bf16.msra.mxu1 %v19894_v54  ;;  %11356 = vmatprep.mubr.msk.f32.mxu1 %vm597_vm1, %v583_v42  ;;  %v19913_v42 = vld [vmem:[#allocation8_spill] sm:$0xff]  ;;  %v19915_v54 = vld [vmem:[#allocation65_spill] sm:$0xff] }
 0x1a3   :  { %12619 = vmatprep.subr.bf16.mxu1 %v19816_v53  ;;  %v14551_v47 = vpop.f32.mrb[78].mxu0  ;;  %12210 = vmatpush1.bf16.msra.mxu0 %v19896_v41  ;;  %v19917_v41 = vld [vmem:[#allocation9_spill] sm:$0xff]  ;;  %v5656_v14 = vld [vmem:[%s19495_s2 + $0x228] sm:$0xff] }
 0x1a4   :  { %19895 = vst [vmem:[#allocation45_spill] sm:$0xff] %v14551_v47  ;;  %3529 = vmatmul.mubr.f32.gmra.mrb[184].mxu0 %v19897_v32  ;;  %v1094_v56 = vpop.f32.mrb[79].mxu0  ;;  %12211 = vmatprep.subr.bf16.mxu0 %v19816_v53  ;;  %v596_v32 = vld [vmem:[%s19500_s3 + $0x78] sm:$0xff]  ;;  %v5653_v47 = vld [vmem:[%s19495_s2 + $0x210] sm:$0xff] }
 0x1a5   :  { %10449 = vmatprep.mubr.msk.f32.mxu0 %vm128_vm0, %v19898_v38  ;;  %11357 = vmatmul.mubr.msk.f32.gmra.mrb[2].mxu1 %vm597_vm1, %v584_v15 }
 0x1a6   :  { %12631 = vmatpush1.bf16.msra.mxu1 %v19899_v1  ;;  %11359 = vmatprep.mubr.msk.f32.mxu1 %vm597_vm1, %v585_v8  ;;  %v19916_v8 = vld [vmem:[#allocation66_spill] sm:$0xff]  ;;  %v19920_v1 = vld [vmem:[#allocation68_spill] sm:$0xff] }
 0x1a7   :  { %12620 = vmatprep.subr.bf16.mxu1 %v19816_v53  ;;  %v14574_v18 = vpop.f32.mrb[80].mxu0  ;;  %12213 = vmatpush1.bf16.msra.mxu0 %v19900_v27  ;;  %v19923_v27 = vld [vmem:[#allocation69_spill] sm:$0xff] }
 0x1a8   :  { %3534 = vmatmul.mubr.f32.gmra.mrb[186].mxu0 %v19901_v37  ;;  %v1099_v24 = vpop.f32.mrb[81].mxu0  ;;  %12214 = vmatprep.subr.bf16.mxu0 %v19816_v53 }
 0x1a9   :  { %10450 = vmatprep.mubr.msk.f32.mxu0 %vm128_vm0, %v19902_v7  ;;  %11360 = vmatmul.mubr.msk.f32.gmra.mrb[4].mxu1 %vm597_vm1, %v586_v20  ;;  %v19921_v20 = vld [vmem:[#allocation10_spill] sm:$0xff] }
 0x1aa   :  { %12632 = vmatpush1.bf16.msra.mxu1 %v19903_v62  ;;  %11362 = vmatprep.mubr.msk.f32.mxu1 %vm597_vm1, %v587_v40  ;;  %v19927_v62 = vld [vmem:[#allocation71_spill] sm:$0xff] }
 0x1ab   :  { %12621 = vmatprep.subr.bf16.mxu1 %v19816_v53  ;;  %v14599_v0 = vpop.f32.mrb[82].mxu0  ;;  %12216 = vmatpush1.bf16.msra.mxu0 %v14577_v22 }
 0x1ac   :  { %3539 = vmatmul.mubr.f32.gmra.mrb[188].mxu0 %v19904_v43  ;;  %v1104_v44 = vpop.f32.mrb[83].mxu0  ;;  %12217 = vmatprep.subr.bf16.mxu0 %v19816_v53  ;;  %v19928_v43 = vld [vmem:[#allocation72_spill] sm:$0xff] }
 0x1ad   :  { %10451 = vmatprep.mubr.msk.f32.mxu0 %vm128_vm0, %v19905_v46  ;;  %11363 = vmatmul.mubr.msk.f32.gmra.mrb[6].mxu1 %vm597_vm1, %v588_v49  ;;  %v19929_v44 = vld [vmem:[#allocation12_spill] sm:$0xff]  ;;  %v14956_v46 = vld [vmem:[%s19496_s0 + $0x218] sm:$0xff] }
 0x1ae   :  { %12633 = vmatpush1.bf16.msra.mxu1 %v19906_v35  ;;  %11365 = vmatprep.mubr.msk.f32.mxu1 %vm597_vm1, %v589_v25 }
 0x1af   :  { %12622 = vmatprep.subr.bf16.mxu1 %v19816_v53  ;;  %v14624_v4 = vpop.f32.mrb[84].mxu0  ;;  %12219 = vmatpush1.bf16.msra.mxu0 %v14602_v52 }
 0x1b0   :  { %3544 = vmatmul.mubr.f32.gmra.mrb[190].mxu0 %v19907_v59  ;;  %v1109_v61 = vpop.f32.mrb[85].mxu0  ;;  %12220 = vmatprep.subr.bf16.mxu0 %v19816_v53 }
 0x1b1   :  { %10452 = vmatprep.mubr.msk.f32.mxu0 %vm128_vm0, %v19908_v10  ;;  %11366 = vmatmul.mubr.msk.f32.gmra.mrb[8].mxu1 %vm597_vm1, %v590_v48  ;;  %v19932_v48 = vld [vmem:[#allocation74_spill] sm:$0xff]  ;;  %v19934_v61 = vld [vmem:[#allocation75_spill] sm:$0xff] }
 0x1b2   :  { %12634 = vmatpush1.bf16.msra.mxu1 %v19909_v51  ;;  %11368 = vmatprep.mubr.msk.f32.mxu1 %vm597_vm1, %v591_v60  ;;  %v19933_v60 = vld [vmem:[#allocation13_spill] sm:$0xff]  ;;  %v19936_v10 = vld [vmem:[#allocation14_spill] sm:$0xff] }
 0x1b3   :  { %12623 = vmatprep.subr.bf16.mxu1 %v19816_v53  ;;  %v14649_v29 = vpop.f32.mrb[86].mxu0  ;;  %12222 = vmatpush1.bf16.msra.mxu0 %v14627_v9 }
 0x1b4   :  { %19910 = vst [vmem:[#allocation47_spill] sm:$0xff] %v14649_v29  ;;  %3549 = vmatmul.mubr.f32.gmra.mrb[192].mxu0 %v19911_v19  ;;  %v1114_v45 = vpop.f32.mrb[87].mxu0  ;;  %12223 = vmatprep.subr.bf16.mxu0 %v19816_v53  ;;  %v19938_v19 = vld [vmem:[#allocation78_spill] sm:$0xff] }
 0x1b5   :  { %10453 = vmatprep.mubr.msk.f32.mxu0 %vm128_vm0, %v19912_v6  ;;  %11369 = vmatmul.mubr.msk.f32.gmra.mrb[10].mxu1 %vm597_vm1, %v592_v30  ;;  %v19937_v30 = vld [vmem:[#allocation77_spill] sm:$0xff]  ;;  %v19939_v6 = vld [vmem:[#allocation79_spill] sm:$0xff] }
 0x1b6   :  { %12635 = vmatpush1.bf16.msra.mxu1 %v19913_v42  ;;  %11371 = vmatprep.mubr.msk.f32.mxu1 %vm597_vm1, %v593_v11 }
 0x1b7   :  { %12624 = vmatprep.subr.bf16.mxu1 %v19816_v53  ;;  %v14668_v23 = vpop.f32.mrb[88].mxu0  ;;  %12225 = vmatpush1.bf16.msra.mxu0 %v14652_v17 }
 0x1b8   :  { %19914 = vst [vmem:[#allocation3_spill] sm:$0xff] %v14668_v23  ;;  %3554 = vmatmul.mubr.f32.gmra.mrb[194].mxu0 %v19915_v54  ;;  %v1119_v15 = vpop.f32.mrb[89].mxu0  ;;  %12294 = vmatprep.subr.bf16.mxu0 %v19816_v53  ;;  %v19941_v54 = vld [vmem:[#allocation81_spill] sm:$0xff] }
 0x1b9   :  { %10454 = vmatprep.mubr.msk.f32.mxu0 %vm128_vm0, %v19916_v8  ;;  %11372 = vmatmul.mubr.msk.f32.gmra.mrb[12].mxu1 %vm597_vm1, %v594_v63  ;;  %v19940_v63 = vld [vmem:[#allocation80_spill] sm:$0xff] }
 0x1ba   :  { %12636 = vmatpush1.bf16.msra.mxu1 %v19917_v41  ;;  %11374 = vmatprep.mubr.msk.f32.mxu1 %vm597_vm1, %v595_v33 }
 0x1bb   :  { %12625 = vmatprep.subr.bf16.mxu1 %v19816_v53  ;;  %v14682_v56 = vpop.f32.mrb[90].mxu0 }
 0x1bc   :  { %19918 = vst [vmem:[#allocation60_spill] sm:$0xff] %v14682_v56  ;;  %3559 = vmatmul.mubr.f32.gmra.mrb[196].mxu0 %v19919_v3  ;;  %v1124_v38 = vpop.f32.mrb[91].mxu0 }
 0x1bd   :  { %10455 = vmatprep.mubr.msk.f32.mxu0 %vm128_vm0, %v19920_v1  ;;  %11375 = vmatmul.mubr.msk.f32.gmra.mrb[14].mxu1 %vm597_vm1, %v596_v32  ;;  %v19943_v32 = vld [vmem:[#allocation83_spill] sm:$0xff]  ;;  %v19944_v38 = vld [vmem:[#allocation84_spill] sm:$0xff] }
 0x1be   :  { %12637 = vmatpush1.bf16.msra.mxu1 %v19921_v20  ;;  %10250 = vmatprep.mubr.msk.f32.mxu1 %vm128_vm0, %v19916_v8  ;;  %v19942_v8 = vld [vmem:[#allocation82_spill] sm:$0xff]  ;;  %v19945_v20 = vld [vmem:[#allocation85_spill] sm:$0xff] }
 0x1bf   :  { %12626 = vmatprep.subr.bf16.mxu1 %v19816_v53  ;;  %v14694_v40 = vpop.f32.mrb[92].mxu0 }
 0x1c0   :  { %19922 = vst [vmem:[#allocation48_spill] sm:$0xff] %v14694_v40  ;;  %3564 = vmatmul.mubr.f32.gmra.mrb[198].mxu0 %v19923_v27  ;;  %v1129_v24 = vpop.f32.mrb[93].mxu0 }
 0x1c1   :  { %10456 = vmatprep.mubr.msk.f32.mxu0 %vm128_vm0, %v19924_v58  ;;  %v19946_v24 = vld [vmem:[#allocation86_spill] sm:$0xff] }
 0x1c2   :  { %12638 = vmatpush1.bf16.msra.mxu1 %v19925_v2  ;;  %v19947_v2 = vld [vmem:[#allocation87_spill] sm:$0xff] }
 0x1c3   :  { %12627 = vmatprep.subr.bf16.mxu1 %v19816_v53  ;;  %v14703_v7 = vpop.f32.mrb[94].mxu0 }
 0x1c4   :  { %19926 = vst [vmem:[#allocation49_spill] sm:$0xff] %v14703_v7  ;;  %3569 = vmatmul.mubr.f32.gmra.mrb[200].mxu0 %v19927_v62  ;;  %v1134_v25 = vpop.f32.mrb[95].mxu0 }
 0x1c5   :  { %10457 = vmatprep.mubr.msk.f32.mxu0 %vm128_vm0, %v19928_v43  ;;  %v19948_v25 = vld [vmem:[#allocation88_spill] sm:$0xff] }
 0x1c6   :  { %12639 = vmatpush1.bf16.msra.mxu1 %v19929_v44  ;;  %v19949_v44 = vld [vmem:[#allocation89_spill] sm:$0xff] }
 0x1c7   :  { %12628 = vmatprep.subr.bf16.mxu1 %v19816_v53  ;;  %v14712_v16 = vpop.f32.mrb[96].mxu0 }
 0x1c8   :  { %19930 = vst [vmem:[#allocation4_spill] sm:$0xff] %v14712_v16  ;;  %3574 = vmatmul.mubr.f32.gmra.mrb[202].mxu0 %v19931_v36  ;;  %v1139_v35 = vpop.f32.mrb[97].mxu0 }
 0x1c9   :  { %10458 = vmatprep.mubr.msk.f32.mxu0 %vm128_vm0, %v19932_v48  ;;  %v19950_v35 = vld [vmem:[#allocation90_spill] sm:$0xff] }
 0x1ca   :  { %12640 = vmatpush1.bf16.msra.mxu1 %v19933_v60  ;;  %v19951_v60 = vld [vmem:[#allocation91_spill] sm:$0xff] }
 0x1cb   :  { %12629 = vmatprep.subr.bf16.mxu1 %v19816_v53  ;;  %v14721_v59 = vpop.f32.mrb[98].mxu0 }
 0x1cc   :  { %3579 = vmatmul.mubr.f32.gmra.mrb[204].mxu0 %v19934_v61  ;;  %v1885_v21 = vpop.f32.mrb[99].mxu0 }
 0x1cd   :  { %10459 = vmatprep.mubr.msk.f32.mxu0 %vm128_vm0, %v19935_v28  ;;  %v19952_v21 = vld [vmem:[#allocation92_spill] sm:$0xff] }
 0x1ce   :  { %12641 = vmatpush1.bf16.msra.mxu1 %v19936_v10  ;;  %v19953_v10 = vld [vmem:[#allocation93_spill] sm:$0xff] }
 0x1cf   :  { %v14727_v51 = vpop.f32.mrb[100].mxu0 }
 0x1d0   :  { %3584 = vmatmul.mubr.f32.gmra.mrb[206].mxu0 %v19937_v30  ;;  %v1890_v11 = vpop.f32.mrb[101].mxu0 }
 0x1d1   :  { %1141 = vmatmul.mubr.f32.vlgmr.msra.gmra.mrb[16].mxu1 %v19919_v3  ;;  %10460 = vmatprep.mubr.msk.f32.mxu0 %vm128_vm0, %v19938_v19 }
 0x1d2   :  { %10251 = vmatprep.mubr.msk.f32.mxu1 %vm128_vm0, %v19920_v1 }
 0x1d3   :  { %v14735_v45 = vpop.f32.mrb[102].mxu0 }
 0x1d4   :  { %3589 = vmatmul.mubr.f32.gmra.mrb[208].mxu0 %v19939_v6  ;;  %v1895_v42 = vpop.f32.mrb[103].mxu0 }
 0x1d5   :  { %1146 = vmatmul.mubr.f32.gmra.mrb[18].mxu1 %v19923_v27  ;;  %10461 = vmatprep.mubr.msk.f32.mxu0 %vm128_vm0, %v19940_v63  ;;  %v19955_v42 = vld [vmem:[#allocation95_spill] sm:$0xff] }
 0x1d6   :  { %10252 = vmatprep.mubr.msk.f32.mxu1 %vm128_vm0, %v19924_v58 }
 0x1d7   :  { %v14743_v33 = vpop.f32.mrb[104].mxu0 }
 0x1d8   :  { %3594 = vmatmul.mubr.f32.gmra.mrb[210].mxu0 %v19941_v54  ;;  %v1900_v15 = vpop.f32.mrb[105].mxu0 }
 0x1d9   :  { %1151 = vmatmul.mubr.f32.gmra.mrb[20].mxu1 %v19927_v62  ;;  %10462 = vmatprep.mubr.msk.f32.mxu0 %vm128_vm0, %v19942_v8  ;;  %v19956_v15 = vld [vmem:[#allocation96_spill] sm:$0xff] }
 0x1da   :  { %10253 = vmatprep.mubr.msk.f32.mxu1 %vm128_vm0, %v19928_v43 }
 0x1db   :  { %v14751_v41 = vpop.f32.mrb[106].mxu0 }
 0x1dc   :  { %3599 = vmatmul.mubr.f32.gmra.mrb[212].mxu0 %v19943_v32  ;;  %v1905_v3 = vpop.f32.mrb[107].mxu0 }
 0x1dd   :  { %1156 = vmatmul.mubr.f32.gmra.mrb[22].mxu1 %v19931_v36  ;;  %10463 = vmatprep.mubr.msk.f32.mxu0 %vm128_vm0, %v19944_v38  ;;  %v5652_v3 = vld [vmem:[%s19495_s2 + $0x208] sm:$0xff] }
 0x1de   :  { %10254 = vmatprep.mubr.msk.f32.mxu1 %vm128_vm0, %v19932_v48 }
 0x1df   :  { %v14759_v1 = vpop.f32.mrb[108].mxu0 }
 0x1e0   :  { %3604 = vmatmul.mubr.f32.gmra.mrb[214].mxu0 %v19945_v20  ;;  %v1910_v27 = vpop.f32.mrb[109].mxu0 }
 0x1e1   :  { %1161 = vmatmul.mubr.f32.gmra.mrb[24].mxu1 %v19934_v61  ;;  %10464 = vmatprep.mubr.msk.f32.mxu0 %vm128_vm0, %v19946_v24  ;;  %v19958_v27 = vld [vmem:[#allocation98_spill] sm:$0xff] }
 0x1e2   :  { %10255 = vmatprep.mubr.msk.f32.mxu1 %vm128_vm0, %v19935_v28 }
 0x1e3   :  { %v14767_v58 = vpop.f32.mrb[110].mxu0 }
 0x1e4   :  { %3609 = vmatmul.mubr.f32.gmra.mrb[216].mxu0 %v19947_v2  ;;  %v1915_v62 = vpop.f32.mrb[111].mxu0 }
 0x1e5   :  { %1166 = vmatmul.mubr.f32.gmra.mrb[26].mxu1 %v19937_v30  ;;  %10465 = vmatprep.mubr.msk.f32.mxu0 %vm128_vm0, %v19948_v25  ;;  %v19959_v62 = vld [vmem:[#allocation99_spill] sm:$0xff]  ;;  %v15036_v30 = vld [vmem:[%s19496_s0 + $0x58] sm:$0xff] }
 0x1e6   :  { %10256 = vmatprep.mubr.msk.f32.mxu1 %vm128_vm0, %v19938_v19  ;;  %v19954_v19 = vld [vmem:[#allocation94_spill] sm:$0xff]  ;;  %19968 = vst [vmem:[#allocation5_spill] sm:$0xff] %v15036_v30 }
 0x1e7   :  { %v14775_v43 = vpop.f32.mrb[112].mxu0 }
 0x1e8   :  { %3614 = vmatmul.mubr.f32.gmra.mrb[218].mxu0 %v19949_v44  ;;  %v1920_v36 = vpop.f32.mrb[113].mxu0 }
 0x1e9   :  { %1171 = vmatmul.mubr.f32.gmra.mrb[28].mxu1 %v19939_v6  ;;  %10466 = vmatprep.mubr.msk.f32.mxu0 %vm128_vm0, %v19950_v35 }
 0x1ea   :  { %10257 = vmatprep.mubr.msk.f32.mxu1 %vm128_vm0, %v19940_v63 }
 0x1eb   :  { %v14783_v48 = vpop.f32.mrb[114].mxu0 }
 0x1ec   :  { %3619 = vmatmul.mubr.f32.gmra.mrb[220].mxu0 %v19951_v60  ;;  %v1925_v61 = vpop.f32.mrb[115].mxu0 }
 0x1ed   :  { %1176 = vmatmul.mubr.f32.gmra.mrb[30].mxu1 %v19941_v54  ;;  %10467 = vmatprep.mubr.msk.f32.mxu0 %vm128_vm0, %v19952_v21  ;;  %v19960_v61 = vld [vmem:[#allocation100_spill] sm:$0xff] }
 0x1ee   :  { %10258 = vmatprep.mubr.msk.f32.mxu1 %vm128_vm0, %v19942_v8 }
 0x1ef   :  { %v14791_v28 = vpop.f32.mrb[116].mxu0 }
 0x1f0   :  { %3624 = vmatmul.mubr.f32.gmra.mrb[222].mxu0 %v19953_v10  ;;  %v1930_v11 = vpop.f32.mrb[117].mxu0 }
 0x1f1   :  { %1181 = vmatmul.mubr.f32.gmra.mrb[32].mxu1 %v19943_v32  ;;  %10468 = vmatprep.mubr.msk.f32.mxu0 %vm128_vm0, %v19954_v19  ;;  %v19957_v32 = vld [vmem:[#allocation97_spill] sm:$0xff] }
 0x1f2   :  { %10259 = vmatprep.mubr.msk.f32.mxu1 %vm128_vm0, %v19944_v38  ;;  %v19961_v11 = vld [vmem:[#allocation101_spill] sm:$0xff] }
 0x1f3   :  { %v14801_v6 = vpop.f32.mrb[118].mxu0 }
 0x1f4   :  { %3629 = vmatmul.mubr.f32.gmra.mrb[224].mxu0 %v19955_v42  ;;  %v1935_v54 = vpop.f32.mrb[119].mxu0 }
 0x1f5   :  { %1186 = vmatmul.mubr.f32.gmra.mrb[34].mxu1 %v19945_v20  ;;  %10469 = vmatprep.mubr.msk.f32.mxu0 %vm128_vm0, %v19956_v15 }
 0x1f6   :  { %10260 = vmatprep.mubr.msk.f32.mxu1 %vm128_vm0, %v19946_v24  ;;  %v5651_v24 = vld [vmem:[%s19495_s2 + $0x200] sm:$0xff] }
 0x1f7   :  { %v14811_v8 = vpop.f32.mrb[120].mxu0 }
 0x1f8   :  { %3634 = vmatmul.mubr.f32.gmra.mrb[226].mxu0 %v19957_v32  ;;  %v1940_v38 = vpop.f32.mrb[121].mxu0 }
 0x1f9   :  { %1191 = vmatmul.mubr.f32.gmra.mrb[36].mxu1 %v19947_v2  ;;  %10470 = vmatprep.mubr.msk.f32.mxu0 %vm128_vm0, %v19958_v27  ;;  %v19962_v38 = vld [vmem:[#allocation102_spill] sm:$0xff] }
 0x1fa   :  { %10261 = vmatprep.mubr.msk.f32.mxu1 %vm128_vm0, %v19948_v25 }
 0x1fb   :  { %v14821_v20 = vpop.f32.mrb[122].mxu0 }
 0x1fc   :  { %3639 = vmatmul.mubr.f32.gmra.mrb[228].mxu0 %v19959_v62  ;;  %v1945_v36 = vpop.f32.mrb[123].mxu0 }
 0x1fd   :  { %1196 = vmatmul.mubr.f32.gmra.mrb[38].mxu1 %v19949_v44  ;;  %10471 = vmatprep.mubr.msk.f32.mxu0 %vm128_vm0, %v19960_v61  ;;  %v19963_v61 = vld [vmem:[#allocation103_spill] sm:$0xff] }
 0x1fe   :  { %10262 = vmatprep.mubr.msk.f32.mxu1 %vm128_vm0, %v19950_v35  ;;  %v15005_v35 = vld [vmem:[%s19496_s0 + $0x220] sm:$0xff] }
 0x1ff   :  { %v14831_v2 = vpop.f32.mrb[124].mxu0 }
 0x200   :  { %3644 = vmatmul.mubr.f32.gmra.mrb[230].mxu0 %v19961_v11  ;;  %v1950_v54 = vpop.f32.mrb[125].mxu0  ;;  %v19964_v11 = vld [vmem:[#allocation104_spill] sm:$0xff] }
 0x201   :  { %1201 = vmatmul.mubr.f32.gmra.mrb[40].mxu1 %v19951_v60  ;;  %10472 = vmatprep.mubr.msk.f32.mxu0 %vm128_vm0, %v19962_v38  ;;  %v14910_v38 = vld [vmem:[%s19496_s0] sm:$0xff] }
 0x202   :  { %10263 = vmatprep.mubr.msk.f32.mxu1 %vm128_vm0, %v19952_v21 }
 0x203   :  { %v14841_v44 = vpop.f32.mrb[126].mxu0 }
 0x204   :  { %3649 = vmatmul.mubr.f32.gmra.mrb[232].mxu0 %v14394_v39  ;;  %v1955_v36 = vpop.f32.mrb[127].mxu0 }
 0x205   :  { %1206 = vmatmul.mubr.f32.gmra.mrb[42].mxu1 %v19953_v10  ;;  %10473 = vmatprep.mubr.msk.f32.mxu0 %vm128_vm0, %v19963_v61  ;;  %v14917_v36 = vld [vmem:[%s19496_s0 + $0x1f0] sm:$0xff]  ;;  %v14922_v61 = vld [vmem:[%s19496_s0 + $0x18] sm:$0xff] }
 0x206   :  { %10264 = vmatprep.mubr.msk.f32.mxu1 %vm128_vm0, %v19954_v19 }
 0x207   :  { %v14851_v60 = vpop.f32.mrb[128].mxu0 }
 0x208   :  { %3654 = vmatmul.mubr.f32.gmra.mrb[234].mxu0 %v14407_v26  ;;  %v1960_v39 = vpop.f32.mrb[129].mxu0 }
 0x209   :  { %1211 = vmatmul.mubr.f32.gmra.mrb[44].mxu1 %v19955_v42  ;;  %10474 = vmatprep.mubr.msk.f32.mxu0 %vm128_vm0, %v19964_v11  ;;  %v14874_v42 = vld [vmem:[%s19496_s0 + $0x1e8] sm:$0xff] }
 0x20a   :  { %10265 = vmatprep.mubr.msk.f32.mxu1 %vm128_vm0, %v19956_v15  ;;  %v14927_v39 = vld [vmem:[%s19496_s0 + $0x208] sm:$0xff] }
 0x20b   :  { %v14861_v10 = vpop.f32.mrb[130].mxu0 }
 0x20c   :  { %3659 = vmatmul.mubr.f32.gmra.mrb[236].mxu0 %v14424_v13  ;;  %v1965_v26 = vpop.f32.mrb[131].mxu0  ;;  %v14986_v13 = vld [vmem:[%s19496_s0 + $0x228] sm:$0xff] }
 0x20d   :  { %1216 = vmatmul.mubr.f32.gmra.mrb[46].mxu1 %v19957_v32  ;;  %10475 = vmatprep.mubr.msk.f32.mxu0 %vm128_vm0, %v14432_v12  ;;  %v14889_v12 = vld [vmem:[%s19496_s0 + $0x1e0] sm:$0xff]  ;;  %v14899_v32 = vld [vmem:[%s19496_s0 + $0x1f8] sm:$0xff] }
 0x20e   :  { %10266 = vmatprep.mubr.msk.f32.mxu1 %vm128_vm0, %v19958_v27 }
 0x20f   :  { %v14876_v15 = vpop.f32.mrb[132].mxu0 }
 0x210   :  { %3664 = vmatmul.mubr.f32.gmra.mrb[238].mxu0 %v14443_v55  ;;  %v1970_v54 = vpop.f32.mrb[133].mxu0  ;;  %v14894_v55 = vld [vmem:[%s19496_s0 + $0x8] sm:$0xff] }
 0x211   :  { %1221 = vmatmul.mubr.f32.gmra.mrb[48].mxu1 %v19959_v62  ;;  %10476 = vmatprep.mubr.msk.f32.mxu0 %vm128_vm0, %v14451_v57  ;;  %v14938_v54 = vld [vmem:[%s19496_s0 + $0x10] sm:$0xff] }
 0x212   :  { %10267 = vmatprep.mubr.msk.f32.mxu1 %vm128_vm0, %v14874_v42 }
 0x213   :  { %v14901_v27 = vpop.f32.mrb[134].mxu0 }
 0x214   :  { %3669 = vmatmul.mubr.f32.gmra.mrb[240].mxu0 %v14460_v5  ;;  %v1975_v62 = vpop.f32.mrb[135].mxu0 }
 0x215   :  { %1226 = vmatmul.mubr.f32.gmra.mrb[50].mxu1 %v14889_v12  ;;  %10509 = vmatprep.mubr.msk.f32.mxu0 %vm128_vm0, %v14894_v55  ;;  %v14945_v62 = vld [vmem:[%s19496_s0 + $0x200] sm:$0xff] }
 0x216   :  { %10268 = vmatprep.mubr.msk.f32.mxu1 %vm128_vm0, %v14899_v32 }
 0x217   :  { %v14929_v11 = vpop.f32.mrb[136].mxu0 }
 0x218   :  { %4300 = vmatmul.mubr.f32.vlgmr.msra.gmra.mrb[242].mxu0 %v14910_v38  ;;  %v1980_v26 = vpop.f32.mrb[137].mxu0 }
 0x219   :  { %1231 = vmatmul.mubr.f32.gmra.mrb[52].mxu1 %v14917_v36  ;;  %10510 = vmatprep.mubr.msk.f32.mxu0 %vm128_vm0, %v14922_v61  ;;  %v14950_v26 = vld [vmem:[%s19496_s0 + $0x28] sm:$0xff] }
 0x21a   :  { %10269 = vmatprep.mubr.msk.f32.mxu1 %vm128_vm0, %v14927_v39  ;;  %12296 = vmatpush1.bf16.msra.mxu0 %v14577_v22  ;;  %v14968_v22 = vld [vmem:[%s19496_s0 + $0x20] sm:$0xff] }
 0x21b   :  { %v14958_v49 = vpop.f32.mrb[138].mxu0  ;;  %12297 = vmatprep.subr.bf16.mxu0 %v19816_v53 }
 0x21c   :  { %4305 = vmatmul.mubr.f32.gmra.mrb[244].mxu0 %v14938_v54  ;;  %v1985_v37 = vpop.f32.mrb[139].mxu0 }
 0x21d   :  { %1236 = vmatmul.mubr.f32.gmra.mrb[54].mxu1 %v14945_v62  ;;  %10511 = vmatprep.mubr.msk.f32.mxu0 %vm128_vm0, %v14950_v26  ;;  %v14980_v37 = vld [vmem:[%s19496_s0 + $0x38] sm:$0xff] }
 0x21e   :  { %10270 = vmatprep.mubr.msk.f32.mxu1 %vm128_vm0, %v14956_v46  ;;  %12299 = vmatpush1.bf16.msra.mxu0 %v14602_v52  ;;  %v14998_v52 = vld [vmem:[%s19496_s0 + $0x30] sm:$0xff] }
 0x21f   :  { %v14988_v19 = vpop.f32.mrb[140].mxu0  ;;  %12300 = vmatprep.subr.bf16.mxu0 %v19816_v53  ;;  %19965 = vst [vmem:[#allocation63_spill] sm:$0xff] %v14998_v52 }
 0x220   :  { %4310 = vmatmul.mubr.f32.gmra.mrb[246].mxu0 %v14968_v22  ;;  %v1990_v21 = vpop.f32.mrb[141].mxu0 }
 0x221   :  { %1241 = vmatmul.mubr.f32.gmra.mrb[56].mxu1 %v14975_v34  ;;  %10512 = vmatprep.mubr.msk.f32.mxu0 %vm128_vm0, %v14980_v37  ;;  %v15010_v21 = vld [vmem:[%s19496_s0 + $0x48] sm:$0xff] }
 0x222   :  { %10271 = vmatprep.mubr.msk.f32.mxu1 %vm128_vm0, %v14986_v13  ;;  %19966 = vst [vmem:[#allocation52_spill] sm:$0xff] %v15010_v21  ;;  %12302 = vmatpush1.bf16.msra.mxu0 %v14627_v9  ;;  %v15029_v9 = vld [vmem:[%s19496_s0 + $0x40] sm:$0xff] }
 0x223   :  { %v15013_v25 = vpop.f32.mrb[142].mxu0  ;;  %12303 = vmatprep.subr.bf16.mxu0 %v19816_v53  ;;  %19967 = vst [vmem:[#allocation53_spill] sm:$0xff] %v15029_v9 }
 0x224   :  { %4315 = vmatmul.mubr.f32.gmra.mrb[248].mxu0 %v14998_v52  ;;  %v1995_v63 = vpop.f32.mrb[143].mxu0  ;;  %v15164_v52 = vld [vmem:[%s19496_s0 + $0xa8] sm:$0xff] }
 0x225   :  { %1246 = vmatmul.mubr.f32.gmra.mrb[58].mxu1 %v15005_v35  ;;  %10513 = vmatprep.mubr.msk.f32.mxu0 %vm128_vm0, %v15010_v21  ;;  %v15039_v63 = vpack.c.bf16 %v5652_v3, %v5651_v24  ;;  %v15062_v3 = vld [vmem:[%s19496_s0 + $0x68] sm:$0xff]  ;;  %19979 = vst [vmem:[#allocation65_spill] sm:$0xff] %v15164_v52 }
 0x226   :  { %10272 = vmatprep.mubr.msk.f32.mxu1 %vm128_vm0, %v14451_v57  ;;  %12305 = vmatpush1.bf16.msra.mxu0 %v14652_v17  ;;  %v5654_v57 = vld [vmem:[%s19495_s2 + $0x218] sm:$0xff]  ;;  %v15057_v17 = vld [vmem:[%s19496_s0 + $0x50] sm:$0xff]  ;;  %19970 = vst [vmem:[#allocation58_spill] sm:$0xff] %v15062_v3 }
 0x227   :  { %v15041_v16 = vpop.f32.mrb[144].mxu0  ;;  %12306 = vmatprep.subr.bf16.mxu0 %v19816_v53  ;;  %19969 = vst [vmem:[#allocation54_spill] sm:$0xff] %v15057_v17  ;;  %v15065_v24 = vpack.c.bf16 %v5654_v57, %v5653_v47  ;;  %v15082_v47 = vld [vmem:[%s19496_s0 + $0x60] sm:$0xff]  ;;  %v15087_v57 = vld [vmem:[%s19496_s0 + $0x78] sm:$0xff] }
 0x228   :  { %4320 = vmatmul.mubr.f32.gmra.mrb[250].mxu0 %v15029_v9  ;;  %v2000_v7 = vpop.f32.mrb[145].mxu0  ;;  %19971 = vst [vmem:[#allocation6_spill] sm:$0xff] %v15082_v47  ;;  %19972 = vst [vmem:[#allocation59_spill] sm:$0xff] %v15087_v57 }
 0x229   :  { %1251 = vmatmul.mubr.f32.gmra.mrb[60].mxu1 %v14460_v5  ;;  %10514 = vmatprep.mubr.msk.f32.mxu0 %vm128_vm0, %v15036_v30  ;;  %v5655_v5 = vld [vmem:[%s19495_s2 + $0x220] sm:$0xff] }
 0x22a   :  { %12308 = vmatpush1.bf16.msra.mxu0 %v15039_v63  ;;  %v15090_v50 = vpack.c.bf16 %v5656_v14, %v5655_v5  ;;  %v15107_v14 = vld [vmem:[%s19496_s0 + $0x70] sm:$0xff]  ;;  %v15112_v5 = vld [vmem:[%s19496_s0 + $0x88] sm:$0xff] }
 0x22b   :  { %v15067_v7 = vpop.f32.mrb[146].mxu0  ;;  %12309 = vmatprep.subr.bf16.mxu0 %v19816_v53  ;;  %19973 = vst [vmem:[#allocation61_spill] sm:$0xff] %v15107_v14  ;;  %19974 = vst [vmem:[#allocation7_spill] sm:$0xff] %v15112_v5 }
 0x22c   :  { %4325 = vmatmul.mubr.f32.gmra.mrb[252].mxu0 %v15057_v17  ;;  %v2005_v40 = vpop.f32.mrb[147].mxu0 }
 0x22d   :  { %10515 = vmatprep.mubr.msk.f32.mxu0 %vm128_vm0, %v15062_v3  ;;  %v5657_v40 = vld [vmem:[%s19495_s2 + $0x230] sm:$0xff] }
 0x22e   :  { %12311 = vmatpush1.bf16.msra.mxu0 %v15065_v24  ;;  %v15115_v17 = vpack.c.bf16 %v5658_v31, %v5657_v40  ;;  %v15132_v31 = vld [vmem:[%s19496_s0 + $0x80] sm:$0xff]  ;;  %v15137_v40 = vld [vmem:[%s19496_s0 + $0x98] sm:$0xff] }
 0x22f   :  { %v15092_v56 = vpop.f32.mrb[148].mxu0  ;;  %12312 = vmatprep.subr.bf16.mxu0 %v19816_v53  ;;  %19976 = vst [vmem:[#allocation64_spill] sm:$0xff] %v15137_v40 }
 0x230   :  { %4330 = vmatmul.mubr.f32.gmra.mrb[254].mxu0 %v15082_v47  ;;  %v2010_v3 = vpop.f32.mrb[149].mxu0  ;;  %19975 = vst [vmem:[#allocation62_spill] sm:$0xff] %v15115_v17 }
 0x231   :  { %10516 = vmatprep.mubr.msk.f32.mxu0 %vm128_vm0, %v15087_v57  ;;  %v5659_v3 = vld [vmem:[%s19495_s2 + $0x240] sm:$0xff]  ;;  %v5660_v57 = vld [vmem:[%s19495_s2 + $0x248] sm:$0xff] }
 0x232   :  { %12314 = vmatpush1.bf16.msra.mxu0 %v15090_v50  ;;  %v15140_v9 = vpack.c.bf16 %v5660_v57, %v5659_v3  ;;  %v15156_v57 = vld [vmem:[%s19496_s0 + $0x90] sm:$0xff]  ;;  %v19978_v3 = vmax.f32 %v14721_v59, %v14791_v28  ;;  %v5664_v59 = vld [vmem:[%s19495_s2 + $0x268] sm:$0xff] }
 0x233   :  { %v15117_v30 = vpop.f32.mrb[150].mxu0  ;;  %12315 = vmatprep.subr.bf16.mxu0 %v19816_v53  ;;  %19977 = vst [vmem:[#allocation8_spill] sm:$0xff] %v15156_v57 }
 0x234   :  { %4335 = vmatmul.mubr.f32.gmra.mrb[0].mxu0 %v15107_v14  ;;  %v2015_v47 = vpop.f32.mrb[151].mxu0 }
 0x235   :  { %10517 = vmatprep.mubr.msk.f32.mxu0 %vm128_vm0, %v15112_v5  ;;  %v5661_v47 = vld [vmem:[%s19495_s2 + $0x250] sm:$0xff]  ;;  %v5662_v5 = vld [vmem:[%s19495_s2 + $0x258] sm:$0xff] }
 0x236   :  { %12317 = vmatpush1.bf16.msra.mxu0 %v15115_v17 }
 0x237   :  { %v2018_v21 = vpop.f32.mrb[152].mxu0  ;;  %12318 = vmatprep.subr.bf16.mxu0 %v19816_v53 }
 0x238   :  { %v2071_v14 = vmax.f32 %v14901_v27, %v2018_v21  ;;  %4340 = vmatmul.mubr.f32.gmra.mrb[2].mxu0 %v15132_v31  ;;  %v2020_v23 = vpop.f32.mrb[153].mxu0  ;;  %v5663_v21 = vld [vmem:[%s19495_s2 + $0x260] sm:$0xff] }
 0x239   :  { %10518 = vmatprep.mubr.msk.f32.mxu0 %vm128_vm0, %v15137_v40  ;;  %v15167_v23 = vpack.c.bf16 %v5662_v5, %v5661_v47  ;;  %v15183_v5 = vld [vmem:[%s19496_s0 + $0xa0] sm:$0xff]  ;;  %v19980_v47 = vmax.f32 %v14727_v51, %v14801_v6  ;;  %v15191_v40 = vld [vmem:[%s19496_s0 + $0xb8] sm:$0xff] }
 0x23a   :  { %v2080_v17 = vmax.f32 %v19978_v3, %v2071_v14  ;;  %12320 = vmatpush1.bf16.msra.mxu0 %v15140_v9  ;;  %19981 = vst [vmem:[#allocation66_spill] sm:$0xff] %v15191_v40  ;;  %v5666_v51 = vld [vmem:[%s19495_s2 + $0x278] sm:$0xff] }
 0x23b   :  { %v2023_v27 = vpop.f32.mrb[154].mxu0  ;;  %12321 = vmatprep.subr.bf16.mxu0 %v19816_v53 }
 0x23c   :  { %v2072_v28 = vmax.f32 %v14929_v11, %v2023_v27  ;;  %4345 = vmatmul.mubr.f32.gmra.mrb[4].mxu0 %v15156_v57  ;;  %v2025_v14 = vpop.f32.mrb[155].mxu0  ;;  %v15194_v11 = vpack.c.bf16 %v5664_v59, %v5663_v21  ;;  %v19982_v27 = vld [vmem:[#allocation25_spill] sm:$0xff]  ;;  %v19983_v21 = vld [vmem:[#allocation24_spill] sm:$0xff] }
 0x23d   :  { %10519 = vmatprep.mubr.msk.f32.mxu0 %vm128_vm0, %v15164_v52  ;;  %v2143_v14 = vadd.f32 %v19982_v27, %v2080_v17  ;;  %v5665_v57 = vld [vmem:[%s19495_s2 + $0x270] sm:$0xff] }
 0x23e   :  { %v2081_v3 = vmax.f32 %v19980_v47, %v2072_v28  ;;  %12323 = vmatpush1.bf16.msra.mxu0 %v15167_v23  ;;  %v15212_v17 = vld [vmem:[%s19496_s0 + $0xb0] sm:$0xff]  ;;  %v19984_v47 = vmax.f32 %v14735_v45, %v14811_v8 }
 0x23f   :  { %v2028_v52 = vpop.f32.mrb[156].mxu0  ;;  %12324 = vmatprep.subr.bf16.mxu0 %v19816_v53 }
 0x240   :  { %v2073_v6 = vmax.f32 %v14958_v49, %v2028_v52  ;;  %4350 = vmatmul.mubr.f32.gmra.mrb[6].mxu0 %v15183_v5  ;;  %v2030_v28 = vpop.f32.mrb[157].mxu0  ;;  %v2144_v59 = vadd.f32 %v19983_v21, %v2081_v3  ;;  %v15220_v49 = vld [vmem:[%s19496_s0 + $0xc8] sm:$0xff]  ;;  %v15223_v52 = vpack.c.bf16 %v5666_v51, %v5665_v57  ;;  %v2152_v3 = vmax.f32 %v2143_v14, 0.0  ;;  %v15235_v57 = vld [vmem:[%s19496_s0 + $0xc0] sm:$0xff] }
 0x241   :  { %10520 = vmatprep.mubr.msk.f32.mxu0 %vm128_vm0, %v15191_v40  ;;  %v19986_v14 = vmax.f32 %v14743_v33, %v14821_v20  ;;  %v15256_v20 = vld [vmem:[%s19496_s0 + $0xd0] sm:$0xff] }
 0x242   :  { %v2082_v27 = vmax.f32 %v19984_v47, %v2073_v6  ;;  %12326 = vmatpush1.bf16.msra.mxu0 %v15194_v11  ;;  %v2153_v28 = vmax.f32 %v2144_v59, 0.0  ;;  %v19987_v6 = vld [vmem:[#allocation27_spill] sm:$0xff] }
 0x243   :  { %v2033_v21 = vpop.f32.mrb[158].mxu0  ;;  %12327 = vmatprep.subr.bf16.mxu0 %v19816_v53 }
 0x244   :  { %v2074_v40 = vmax.f32 %v14988_v19, %v2033_v21  ;;  %4355 = vmatmul.mubr.f32.gmra.mrb[8].mxu0 %v15212_v17  ;;  %v2035_v45 = vpop.f32.mrb[159].mxu0  ;;  %v15228_v8 = vpack.c.bf16 %v2153_v28, %v2152_v3  ;;  %v15243_v19 = vld [vmem:[%s19496_s0 + $0xd8] sm:$0xff]  ;;  %v2145_v59 = vadd.f32 %v19987_v6, %v2082_v27 }
 0x245   :  { %10521 = vmatprep.mubr.msk.f32.mxu0 %vm128_vm0, %v15220_v49  ;;  %v19988_v21 = vld [vmem:[#allocation26_spill] sm:$0xff] }
 0x246   :  { %19985 = vst [vmem:[#allocation9_spill] sm:$0xff] %v15228_v8  ;;  %v2083_v51 = vmax.f32 %v19986_v14, %v2074_v40  ;;  %12329 = vmatpush1.bf16.msra.mxu0 %v15223_v52  ;;  %v19989_v40 = vmax.f32 %v14751_v41, %v14831_v2  ;;  %v2154_v45 = vmax.f32 %v2145_v59, 0.0  ;;  %v15275_v41 = vld [vmem:[%s19496_s0 + $0xe0] sm:$0xff]  ;;  %v19991_v2 = vmax.f32 %v14759_v1, %v14841_v44  ;;  %v15294_v1 = vld [vmem:[%s19496_s0 + $0xf0] sm:$0xff]  ;;  %v15434_v8 = vld [vmem:[%s19496_s0 + $0x188] sm:$0xff] }
 0x247   :  { %v2038_v47 = vpop.f32.mrb[160].mxu0  ;;  %12346 = vmatprep.subr.bf16.mxu0 %v19816_v53  ;;  %v19994_v44 = vmax.f32 %v14767_v58, %v14851_v60  ;;  %v15313_v58 = vld [vmem:[%s19496_s0 + $0x100] sm:$0xff]  ;;  %v19996_v60 = vmax.f32 %v14775_v43, %v14861_v10  ;;  %v15332_v43 = vld [vmem:[%s19496_s0 + $0x110] sm:$0xff]  ;;  %v19999_v10 = vmax.f32 %v14783_v48, %v14876_v15  ;;  %v15359_v15 = vld [vmem:[%s19496_s0 + $0x138] sm:$0xff]  ;;  %20014 = vst [vmem:[#allocation78_spill] sm:$0xff] %v15434_v8 }
 0x248   :  { %v2075_v3 = vmax.f32 %v15013_v25, %v2038_v47  ;;  %4360 = vmatmul.mubr.f32.gmra.mrb[10].mxu0 %v15235_v57  ;;  %v2040_v28 = vpop.f32.mrb[161].mxu0  ;;  %v2146_v33 = vadd.f32 %v19988_v21, %v2083_v51  ;;  %v15264_v25 = vld [vmem:[%s19496_s0 + $0xe8] sm:$0xff]  ;;  %v15354_v48 = vld [vmem:[%s19496_s0 + $0x120] sm:$0xff]  ;;  %20004 = vst [vmem:[#allocation71_spill] sm:$0xff] %v15359_v15 }
 0x249   :  { %10522 = vmatprep.mubr.msk.f32.mxu0 %vm128_vm0, %v15243_v19  ;;  %20003 = vst [vmem:[#allocation11_spill] sm:$0xff] %v15354_v48 }
 0x24a   :  { %v2084_v27 = vmax.f32 %v19989_v40, %v2075_v3  ;;  %v2155_v14 = vmax.f32 %v2146_v33, 0.0  ;;  %v19992_v3 = vld [vmem:[#allocation29_spill] sm:$0xff] }
 0x24b   :  { %v2043_v51 = vpop.f32.mrb[162].mxu0 }
 0x24c   :  { %v2076_v6 = vmax.f32 %v15041_v16, %v2043_v51  ;;  %4365 = vmatmul.mubr.f32.gmra.mrb[12].mxu0 %v15256_v20  ;;  %v2045_v47 = vpop.f32.mrb[163].mxu0  ;;  %v15268_v28 = vpack.c.bf16 %v2155_v14, %v2154_v45  ;;  %v15283_v16 = vld [vmem:[%s19496_s0 + $0xf8] sm:$0xff]  ;;  %v2147_v21 = vadd.f32 %v19992_v3, %v2084_v27  ;;  %v19993_v14 = vld [vmem:[#allocation28_spill] sm:$0xff] }
 0x24d   :  { %10523 = vmatprep.mubr.msk.f32.mxu0 %vm128_vm0, %v15264_v25 }
 0x24e   :  { %19990 = vst [vmem:[#allocation67_spill] sm:$0xff] %v15268_v28  ;;  %v2085_v59 = vmax.f32 %v19991_v2, %v2076_v6  ;;  %v2156_v6 = vmax.f32 %v2147_v21, 0.0 }
 0x24f   :  { %v2048_v33 = vpop.f32.mrb[164].mxu0 }
 0x250   :  { %v2077_v40 = vmax.f32 %v15067_v7, %v2048_v33  ;;  %4370 = vmatmul.mubr.f32.gmra.mrb[14].mxu0 %v15275_v41  ;;  %v2050_v45 = vpop.f32.mrb[165].mxu0  ;;  %v2148_v51 = vadd.f32 %v19993_v14, %v2085_v59  ;;  %v15302_v7 = vld [vmem:[%s19496_s0 + $0x108] sm:$0xff] }
 0x251   :  { %10524 = vmatprep.mubr.msk.f32.mxu0 %vm128_vm0, %v15283_v16 }
 0x252   :  { %v2086_v27 = vmax.f32 %v19994_v44, %v2077_v40  ;;  %v2157_v47 = vmax.f32 %v2148_v51, 0.0  ;;  %v19997_v40 = vld [vmem:[#allocation31_spill] sm:$0xff] }
 0x253   :  { %v2053_v2 = vpop.f32.mrb[166].mxu0 }
 0x254   :  { %v2078_v59 = vmax.f32 %v15092_v56, %v2053_v2  ;;  %4375 = vmatmul.mubr.f32.gmra.mrb[16].mxu0 %v15294_v1  ;;  %v2055_v3 = vpop.f32.mrb[167].mxu0  ;;  %v15306_v33 = vpack.c.bf16 %v2157_v47, %v2156_v6  ;;  %v15321_v56 = vld [vmem:[%s19496_s0 + $0x118] sm:$0xff]  ;;  %v2149_v45 = vadd.f32 %v19997_v40, %v2086_v27 }
 0x255   :  { %10525 = vmatprep.mubr.msk.f32.mxu0 %vm128_vm0, %v15302_v7  ;;  %v19998_v6 = vld [vmem:[#allocation30_spill] sm:$0xff] }
 0x256   :  { %19995 = vst [vmem:[#allocation68_spill] sm:$0xff] %v15306_v33  ;;  %v2087_v21 = vmax.f32 %v19996_v60, %v2078_v59  ;;  %v2158_v2 = vmax.f32 %v2149_v45, 0.0 }
 0x257   :  { %v2058_v14 = vpop.f32.mrb[168].mxu0 }
 0x258   :  { %v2079_v51 = vmax.f32 %v15117_v30, %v2058_v14  ;;  %4380 = vmatmul.mubr.f32.gmra.mrb[18].mxu0 %v15313_v58  ;;  %v2060_v44 = vpop.f32.mrb[169].mxu0  ;;  %v2150_v47 = vadd.f32 %v19998_v6, %v2087_v21  ;;  %v15342_v30 = vld [vmem:[%s19496_s0 + $0x128] sm:$0xff]  ;;  %v15369_v14 = vld [vmem:[%s19496_s0 + $0x130] sm:$0xff] }
 0x259   :  { %10526 = vmatprep.mubr.msk.f32.mxu0 %vm128_vm0, %v15321_v56  ;;  %20001 = vst [vmem:[#allocation69_spill] sm:$0xff] %v15342_v30  ;;  %20005 = vst [vmem:[#allocation72_spill] sm:$0xff] %v15369_v14 }
 0x25a   :  { %v15337_v27 = vmax.f32 %v19999_v10, %v2079_v51  ;;  %v2159_v59 = vmax.f32 %v2150_v47, 0.0  ;;  %v15374_v51 = vld [vmem:[%s19496_s0 + $0x148] sm:$0xff]  ;;  %v15384_v47 = vld [vmem:[%s19496_s0 + $0x140] sm:$0xff]  ;;  %v15389_v10 = vld [vmem:[%s19496_s0 + $0x158] sm:$0xff] }
 0x25b   :  { %v15344_v3 = vpop.f32.mrb[170].mxu0  ;;  %20006 = vst [vmem:[#allocation12_spill] sm:$0xff] %v15374_v51  ;;  %20007 = vst [vmem:[#allocation73_spill] sm:$0xff] %v15384_v47 }
 0x25c   :  { %20000 = vst [vmem:[#allocation10_spill] sm:$0xff] %v15337_v27  ;;  %4385 = vmatmul.mubr.f32.gmra.mrb[20].mxu0 %v15332_v43  ;;  %v3497_v60 = vpop.f32.mrb[171].mxu0  ;;  %v15347_v21 = vpack.c.bf16 %v2159_v59, %v2158_v2  ;;  %20008 = vst [vmem:[#allocation74_spill] sm:$0xff] %v15389_v10  ;;  %v15419_v27 = vld [vmem:[%s19496_s0 + $0x178] sm:$0xff] }
 0x25d   :  { %10527 = vmatprep.mubr.msk.f32.mxu0 %vm128_vm0, %v15342_v30  ;;  %v15399_v60 = vld [vmem:[%s19496_s0 + $0x150] sm:$0xff]  ;;  %20012 = vst [vmem:[#allocation14_spill] sm:$0xff] %v15419_v27 }
 0x25e   :  { %20002 = vst [vmem:[#allocation70_spill] sm:$0xff] %v15347_v21  ;;  %20009 = vst [vmem:[#allocation13_spill] sm:$0xff] %v15399_v60 }
 0x25f   :  { %v15361_v40 = vpop.f32.mrb[172].mxu0 }
 0x260   :  { %4390 = vmatmul.mubr.f32.gmra.mrb[22].mxu0 %v15354_v48  ;;  %v3502_v45 = vpop.f32.mrb[173].mxu0 }
 0x261   :  { %10528 = vmatprep.mubr.msk.f32.mxu0 %vm128_vm0, %v15359_v15  ;;  %v15404_v45 = vld [vmem:[%s19496_s0 + $0x168] sm:$0xff] }
 0x262   :  { %20010 = vst [vmem:[#allocation75_spill] sm:$0xff] %v15404_v45 }
 0x263   :  { %v15376_v44 = vpop.f32.mrb[174].mxu0 }
 0x264   :  { %4395 = vmatmul.mubr.f32.gmra.mrb[24].mxu0 %v15369_v14  ;;  %v3507_v6 = vpop.f32.mrb[175].mxu0 }
 0x265   :  { %10529 = vmatprep.mubr.msk.f32.mxu0 %vm128_vm0, %v15374_v51  ;;  %v15496_v51 = vld [vmem:[%s19496_s0 + $0x1c8] sm:$0xff] }
 0x266   :  { %20022 = vst [vmem:[#allocation86_spill] sm:$0xff] %v15496_v51 }
 0x267   :  { %v15391_v2 = vpop.f32.mrb[176].mxu0 }
 0x268   :  { %4400 = vmatmul.mubr.f32.gmra.mrb[26].mxu0 %v15384_v47  ;;  %v3512_v59 = vpop.f32.mrb[177].mxu0 }
 0x269   :  { %10530 = vmatprep.mubr.msk.f32.mxu0 %vm128_vm0, %v15389_v10  ;;  %v15414_v59 = vld [vmem:[%s19496_s0 + $0x160] sm:$0xff] }
 0x26a   :  { %20011 = vst [vmem:[#allocation76_spill] sm:$0xff] %v15414_v59 }
 0x26b   :  { %v15406_v6 = vpop.f32.mrb[178].mxu0 }
 0x26c   :  { %4405 = vmatmul.mubr.f32.gmra.mrb[28].mxu0 %v15399_v60  ;;  %v3517_v21 = vpop.f32.mrb[179].mxu0 }
 0x26d   :  { %10531 = vmatprep.mubr.msk.f32.mxu0 %vm128_vm0, %v15404_v45  ;;  %v15429_v21 = vld [vmem:[%s19496_s0 + $0x170] sm:$0xff] }
 0x26e   :  { %20013 = vst [vmem:[#allocation77_spill] sm:$0xff] %v15429_v21 }
 0x26f   :  { %v15421_v33 = vpop.f32.mrb[180].mxu0 }
 0x270   :  { %4410 = vmatmul.mubr.f32.gmra.mrb[30].mxu0 %v15414_v59  ;;  %v3522_v28 = vpop.f32.mrb[181].mxu0 }
 0x271   :  { %10532 = vmatprep.mubr.msk.f32.mxu0 %vm128_vm0, %v15419_v27  ;;  %v15444_v28 = vld [vmem:[%s19496_s0 + $0x180] sm:$0xff]  ;;  %v15449_v27 = vld [vmem:[%s19496_s0 + $0x198] sm:$0xff] }
 0x272   :  { %20015 = vst [vmem:[#allocation79_spill] sm:$0xff] %v15444_v28  ;;  %20016 = vst [vmem:[#allocation80_spill] sm:$0xff] %v15449_v27 }
 0x273   :  { %v15436_v45 = vpop.f32.mrb[182].mxu0 }
 0x274   :  { %4415 = vmatmul.mubr.f32.gmra.mrb[32].mxu0 %v15429_v21  ;;  %v3527_v60 = vpop.f32.mrb[183].mxu0 }
 0x275   :  { %10533 = vmatprep.mubr.msk.f32.mxu0 %vm128_vm0, %v15434_v8  ;;  %v15459_v60 = vld [vmem:[%s19496_s0 + $0x190] sm:$0xff]  ;;  %v15464_v8 = vld [vmem:[%s19496_s0 + $0x1a8] sm:$0xff] }
 0x276   :  { %20017 = vst [vmem:[#allocation81_spill] sm:$0xff] %v15459_v60  ;;  %20018 = vst [vmem:[#allocation82_spill] sm:$0xff] %v15464_v8 }
 0x277   :  { %v15451_v59 = vpop.f32.mrb[184].mxu0 }
 0x278   :  { %4420 = vmatmul.mubr.f32.gmra.mrb[34].mxu0 %v15444_v28  ;;  %v3532_v10 = vpop.f32.mrb[185].mxu0 }
 0x279   :  { %10534 = vmatprep.mubr.msk.f32.mxu0 %vm128_vm0, %v15449_v27  ;;  %v15474_v10 = vld [vmem:[%s19496_s0 + $0x1a0] sm:$0xff]  ;;  %v15479_v27 = vld [vmem:[%s19496_s0 + $0x1b8] sm:$0xff] }
 0x27a   :  { %20019 = vst [vmem:[#allocation83_spill] sm:$0xff] %v15474_v10  ;;  %20020 = vst [vmem:[#allocation84_spill] sm:$0xff] %v15479_v27 }
 0x27b   :  { %v15466_v21 = vpop.f32.mrb[186].mxu0 }
 0x27c   :  { %4425 = vmatmul.mubr.f32.gmra.mrb[36].mxu0 %v15459_v60  ;;  %v3537_v47 = vpop.f32.mrb[187].mxu0 }
 0x27d   :  { %10535 = vmatprep.mubr.msk.f32.mxu0 %vm128_vm0, %v15464_v8  ;;  %v15491_v8 = vld [vmem:[%s19496_s0 + $0x1b0] sm:$0xff] }
 0x27e   :  { %20021 = vst [vmem:[#allocation85_spill] sm:$0xff] %v15491_v8 }
 0x27f   :  { %v15481_v28 = vpop.f32.mrb[188].mxu0 }
 0x280   :  { %4430 = vmatmul.mubr.f32.gmra.mrb[38].mxu0 %v15474_v10  ;;  %v3542_v60 = vpop.f32.mrb[189].mxu0  ;;  %v15513_v10 = vld [vmem:[%s19496_s0 + $0x1d8] sm:$0xff]  ;;  %v20045_v29 = vmax.f32 %v15344_v3, %v15481_v28 }
 0x281   :  { %10536 = vmatprep.mubr.msk.f32.mxu0 %vm128_vm0, %v15479_v27  ;;  %v15508_v27 = vld [vmem:[%s19496_s0 + $0x1c0] sm:$0xff]  ;;  %20024 = vst [vmem:[#allocation88_spill] sm:$0xff] %v15513_v10 }
 0x282   :  { %20023 = vst [vmem:[#allocation87_spill] sm:$0xff] %v15508_v27  ;;  %v10273_v60 = vld [vmem:[%s19500_s3 + $0x80] sm:$0xff] }
 0x283   :  { %v15498_v14 = vpop.f32.mrb[190].mxu0  ;;  %11395 = vmatprep.mubr.msk.f32.mxu1 %vm597_vm1, %v10273_v60 }
 0x284   :  { %4435 = vmatmul.mubr.f32.gmra.mrb[40].mxu0 %v15491_v8  ;;  %v3547_v47 = vpop.f32.mrb[191].mxu0  ;;  %v15529_v8 = vld [vmem:[%s19496_s0 + $0x1d0] sm:$0xff] }
 0x285   :  { %10537 = vmatprep.mubr.msk.f32.mxu0 %vm128_vm0, %v15496_v51  ;;  %20025 = vst [vmem:[#allocation89_spill] sm:$0xff] %v15529_v8 }
 0x287   :  { %v15515_v15 = vpop.f32.mrb[192].mxu0 }
 0x288   :  { %4440 = vmatmul.mubr.f32.gmra.mrb[42].mxu0 %v15508_v27  ;;  %v3552_v51 = vpop.f32.mrb[193].mxu0 }
 0x289   :  { %10538 = vmatprep.mubr.msk.f32.mxu0 %vm128_vm0, %v15513_v10 }
 0x28b   :  { %v15531_v48 = vpop.f32.mrb[194].mxu0 }
 0x28c   :  { %4445 = vmatmul.mubr.f32.gmra.mrb[44].mxu0 %v15529_v8  ;;  %v3557_v30 = vpop.f32.mrb[195].mxu0 }
 0x28d   :  { %10539 = vmatprep.mubr.msk.f32.mxu0 %vm128_vm0, %v14874_v42 }
 0x28f   :  { %v15538_v51 = vpop.f32.mrb[196].mxu0 }
 0x290   :  { %4450 = vmatmul.mubr.f32.gmra.mrb[46].mxu0 %v14889_v12  ;;  %v3562_v47 = vpop.f32.mrb[197].mxu0 }
 0x291   :  { %10540 = vmatprep.mubr.msk.f32.mxu0 %vm128_vm0, %v14899_v32 }
 0x293   :  { %v15545_v10 = vpop.f32.mrb[198].mxu0 }
 0x294   :  { %4455 = vmatmul.mubr.f32.gmra.mrb[48].mxu0 %v14917_v36  ;;  %v3567_v27 = vpop.f32.mrb[199].mxu0 }
 0x295   :  { %10541 = vmatprep.mubr.msk.f32.mxu0 %vm128_vm0, %v14927_v39  ;;  %v15569_v39 = vld [vmem:[%s19496_s0 + $0x238] sm:$0xff] }
 0x296   :  { %20026 = vst [vmem:[#allocation90_spill] sm:$0xff] %v15569_v39 }
 0x297   :  { %v15552_v42 = vpop.f32.mrb[200].mxu0 }
 0x298   :  { %4460 = vmatmul.mubr.f32.gmra.mrb[50].mxu0 %v14945_v62  ;;  %v3572_v47 = vpop.f32.mrb[201].mxu0 }
 0x299   :  { %10542 = vmatprep.mubr.msk.f32.mxu0 %vm128_vm0, %v14956_v46 }
 0x29b   :  { %v15559_v32 = vpop.f32.mrb[202].mxu0 }
 0x29c   :  { %4465 = vmatmul.mubr.f32.gmra.mrb[52].mxu0 %v14975_v34  ;;  %v3577_v27 = vpop.f32.mrb[203].mxu0 }
 0x29d   :  { %10543 = vmatprep.mubr.msk.f32.mxu0 %vm128_vm0, %v14986_v13  ;;  %v15581_v13 = vld [vmem:[%s19496_s0 + $0x230] sm:$0xff] }
 0x29e   :  { %20027 = vst [vmem:[#allocation91_spill] sm:$0xff] %v15581_v13 }
 0x29f   :  { %v15571_v62 = vpop.f32.mrb[204].mxu0 }
 0x2a0   :  { %4470 = vmatmul.mubr.f32.gmra.mrb[54].mxu0 %v15005_v35  ;;  %v3582_v34 = vpop.f32.mrb[205].mxu0  ;;  %v20035_v35 = vld [vmem:[#allocation53_spill] sm:$0xff] }
 0x2a1   :  { %10544 = vmatprep.mubr.msk.f32.mxu0 %vm128_vm0, %v15569_v39 }
 0x2a3   :  { %v15583_v47 = vpop.f32.mrb[206].mxu0 }
 0x2a4   :  { %v15585_v27 = vpop.f32.mrb[16].mxu1  ;;  %4475 = vmatmul.mubr.f32.gmra.mrb[56].mxu0 %v15581_v13  ;;  %v3587_v36 = vpop.f32.mrb[207].mxu0 }
 0x2a5   :  { %v1144_v46 = vpop.f32.mrb[17].mxu1  ;;  %10645 = vmatprep.mubr.msk.f32.mxu0 %vm128_vm0, %v14894_v55 }
 0x2a7   :  { %v15592_v34 = vpop.f32.mrb[208].mxu0 }
 0x2a8   :  { %v15594_v12 = vpop.f32.mrb[18].mxu1  ;;  %5912 = vmatmul.mubr.f32.vlgmr.msra.gmra.mrb[58].mxu0 %v14910_v38  ;;  %v3592_v30 = vpop.f32.mrb[209].mxu0 }
 0x2a9   :  { %v1149_v39 = vpop.f32.mrb[19].mxu1  ;;  %10646 = vmatprep.mubr.msk.f32.mxu0 %vm128_vm0, %v14922_v61  ;;  %12348 = vmatpush1.bf16.msra.mxu0 %v15039_v63 }
 0x2aa   :  { %12349 = vmatprep.subr.bf16.mxu0 %v19816_v53 }
 0x2ab   :  { %v15603_v36 = vpop.f32.mrb[210].mxu0 }
 0x2ac   :  { %v15605_v55 = vpop.f32.mrb[20].mxu1  ;;  %5917 = vmatmul.mubr.f32.gmra.mrb[60].mxu0 %v14938_v54  ;;  %v3597_v46 = vpop.f32.mrb[211].mxu0  ;;  %v20033_v54 = vld [vmem:[#allocation52_spill] sm:$0xff] }
 0x2ad   :  { %20028 = vst [vmem:[#allocation92_spill] sm:$0xff] %v15605_v55  ;;  %v1154_v30 = vpop.f32.mrb[21].mxu1  ;;  %10647 = vmatprep.mubr.msk.f32.mxu0 %vm128_vm0, %v14950_v26  ;;  %12351 = vmatpush1.bf16.msra.mxu0 %v15065_v24 }
 0x2ae   :  { %12352 = vmatprep.subr.bf16.mxu0 %v19816_v53  ;;  %v20031_v30 = vld [vmem:[#allocation63_spill] sm:$0xff] }
 0x2af   :  { %v15614_v61 = vpop.f32.mrb[212].mxu0 }
 0x2b0   :  { %v15616_v63 = vpop.f32.mrb[22].mxu1  ;;  %5922 = vmatmul.mubr.f32.gmra.mrb[62].mxu0 %v14968_v22  ;;  %v3602_v39 = vpop.f32.mrb[213].mxu0  ;;  %v20040_v22 = vld [vmem:[#allocation59_spill] sm:$0xff] }
 0x2b1   :  { %20029 = vst [vmem:[#allocation93_spill] sm:$0xff] %v15616_v63  ;;  %v1159_v46 = vpop.f32.mrb[23].mxu1  ;;  %10648 = vmatprep.mubr.msk.f32.mxu0 %vm128_vm0, %v14980_v37  ;;  %12354 = vmatpush1.bf16.msra.mxu0 %v15090_v50  ;;  %v6468_v63 = vld [vmem:[%s19495_s2 + $0x298] sm:$0xff] }
 0x2b2   :  { %12355 = vmatprep.subr.bf16.mxu0 %v19816_v53  ;;  %v20034_v46 = vld [vmem:[#allocation62_spill] sm:$0xff] }
 0x2b3   :  { %v15625_v26 = vpop.f32.mrb[214].mxu0 }
 0x2b4   :  { %v15627_v24 = vpop.f32.mrb[24].mxu1  ;;  %5927 = vmatmul.mubr.f32.gmra.mrb[64].mxu0 %v20031_v30  ;;  %v3607_v38 = vpop.f32.mrb[215].mxu0 }
 0x2b5   :  { %20030 = vst [vmem:[#allocation94_spill] sm:$0xff] %v15627_v24  ;;  %v1164_v60 = vpop.f32.mrb[25].mxu1  ;;  %10649 = vmatprep.mubr.msk.f32.mxu0 %vm128_vm0, %v20033_v54  ;;  %12357 = vmatpush1.bf16.msra.mxu0 %v20034_v46  ;;  %v20036_v38 = vld [vmem:[#allocation5_spill] sm:$0xff]  ;;  %v20037_v46 = vld [vmem:[#allocation54_spill] sm:$0xff] }
 0x2b6   :  { %12358 = vmatprep.subr.bf16.mxu0 %v19816_v53  ;;  %v20038_v24 = vld [vmem:[#allocation58_spill] sm:$0xff] }
 0x2b7   :  { %v15636_v50 = vpop.f32.mrb[216].mxu0 }
 0x2b8   :  { %v15638_v37 = vpop.f32.mrb[26].mxu1  ;;  %5932 = vmatmul.mubr.f32.gmra.mrb[66].mxu0 %v20035_v35  ;;  %v3612_v13 = vpop.f32.mrb[217].mxu0  ;;  %v20039_v35 = vld [vmem:[#allocation6_spill] sm:$0xff] }
 0x2b9   :  { %v1169_v30 = vpop.f32.mrb[27].mxu1  ;;  %10650 = vmatprep.mubr.msk.f32.mxu0 %vm128_vm0, %v20036_v38  ;;  %12360 = vmatpush1.bf16.msra.mxu0 %v15140_v9 }
 0x2ba   :  { %12361 = vmatprep.subr.bf16.mxu0 %v19816_v53 }
 0x2bb   :  { %v15645_v60 = vpop.f32.mrb[218].mxu0 }
 0x2bc   :  { %v15647_v54 = vpop.f32.mrb[28].mxu1  ;;  %5937 = vmatmul.mubr.f32.gmra.mrb[68].mxu0 %v20037_v46  ;;  %v3617_v39 = vpop.f32.mrb[219].mxu0  ;;  %v20041_v46 = vld [vmem:[#allocation61_spill] sm:$0xff] }
 0x2bd   :  { %v1174_v8 = vpop.f32.mrb[29].mxu1  ;;  %10651 = vmatprep.mubr.msk.f32.mxu0 %vm128_vm0, %v20038_v24  ;;  %12363 = vmatpush1.bf16.msra.mxu0 %v15167_v23  ;;  %v6465_v23 = vld [vmem:[%s19495_s2 + $0x280] sm:$0xff] }
 0x2be   :  { %12364 = vmatprep.subr.bf16.mxu0 %v19816_v53  ;;  %v6466_v8 = vld [vmem:[%s19495_s2 + $0x288] sm:$0xff] }
 0x2bf   :  { %v15654_v13 = vpop.f32.mrb[220].mxu0 }
 0x2c0   :  { %v15656_v9 = vpop.f32.mrb[30].mxu1  ;;  %5942 = vmatmul.mubr.f32.gmra.mrb[70].mxu0 %v20039_v35  ;;  %v3622_v30 = vpop.f32.mrb[221].mxu0 }
 0x2c1   :  { %v1179_v38 = vpop.f32.mrb[31].mxu1  ;;  %10652 = vmatprep.mubr.msk.f32.mxu0 %vm128_vm0, %v20040_v22  ;;  %12366 = vmatpush1.bf16.msra.mxu0 %v15194_v11  ;;  %v20042_v30 = vld [vmem:[#allocation7_spill] sm:$0xff]  ;;  %v15677_v11 = vpack.c.bf16 %v6466_v8, %v6465_v23  ;;  %v20043_v8 = vld [vmem:[#allocation64_spill] sm:$0xff] }
 0x2c2   :  { %12367 = vmatprep.subr.bf16.mxu0 %v19816_v53  ;;  %v6467_v38 = vld [vmem:[%s19495_s2 + $0x290] sm:$0xff] }
 0x2c3   :  { %v15669_v24 = vpop.f32.mrb[222].mxu0 }
 0x2c4   :  { %v15671_v39 = vpop.f32.mrb[32].mxu1  ;;  %5947 = vmatmul.mubr.f32.gmra.mrb[72].mxu0 %v20041_v46  ;;  %v3627_v35 = vpop.f32.mrb[223].mxu0 }
 0x2c5   :  { %v1184_v22 = vpop.f32.mrb[33].mxu1  ;;  %10653 = vmatprep.mubr.msk.f32.mxu0 %vm128_vm0, %v20042_v30  ;;  %12369 = vmatpush1.bf16.msra.mxu0 %v15223_v52  ;;  %v15693_v30 = vpack.c.bf16 %v6468_v63, %v6467_v38  ;;  %v20046_v38 = vld [vmem:[#allocation8_spill] sm:$0xff] }
 0x2c6   :  { %12370 = vmatprep.subr.bf16.mxu0 %v19816_v53 }
 0x2c7   :  { %v3630_v46 = vpop.f32.mrb[224].mxu0  ;;  %20044 = vst [vmem:[#allocation95_spill] sm:$0xff] %v15693_v30 }
 0x2c8   :  { %v15686_v35 = vpop.f32.mrb[34].mxu1  ;;  %v3683_v22 = vmax.f32 %v15583_v47, %v3630_v46  ;;  %5952 = vmatmul.mubr.f32.gmra.mrb[74].mxu0 %v15132_v31  ;;  %v3632_v52 = vpop.f32.mrb[225].mxu0  ;;  %v6469_v47 = vld [vmem:[%s19495_s2 + $0x2a0] sm:$0xff]  ;;  %v6470_v31 = vld [vmem:[%s19495_s2 + $0x2a8] sm:$0xff] }
 0x2c9   :  { %v1189_v23 = vpop.f32.mrb[35].mxu1  ;;  %10654 = vmatprep.mubr.msk.f32.mxu0 %vm128_vm0, %v20043_v8  ;;  %12372 = vmatpush1.bf16.msra.mxu0 %v15677_v11  ;;  %v15712_v28 = vpack.c.bf16 %v6470_v31, %v6469_v47 }
 0x2ca   :  { %v3692_v55 = vmax.f32 %v20045_v29, %v3683_v22  ;;  %12373 = vmatprep.subr.bf16.mxu0 %v19816_v53  ;;  %v20047_v29 = vld [vmem:[#allocation65_spill] sm:$0xff]  ;;  %v20048_v22 = vmax.f32 %v15361_v40, %v15498_v14  ;;  %v20050_v14 = vld [vmem:[#allocation42_spill] sm:$0xff] }
 0x2cb   :  { %v3635_v46 = vpop.f32.mrb[226].mxu0 }
 0x2cc   :  { %v15705_v52 = vpop.f32.mrb[36].mxu1  ;;  %v3684_v63 = vmax.f32 %v15592_v34, %v3635_v46  ;;  %5957 = vmatmul.mubr.f32.gmra.mrb[76].mxu0 %v20046_v38  ;;  %v3637_v23 = vpop.f32.mrb[227].mxu0  ;;  %v6471_v34 = vld [vmem:[%s19495_s2 + $0x2b0] sm:$0xff]  ;;  %v6472_v46 = vld [vmem:[%s19495_s2 + $0x2b8] sm:$0xff]  ;;  %v20049_v38 = vld [vmem:[#allocation43_spill] sm:$0xff] }
 0x2cd   :  { %v1194_v3 = vpop.f32.mrb[37].mxu1  ;;  %10655 = vmatprep.mubr.msk.f32.mxu0 %vm128_vm0, %v20047_v29  ;;  %12375 = vmatpush1.bf16.msra.mxu0 %v15693_v30  ;;  %v3755_v23 = vadd.f32 %v20049_v38, %v3692_v55  ;;  %v15733_v30 = vpack.c.bf16 %v6472_v46, %v6471_v34  ;;  %v20052_v55 = vmax.f32 %v15376_v44, %v15515_v15  ;;  %v20055_v46 = vld [vmem:[#allocation46_spill] sm:$0xff] }
 0x2ce   :  { %v3693_v8 = vmax.f32 %v20048_v22, %v3684_v63  ;;  %12376 = vmatprep.subr.bf16.mxu0 %v19816_v53  ;;  %v20051_v22 = vld [vmem:[#allocation66_spill] sm:$0xff]  ;;  %v20054_v15 = vmax.f32 %v15391_v2, %v15531_v48  ;;  %v20057_v48 = vmax.f32 %v15406_v6, %v15538_v51  ;;  %v20060_v51 = vld [vmem:[#allocation51_spill] sm:$0xff] }
 0x2cf   :  { %v3640_v3 = vpop.f32.mrb[228].mxu0 }
 0x2d0   :  { %v15725_v29 = vpop.f32.mrb[38].mxu1  ;;  %v3685_v47 = vmax.f32 %v15603_v36, %v3640_v3  ;;  %5962 = vmatmul.mubr.f32.gmra.mrb[78].mxu0 %v15183_v5  ;;  %v3642_v40 = vpop.f32.mrb[229].mxu0  ;;  %v3756_v31 = vadd.f32 %v20050_v14, %v3693_v8  ;;  %v3764_v36 = vmax.f32 %v3755_v23, 0.0 }
 0x2d1   :  { %v1199_v63 = vpop.f32.mrb[39].mxu1  ;;  %10656 = vmatprep.mubr.msk.f32.mxu0 %vm128_vm0, %v20051_v22  ;;  %12378 = vmatpush1.bf16.msra.mxu0 %v15712_v28  ;;  %v20056_v22 = vld [vmem:[#allocation44_spill] sm:$0xff] }
 0x2d2   :  { %v3694_v38 = vmax.f32 %v20052_v55, %v3685_v47  ;;  %12379 = vmatprep.subr.bf16.mxu0 %v19816_v53  ;;  %v3765_v3 = vmax.f32 %v3756_v31, 0.0 }
 0x2d3   :  { %v3645_v5 = vpop.f32.mrb[230].mxu0 }
 0x2d4   :  { %v15739_v40 = vpop.f32.mrb[40].mxu1  ;;  %v3686_v8 = vmax.f32 %v15614_v61, %v3645_v5  ;;  %5967 = vmatmul.mubr.f32.gmra.mrb[80].mxu0 %v15212_v17  ;;  %v3647_v14 = vpop.f32.mrb[231].mxu0  ;;  %v15743_v63 = vpack.c.bf16 %v3765_v3, %v3764_v36  ;;  %v3757_v23 = vadd.f32 %v20055_v46, %v3694_v38  ;;  %v20062_v46 = vld [vmem:[#allocation60_spill] sm:$0xff] }
 0x2d5   :  { %v1204_v34 = vpop.f32.mrb[41].mxu1  ;;  %10657 = vmatprep.mubr.msk.f32.mxu0 %vm128_vm0, %v15220_v49  ;;  %12381 = vmatpush1.bf16.msra.mxu0 %v15733_v30 }
 0x2d6   :  { %20053 = vst [vmem:[#allocation96_spill] sm:$0xff] %v15743_v63  ;;  %v3695_v44 = vmax.f32 %v20054_v15, %v3686_v8  ;;  %12450 = vmatprep.subr.bf16.mxu0 %v19816_v53  ;;  %v3766_v36 = vmax.f32 %v3757_v23, 0.0 }
 0x2d7   :  { %v3650_v61 = vpop.f32.mrb[232].mxu0 }
 0x2d8   :  { %v15753_v47 = vpop.f32.mrb[42].mxu1  ;;  %v3687_v17 = vmax.f32 %v15625_v26, %v3650_v61  ;;  %5972 = vmatmul.mubr.f32.gmra.mrb[82].mxu0 %v15235_v57  ;;  %v3652_v31 = vpop.f32.mrb[233].mxu0  ;;  %v3758_v49 = vadd.f32 %v20056_v22, %v3695_v44  ;;  %v20061_v44 = vld [vmem:[#allocation105_spill] sm:$0xff] }
 0x2d9   :  { %v1209_v55 = vpop.f32.mrb[43].mxu1  ;;  %10658 = vmatprep.mubr.msk.f32.mxu0 %vm128_vm0, %v15243_v19  ;;  %v20059_v19 = vmax.f32 %v15421_v33, %v15545_v10  ;;  %v20064_v31 = vld [vmem:[#allocation50_spill] sm:$0xff]  ;;  %v20065_v33 = vmax.f32 %v15436_v45, %v15552_v42 }
 0x2da   :  { %v3696_v2 = vmax.f32 %v20057_v48, %v3687_v17  ;;  %v3767_v38 = vmax.f32 %v3758_v49, 0.0 }
 0x2db   :  { %v3655_v3 = vpop.f32.mrb[234].mxu0 }
 0x2dc   :  { %v1212_v5 = vpop.f32.mrb[44].mxu1  ;;  %v3688_v8 = vmax.f32 %v15636_v50, %v3655_v3  ;;  %5977 = vmatmul.mubr.f32.gmra.mrb[84].mxu0 %v15256_v20  ;;  %v3657_v57 = vpop.f32.mrb[235].mxu0  ;;  %v15765_v26 = vpack.c.bf16 %v3767_v38, %v3766_v36  ;;  %v3759_v15 = vadd.f32 %v20060_v51, %v3696_v2  ;;  %v20063_v50 = vmax.f32 %v20061_v44, %v20062_v46  ;;  %v20066_v2 = vld [vmem:[#allocation106_spill] sm:$0xff]  ;;  %v20067_v36 = vld [vmem:[#allocation48_spill] sm:$0xff]  ;;  %v20069_v3 = vld [vmem:[#allocation15_spill] sm:$0xff] }
 0x2dd   :  { %v1265_v14 = vmax.f32 %v15638_v37, %v1212_v5  ;;  %v1214_v34 = vpop.f32.mrb[45].mxu1  ;;  %10659 = vmatprep.mubr.msk.f32.mxu0 %vm128_vm0, %v15264_v25  ;;  %v20073_v51 = vld [vmem:[#allocation57_spill] sm:$0xff] }
 0x2de   :  { %20058 = vst [vmem:[#allocation97_spill] sm:$0xff] %v15765_v26  ;;  %v3697_v6 = vmax.f32 %v20059_v19, %v3688_v8  ;;  %v3768_v55 = vmax.f32 %v3759_v15, 0.0  ;;  %v20072_v19 = vmax.f32 %v15451_v59, %v15559_v32  ;;  %v20075_v44 = vld [vmem:[#allocation49_spill] sm:$0xff] }
 0x2df   :  { %v1274_v23 = vmax.f32 %v20063_v50, %v1265_v14  ;;  %v3660_v20 = vpop.f32.mrb[236].mxu0  ;;  %v20071_v14 = vld [vmem:[#allocation17_spill] sm:$0xff] }
 0x2e0   :  { %v1217_v61 = vpop.f32.mrb[46].mxu1  ;;  %v3689_v17 = vmax.f32 %v15645_v60, %v3660_v20  ;;  %5982 = vmatmul.mubr.f32.gmra.mrb[86].mxu0 %v15275_v41  ;;  %v3662_v37 = vpop.f32.mrb[237].mxu0  ;;  %v3760_v22 = vadd.f32 %v20064_v31, %v3697_v6  ;;  %v20068_v60 = vmax.f32 %v20066_v2, %v20067_v36 }
 0x2e1   :  { %v1266_v25 = vmax.f32 %v15647_v54, %v1217_v61  ;;  %v1219_v49 = vpop.f32.mrb[47].mxu1  ;;  %10660 = vmatprep.mubr.msk.f32.mxu0 %vm128_vm0, %v15283_v16  ;;  %v1337_v5 = vadd.f32 %v20069_v3, %v1274_v23 }
 0x2e2   :  { %v3698_v10 = vmax.f32 %v20065_v33, %v3689_v17  ;;  %v3769_v48 = vmax.f32 %v3760_v22, 0.0  ;;  %v20077_v17 = vld [vmem:[#allocation56_spill] sm:$0xff]  ;;  %v20078_v22 = vmax.f32 %v15466_v21, %v15571_v62 }
 0x2e3   :  { %v1275_v38 = vmax.f32 %v20068_v60, %v1266_v25  ;;  %v3665_v41 = vpop.f32.mrb[238].mxu0  ;;  %v1346_v23 = vmax.f32 %v1337_v5, 0.0  ;;  %v20087_v5 = vmax.f32 %v14574_v18, %v15585_v27  ;;  %v20091_v27 = vld [vmem:[#allocation18_spill] sm:$0xff] }
 0x2e4   :  { %v1222_v8 = vpop.f32.mrb[48].mxu1  ;;  %v3690_v54 = vmax.f32 %v15654_v13, %v3665_v41  ;;  %5987 = vmatmul.mubr.f32.gmra.mrb[88].mxu0 %v15294_v1  ;;  %v3667_v57 = vpop.f32.mrb[239].mxu0  ;;  %v15792_v16 = vpack.c.bf16 %v3769_v48, %v3768_v55  ;;  %v3761_v15 = vadd.f32 %v20073_v51, %v3698_v10  ;;  %v20074_v13 = vld [vmem:[#allocation55_spill] sm:$0xff]  ;;  %v20081_v10 = vld [vmem:[#allocation4_spill] sm:$0xff]  ;;  %v20090_v51 = vmax.f32 %v14599_v0, %v15594_v12 }
 0x2e5   :  { %v1267_v45 = vmax.f32 %v15656_v9, %v1222_v8  ;;  %v1224_v42 = vpop.f32.mrb[49].mxu1  ;;  %10661 = vmatprep.mubr.msk.f32.mxu0 %vm128_vm0, %v15302_v7  ;;  %v1338_v34 = vadd.f32 %v20071_v14, %v1275_v38  ;;  %v20076_v1 = vmax.f32 %v20074_v13, %v20075_v44  ;;  %v20083_v48 = vld [vmem:[#allocation16_spill] sm:$0xff]  ;;  %v20085_v38 = vld [vmem:[#allocation69_spill] sm:$0xff]  ;;  %v20086_v41 = vld [vmem:[#allocation19_spill] sm:$0xff] }
 0x2e6   :  { %20070 = vst [vmem:[#allocation98_spill] sm:$0xff] %v15792_v16  ;;  %v3699_v6 = vmax.f32 %v20072_v19, %v3690_v54  ;;  %v3770_v49 = vmax.f32 %v3761_v15, 0.0  ;;  %v20088_v42 = vld [vmem:[#allocation11_spill] sm:$0xff]  ;;  %v20095_v0 = vld [vmem:[#allocation92_spill] sm:$0xff]  ;;  %v8076_v16 = vld [vmem:[%s19495_s2 + $0x2f8] sm:$0xff] }
 0x2e7   :  { %v1276_v46 = vmax.f32 %v20076_v1, %v1267_v45  ;;  %v3670_v50 = vpop.f32.mrb[240].mxu0  ;;  %v1347_v20 = vmax.f32 %v1338_v34, 0.0  ;;  %v20092_v1 = vld [vmem:[#allocation72_spill] sm:$0xff]  ;;  %v20096_v12 = vmax.f32 %v14624_v4, %v20095_v0  ;;  %v10276_v0 = vld [vmem:[%s19500_s3 + $0x98] sm:$0xff] }
 0x2e8   :  { %v1227_v9 = vpop.f32.mrb[50].mxu1  ;;  %v3691_v61 = vmax.f32 %v15669_v24, %v3670_v50  ;;  %5992 = vmatmul.mubr.f32.gmra.mrb[90].mxu0 %v15313_v58  ;;  %v3672_v7 = vpop.f32.mrb[241].mxu0  ;;  %v3762_v37 = vadd.f32 %v20077_v17, %v3699_v6  ;;  %v20080_v24 = vld [vmem:[#allocation45_spill] sm:$0xff]  ;;  %v20089_v6 = vld [vmem:[#allocation71_spill] sm:$0xff] }
 0x2e9   :  { %v1268_v59 = vmax.f32 %v15671_v39, %v1227_v9  ;;  %v1229_v32 = vpop.f32.mrb[51].mxu1  ;;  %v12018_v31 = vpack.c.bf16 %v1347_v20, %v1346_v23  ;;  %10662 = vmatprep.mubr.msk.f32.mxu0 %vm128_vm0, %v15321_v56  ;;  %v20082_v58 = vmax.f32 %v20080_v24, %v20081_v10  ;;  %v1339_v2 = vadd.f32 %v20083_v48, %v1276_v46  ;;  %v20093_v23 = vld [vmem:[#allocation12_spill] sm:$0xff]  ;;  %v20094_v20 = vld [vmem:[#allocation21_spill] sm:$0xff]  ;;  %v20099_v24 = vld [vmem:[#allocation47_spill] sm:$0xff] }
 0x2ea   :  { %v15814_v25 = vmax.f32 %v20078_v22, %v3691_v61  ;;  %v3771_v33 = vmax.f32 %v3762_v37, 0.0  ;;  %v20097_v32 = vld [vmem:[#allocation73_spill] sm:$0xff] }
 0x2eb   :  { %v1277_v55 = vmax.f32 %v20082_v58, %v1268_v59  ;;  %12019 = vmatprep.subr.bf16.mxu1 %v12018_v31  ;;  %v15820_v39 = vpop.f32.mrb[242].mxu0  ;;  %v1348_v54 = vmax.f32 %v1339_v2, 0.0  ;;  %v20100_v10 = vld [vmem:[#allocation93_spill] sm:$0xff] }
 0x2ec   :  { %20079 = vst [vmem:[#allocation99_spill] sm:$0xff] %v15814_v25  ;;  %v1232_v36 = vpop.f32.mrb[52].mxu1  ;;  %12021 = vmatpush3.bf16.msra.mxu1 %v12018_v31  ;;  %5997 = vmatmul.mubr.f32.gmra.mrb[92].mxu0 %v15332_v43  ;;  %v4303_v56 = vpop.f32.mrb[243].mxu0  ;;  %v15823_v60 = vpack.c.bf16 %v3771_v33, %v3770_v49  ;;  %v20098_v33 = vld [vmem:[#allocation74_spill] sm:$0xff]  ;;  %v20101_v58 = vmax.f32 %v20099_v24, %v20100_v10  ;;  %v20121_v24 = vld [vmem:[#allocation83_spill] sm:$0xff]  ;;  %v8074_v10 = vld [vmem:[%s19495_s2 + $0x2e8] sm:$0xff] }
 0x2ed   :  { %v1269_v21 = vmax.f32 %v15686_v35, %v1232_v36  ;;  %v1234_v62 = vpop.f32.mrb[53].mxu1  ;;  %10663 = vmatprep.mubr.msk.f32.mxu0 %vm128_vm0, %v20085_v38  ;;  %v1340_v3 = vadd.f32 %v20086_v41, %v1277_v55  ;;  %v20102_v55 = vld [vmem:[#allocation20_spill] sm:$0xff]  ;;  %v20103_v56 = vld [vmem:[#allocation13_spill] sm:$0xff]  ;;  %v20104_v38 = vld [vmem:[#allocation75_spill] sm:$0xff] }
 0x2ee   :  { %20084 = vst [vmem:[#allocation100_spill] sm:$0xff] %v15823_v60  ;;  %v20105_v41 = vld [vmem:[#allocation23_spill] sm:$0xff]  ;;  %v2441_v60 = vld [vmem:[%s19495_s2 + $0x170] sm:$0xff]  ;;  %v2442_v25 = vld [vmem:[%s19495_s2 + $0x178] sm:$0xff] }
 0x2ef   :  { %v1278_v8 = vmax.f32 %v20087_v5, %v1269_v21  ;;  %v1349_v57 = vmax.f32 %v1340_v3, 0.0  ;;  %v15832_v45 = vpop.f32.mrb[244].mxu0  ;;  %v20106_v5 = vld [vmem:[#allocation3_spill] sm:$0xff] }
 0x2f0   :  { %v1237_v43 = vpop.f32.mrb[54].mxu1  ;;  %6002 = vmatmul.mubr.f32.gmra.mrb[94].mxu0 %v20088_v42  ;;  %v4308_v14 = vpop.f32.mrb[245].mxu0 }
 0x2f1   :  { %v1270_v35 = vmax.f32 %v15705_v52, %v1237_v43  ;;  %v1239_v34 = vpop.f32.mrb[55].mxu1  ;;  %v12022_v19 = vpack.c.bf16 %v1349_v57, %v1348_v54  ;;  %10664 = vmatprep.mubr.msk.f32.mxu0 %vm128_vm0, %v20089_v6  ;;  %v1341_v15 = vadd.f32 %v20091_v27, %v1278_v8  ;;  %v20107_v8 = vld [vmem:[#allocation94_spill] sm:$0xff] }
 0x2f2   :  { %v20108_v54 = vmax.f32 %v20106_v5, %v20107_v8  ;;  %v20110_v6 = vld [vmem:[#allocation14_spill] sm:$0xff] }
 0x2f3   :  { %v1279_v18 = vmax.f32 %v20090_v51, %v1270_v35  ;;  %12023 = vmatprep.subr.bf16.mxu1 %v12022_v19  ;;  %v15842_v13 = vpop.f32.mrb[246].mxu0  ;;  %v1350_v7 = vmax.f32 %v1341_v15, 0.0  ;;  %v20109_v35 = vld [vmem:[#allocation76_spill] sm:$0xff]  ;;  %v20112_v15 = vld [vmem:[#allocation77_spill] sm:$0xff]  ;;  %v20127_v8 = vld [vmem:[#allocation86_spill] sm:$0xff] }
 0x2f4   :  { %v1242_v44 = vpop.f32.mrb[56].mxu1  ;;  %12025 = vmatpush3.bf16.msra.mxu1 %v12022_v19  ;;  %6007 = vmatmul.mubr.f32.gmra.mrb[96].mxu0 %v20092_v1  ;;  %v4313_v46 = vpop.f32.mrb[247].mxu0  ;;  %v20113_v1 = vld [vmem:[#allocation78_spill] sm:$0xff] }
 0x2f5   :  { %v1271_v52 = vmax.f32 %v15725_v29, %v1242_v44  ;;  %v1244_v50 = vpop.f32.mrb[57].mxu1  ;;  %10665 = vmatprep.mubr.msk.f32.mxu0 %vm128_vm0, %v20093_v23  ;;  %v1342_v9 = vadd.f32 %v20094_v20, %v1279_v18  ;;  %v10274_v46 = vld [vmem:[%s19500_s3 + $0x88] sm:$0xff]  ;;  %v20114_v23 = vld [vmem:[#allocation79_spill] sm:$0xff] }
 0x2f7   :  { %v1280_v61 = vmax.f32 %v20096_v12, %v1271_v52  ;;  %v1351_v17 = vmax.f32 %v1342_v9, 0.0  ;;  %v15852_v37 = vpop.f32.mrb[248].mxu0  ;;  %v10275_v52 = vld [vmem:[%s19500_s3 + $0x90] sm:$0xff]  ;;  %v20116_v12 = vld [vmem:[#allocation67_spill] sm:$0xff] }
 0x2f8   :  { %v1247_v59 = vpop.f32.mrb[58].mxu1  ;;  %6012 = vmatmul.mubr.f32.gmra.mrb[98].mxu0 %v20097_v32  ;;  %v4318_v31 = vpop.f32.mrb[249].mxu0  ;;  %v20115_v9 = vld [vmem:[#allocation9_spill] sm:$0xff] }
 0x2f9   :  { %v1272_v29 = vmax.f32 %v15739_v40, %v1247_v59  ;;  %v1249_v22 = vpop.f32.mrb[59].mxu1  ;;  %v12026_v49 = vpack.c.bf16 %v1351_v17, %v1350_v7  ;;  %10666 = vmatprep.mubr.msk.f32.mxu0 %vm128_vm0, %v20098_v33  ;;  %v1343_v48 = vadd.f32 %v20102_v55, %v1280_v61  ;;  %v20117_v61 = vld [vmem:[#allocation80_spill] sm:$0xff]  ;;  %v10277_v7 = vld [vmem:[%s19500_s3 + $0xa0] sm:$0xff]  ;;  %v20118_v59 = vld [vmem:[#allocation81_spill] sm:$0xff] }
 0x2fa   :  { %v20119_v31 = vld [vmem:[#allocation82_spill] sm:$0xff]  ;;  %v20120_v22 = vld [vmem:[#allocation68_spill] sm:$0xff] }
 0x2fb   :  { %v1281_v4 = vmax.f32 %v20101_v58, %v1272_v29  ;;  %12027 = vmatprep.subr.bf16.mxu1 %v12026_v49  ;;  %v15862_v2 = vpop.f32.mrb[250].mxu0  ;;  %v1352_v43 = vmax.f32 %v1343_v48, 0.0  ;;  %v10278_v29 = vld [vmem:[%s19500_s3 + $0xa8] sm:$0xff]  ;;  %v20123_v55 = vld [vmem:[#allocation10_spill] sm:$0xff]  ;;  %v20124_v48 = vld [vmem:[#allocation33_spill] sm:$0xff] }
 0x2fc   :  { %v1252_v36 = vpop.f32.mrb[60].mxu1  ;;  %12029 = vmatpush3.bf16.msra.mxu1 %v12026_v49  ;;  %6017 = vmatmul.mubr.f32.gmra.mrb[100].mxu0 %v20103_v56  ;;  %v4323_v21 = vpop.f32.mrb[251].mxu0  ;;  %v10279_v49 = vld [vmem:[%s19500_s3 + $0xb0] sm:$0xff]  ;;  %v10280_v56 = vld [vmem:[%s19500_s3 + $0xb8] sm:$0xff] }
 0x2fd   :  { %v1273_v40 = vmax.f32 %v15753_v47, %v1252_v36  ;;  %v1254_v62 = vpop.f32.mrb[61].mxu1  ;;  %10667 = vmatprep.mubr.msk.f32.mxu0 %vm128_vm0, %v20104_v38  ;;  %v1344_v3 = vadd.f32 %v20105_v41, %v1281_v4  ;;  %v20111_v47 = vld [vmem:[#allocation22_spill] sm:$0xff]  ;;  %v20122_v4 = vld [vmem:[#allocation84_spill] sm:$0xff]  ;;  %v2151_v36 = vadd.f32 %v20124_v48, %v20123_v55  ;;  %v20126_v38 = vld [vmem:[#allocation85_spill] sm:$0xff] }
 0x2fe   :  { %v20125_v21 = vld [vmem:[#allocation70_spill] sm:$0xff] }
 0x2ff   :  { %v1282_v57 = vmax.f32 %v20108_v54, %v1273_v40  ;;  %v1353_v42 = vmax.f32 %v1344_v3, 0.0  ;;  %v15872_v14 = vpop.f32.mrb[252].mxu0  ;;  %v10281_v40 = vld [vmem:[%s19500_s3 + $0xc0] sm:$0xff]  ;;  %v2160_v5 = vmax.f32 %v2151_v36, 0.0  ;;  %v10282_v54 = vld [vmem:[%s19500_s3 + $0xc8] sm:$0xff]  ;;  %v16052_v48 = vld [vmem:[%s19496_s0 + $0x218] sm:$0xff] }
 0x300   :  { %6022 = vmatmul.mubr.f32.gmra.mrb[102].mxu0 %v20109_v35  ;;  %v4328_v34 = vpop.f32.mrb[253].mxu0  ;;  %v2421_v36 = vld [vmem:[%s19495_s2 + $0xd0] sm:$0xff]  ;;  %v2440_v35 = vld [vmem:[%s19495_s2 + $0x168] sm:$0xff] }
 0x301   :  { %v12030_v19 = vpack.c.bf16 %v1353_v42, %v1352_v43  ;;  %10668 = vmatprep.mubr.msk.f32.mxu0 %vm128_vm0, %v20110_v6  ;;  %v1345_v51 = vadd.f32 %v20111_v47, %v1282_v57  ;;  %v10283_v57 = vld [vmem:[%s19500_s3 + $0xd0] sm:$0xff]  ;;  %v20128_v42 = vld [vmem:[#allocation87_spill] sm:$0xff]  ;;  %v10284_v6 = vld [vmem:[%s19500_s3 + $0xd8] sm:$0xff] }
 0x302   :  { %v15970_v47 = vld [vmem:[%s19496_s0 + $0x1e8] sm:$0xff] }
 0x303   :  { %12031 = vmatprep.subr.bf16.mxu1 %v12030_v19  ;;  %v1354_v18 = vmax.f32 %v1345_v51, 0.0  ;;  %v15878_v27 = vpop.f32.mrb[254].mxu0  ;;  %v10285_v51 = vld [vmem:[%s19500_s3 + $0xe0] sm:$0xff] }
 0x304   :  { %12033 = vmatpush3.bf16.msra.mxu1 %v12030_v19  ;;  %6027 = vmatmul.mubr.f32.gmra.mrb[104].mxu0 %v20112_v15  ;;  %v4333_v44 = vpop.f32.mrb[255].mxu0  ;;  %v20129_v19 = vld [vmem:[#allocation88_spill] sm:$0xff]  ;;  %v20130_v15 = vld [vmem:[#allocation89_spill] sm:$0xff] }
 0x305   :  { %11393 = vmatprep.subr.mxu1 %v1354_v18  ;;  %10669 = vmatprep.mubr.msk.f32.mxu0 %vm128_vm0, %v20113_v1  ;;  %v8072_v44 = vld [vmem:[%s19495_s2 + $0x2d8] sm:$0xff] }
 0x307   :  { %v15889_v50 = vpop.f32.mrb[0].mxu0 }
 0x308   :  { %11394 = vmatpush3.msra.mxu1 %v1354_v18  ;;  %6032 = vmatmul.mubr.f32.gmra.mrb[106].mxu0 %v20114_v23  ;;  %v4338_v20 = vpop.f32.mrb[1].mxu0  ;;  %v15996_v23 = vld [vmem:[%s19496_s0 + $0x1f8] sm:$0xff] }
 0x309   :  { %11396 = vmatmul.mubr.msk.f32.vlgmr.msra.gmra.mrb[0].mxu1 %vm597_vm1, %v10274_v46  ;;  %12071 = vmatprep.subr.bf16.mxu1 %v20115_v9  ;;  %v15987_v46 = vld [vmem:[%s19496_s0 + $0x1e0] sm:$0xff]  ;;  %v10287_v20 = vld [vmem:[%s19500_s3 + $0xf0] sm:$0xff] }
 0x30a   :  { %12073 = vmatpush3.bf16.msra.mxu1 %v20115_v9  ;;  %11398 = vmatprep.mubr.msk.f32.mxu1 %vm597_vm1, %v10275_v52  ;;  %v10286_v52 = vld [vmem:[%s19500_s3 + $0xe8] sm:$0xff] }
 0x30b   :  { %12075 = vmatprep.subr.bf16.mxu1 %v20116_v12  ;;  %10670 = vmatprep.mubr.msk.f32.mxu0 %vm128_vm0, %v20117_v61  ;;  %v15905_v17 = vpop.f32.mrb[2].mxu0  ;;  %v16012_v61 = vld [vmem:[%s19496_s0 + $0x1f0] sm:$0xff] }
 0x30c   :  { %6037 = vmatmul.mubr.f32.gmra.mrb[108].mxu0 %v20118_v59  ;;  %v4343_v32 = vpop.f32.mrb[3].mxu0  ;;  %v16021_v59 = vld [vmem:[%s19496_s0 + $0x208] sm:$0xff] }
 0x30d   :  { %11399 = vmatmul.mubr.msk.f32.gmra.mrb[2].mxu1 %vm597_vm1, %v10276_v0  ;;  %10671 = vmatprep.mubr.msk.f32.mxu0 %vm128_vm0, %v20119_v31  ;;  %v10341_v32 = vld [vmem:[%s19500_s3 + $0x100] sm:$0xff]  ;;  %v8071_v0 = vld [vmem:[%s19495_s2 + $0x2d0] sm:$0xff] }
 0x30e   :  { %12077 = vmatpush3.bf16.msra.mxu1 %v20116_v12  ;;  %11401 = vmatprep.mubr.msk.f32.mxu1 %vm597_vm1, %v10277_v7  ;;  %v10288_v7 = vld [vmem:[%s19500_s3 + $0xf8] sm:$0xff]  ;;  %v2419_v31 = vld [vmem:[%s19495_s2 + $0xc0] sm:$0xff] }
 0x30f   :  { %12079 = vmatprep.subr.bf16.mxu1 %v20120_v22  ;;  %v15920_v33 = vpop.f32.mrb[4].mxu0 }
 0x310   :  { %6042 = vmatmul.mubr.f32.gmra.mrb[110].mxu0 %v20121_v24  ;;  %v4348_v58 = vpop.f32.mrb[5].mxu0 }
 0x311   :  { %11402 = vmatmul.mubr.msk.f32.gmra.mrb[4].mxu1 %vm597_vm1, %v10278_v29  ;;  %10672 = vmatprep.mubr.msk.f32.mxu0 %vm128_vm0, %v20122_v4  ;;  %v2420_v29 = vld [vmem:[%s19495_s2 + $0xc8] sm:$0xff]  ;;  %v16043_v58 = vld [vmem:[%s19496_s0 + $0x200] sm:$0xff] }
 0x312   :  { %12081 = vmatpush3.bf16.msra.mxu1 %v20120_v22  ;;  %11404 = vmatprep.mubr.msk.f32.mxu1 %vm597_vm1, %v10279_v49  ;;  %v10342_v4 = vld [vmem:[%s19500_s3 + $0x108] sm:$0xff]  ;;  %v12087_v55 = vpack.c.bf16 %v2420_v29, %v2419_v31  ;;  %v2437_v49 = vld [vmem:[%s19495_s2 + $0x150] sm:$0xff] }
 0x313   :  { %12083 = vmatprep.subr.bf16.mxu1 %v20125_v21  ;;  %v15939_v62 = vpop.f32.mrb[6].mxu0 }
 0x314   :  { %6047 = vmatmul.mubr.f32.gmra.mrb[112].mxu0 %v20126_v38  ;;  %v4353_v3 = vpop.f32.mrb[7].mxu0  ;;  %v16292_v38 = vld [vmem:[%s19496_s0 + $0x58] sm:$0xff] }
 0x315   :  { %11405 = vmatmul.mubr.msk.f32.gmra.mrb[6].mxu1 %vm597_vm1, %v10280_v56  ;;  %10673 = vmatprep.mubr.msk.f32.mxu0 %vm128_vm0, %v20127_v8  ;;  %v2422_v56 = vld [vmem:[%s19495_s2 + $0xd8] sm:$0xff] }
 0x316   :  { %12085 = vmatpush3.bf16.msra.mxu1 %v20125_v21  ;;  %11407 = vmatprep.mubr.msk.f32.mxu1 %vm597_vm1, %v10281_v40  ;;  %v10343_v21 = vld [vmem:[%s19500_s3 + $0x110] sm:$0xff]  ;;  %v12090_v8 = vpack.c.bf16 %v2422_v56, %v2421_v36  ;;  %v16133_v36 = vld [vmem:[%s19496_s0 + $0x8] sm:$0xff]  ;;  %v10348_v56 = vld [vmem:[%s19500_s3 + $0x138] sm:$0xff] }
 0x317   :  { %11435 = vmatprep.subr.mxu1 %v2160_v5  ;;  %v15955_v43 = vpop.f32.mrb[8].mxu0  ;;  %20135 = vst [vmem:[#allocation104_spill] sm:$0xff] %v16133_v36 }
 0x318   :  { %6052 = vmatmul.mubr.f32.gmra.mrb[114].mxu0 %v20128_v42  ;;  %v4358_v34 = vpop.f32.mrb[9].mxu0  ;;  %v2423_v42 = vld [vmem:[%s19495_s2 + $0xe0] sm:$0xff] }
 0x319   :  { %11408 = vmatmul.mubr.msk.f32.gmra.mrb[8].mxu1 %vm597_vm1, %v10282_v54  ;;  %10674 = vmatprep.mubr.msk.f32.mxu0 %vm128_vm0, %v20129_v19  ;;  %v16079_v54 = vld [vmem:[%s19496_s0 + $0x228] sm:$0xff]  ;;  %v10345_v19 = vld [vmem:[%s19500_s3 + $0x120] sm:$0xff] }
 0x31a   :  { %11436 = vmatpush3.msra.mxu1 %v2160_v5  ;;  %11410 = vmatprep.mubr.msk.f32.mxu1 %vm597_vm1, %v10283_v57  ;;  %v16074_v5 = vld [vmem:[%s19496_s0 + $0x210] sm:$0xff]  ;;  %20132 = vst [vmem:[#allocation102_spill] sm:$0xff] %v16079_v54  ;;  %v10344_v57 = vld [vmem:[%s19500_s3 + $0x118] sm:$0xff]  ;;  %v2424_v34 = vld [vmem:[%s19495_s2 + $0xe8] sm:$0xff] }
 0x31b   :  { %12086 = vmatprep.subr.bf16.mxu1 %v19816_v53  ;;  %v15976_v18 = vpop.f32.mrb[10].mxu0  ;;  %20131 = vst [vmem:[#allocation101_spill] sm:$0xff] %v16074_v5 }
 0x31c   :  { %6057 = vmatmul.mubr.f32.gmra.mrb[116].mxu0 %v20130_v15  ;;  %v4363_v1 = vpop.f32.mrb[11].mxu0 }
 0x31d   :  { %11411 = vmatmul.mubr.msk.f32.gmra.mrb[10].mxu1 %vm597_vm1, %v10284_v6  ;;  %10675 = vmatprep.mubr.msk.f32.mxu0 %vm128_vm0, %v15970_v47  ;;  %v16105_v1 = vld [vmem:[%s19496_s0 + $0x220] sm:$0xff] }
 0x31e   :  { %11413 = vmatprep.mubr.msk.f32.mxu1 %vm597_vm1, %v10285_v51  ;;  %20133 = vst [vmem:[#allocation103_spill] sm:$0xff] %v16105_v1  ;;  %v2435_v51 = vld [vmem:[%s19495_s2 + $0x140] sm:$0xff] }
 0x31f   :  { %v16001_v9 = vpop.f32.mrb[12].mxu0 }
 0x320   :  { %6062 = vmatmul.mubr.f32.gmra.mrb[118].mxu0 %v15987_v46  ;;  %v4368_v12 = vpop.f32.mrb[13].mxu0 }
 0x321   :  { %11414 = vmatmul.mubr.msk.f32.gmra.mrb[12].mxu1 %vm597_vm1, %v10286_v52  ;;  %10676 = vmatprep.mubr.msk.f32.mxu0 %vm128_vm0, %v15996_v23  ;;  %v12093_v52 = vpack.c.bf16 %v2424_v34, %v2423_v42  ;;  %v2425_v12 = vld [vmem:[%s19495_s2 + $0xf0] sm:$0xff]  ;;  %v20136_v42 = vld [vmem:[#allocation91_spill] sm:$0xff] }
 0x322   :  { %11416 = vmatprep.mubr.msk.f32.mxu1 %vm597_vm1, %v10287_v20  ;;  %v10346_v20 = vld [vmem:[%s19500_s3 + $0x128] sm:$0xff] }
 0x323   :  { %v16032_v22 = vpop.f32.mrb[14].mxu0 }
 0x324   :  { %6067 = vmatmul.mubr.f32.gmra.mrb[120].mxu0 %v16012_v61  ;;  %v4373_v24 = vpop.f32.mrb[15].mxu0 }
 0x325   :  { %11417 = vmatmul.mubr.msk.f32.gmra.mrb[14].mxu1 %vm597_vm1, %v10288_v7  ;;  %10677 = vmatprep.mubr.msk.f32.mxu0 %vm128_vm0, %v16021_v59  ;;  %v2426_v7 = vld [vmem:[%s19495_s2 + $0xf8] sm:$0xff] }
 0x326   :  { %11437 = vmatprep.mubr.msk.f32.mxu1 %vm597_vm1, %v10341_v32  ;;  %v10347_v32 = vld [vmem:[%s19500_s3 + $0x130] sm:$0xff] }
 0x327   :  { %v16063_v40 = vpop.f32.mrb[16].mxu0 }
 0x328   :  { %6072 = vmatmul.mubr.f32.gmra.mrb[122].mxu0 %v16043_v58  ;;  %v4378_v3 = vpop.f32.mrb[17].mxu0 }
 0x329   :  { %11438 = vmatmul.mubr.msk.f32.vlgmr.msra.gmra.mrb[0].mxu1 %vm597_vm1, %v10342_v4  ;;  %10678 = vmatprep.mubr.msk.f32.mxu0 %vm128_vm0, %v16052_v48  ;;  %v20134_v4 = vld [vmem:[#allocation90_spill] sm:$0xff]  ;;  %v2428_v3 = vld [vmem:[%s19495_s2 + $0x108] sm:$0xff] }
 0x32a   :  { %12088 = vmatpush1.bf16.msra.mxu1 %v12087_v55  ;;  %11440 = vmatprep.mubr.msk.f32.mxu1 %vm597_vm1, %v10343_v21  ;;  %v12096_v55 = vpack.c.bf16 %v2426_v7, %v2425_v12  ;;  %v2427_v21 = vld [vmem:[%s19495_s2 + $0x100] sm:$0xff]  ;;  %v2429_v12 = vld [vmem:[%s19495_s2 + $0x110] sm:$0xff]  ;;  %v2430_v7 = vld [vmem:[%s19495_s2 + $0x118] sm:$0xff] }
 0x32b   :  { %12089 = vmatprep.subr.bf16.mxu1 %v19816_v53  ;;  %v16095_v6 = vpop.f32.mrb[18].mxu0 }
 0x32c   :  { %6077 = vmatmul.mubr.f32.gmra.mrb[124].mxu0 %v16074_v5  ;;  %v4383_v15 = vpop.f32.mrb[19].mxu0 }
 0x32d   :  { %10679 = vmatprep.mubr.msk.f32.mxu0 %vm128_vm0, %v16079_v54  ;;  %11441 = vmatmul.mubr.msk.f32.gmra.mrb[2].mxu1 %vm597_vm1, %v10344_v57  ;;  %v10349_v57 = vld [vmem:[%s19500_s3 + $0x140] sm:$0xff]  ;;  %v12099_v15 = vpack.c.bf16 %v2428_v3, %v2427_v21  ;;  %v16193_v21 = vld [vmem:[%s19496_s0 + $0x28] sm:$0xff]  ;;  %v10352_v3 = vld [vmem:[%s19500_s3 + $0x158] sm:$0xff]  ;;  %v16416_v54 = vpop.permute.xlu0 %3752 }
 0x32e   :  { %12091 = vmatpush1.bf16.msra.mxu1 %v12090_v8  ;;  %11443 = vmatprep.mubr.msk.f32.mxu1 %vm597_vm1, %v10345_v19  ;;  %v16157_v19 = vld [vmem:[%s19496_s0] sm:$0xff]  ;;  %20141 = vst [vmem:[#allocation26_spill] sm:$0xff] %v16416_v54 }
 0x32f   :  { %12092 = vmatprep.subr.bf16.mxu1 %v19816_v53  ;;  %v16122_v31 = vpop.f32.mrb[20].mxu0  ;;  %20137 = vst [vmem:[#allocation25_spill] sm:$0xff] %v16157_v19 }
 0x330   :  { %6082 = vmatmul.mubr.f32.gmra.mrb[126].mxu0 %v16105_v1  ;;  %v4388_v24 = vpop.f32.mrb[21].mxu0  ;;  %v8079_v1 = vld [vmem:[%s19495_s2 + $0x310] sm:$0xff] }
 0x331   :  { %10680 = vmatprep.mubr.msk.f32.mxu0 %vm128_vm0, %v20134_v4  ;;  %11444 = vmatmul.mubr.msk.f32.gmra.mrb[4].mxu1 %vm597_vm1, %v10346_v20  ;;  %v10350_v20 = vld [vmem:[%s19500_s3 + $0x148] sm:$0xff]  ;;  %v10351_v24 = vld [vmem:[%s19500_s3 + $0x150] sm:$0xff] }
 0x332   :  { %12094 = vmatpush1.bf16.msra.mxu1 %v12093_v52  ;;  %11446 = vmatprep.mubr.msk.f32.mxu1 %vm597_vm1, %v10347_v32  ;;  %v16163_v52 = vld [vmem:[%s19496_s0 + $0x18] sm:$0xff] }
 0x333   :  { %12095 = vmatprep.subr.bf16.mxu1 %v19816_v53  ;;  %v16146_v8 = vpop.f32.mrb[22].mxu0  ;;  %20138 = vst [vmem:[#allocation24_spill] sm:$0xff] %v16163_v52 }
 0x334   :  { %6087 = vmatmul.mubr.f32.gmra.mrb[128].mxu0 %v20136_v42  ;;  %v4393_v34 = vpop.f32.mrb[23].mxu0  ;;  %v2432_v42 = vld [vmem:[%s19495_s2 + $0x128] sm:$0xff] }
 0x335   :  { %10713 = vmatprep.mubr.msk.f32.mxu0 %vm128_vm0, %v16133_v36  ;;  %11447 = vmatmul.mubr.msk.f32.gmra.mrb[6].mxu1 %vm597_vm1, %v10348_v56  ;;  %v12102_v56 = vpack.c.bf16 %v2430_v7, %v2429_v12  ;;  %v16219_v12 = vld [vmem:[%s19496_s0 + $0x20] sm:$0xff] }
 0x336   :  { %12097 = vmatpush1.bf16.msra.mxu1 %v12096_v55  ;;  %11449 = vmatprep.mubr.msk.f32.mxu1 %vm597_vm1, %v10349_v57  ;;  %v16187_v55 = vld [vmem:[%s19496_s0 + $0x10] sm:$0xff]  ;;  %v2431_v57 = vld [vmem:[%s19495_s2 + $0x120] sm:$0xff] }
 0x337   :  { %12098 = vmatprep.subr.bf16.mxu1 %v19816_v53  ;;  %v16176_v32 = vpop.f32.mrb[24].mxu0  ;;  %20139 = vst [vmem:[#allocation27_spill] sm:$0xff] %v16187_v55  ;;  %v12105_v7 = vpack.c.bf16 %v2432_v42, %v2431_v57  ;;  %v10355_v57 = vld [vmem:[%s19500_s3 + $0x170] sm:$0xff]  ;;  %v20140_v42 = vld [vmem:[#allocation95_spill] sm:$0xff] }
 0x338   :  { %6718 = vmatmul.mubr.f32.vlgmr.msra.gmra.mrb[130].mxu0 %v16157_v19  ;;  %v4398_v4 = vpop.f32.mrb[25].mxu0 }
 0x339   :  { %10714 = vmatprep.mubr.msk.f32.mxu0 %vm128_vm0, %v16163_v52  ;;  %11450 = vmatmul.mubr.msk.f32.gmra.mrb[8].mxu1 %vm597_vm1, %v10350_v20  ;;  %v2433_v4 = vld [vmem:[%s19495_s2 + $0x130] sm:$0xff] }
 0x33a   :  { %12100 = vmatpush1.bf16.msra.mxu1 %v12099_v15  ;;  %11452 = vmatprep.mubr.msk.f32.mxu1 %vm597_vm1, %v10351_v24  ;;  %v10353_v15 = vld [vmem:[%s19500_s3 + $0x160] sm:$0xff]  ;;  %v10354_v24 = vld [vmem:[%s19500_s3 + $0x168] sm:$0xff] }
 0x33b   :  { %12101 = vmatprep.subr.bf16.mxu1 %v19816_v53  ;;  %v16206_v34 = vpop.f32.mrb[26].mxu0  ;;  %12452 = vmatpush1.bf16.msra.mxu0 %v15677_v11  ;;  %v16225_v11 = vld [vmem:[%s19496_s0 + $0x38] sm:$0xff] }
 0x33c   :  { %6723 = vmatmul.mubr.f32.gmra.mrb[132].mxu0 %v16187_v55  ;;  %v4403_v20 = vpop.f32.mrb[27].mxu0  ;;  %12453 = vmatprep.subr.bf16.mxu0 %v19816_v53 }
 0x33d   :  { %10715 = vmatprep.mubr.msk.f32.mxu0 %vm128_vm0, %v16193_v21  ;;  %11453 = vmatmul.mubr.msk.f32.gmra.mrb[10].mxu1 %vm597_vm1, %v10352_v3  ;;  %v16251_v20 = vld [vmem:[%s19496_s0 + $0x30] sm:$0xff] }
 0x33e   :  { %12103 = vmatpush1.bf16.msra.mxu1 %v12102_v56  ;;  %11455 = vmatprep.mubr.msk.f32.mxu1 %vm597_vm1, %v10353_v15  ;;  %v2434_v56 = vld [vmem:[%s19495_s2 + $0x138] sm:$0xff] }
 0x33f   :  { %12104 = vmatprep.subr.bf16.mxu1 %v19816_v53  ;;  %v16238_v3 = vpop.f32.mrb[28].mxu0  ;;  %12455 = vmatpush1.bf16.msra.mxu0 %v20140_v42  ;;  %v12108_v29 = vpack.c.bf16 %v2434_v56, %v2433_v4  ;;  %v16257_v42 = vld [vmem:[%s19496_s0 + $0x48] sm:$0xff]  ;;  %v8069_v56 = vld [vmem:[%s19495_s2 + $0x2c0] sm:$0xff] }
 0x340   :  { %6728 = vmatmul.mubr.f32.gmra.mrb[134].mxu0 %v16219_v12  ;;  %v4408_v15 = vpop.f32.mrb[29].mxu0  ;;  %12456 = vmatprep.subr.bf16.mxu0 %v19816_v53 }
 0x341   :  { %10716 = vmatprep.mubr.msk.f32.mxu0 %vm128_vm0, %v16225_v11  ;;  %11456 = vmatmul.mubr.msk.f32.gmra.mrb[12].mxu1 %vm597_vm1, %v10354_v24  ;;  %v10356_v15 = vld [vmem:[%s19500_s3 + $0x178] sm:$0xff] }
 0x342   :  { %12106 = vmatpush1.bf16.msra.mxu1 %v12105_v7  ;;  %11458 = vmatprep.mubr.msk.f32.mxu1 %vm597_vm1, %v10355_v57  ;;  %v2436_v7 = vld [vmem:[%s19495_s2 + $0x148] sm:$0xff] }
 0x343   :  { %12107 = vmatprep.subr.bf16.mxu1 %v19816_v53  ;;  %v16270_v24 = vpop.f32.mrb[30].mxu0  ;;  %12458 = vmatpush1.bf16.msra.mxu0 %v15712_v28  ;;  %v8070_v57 = vld [vmem:[%s19495_s2 + $0x2c8] sm:$0xff]  ;;  %v16286_v28 = vld [vmem:[%s19496_s0 + $0x40] sm:$0xff] }
 0x344   :  { %6733 = vmatmul.mubr.f32.gmra.mrb[136].mxu0 %v16251_v20  ;;  %v4413_v4 = vpop.f32.mrb[31].mxu0  ;;  %12459 = vmatprep.subr.bf16.mxu0 %v19816_v53 }
 0x345   :  { %10717 = vmatprep.mubr.msk.f32.mxu0 %vm128_vm0, %v16257_v42  ;;  %11459 = vmatmul.mubr.msk.f32.gmra.mrb[14].mxu1 %vm597_vm1, %v10356_v15  ;;  %v12111_v4 = vpack.c.bf16 %v2436_v7, %v2435_v51  ;;  %v2438_v15 = vld [vmem:[%s19495_s2 + $0x158] sm:$0xff]  ;;  %v12463_v51 = vpack.c.bf16 %v8070_v57, %v8069_v56  ;;  %v16324_v57 = vld [vmem:[%s19496_s0 + $0x68] sm:$0xff] }
 0x346   :  { %12109 = vmatpush1.bf16.msra.mxu1 %v12108_v29  ;;  %10373 = vmatprep.mubr.msk.f32.mxu1 %vm128_vm0, %v16133_v36  ;;  %v12114_v56 = vpack.c.bf16 %v2438_v15, %v2437_v49  ;;  %v8073_v15 = vld [vmem:[%s19495_s2 + $0x2e0] sm:$0xff] }
 0x347   :  { %12110 = vmatprep.subr.bf16.mxu1 %v19816_v53  ;;  %v16303_v29 = vpop.f32.mrb[32].mxu0  ;;  %12461 = vmatpush1.bf16.msra.mxu0 %v15733_v30  ;;  %v16319_v30 = vld [vmem:[%s19496_s0 + $0x50] sm:$0xff] }
 0x348   :  { %6738 = vmatmul.mubr.f32.gmra.mrb[138].mxu0 %v16286_v28  ;;  %v4418_v7 = vpop.f32.mrb[33].mxu0  ;;  %12462 = vmatprep.subr.bf16.mxu0 %v19816_v53 }
 0x349   :  { %10718 = vmatprep.mubr.msk.f32.mxu0 %vm128_vm0, %v16292_v38  ;;  %v2439_v7 = vld [vmem:[%s19495_s2 + $0x160] sm:$0xff] }
 0x34a   :  { %12112 = vmatpush1.bf16.msra.mxu1 %v12111_v4  ;;  %v12466_v4 = vpack.c.bf16 %v8072_v44, %v8071_v0  ;;  %v16348_v44 = vld [vmem:[%s19496_s0 + $0x60] sm:$0xff]  ;;  %v12117_v0 = vpack.c.bf16 %v2440_v35, %v2439_v7  ;;  %v8075_v7 = vld [vmem:[%s19495_s2 + $0x2f0] sm:$0xff] }
 0x34b   :  { %12113 = vmatprep.subr.bf16.mxu1 %v19816_v53  ;;  %v16333_v41 = vpop.f32.mrb[34].mxu0  ;;  %12464 = vmatpush1.bf16.msra.mxu0 %v12463_v51  ;;  %v16353_v51 = vld [vmem:[%s19496_s0 + $0x78] sm:$0xff]  ;;  %v12472_v26 = vpack.c.bf16 %v8076_v16, %v8075_v7  ;;  %v16400_v16 = vld [vmem:[%s19496_s0 + $0x80] sm:$0xff] }
 0x34c   :  { %6743 = vmatmul.mubr.f32.gmra.mrb[140].mxu0 %v16319_v30  ;;  %v4423_v49 = vpop.f32.mrb[35].mxu0  ;;  %12465 = vmatprep.subr.bf16.mxu0 %v19816_v53 }
 0x34d   :  { %10719 = vmatprep.mubr.msk.f32.mxu0 %vm128_vm0, %v16324_v57 }
 0x34e   :  { %12115 = vmatpush1.bf16.msra.mxu1 %v12114_v56  ;;  %v12469_v56 = vpack.c.bf16 %v8074_v10, %v8073_v15  ;;  %v16377_v10 = vld [vmem:[%s19496_s0 + $0x70] sm:$0xff]  ;;  %v16382_v15 = vld [vmem:[%s19496_s0 + $0x88] sm:$0xff] }
 0x34f   :  { %12116 = vmatprep.subr.bf16.mxu1 %v19816_v53  ;;  %v16356_v49 = vpop.f32.mrb[36].mxu0  ;;  %12467 = vmatpush1.bf16.msra.mxu0 %v12466_v4  ;;  %v12120_v4 = vpack.c.bf16 %v2442_v25, %v2441_v60  ;;  %v8077_v25 = vld [vmem:[%s19495_s2 + $0x300] sm:$0xff]  ;;  %v8078_v60 = vld [vmem:[%s19495_s2 + $0x308] sm:$0xff] }
 0x350   :  { %6748 = vmatmul.mubr.f32.gmra.mrb[142].mxu0 %v16348_v44  ;;  %v4428_v35 = vpop.f32.mrb[37].mxu0  ;;  %12468 = vmatprep.subr.bf16.mxu0 %v19816_v53 }
 0x351   :  { %10720 = vmatprep.mubr.msk.f32.mxu0 %vm128_vm0, %v16353_v51 }
 0x352   :  { %12118 = vmatpush1.bf16.msra.mxu1 %v12117_v0 }
 0x353   :  { %12119 = vmatprep.subr.bf16.mxu1 %v19816_v53  ;;  %v16385_v35 = vpop.f32.mrb[38].mxu0  ;;  %12470 = vmatpush1.bf16.msra.mxu0 %v12469_v56  ;;  %v12475_v56 = vpack.c.bf16 %v8078_v60, %v8077_v25  ;;  %v16434_v25 = vld [vmem:[%s19496_s0 + $0xa8] sm:$0xff] }
 0x354   :  { %6753 = vmatmul.mubr.f32.gmra.mrb[144].mxu0 %v16377_v10  ;;  %v4433_v63 = vpop.f32.mrb[39].mxu0  ;;  %12471 = vmatprep.subr.bf16.mxu0 %v19816_v53 }
 0x355   :  { %10721 = vmatprep.mubr.msk.f32.mxu0 %vm128_vm0, %v16382_v15  ;;  %v16405_v63 = vld [vmem:[%s19496_s0 + $0x98] sm:$0xff] }
 0x356   :  { %12121 = vmatpush1.bf16.msra.mxu1 %v12120_v4  ;;  %v8080_v4 = vld [vmem:[%s19495_s2 + $0x318] sm:$0xff] }
 0x357   :  { %v4436_v0 = vpop.f32.mrb[40].mxu0  ;;  %12473 = vmatpush1.bf16.msra.mxu0 %v12472_v26  ;;  %v16424_v26 = vld [vmem:[%s19496_s0 + $0x90] sm:$0xff] }
 0x358   :  { %v4489_v7 = vmax.f32 %v16146_v8, %v4436_v0  ;;  %6758 = vmatmul.mubr.f32.gmra.mrb[146].mxu0 %v16400_v16  ;;  %v4438_v36 = vpop.f32.mrb[41].mxu0  ;;  %12474 = vmatprep.subr.bf16.mxu0 %v19816_v53  ;;  %v12478_v0 = vpack.c.bf16 %v8080_v4, %v8079_v1  ;;  %v16451_v1 = vld [vmem:[%s19496_s0 + $0xa0] sm:$0xff]  ;;  %v16461_v4 = vld [vmem:[%s19496_s0 + $0xb8] sm:$0xff] }
 0x359   :  { %2688 = vmatmul.mubr.f32.vlgmr.msra.gmra.mrb[62].mxu1 %v16157_v19  ;;  %10722 = vmatprep.mubr.msk.f32.mxu0 %vm128_vm0, %v16405_v63  ;;  %v20142_v36 = vmax.f32 %v15820_v39, %v15920_v33  ;;  %v8081_v39 = vld [vmem:[%s19495_s2 + $0x320] sm:$0xff]  ;;  %v8082_v33 = vld [vmem:[%s19495_s2 + $0x328] sm:$0xff] }
 0x35a   :  { %10374 = vmatprep.mubr.msk.f32.mxu1 %vm128_vm0, %v16163_v52 }
 0x35b   :  { %v4498_v8 = vmax.f32 %v20142_v36, %v4489_v7  ;;  %v4441_v60 = vpop.f32.mrb[42].mxu0  ;;  %12476 = vmatpush1.bf16.msra.mxu0 %v12475_v56  ;;  %v4519_v7 = vpop.permute.xlu1 %4518 }
 0x35c   :  { %v4490_v54 = vmax.f32 %v16176_v32, %v4441_v60  ;;  %6763 = vmatmul.mubr.f32.gmra.mrb[148].mxu0 %v16424_v26  ;;  %v4443_v19 = vpop.f32.mrb[43].mxu0  ;;  %12477 = vmatprep.subr.bf16.mxu0 %v19816_v53  ;;  %v20143_v32 = vmax.f32 %v15832_v45, %v15939_v62  ;;  %v4524_v36 = vpop.permute.xlu0 %4523  ;;  %v8083_v45 = vld [vmem:[%s19495_s2 + $0x330] sm:$0xff]  ;;  %v8084_v62 = vld [vmem:[%s19495_s2 + $0x338] sm:$0xff] }
 0x35d   :  { %2693 = vmatmul.mubr.f32.gmra.mrb[64].mxu1 %v16187_v55  ;;  %10723 = vmatprep.mubr.msk.f32.mxu0 %vm128_vm0, %v16434_v25  ;;  %v4561_v19 = vadd.f32 %v4519_v7, %v4498_v8  ;;  %v12481_v55 = vpack.c.bf16 %v8082_v33, %v8081_v39  ;;  %v20144_v39 = vmax.f32 %v15842_v13, %v15955_v43  ;;  %v16488_v7 = vld [vmem:[%s19496_s0 + $0xc8] sm:$0xff] }
 0x35e   :  { %v4499_v56 = vmax.f32 %v20143_v32, %v4490_v54  ;;  %10375 = vmatprep.mubr.msk.f32.mxu1 %vm128_vm0, %v16193_v21  ;;  %v16478_v54 = vld [vmem:[%s19496_s0 + $0xb0] sm:$0xff] }
 0x35f   :  { %v4446_v60 = vpop.f32.mrb[44].mxu0  ;;  %12479 = vmatpush1.bf16.msra.mxu0 %v12478_v0  ;;  %v4529_v43 = vpop.permute.xlu1 %4528 }
 0x360   :  { %v4562_v52 = vadd.f32 %v4524_v36, %v4499_v56  ;;  %v4491_v5 = vmax.f32 %v16206_v34, %v4446_v60  ;;  %6768 = vmatmul.mubr.f32.gmra.mrb[150].mxu0 %v16451_v1  ;;  %v4448_v8 = vpop.f32.mrb[45].mxu0  ;;  %12480 = vmatprep.subr.bf16.mxu0 %v19816_v53  ;;  %v4570_v34 = vmax.f32 %v4561_v19, 0.0  ;;  %v12484_v56 = vpack.c.bf16 %v8084_v62, %v8083_v45  ;;  %v16511_v60 = vld [vmem:[%s19496_s0 + $0xd8] sm:$0xff] }
 0x361   :  { %2698 = vmatmul.mubr.f32.gmra.mrb[66].mxu1 %v16219_v12  ;;  %10724 = vmatprep.mubr.msk.f32.mxu0 %vm128_vm0, %v16461_v4  ;;  %20147 = vst [vmem:[#allocation28_spill] sm:$0xff] %v16511_v60  ;;  %v4534_v8 = vpop.permute.xlu0 %4533 }
 0x362   :  { %v4571_v0 = vmax.f32 %v4562_v52, 0.0  ;;  %v4500_v33 = vmax.f32 %v20144_v39, %v4491_v5  ;;  %10376 = vmatprep.mubr.msk.f32.mxu1 %vm128_vm0, %v16225_v11  ;;  %v16501_v5 = vld [vmem:[%s19496_s0 + $0xc0] sm:$0xff] }
 0x363   :  { %v4451_v32 = vpop.f32.mrb[46].mxu0  ;;  %12482 = vmatpush1.bf16.msra.mxu0 %v12481_v55 }
 0x364   :  { %v4492_v36 = vmax.f32 %v16238_v3, %v4451_v32  ;;  %6773 = vmatmul.mubr.f32.gmra.mrb[152].mxu0 %v16478_v54  ;;  %v4453_v52 = vpop.f32.mrb[47].mxu0  ;;  %12483 = vmatprep.subr.bf16.mxu0 %v19816_v53  ;;  %v16493_v13 = vpack.c.bf16 %v4571_v0, %v4570_v34  ;;  %v4563_v55 = vadd.f32 %v4529_v43, %v4500_v33  ;;  %v16727_v53 = vld [vmem:[%s19496_s0 + $0x188] sm:$0xff] }
 0x365   :  { %2703 = vmatmul.mubr.f32.gmra.mrb[68].mxu1 %v16251_v20  ;;  %10725 = vmatprep.mubr.msk.f32.mxu0 %vm128_vm0, %v16488_v7  ;;  %v20146_v3 = vmax.f32 %v15852_v37, %v15976_v18  ;;  %v16521_v37 = vld [vmem:[%s19496_s0 + $0xd0] sm:$0xff]  ;;  %v20149_v33 = vmax.f32 %v15862_v2, %v16001_v9  ;;  %v16543_v2 = vld [vmem:[%s19496_s0 + $0xe0] sm:$0xff] }
 0x366   :  { %20145 = vst [vmem:[#allocation29_spill] sm:$0xff] %v16493_v13  ;;  %10377 = vmatprep.mubr.msk.f32.mxu1 %vm128_vm0, %v16257_v42  ;;  %20148 = vst [vmem:[#allocation31_spill] sm:$0xff] %v16521_v37  ;;  %v4572_v18 = vmax.f32 %v4563_v55, 0.0  ;;  %v4539_v55 = vpop.permute.xlu1 %4538  ;;  %v16756_v13 = vld [vmem:[%s19496_s0 + $0x190] sm:$0xff] }
 0x367   :  { %v4501_v19 = vmax.f32 %v20146_v3, %v4492_v36  ;;  %v4456_v45 = vpop.f32.mrb[48].mxu0  ;;  %12485 = vmatpush1.bf16.msra.mxu0 %v12484_v56  ;;  %20152 = vst [vmem:[#allocation52_spill] sm:$0xff] %v16543_v2 }
 0x368   :  { %v4493_v34 = vmax.f32 %v16270_v24, %v4456_v45  ;;  %6778 = vmatmul.mubr.f32.gmra.mrb[154].mxu0 %v16501_v5  ;;  %v4458_v0 = vpop.f32.mrb[49].mxu0  ;;  %v16531_v24 = vld [vmem:[%s19496_s0 + $0xe8] sm:$0xff] }
 0x369   :  { %v4564_v62 = vadd.f32 %v4534_v8, %v4501_v19  ;;  %2708 = vmatmul.mubr.f32.gmra.mrb[70].mxu1 %v16286_v28  ;;  %10726 = vmatprep.mubr.msk.f32.mxu0 %vm128_vm0, %v16511_v60  ;;  %20150 = vst [vmem:[#allocation30_spill] sm:$0xff] %v16531_v24  ;;  %v16553_v19 = vld [vmem:[%s19496_s0 + $0xf8] sm:$0xff]  ;;  %v4544_v8 = vpop.permute.xlu0 %4543 }
 0x36a   :  { %v4502_v32 = vmax.f32 %v20149_v33, %v4493_v34  ;;  %10378 = vmatprep.mubr.msk.f32.mxu1 %vm128_vm0, %v16292_v38  ;;  %20154 = vst [vmem:[#allocation62_spill] sm:$0xff] %v16553_v19 }
 0x36b   :  { %v4573_v39 = vmax.f32 %v4564_v62, 0.0  ;;  %v4461_v56 = vpop.f32.mrb[50].mxu0 }
 0x36c   :  { %v4494_v36 = vmax.f32 %v16303_v29, %v4461_v56  ;;  %6783 = vmatmul.mubr.f32.gmra.mrb[156].mxu0 %v16521_v37  ;;  %v4463_v52 = vpop.f32.mrb[51].mxu0  ;;  %v4565_v9 = vadd.f32 %v4539_v55, %v4502_v32  ;;  %v20153_v29 = vmax.f32 %v15872_v14, %v16032_v22  ;;  %v16563_v14 = vld [vmem:[%s19496_s0 + $0xf0] sm:$0xff]  ;;  %v4549_v55 = vpop.permute.xlu1 %4548 }
 0x36d   :  { %v16535_v43 = vpack.c.bf16 %v4573_v39, %v4572_v18  ;;  %2713 = vmatmul.mubr.f32.gmra.mrb[72].mxu1 %v16319_v30  ;;  %10727 = vmatprep.mubr.msk.f32.mxu0 %vm128_vm0, %v16531_v24  ;;  %20155 = vst [vmem:[#allocation53_spill] sm:$0xff] %v16563_v14  ;;  %v20156_v39 = vmax.f32 %v15878_v27, %v16063_v40  ;;  %v16585_v27 = vld [vmem:[%s19496_s0 + $0x100] sm:$0xff] }
 0x36e   :  { %v4503_v3 = vmax.f32 %v20153_v29, %v4494_v36  ;;  %10379 = vmatprep.mubr.msk.f32.mxu1 %vm128_vm0, %v16324_v57  ;;  %v4574_v22 = vmax.f32 %v4565_v9, 0.0  ;;  %20159 = vst [vmem:[#allocation58_spill] sm:$0xff] %v16585_v27  ;;  %v16595_v29 = vld [vmem:[%s19496_s0 + $0x118] sm:$0xff] }
 0x36f   :  { %20151 = vst [vmem:[#allocation63_spill] sm:$0xff] %v16535_v43  ;;  %v4466_v45 = vpop.f32.mrb[52].mxu0  ;;  %20161 = vst [vmem:[#allocation6_spill] sm:$0xff] %v16595_v29 }
 0x370   :  { %v4566_v62 = vadd.f32 %v4544_v8, %v4503_v3  ;;  %v4495_v34 = vmax.f32 %v16333_v41, %v4466_v45  ;;  %6788 = vmatmul.mubr.f32.gmra.mrb[158].mxu0 %v16543_v2  ;;  %v4468_v0 = vpop.f32.mrb[53].mxu0  ;;  %v16573_v41 = vld [vmem:[%s19496_s0 + $0x108] sm:$0xff]  ;;  %v4554_v3 = vpop.permute.xlu0 %4553 }
 0x371   :  { %2718 = vmatmul.mubr.f32.gmra.mrb[74].mxu1 %v16348_v44  ;;  %10728 = vmatprep.mubr.msk.f32.mxu0 %vm128_vm0, %v16553_v19  ;;  %20157 = vst [vmem:[#allocation5_spill] sm:$0xff] %v16573_v41 }
 0x372   :  { %v4575_v18 = vmax.f32 %v4566_v62, 0.0  ;;  %v4504_v33 = vmax.f32 %v20156_v39, %v4495_v34  ;;  %10380 = vmatprep.mubr.msk.f32.mxu1 %vm128_vm0, %v16353_v51 }
 0x373   :  { %v4471_v32 = vpop.f32.mrb[54].mxu0 }
 0x374   :  { %v4496_v56 = vmax.f32 %v16356_v49, %v4471_v32  ;;  %6793 = vmatmul.mubr.f32.gmra.mrb[160].mxu0 %v16563_v14  ;;  %v4473_v36 = vpop.f32.mrb[55].mxu0  ;;  %v16577_v52 = vpack.c.bf16 %v4575_v18, %v4574_v22  ;;  %v4567_v40 = vadd.f32 %v4549_v55, %v4504_v33  ;;  %v20160_v49 = vmax.f32 %v15889_v50, %v16095_v6  ;;  %v16605_v50 = vld [vmem:[%s19496_s0 + $0x110] sm:$0xff] }
 0x375   :  { %2723 = vmatmul.mubr.f32.gmra.mrb[76].mxu1 %v16377_v10  ;;  %10729 = vmatprep.mubr.msk.f32.mxu0 %vm128_vm0, %v16573_v41  ;;  %20162 = vst [vmem:[#allocation59_spill] sm:$0xff] %v16605_v50  ;;  %v20163_v22 = vmax.f32 %v15905_v17, %v16122_v31  ;;  %v16630_v17 = vld [vmem:[%s19496_s0 + $0x120] sm:$0xff]  ;;  %v16637_v31 = vld [vmem:[%s19496_s0 + $0x138] sm:$0xff]  ;;  %v16648_v55 = vld [vmem:[%s19496_s0 + $0x130] sm:$0xff] }
 0x376   :  { %20158 = vst [vmem:[#allocation54_spill] sm:$0xff] %v16577_v52  ;;  %v4505_v9 = vmax.f32 %v20160_v49, %v4496_v56  ;;  %10381 = vmatprep.mubr.msk.f32.mxu1 %vm128_vm0, %v16382_v15  ;;  %v4576_v6 = vmax.f32 %v4567_v40, 0.0  ;;  %20167 = vst [vmem:[#allocation8_spill] sm:$0xff] %v16630_v17  ;;  %v16655_v40 = vld [vmem:[%s19496_s0 + $0x148] sm:$0xff]  ;;  %v16745_v52 = vld [vmem:[%s19496_s0 + $0x198] sm:$0xff] }
 0x377   :  { %v4476_v8 = vpop.f32.mrb[56].mxu0  ;;  %20168 = vst [vmem:[#allocation65_spill] sm:$0xff] %v16637_v31  ;;  %20169 = vst [vmem:[#allocation43_spill] sm:$0xff] %v16648_v55 }
 0x378   :  { %v4568_v45 = vadd.f32 %v4554_v3, %v4505_v9  ;;  %v4497_v62 = vmax.f32 %v16385_v35, %v4476_v8  ;;  %6798 = vmatmul.mubr.f32.gmra.mrb[162].mxu0 %v16585_v27  ;;  %v4478_v34 = vpop.f32.mrb[57].mxu0  ;;  %v16617_v35 = vld [vmem:[%s19496_s0 + $0x128] sm:$0xff]  ;;  %20170 = vst [vmem:[#allocation42_spill] sm:$0xff] %v16655_v40  ;;  %v16666_v3 = vld [vmem:[%s19496_s0 + $0x140] sm:$0xff]  ;;  %v16673_v8 = vld [vmem:[%s19496_s0 + $0x158] sm:$0xff] }
 0x379   :  { %2728 = vmatmul.mubr.f32.gmra.mrb[78].mxu1 %v16400_v16  ;;  %10730 = vmatprep.mubr.msk.f32.mxu0 %vm128_vm0, %v16595_v29  ;;  %20165 = vst [vmem:[#allocation7_spill] sm:$0xff] %v16617_v35  ;;  %20171 = vst [vmem:[#allocation66_spill] sm:$0xff] %v16666_v3  ;;  %v16684_v34 = vld [vmem:[%s19496_s0 + $0x150] sm:$0xff] }
 0x37a   :  { %v4577_v0 = vmax.f32 %v4568_v45, 0.0  ;;  %v16610_v18 = vmax.f32 %v20163_v22, %v4497_v62  ;;  %10382 = vmatprep.mubr.msk.f32.mxu1 %vm128_vm0, %v16405_v63  ;;  %20172 = vst [vmem:[#allocation46_spill] sm:$0xff] %v16673_v8 }
 0x37b   :  { %v16619_v39 = vpop.f32.mrb[58].mxu0 }
 0x37c   :  { %20164 = vst [vmem:[#allocation61_spill] sm:$0xff] %v16610_v18  ;;  %6803 = vmatmul.mubr.f32.gmra.mrb[164].mxu0 %v16605_v50  ;;  %v5915_v33 = vpop.f32.mrb[59].mxu0  ;;  %v16622_v32 = vpack.c.bf16 %v4577_v0, %v4576_v6  ;;  %v16691_v6 = vld [vmem:[%s19496_s0 + $0x168] sm:$0xff]  ;;  %v16738_v18 = vld [vmem:[%s19496_s0 + $0x180] sm:$0xff] }
 0x37d   :  { %2733 = vmatmul.mubr.f32.gmra.mrb[80].mxu1 %v16424_v26  ;;  %10731 = vmatprep.mubr.msk.f32.mxu0 %vm128_vm0, %v16617_v35  ;;  %v16702_v33 = vld [vmem:[%s19496_s0 + $0x160] sm:$0xff] }
 0x37e   :  { %20166 = vst [vmem:[#allocation64_spill] sm:$0xff] %v16622_v32  ;;  %10383 = vmatprep.mubr.msk.f32.mxu1 %vm128_vm0, %v16434_v25 }
 0x37f   :  { %v16639_v56 = vpop.f32.mrb[60].mxu0 }
 0x380   :  { %6808 = vmatmul.mubr.f32.gmra.mrb[166].mxu0 %v16630_v17  ;;  %v5920_v36 = vpop.f32.mrb[61].mxu0 }
 0x381   :  { %2738 = vmatmul.mubr.f32.gmra.mrb[82].mxu1 %v16451_v1  ;;  %10732 = vmatprep.mubr.msk.f32.mxu0 %vm128_vm0, %v16637_v31  ;;  %v16709_v36 = vld [vmem:[%s19496_s0 + $0x178] sm:$0xff] }
 0x382   :  { %10384 = vmatprep.mubr.msk.f32.mxu1 %vm128_vm0, %v16461_v4 }
 0x383   :  { %v16657_v49 = vpop.f32.mrb[62].mxu0 }
 0x384   :  { %6813 = vmatmul.mubr.f32.gmra.mrb[168].mxu0 %v16648_v55  ;;  %v5925_v9 = vpop.f32.mrb[63].mxu0 }
 0x385   :  { %2743 = vmatmul.mubr.f32.gmra.mrb[84].mxu1 %v16478_v54  ;;  %10733 = vmatprep.mubr.msk.f32.mxu0 %vm128_vm0, %v16655_v40 }
 0x386   :  { %10385 = vmatprep.mubr.msk.f32.mxu1 %vm128_vm0, %v16488_v7 }
 0x387   :  { %v16675_v45 = vpop.f32.mrb[64].mxu0 }
 0x388   :  { %6818 = vmatmul.mubr.f32.gmra.mrb[170].mxu0 %v16666_v3  ;;  %v5930_v62 = vpop.f32.mrb[65].mxu0 }
 0x389   :  { %2748 = vmatmul.mubr.f32.gmra.mrb[86].mxu1 %v16501_v5  ;;  %10734 = vmatprep.mubr.msk.f32.mxu0 %vm128_vm0, %v16673_v8 }
 0x38a   :  { %10386 = vmatprep.mubr.msk.f32.mxu1 %vm128_vm0, %v16511_v60 }
 0x38b   :  { %v16693_v0 = vpop.f32.mrb[66].mxu0 }
 0x38c   :  { %6823 = vmatmul.mubr.f32.gmra.mrb[172].mxu0 %v16684_v34  ;;  %v5935_v22 = vpop.f32.mrb[67].mxu0 }
 0x38d   :  { %2753 = vmatmul.mubr.f32.gmra.mrb[88].mxu1 %v16521_v37  ;;  %10735 = vmatprep.mubr.msk.f32.mxu0 %vm128_vm0, %v16691_v6  ;;  %v16720_v22 = vld [vmem:[%s19496_s0 + $0x170] sm:$0xff] }
 0x38e   :  { %10387 = vmatprep.mubr.msk.f32.mxu1 %vm128_vm0, %v16531_v24  ;;  %v16821_v24 = vld [vmem:[%s19496_s0 + $0x1d8] sm:$0xff] }
 0x38f   :  { %v16711_v9 = vpop.f32.mrb[68].mxu0 }
 0x390   :  { %6828 = vmatmul.mubr.f32.gmra.mrb[174].mxu0 %v16702_v33  ;;  %v5940_v62 = vpop.f32.mrb[69].mxu0 }
 0x391   :  { %2758 = vmatmul.mubr.f32.gmra.mrb[90].mxu1 %v16543_v2  ;;  %10736 = vmatprep.mubr.msk.f32.mxu0 %vm128_vm0, %v16709_v36  ;;  %v16801_v2 = vld [vmem:[%s19496_s0 + $0x1c8] sm:$0xff] }
 0x392   :  { %10388 = vmatprep.mubr.msk.f32.mxu1 %vm128_vm0, %v16553_v19  ;;  %20176 = vst [vmem:[#allocation60_spill] sm:$0xff] %v16801_v2 }
 0x393   :  { %v16729_v32 = vpop.f32.mrb[70].mxu0 }
 0x394   :  { %6833 = vmatmul.mubr.f32.gmra.mrb[176].mxu0 %v16720_v22  ;;  %v5945_v62 = vpop.f32.mrb[71].mxu0 }
 0x395   :  { %2763 = vmatmul.mubr.f32.gmra.mrb[92].mxu1 %v16563_v14  ;;  %10737 = vmatprep.mubr.msk.f32.mxu0 %vm128_vm0, %v16727_v53 }
 0x396   :  { %10389 = vmatprep.mubr.msk.f32.mxu1 %vm128_vm0, %v16573_v41  ;;  %v16763_v41 = vld [vmem:[%s19496_s0 + $0x1a8] sm:$0xff] }
 0x397   :  { %v16747_v43 = vpop.f32.mrb[72].mxu0 }
 0x398   :  { %6838 = vmatmul.mubr.f32.gmra.mrb[178].mxu0 %v16738_v18  ;;  %v5950_v62 = vpop.f32.mrb[73].mxu0 }
 0x399   :  { %2768 = vmatmul.mubr.f32.gmra.mrb[94].mxu1 %v16585_v27  ;;  %10738 = vmatprep.mubr.msk.f32.mxu0 %vm128_vm0, %v16745_v52  ;;  %v16774_v27 = vld [vmem:[%s19496_s0 + $0x1a0] sm:$0xff] }
 0x39a   :  { %10390 = vmatprep.mubr.msk.f32.mxu1 %vm128_vm0, %v16595_v29  ;;  %20173 = vst [vmem:[#allocation44_spill] sm:$0xff] %v16774_v27  ;;  %v16781_v29 = vld [vmem:[%s19496_s0 + $0x1b8] sm:$0xff] }
 0x39b   :  { %v16765_v14 = vpop.f32.mrb[74].mxu0  ;;  %20174 = vst [vmem:[#allocation51_spill] sm:$0xff] %v16781_v29 }
 0x39c   :  { %6843 = vmatmul.mubr.f32.gmra.mrb[180].mxu0 %v16756_v13  ;;  %v5955_v62 = vpop.f32.mrb[75].mxu0 }
 0x39d   :  { %2773 = vmatmul.mubr.f32.gmra.mrb[96].mxu1 %v16605_v50  ;;  %10739 = vmatprep.mubr.msk.f32.mxu0 %vm128_vm0, %v16763_v41 }
 0x39e   :  { %10391 = vmatprep.mubr.msk.f32.mxu1 %vm128_vm0, %v16617_v35  ;;  %v16794_v35 = vld [vmem:[%s19496_s0 + $0x1b0] sm:$0xff] }
 0x39f   :  { %v16783_v19 = vpop.f32.mrb[76].mxu0  ;;  %20175 = vst [vmem:[#allocation105_spill] sm:$0xff] %v16794_v35 }
 0x3a0   :  { %6848 = vmatmul.mubr.f32.gmra.mrb[182].mxu0 %v16774_v27  ;;  %v5960_v50 = vpop.f32.mrb[77].mxu0 }
 0x3a1   :  { %2778 = vmatmul.mubr.f32.gmra.mrb[98].mxu1 %v16630_v17  ;;  %10740 = vmatprep.mubr.msk.f32.mxu0 %vm128_vm0, %v16781_v29 }
 0x3a2   :  { %10392 = vmatprep.mubr.msk.f32.mxu1 %vm128_vm0, %v16637_v31  ;;  %v16814_v31 = vld [vmem:[%s19496_s0 + $0x1c0] sm:$0xff] }
 0x3a3   :  { %v16803_v62 = vpop.f32.mrb[78].mxu0 }
 0x3a4   :  { %6853 = vmatmul.mubr.f32.gmra.mrb[184].mxu0 %v16794_v35  ;;  %v5965_v17 = vpop.f32.mrb[79].mxu0 }
 0x3a5   :  { %2783 = vmatmul.mubr.f32.gmra.mrb[100].mxu1 %v16648_v55  ;;  %10741 = vmatprep.mubr.msk.f32.mxu0 %vm128_vm0, %v16801_v2 }
 0x3a6   :  { %10393 = vmatprep.mubr.msk.f32.mxu1 %vm128_vm0, %v16655_v40  ;;  %v16834_v40 = vld [vmem:[%s19496_s0 + $0x1d0] sm:$0xff] }
 0x3a7   :  { %v16823_v50 = vpop.f32.mrb[80].mxu0 }
 0x3a8   :  { %6858 = vmatmul.mubr.f32.gmra.mrb[186].mxu0 %v16814_v31  ;;  %v5970_v55 = vpop.f32.mrb[81].mxu0 }
 0x3a9   :  { %2788 = vmatmul.mubr.f32.gmra.mrb[102].mxu1 %v16666_v3  ;;  %10742 = vmatprep.mubr.msk.f32.mxu0 %vm128_vm0, %v16821_v24  ;;  %v20183_v55 = vld [vmem:[#allocation25_spill] sm:$0xff] }
 0x3aa   :  { %10394 = vmatprep.mubr.msk.f32.mxu1 %vm128_vm0, %v16673_v8 }
 0x3ab   :  { %v16838_v37 = vpop.f32.mrb[82].mxu0 }
 0x3ac   :  { %6863 = vmatmul.mubr.f32.gmra.mrb[188].mxu0 %v16834_v40  ;;  %v5975_v17 = vpop.f32.mrb[83].mxu0 }
 0x3ad   :  { %2793 = vmatmul.mubr.f32.gmra.mrb[104].mxu1 %v16684_v34  ;;  %10743 = vmatprep.mubr.msk.f32.mxu0 %vm128_vm0, %v15970_v47 }
 0x3ae   :  { %10395 = vmatprep.mubr.msk.f32.mxu1 %vm128_vm0, %v16691_v6 }
 0x3af   :  { %v16848_v3 = vpop.f32.mrb[84].mxu0 }
 0x3b0   :  { %6868 = vmatmul.mubr.f32.gmra.mrb[190].mxu0 %v15987_v46  ;;  %v5980_v60 = vpop.f32.mrb[85].mxu0 }
 0x3b1   :  { %2798 = vmatmul.mubr.f32.gmra.mrb[106].mxu1 %v16702_v33  ;;  %10744 = vmatprep.mubr.msk.f32.mxu0 %vm128_vm0, %v15996_v23  ;;  %v20178_v60 = vld [vmem:[#allocation102_spill] sm:$0xff] }
 0x3b2   :  { %10396 = vmatprep.mubr.msk.f32.mxu1 %vm128_vm0, %v16709_v36 }
 0x3b3   :  { %v16858_v47 = vpop.f32.mrb[86].mxu0 }
 0x3b4   :  { %6873 = vmatmul.mubr.f32.gmra.mrb[192].mxu0 %v16012_v61  ;;  %v5985_v46 = vpop.f32.mrb[87].mxu0 }
 0x3b5   :  { %2803 = vmatmul.mubr.f32.gmra.mrb[108].mxu1 %v16720_v22  ;;  %10745 = vmatprep.mubr.msk.f32.mxu0 %vm128_vm0, %v16021_v59  ;;  %v20177_v46 = vld [vmem:[#allocation101_spill] sm:$0xff] }
 0x3b6   :  { %10397 = vmatprep.mubr.msk.f32.mxu1 %vm128_vm0, %v16727_v53 }
 0x3b7   :  { %v16868_v23 = vpop.f32.mrb[88].mxu0 }
 0x3b8   :  { %6878 = vmatmul.mubr.f32.gmra.mrb[194].mxu0 %v16043_v58  ;;  %v5990_v61 = vpop.f32.mrb[89].mxu0 }
 0x3b9   :  { %2808 = vmatmul.mubr.f32.gmra.mrb[110].mxu1 %v16738_v18  ;;  %10746 = vmatprep.mubr.msk.f32.mxu0 %vm128_vm0, %v16052_v48  ;;  %v16891_v48 = vld [vmem:[%s19496_s0 + $0x238] sm:$0xff] }
 0x3ba   :  { %10398 = vmatprep.mubr.msk.f32.mxu1 %vm128_vm0, %v16745_v52  ;;  %20179 = vst [vmem:[#allocation50_spill] sm:$0xff] %v16891_v48 }
 0x3bb   :  { %v16878_v59 = vpop.f32.mrb[90].mxu0 }
 0x3bc   :  { %6883 = vmatmul.mubr.f32.gmra.mrb[196].mxu0 %v20177_v46  ;;  %v5995_v58 = vpop.f32.mrb[91].mxu0  ;;  %v20180_v46 = vld [vmem:[#allocation103_spill] sm:$0xff] }
 0x3bd   :  { %2813 = vmatmul.mubr.f32.gmra.mrb[112].mxu1 %v16756_v13  ;;  %10747 = vmatprep.mubr.msk.f32.mxu0 %vm128_vm0, %v20178_v60  ;;  %v16904_v60 = vld [vmem:[%s19496_s0 + $0x230] sm:$0xff] }
 0x3be   :  { %10399 = vmatprep.mubr.msk.f32.mxu1 %vm128_vm0, %v16763_v41  ;;  %20181 = vst [vmem:[#allocation106_spill] sm:$0xff] %v16904_v60 }
 0x3bf   :  { %v16893_v61 = vpop.f32.mrb[92].mxu0 }
 0x3c0   :  { %6888 = vmatmul.mubr.f32.gmra.mrb[198].mxu0 %v20180_v46  ;;  %v6000_v17 = vpop.f32.mrb[93].mxu0 }
 0x3c1   :  { %2818 = vmatmul.mubr.f32.gmra.mrb[114].mxu1 %v16774_v27  ;;  %10748 = vmatprep.mubr.msk.f32.mxu0 %vm128_vm0, %v16891_v48  ;;  %v20182_v17 = vld [vmem:[#allocation104_spill] sm:$0xff] }
 0x3c2   :  { %10400 = vmatprep.mubr.msk.f32.mxu1 %vm128_vm0, %v16781_v29  ;;  %v20184_v29 = vld [vmem:[#allocation24_spill] sm:$0xff] }
 0x3c3   :  { %v16908_v8 = vpop.f32.mrb[94].mxu0 }
 0x3c4   :  { %6893 = vmatmul.mubr.f32.gmra.mrb[200].mxu0 %v16904_v60  ;;  %v6005_v46 = vpop.f32.mrb[95].mxu0 }
 0x3c5   :  { %2823 = vmatmul.mubr.f32.gmra.mrb[116].mxu1 %v16794_v35  ;;  %10849 = vmatprep.mubr.msk.f32.mxu0 %vm128_vm0, %v20182_v17  ;;  %v16927_v46 = vld [vmem:[%s19496_s0 + $0x1e8] sm:$0xff] }
 0x3c6   :  { %10401 = vmatprep.mubr.msk.f32.mxu1 %vm128_vm0, %v16801_v2  ;;  %v20185_v2 = vld [vmem:[#allocation27_spill] sm:$0xff] }
 0x3c7   :  { %v16916_v58 = vpop.f32.mrb[96].mxu0 }
 0x3c8   :  { %8330 = vmatmul.mubr.f32.vlgmr.msra.gmra.mrb[202].mxu0 %v20183_v55  ;;  %v6010_v27 = vpop.f32.mrb[97].mxu0  ;;  %v16952_v55 = vpop.permute.xlu0 %5324 }
 0x3c9   :  { %2828 = vmatmul.mubr.f32.gmra.mrb[118].mxu1 %v16814_v31  ;;  %10850 = vmatprep.mubr.msk.f32.mxu0 %vm128_vm0, %v20184_v29  ;;  %v16940_v27 = vld [vmem:[%s19496_s0 + $0x1e0] sm:$0xff]  ;;  %v16942_v29 = vpop.permute.xlu1 %4558  ;;  %20189 = vst [vmem:[#allocation57_spill] sm:$0xff] %v16952_v55 }
 0x3ca   :  { %10402 = vmatprep.mubr.msk.f32.mxu1 %vm128_vm0, %v16821_v24  ;;  %20186 = vst [vmem:[#allocation48_spill] sm:$0xff] %v16940_v27  ;;  %20187 = vst [vmem:[#allocation15_spill] sm:$0xff] %v16942_v29  ;;  %v16962_v29 = vld [vmem:[%s19496_s0 + $0x1f0] sm:$0xff] }
 0x3cb   :  { %v16929_v17 = vpop.f32.mrb[98].mxu0 }
 0x3cc   :  { %8335 = vmatmul.mubr.f32.gmra.mrb[204].mxu0 %v20185_v2  ;;  %v6015_v35 = vpop.f32.mrb[99].mxu0  ;;  %v16947_v2 = vld [vmem:[%s19496_s0 + $0x1f8] sm:$0xff] }
 0x3cd   :  { %2833 = vmatmul.mubr.f32.gmra.mrb[120].mxu1 %v16834_v40  ;;  %10851 = vmatprep.mubr.msk.f32.mxu0 %vm128_vm0, %v16193_v21  ;;  %20188 = vst [vmem:[#allocation17_spill] sm:$0xff] %v16947_v2 }
 0x3ce   :  { %10403 = vmatprep.mubr.msk.f32.mxu1 %vm128_vm0, %v16927_v46 }
 0x3cf   :  { %v16949_v35 = vpop.f32.mrb[100].mxu0 }
 0x3d0   :  { %8340 = vmatmul.mubr.f32.gmra.mrb[206].mxu0 %v16219_v12  ;;  %v6020_v21 = vpop.f32.mrb[101].mxu0  ;;  %v16967_v12 = vld [vmem:[%s19496_s0 + $0x208] sm:$0xff] }
 0x3d1   :  { %2838 = vmatmul.mubr.f32.gmra.mrb[122].mxu1 %v16940_v27  ;;  %10852 = vmatprep.mubr.msk.f32.mxu0 %vm128_vm0, %v16225_v11  ;;  %v16972_v27 = vpop.permute.xlu1 %5329  ;;  %v16982_v11 = vld [vmem:[%s19496_s0 + $0x200] sm:$0xff] }
 0x3d2   :  { %10404 = vmatprep.mubr.msk.f32.mxu1 %vm128_vm0, %v16947_v2  ;;  %20190 = vst [vmem:[#allocation55_spill] sm:$0xff] %v16972_v27  ;;  %20191 = vst [vmem:[#allocation49_spill] sm:$0xff] %v16982_v11  ;;  %v16984_v2 = vpop.permute.xlu0 %5334 }
 0x3d3   :  { %v16969_v21 = vpop.f32.mrb[102].mxu0  ;;  %20192 = vst [vmem:[#allocation56_spill] sm:$0xff] %v16984_v2  ;;  %v17002_v2 = vld [vmem:[%s19496_s0 + $0x210] sm:$0xff] }
 0x3d4   :  { %8345 = vmatmul.mubr.f32.gmra.mrb[208].mxu0 %v16251_v20  ;;  %v6025_v55 = vpop.f32.mrb[103].mxu0  ;;  %v16989_v20 = vld [vmem:[%s19496_s0 + $0x218] sm:$0xff] }
 0x3d5   :  { %2843 = vmatmul.mubr.f32.gmra.mrb[124].mxu1 %v16962_v29  ;;  %10853 = vmatprep.mubr.msk.f32.mxu0 %vm128_vm0, %v16257_v42  ;;  %20193 = vst [vmem:[#allocation45_spill] sm:$0xff] %v16989_v20  ;;  %v17004_v27 = vpop.permute.xlu1 %5339 }
 0x3d6   :  { %10405 = vmatprep.mubr.msk.f32.mxu1 %vm128_vm0, %v16967_v12  ;;  %20194 = vst [vmem:[#allocation4_spill] sm:$0xff] %v17004_v27  ;;  %v17024_v27 = vld [vmem:[%s19496_s0 + $0x220] sm:$0xff] }
 0x3d7   :  { %v16991_v55 = vpop.f32.mrb[104].mxu0 }
 0x3d8   :  { %8350 = vmatmul.mubr.f32.gmra.mrb[210].mxu0 %v16286_v28  ;;  %v6030_v42 = vpop.f32.mrb[105].mxu0  ;;  %v17009_v28 = vld [vmem:[%s19496_s0 + $0x228] sm:$0xff] }
 0x3d9   :  { %2848 = vmatmul.mubr.f32.gmra.mrb[126].mxu1 %v16982_v11  ;;  %10854 = vmatprep.mubr.msk.f32.mxu0 %vm128_vm0, %v16292_v38  ;;  %20195 = vst [vmem:[#allocation16_spill] sm:$0xff] %v17009_v28  ;;  %v17014_v11 = vpop.permute.xlu0 %5344 }
 0x3da   :  { %10406 = vmatprep.mubr.msk.f32.mxu1 %vm128_vm0, %v16989_v20  ;;  %20196 = vst [vmem:[#allocation69_spill] sm:$0xff] %v17014_v11 }
 0x3db   :  { %v17011_v42 = vpop.f32.mrb[106].mxu0 }
 0x3dc   :  { %8355 = vmatmul.mubr.f32.gmra.mrb[212].mxu0 %v16319_v30  ;;  %v6035_v38 = vpop.f32.mrb[107].mxu0 }
 0x3dd   :  { %2853 = vmatmul.mubr.f32.gmra.mrb[128].mxu1 %v17002_v2  ;;  %10855 = vmatprep.mubr.msk.f32.mxu0 %vm128_vm0, %v16324_v57  ;;  %v17029_v38 = vpop.permute.xlu1 %5349  ;;  %v17036_v57 = vpop.permute.xlu0 %5354 }
 0x3de   :  { %10407 = vmatprep.mubr.msk.f32.mxu1 %vm128_vm0, %v17009_v28  ;;  %20197 = vst [vmem:[#allocation19_spill] sm:$0xff] %v17029_v38  ;;  %20198 = vst [vmem:[#allocation11_spill] sm:$0xff] %v17036_v57 }
 0x3df   :  { %v17026_v20 = vpop.f32.mrb[108].mxu0 }
 0x3e0   :  { %8360 = vmatmul.mubr.f32.gmra.mrb[214].mxu0 %v16348_v44  ;;  %v6040_v30 = vpop.f32.mrb[109].mxu0 }
 0x3e1   :  { %2858 = vmatmul.mubr.f32.gmra.mrb[130].mxu1 %v17024_v27  ;;  %10856 = vmatprep.mubr.msk.f32.mxu0 %vm128_vm0, %v16353_v51  ;;  %v17044_v44 = vpop.permute.xlu1 %5359 }
 0x3e2   :  { %10408 = vmatprep.mubr.msk.f32.mxu1 %vm128_vm0, %v16891_v48  ;;  %20199 = vst [vmem:[#allocation71_spill] sm:$0xff] %v17044_v44  ;;  %v17048_v48 = vpop.permute.xlu0 %5364 }
 0x3e3   :  { %v17038_v11 = vpop.f32.mrb[110].mxu0  ;;  %20200 = vst [vmem:[#allocation18_spill] sm:$0xff] %v17048_v48 }
 0x3e4   :  { %8365 = vmatmul.mubr.f32.gmra.mrb[216].mxu0 %v16377_v10  ;;  %v6045_v28 = vpop.f32.mrb[111].mxu0  ;;  %v20201_v10 = vmax.f32 %v16619_v39, %v16783_v19 }
 0x3e5   :  { %2863 = vmatmul.mubr.f32.gmra.mrb[132].mxu1 %v16904_v60  ;;  %10857 = vmatprep.mubr.msk.f32.mxu0 %vm128_vm0, %v16382_v15  ;;  %v6131_v60 = vpop.permute.xlu1 %6130 }
 0x3e7   :  { %v6048_v30 = vpop.f32.mrb[112].mxu0 }
 0x3e8   :  { %v6101_v51 = vmax.f32 %v16908_v8, %v6048_v30  ;;  %8370 = vmatmul.mubr.f32.gmra.mrb[218].mxu0 %v16400_v16  ;;  %v6050_v38 = vpop.f32.mrb[113].mxu0  ;;  %v20202_v8 = vmax.f32 %v16639_v56, %v16803_v62 }
 0x3e9   :  { %10858 = vmatprep.mubr.msk.f32.mxu0 %vm128_vm0, %v16405_v63  ;;  %v6136_v63 = vpop.permute.xlu0 %6135 }
 0x3ea   :  { %v6110_v28 = vmax.f32 %v20201_v10, %v6101_v51 }
 0x3eb   :  { %v6053_v57 = vpop.f32.mrb[114].mxu0 }
 0x3ec   :  { %v6102_v15 = vmax.f32 %v16916_v58, %v6053_v57  ;;  %8375 = vmatmul.mubr.f32.gmra.mrb[220].mxu0 %v16424_v26  ;;  %v6055_v44 = vpop.f32.mrb[115].mxu0  ;;  %v6173_v16 = vadd.f32 %v6131_v60, %v6110_v28 }
 0x3ed   :  { %10859 = vmatprep.mubr.msk.f32.mxu0 %vm128_vm0, %v16434_v25  ;;  %v20203_v25 = vmax.f32 %v16657_v49, %v16823_v50  ;;  %v6146_v51 = vpop.permute.xlu0 %6145 }
 0x3ee   :  { %v6111_v38 = vmax.f32 %v20202_v8, %v6102_v15  ;;  %v6182_v26 = vmax.f32 %v6173_v16, 0.0 }
 0x3ef   :  { %v6058_v30 = vpop.f32.mrb[116].mxu0 }
 0x3f0   :  { %v6174_v48 = vadd.f32 %v6136_v63, %v6111_v38  ;;  %v6103_v19 = vmax.f32 %v16929_v17, %v6058_v30  ;;  %8380 = vmatmul.mubr.f32.gmra.mrb[222].mxu0 %v16451_v1  ;;  %v6060_v39 = vpop.f32.mrb[117].mxu0  ;;  %v6141_v17 = vpop.permute.xlu1 %6140 }
 0x3f1   :  { %10860 = vmatprep.mubr.msk.f32.mxu0 %vm128_vm0, %v16461_v4  ;;  %v20204_v4 = vmax.f32 %v16675_v45, %v16838_v37  ;;  %v20207_v45 = vld [vmem:[#allocation31_spill] sm:$0xff] }
 0x3f2   :  { %v6183_v58 = vmax.f32 %v6174_v48, 0.0  ;;  %v6112_v60 = vmax.f32 %v20203_v25, %v6103_v19  ;;  %v20210_v19 = vmax.f32 %v16711_v9, %v16858_v47  ;;  %v20214_v47 = vld [vmem:[#allocation53_spill] sm:$0xff] }
 0x3f3   :  { %v6063_v57 = vpop.f32.mrb[118].mxu0 }
 0x3f4   :  { %v6104_v56 = vmax.f32 %v16949_v35, %v6063_v57  ;;  %8385 = vmatmul.mubr.f32.gmra.mrb[224].mxu0 %v16478_v54  ;;  %v6065_v62 = vpop.f32.mrb[119].mxu0  ;;  %v17071_v44 = vpack.c.bf16 %v6183_v58, %v6182_v26  ;;  %v6175_v1 = vadd.f32 %v6141_v17, %v6112_v60  ;;  %v20205_v35 = vld [vmem:[#allocation28_spill] sm:$0xff]  ;;  %v6156_v26 = vpop.permute.xlu0 %6155  ;;  %v20212_v60 = vld [vmem:[#allocation62_spill] sm:$0xff] }
 0x3f5   :  { %10861 = vmatprep.mubr.msk.f32.mxu0 %vm128_vm0, %v16488_v7  ;;  %v20206_v7 = vmax.f32 %v16693_v0, %v16848_v3  ;;  %v20213_v62 = vmax.f32 %v16729_v32, %v16868_v23 }
 0x3f6   :  { %v6113_v48 = vmax.f32 %v20204_v4, %v6104_v56  ;;  %v6184_v28 = vmax.f32 %v6175_v1, 0.0 }
 0x3f7   :  { %v6068_v49 = vpop.f32.mrb[120].mxu0 }
 0x3f8   :  { %v6176_v50 = vadd.f32 %v6146_v51, %v6113_v48  ;;  %v6105_v10 = vmax.f32 %v16969_v21, %v6068_v49  ;;  %8390 = vmatmul.mubr.f32.gmra.mrb[226].mxu0 %v16501_v5  ;;  %v6070_v54 = vpop.f32.mrb[121].mxu0  ;;  %v6151_v21 = vpop.permute.xlu1 %6150  ;;  %v20209_v5 = vld [vmem:[#allocation30_spill] sm:$0xff]  ;;  %v20216_v51 = vld [vmem:[#allocation5_spill] sm:$0xff] }
 0x3f9   :  { %10862 = vmatprep.mubr.msk.f32.mxu0 %vm128_vm0, %v20205_v35  ;;  %v6166_v54 = vpop.permute.xlu0 %6165 }
 0x3fa   :  { %v6185_v15 = vmax.f32 %v6176_v50, 0.0  ;;  %v6114_v16 = vmax.f32 %v20206_v7, %v6105_v10  ;;  %v20217_v50 = vmax.f32 %v16747_v43, %v16878_v59  ;;  %v20222_v59 = vld [vmem:[#allocation59_spill] sm:$0xff] }
 0x3fb   :  { %v6073_v8 = vpop.f32.mrb[122].mxu0 }
 0x3fc   :  { %v6106_v37 = vmax.f32 %v16991_v55, %v6073_v8  ;;  %8395 = vmatmul.mubr.f32.gmra.mrb[228].mxu0 %v20207_v45  ;;  %v6075_v38 = vpop.f32.mrb[123].mxu0  ;;  %v17087_v63 = vpack.c.bf16 %v6185_v15, %v6184_v28  ;;  %v6177_v30 = vadd.f32 %v6151_v21, %v6114_v16  ;;  %v20211_v55 = vld [vmem:[#allocation52_spill] sm:$0xff]  ;;  %v20219_v15 = vld [vmem:[#allocation6_spill] sm:$0xff]  ;;  %v20220_v8 = vmax.f32 %v16765_v14, %v16893_v61  ;;  %v20227_v61 = vld [vmem:[#allocation43_spill] sm:$0xff] }
 0x3fd   :  { %10863 = vmatprep.mubr.msk.f32.mxu0 %vm128_vm0, %v20209_v5  ;;  %v20225_v5 = vld [vmem:[#allocation8_spill] sm:$0xff] }
 0x3fe   :  { %20208 = vst [vmem:[#allocation72_spill] sm:$0xff] %v17087_v63  ;;  %v6115_v39 = vmax.f32 %v20210_v19, %v6106_v37  ;;  %v6186_v57 = vmax.f32 %v6177_v30, 0.0  ;;  %v20226_v19 = vld [vmem:[#allocation65_spill] sm:$0xff] }
 0x3ff   :  { %v6078_v3 = vpop.f32.mrb[124].mxu0 }
 0x400   :  { %v6178_v0 = vadd.f32 %v6156_v26, %v6115_v39  ;;  %v6107_v58 = vmax.f32 %v17011_v42, %v6078_v3  ;;  %8400 = vmatmul.mubr.f32.gmra.mrb[230].mxu0 %v20211_v55  ;;  %v6080_v25 = vpop.f32.mrb[125].mxu0  ;;  %v6161_v42 = vpop.permute.xlu1 %6160  ;;  %v20228_v26 = vld [vmem:[#allocation42_spill] sm:$0xff] }
 0x401   :  { %10864 = vmatprep.mubr.msk.f32.mxu0 %vm128_vm0, %v20212_v60  ;;  %v20230_v55 = vld [vmem:[#allocation46_spill] sm:$0xff] }
 0x402   :  { %v6187_v56 = vmax.f32 %v6178_v0, 0.0  ;;  %v6116_v17 = vmax.f32 %v20213_v62, %v6107_v58  ;;  %v20229_v0 = vld [vmem:[#allocation66_spill] sm:$0xff] }
 0x403   :  { %v6083_v1 = vpop.f32.mrb[126].mxu0 }
 0x404   :  { %v6108_v9 = vmax.f32 %v17026_v20, %v6083_v1  ;;  %8405 = vmatmul.mubr.f32.gmra.mrb[232].mxu0 %v20214_v47  ;;  %v6085_v4 = vpop.f32.mrb[127].mxu0  ;;  %v17103_v48 = vpack.c.bf16 %v6187_v56, %v6186_v57  ;;  %v6179_v49 = vadd.f32 %v6161_v42, %v6116_v17  ;;  %v20218_v20 = vld [vmem:[#allocation58_spill] sm:$0xff]  ;;  %v20232_v42 = vld [vmem:[#allocation51_spill] sm:$0xff] }
 0x405   :  { %10865 = vmatprep.mubr.msk.f32.mxu0 %vm128_vm0, %v20216_v51 }
 0x406   :  { %20215 = vst [vmem:[#allocation12_spill] sm:$0xff] %v17103_v48  ;;  %v6117_v10 = vmax.f32 %v20217_v50, %v6108_v9  ;;  %v6188_v7 = vmax.f32 %v6179_v49, 0.0  ;;  %v20233_v49 = vld [vmem:[#allocation105_spill] sm:$0xff] }
 0x407   :  { %v6088_v32 = vpop.f32.mrb[128].mxu0 }
 0x408   :  { %v6180_v23 = vadd.f32 %v6166_v54, %v6117_v10  ;;  %v6109_v35 = vmax.f32 %v17038_v11, %v6088_v32  ;;  %8410 = vmatmul.mubr.f32.gmra.mrb[234].mxu0 %v20218_v20  ;;  %v6090_v28 = vpop.f32.mrb[129].mxu0  ;;  %v20224_v11 = vld [vmem:[#allocation7_spill] sm:$0xff]  ;;  %v20234_v54 = vld [vmem:[#allocation60_spill] sm:$0xff] }
 0x409   :  { %10866 = vmatprep.mubr.msk.f32.mxu0 %vm128_vm0, %v20219_v15 }
 0x40a   :  { %v6189_v16 = vmax.f32 %v6180_v23, 0.0  ;;  %v17117_v37 = vmax.f32 %v20220_v8, %v6109_v35 }
 0x40b   :  { %v17119_v43 = vpop.f32.mrb[130].mxu0 }
 0x40c   :  { %20221 = vst [vmem:[#allocation21_spill] sm:$0xff] %v17117_v37  ;;  %8415 = vmatmul.mubr.f32.gmra.mrb[236].mxu0 %v20222_v59  ;;  %v6721_v45 = vpop.f32.mrb[131].mxu0  ;;  %v17122_v38 = vpack.c.bf16 %v6189_v16, %v6188_v7  ;;  %v17304_v16 = vpop.permute.xlu1 %6170 }
 0x40d   :  { %10867 = vmatprep.mubr.msk.f32.mxu0 %vm128_vm0, %v20224_v11  ;;  %v20235_v11 = vld [vmem:[#allocation48_spill] sm:$0xff]  ;;  %20242 = vst [vmem:[#allocation73_spill] sm:$0xff] %v17304_v16  ;;  %v6937_v37 = vpop.permute.xlu0 %6936 }
 0x40e   :  { %20223 = vst [vmem:[#allocation92_spill] sm:$0xff] %v17122_v38 }
 0x40f   :  { %v17126_v21 = vpop.f32.mrb[132].mxu0 }
 0x410   :  { %8420 = vmatmul.mubr.f32.gmra.mrb[238].mxu0 %v20225_v5  ;;  %v6726_v30 = vpop.f32.mrb[133].mxu0 }
 0x411   :  { %10868 = vmatprep.mubr.msk.f32.mxu0 %vm128_vm0, %v20226_v19 }
 0x413   :  { %v17131_v14 = vpop.f32.mrb[134].mxu0 }
 0x414   :  { %8425 = vmatmul.mubr.f32.gmra.mrb[240].mxu0 %v20227_v61  ;;  %v6731_v39 = vpop.f32.mrb[135].mxu0 }
 0x415   :  { %10869 = vmatprep.mubr.msk.f32.mxu0 %vm128_vm0, %v20228_v26 }
 0x417   :  { %v17136_v3 = vpop.f32.mrb[136].mxu0 }
 0x418   :  { %8430 = vmatmul.mubr.f32.gmra.mrb[242].mxu0 %v20229_v0  ;;  %v6736_v58 = vpop.f32.mrb[137].mxu0 }
 0x419   :  { %10870 = vmatprep.mubr.msk.f32.mxu0 %vm128_vm0, %v20230_v55 }
 0x41b   :  { %v17141_v25 = vpop.f32.mrb[138].mxu0 }
 0x41c   :  { %8435 = vmatmul.mubr.f32.gmra.mrb[244].mxu0 %v16684_v34  ;;  %v6741_v60 = vpop.f32.mrb[139].mxu0 }
 0x41d   :  { %10871 = vmatprep.mubr.msk.f32.mxu0 %vm128_vm0, %v16691_v6  ;;  %v20237_v60 = vld [vmem:[#allocation49_spill] sm:$0xff] }
 0x41f   :  { %v17146_v57 = vpop.f32.mrb[140].mxu0 }
 0x420   :  { %8440 = vmatmul.mubr.f32.gmra.mrb[246].mxu0 %v16702_v33  ;;  %v6746_v56 = vpop.f32.mrb[141].mxu0 }
 0x421   :  { %10872 = vmatprep.mubr.msk.f32.mxu0 %vm128_vm0, %v16709_v36 }
 0x423   :  { %v17151_v62 = vpop.f32.mrb[142].mxu0 }
 0x424   :  { %8445 = vmatmul.mubr.f32.gmra.mrb[248].mxu0 %v16720_v22  ;;  %v6751_v17 = vpop.f32.mrb[143].mxu0 }
 0x425   :  { %10873 = vmatprep.mubr.msk.f32.mxu0 %vm128_vm0, %v16727_v53 }
 0x427   :  { %v17156_v34 = vpop.f32.mrb[144].mxu0 }
 0x428   :  { %8450 = vmatmul.mubr.f32.gmra.mrb[250].mxu0 %v16738_v18  ;;  %v6756_v6 = vpop.f32.mrb[145].mxu0  ;;  %v20231_v18 = vld [vmem:[#allocation44_spill] sm:$0xff] }
 0x429   :  { %10874 = vmatprep.mubr.msk.f32.mxu0 %vm128_vm0, %v16745_v52  ;;  %v20238_v6 = vld [vmem:[#allocation45_spill] sm:$0xff] }
 0x42b   :  { %v17161_v33 = vpop.f32.mrb[146].mxu0 }
 0x42c   :  { %v17163_v1 = vpop.f32.mrb[62].mxu1  ;;  %8455 = vmatmul.mubr.f32.gmra.mrb[252].mxu0 %v16756_v13  ;;  %v6761_v36 = vpop.f32.mrb[147].mxu0 }
 0x42d   :  { %v2691_v22 = vpop.f32.mrb[63].mxu1  ;;  %10875 = vmatprep.mubr.msk.f32.mxu0 %vm128_vm0, %v16763_v41 }
 0x42f   :  { %v17168_v53 = vpop.f32.mrb[148].mxu0 }
 0x430   :  { %v17170_v9 = vpop.f32.mrb[64].mxu1  ;;  %8460 = vmatmul.mubr.f32.gmra.mrb[254].mxu0 %v20231_v18  ;;  %v6898_v52 = vmax.f32 %v17119_v43, %v17168_v53  ;;  %v6766_v47 = vpop.f32.mrb[149].mxu0 }
 0x431   :  { %v2696_v4 = vpop.f32.mrb[65].mxu1  ;;  %10876 = vmatprep.mubr.msk.f32.mxu0 %vm128_vm0, %v20232_v42 }
 0x432   :  { %v20239_v4 = vld [vmem:[#allocation16_spill] sm:$0xff] }
 0x433   :  { %v17177_v13 = vpop.f32.mrb[150].mxu0 }
 0x434   :  { %v17179_v51 = vpop.f32.mrb[66].mxu1  ;;  %8465 = vmatmul.mubr.f32.gmra.mrb[0].mxu0 %v20233_v49  ;;  %v6771_v50 = vpop.f32.mrb[151].mxu0  ;;  %v20243_v48 = vmax.f32 %v17126_v21, %v17177_v13 }
 0x435   :  { %v2701_v10 = vpop.f32.mrb[67].mxu1  ;;  %10877 = vmatprep.mubr.msk.f32.mxu0 %vm128_vm0, %v20234_v54 }
 0x437   :  { %v17186_v32 = vpop.f32.mrb[152].mxu0 }
 0x438   :  { %v17188_v23 = vpop.f32.mrb[68].mxu1  ;;  %8470 = vmatmul.mubr.f32.gmra.mrb[2].mxu0 %v16814_v31  ;;  %v6776_v20 = vpop.f32.mrb[153].mxu0 }
 0x439   :  { %v2706_v28 = vpop.f32.mrb[69].mxu1  ;;  %10878 = vmatprep.mubr.msk.f32.mxu0 %vm128_vm0, %v16821_v24  ;;  %v20240_v20 = vld [vmem:[#allocation50_spill] sm:$0xff] }
 0x43b   :  { %v17195_v15 = vpop.f32.mrb[154].mxu0 }
 0x43c   :  { %v17197_v7 = vpop.f32.mrb[70].mxu1  ;;  %8475 = vmatmul.mubr.f32.gmra.mrb[4].mxu0 %v16834_v40  ;;  %v6781_v8 = vpop.f32.mrb[155].mxu0  ;;  %v20236_v40 = vld [vmem:[#allocation17_spill] sm:$0xff] }
 0x43d   :  { %v2711_v59 = vpop.f32.mrb[71].mxu1  ;;  %10879 = vmatprep.mubr.msk.f32.mxu0 %vm128_vm0, %v16927_v46  ;;  %v10409_v46 = vld [vmem:[%s19500_s3 + $0x180] sm:$0xff] }
 0x43e   :  { %11479 = vmatprep.mubr.msk.f32.mxu1 %vm597_vm1, %v10409_v46  ;;  %v20241_v59 = vld [vmem:[#allocation106_spill] sm:$0xff] }
 0x43f   :  { %v17204_v31 = vpop.f32.mrb[156].mxu0 }
 0x440   :  { %v17206_v45 = vpop.f32.mrb[72].mxu1  ;;  %8480 = vmatmul.mubr.f32.gmra.mrb[6].mxu0 %v20235_v11  ;;  %v6786_v5 = vpop.f32.mrb[157].mxu0 }
 0x441   :  { %v2716_v30 = vpop.f32.mrb[73].mxu1  ;;  %10880 = vmatprep.mubr.msk.f32.mxu0 %vm128_vm0, %v20236_v40 }
 0x443   :  { %v17213_v19 = vpop.f32.mrb[158].mxu0 }
 0x444   :  { %v17218_v61 = vpop.f32.mrb[74].mxu1  ;;  %8485 = vmatmul.mubr.f32.gmra.mrb[8].mxu0 %v16962_v29  ;;  %v6791_v26 = vpop.f32.mrb[159].mxu0 }
 0x445   :  { %v2721_v0 = vpop.f32.mrb[75].mxu1  ;;  %10881 = vmatprep.mubr.msk.f32.mxu0 %vm128_vm0, %v16967_v12 }
 0x447   :  { %v17226_v58 = vpop.f32.mrb[160].mxu0 }
 0x448   :  { %v17228_v55 = vpop.f32.mrb[76].mxu1  ;;  %8490 = vmatmul.mubr.f32.gmra.mrb[10].mxu0 %v20237_v60  ;;  %v6796_v29 = vpop.f32.mrb[161].mxu0 }
 0x449   :  { %v2726_v17 = vpop.f32.mrb[77].mxu1  ;;  %10882 = vmatprep.mubr.msk.f32.mxu0 %vm128_vm0, %v20238_v6 }
 0x44b   :  { %v17235_v36 = vpop.f32.mrb[162].mxu0 }
 0x44c   :  { %v17237_v22 = vpop.f32.mrb[78].mxu1  ;;  %8495 = vmatmul.mubr.f32.gmra.mrb[12].mxu0 %v17002_v2  ;;  %v6801_v18 = vpop.f32.mrb[163].mxu0 }
 0x44d   :  { %v2731_v47 = vpop.f32.mrb[79].mxu1  ;;  %10883 = vmatprep.mubr.msk.f32.mxu0 %vm128_vm0, %v20239_v4 }
 0x44f   :  { %v17244_v42 = vpop.f32.mrb[164].mxu0 }
 0x450   :  { %v17246_v49 = vpop.f32.mrb[80].mxu1  ;;  %8500 = vmatmul.mubr.f32.gmra.mrb[14].mxu0 %v17024_v27  ;;  %v6806_v10 = vpop.f32.mrb[165].mxu0 }
 0x451   :  { %v2736_v54 = vpop.f32.mrb[81].mxu1  ;;  %10884 = vmatprep.mubr.msk.f32.mxu0 %vm128_vm0, %v20240_v20 }
 0x453   :  { %v6809_v28 = vpop.f32.mrb[166].mxu0 }
 0x454   :  { %v17255_v8 = vpop.f32.mrb[82].mxu1  ;;  %8505 = vmatmul.mubr.f32.gmra.mrb[16].mxu0 %v20241_v59  ;;  %v6811_v11 = vpop.f32.mrb[167].mxu0 }
 0x455   :  { %v2741_v5 = vpop.f32.mrb[83].mxu1 }
 0x457   :  { %v6814_v30 = vpop.f32.mrb[168].mxu0 }
 0x458   :  { %v17260_v40 = vpop.f32.mrb[84].mxu1  ;;  %v6816_v46 = vpop.f32.mrb[169].mxu0 }
 0x459   :  { %v2746_v0 = vpop.f32.mrb[85].mxu1 }
 0x45b   :  { %v6819_v60 = vpop.f32.mrb[170].mxu0 }
 0x45c   :  { %v17264_v29 = vpop.f32.mrb[86].mxu1  ;;  %v6821_v17 = vpop.f32.mrb[171].mxu0 }
 0x45d   :  { %v2751_v18 = vpop.f32.mrb[87].mxu1 }
 0x45f   :  { %v17268_v47 = vpop.f32.mrb[172].mxu0 }
 0x460   :  { %v17270_v4 = vpop.f32.mrb[88].mxu1  ;;  %v6826_v10 = vpop.f32.mrb[173].mxu0 }
 0x461   :  { %v2756_v20 = vpop.f32.mrb[89].mxu1 }
 0x463   :  { %v17274_v59 = vpop.f32.mrb[174].mxu0 }
 0x464   :  { %v17276_v11 = vpop.f32.mrb[90].mxu1  ;;  %v6831_v5 = vpop.f32.mrb[175].mxu0 }
 0x465   :  { %v2761_v0 = vpop.f32.mrb[91].mxu1 }
 0x467   :  { %v17280_v17 = vpop.f32.mrb[176].mxu0 }
 0x468   :  { %v17282_v18 = vpop.f32.mrb[92].mxu1  ;;  %v6836_v6 = vpop.f32.mrb[177].mxu0 }
 0x469   :  { %v2766_v26 = vpop.f32.mrb[93].mxu1 }
 0x46b   :  { %v17286_v54 = vpop.f32.mrb[178].mxu0 }
 0x46c   :  { %v17288_v20 = vpop.f32.mrb[94].mxu1  ;;  %v6841_v27 = vpop.f32.mrb[179].mxu0 }
 0x46d   :  { %v2771_v2 = vpop.f32.mrb[95].mxu1 }
 0x46f   :  { %v17292_v46 = vpop.f32.mrb[180].mxu0 }
 0x470   :  { %v17294_v0 = vpop.f32.mrb[96].mxu1  ;;  %v6846_v50 = vpop.f32.mrb[181].mxu0 }
 0x471   :  { %v2776_v12 = vpop.f32.mrb[97].mxu1 }
 0x473   :  { %v17298_v10 = vpop.f32.mrb[182].mxu0 }
 0x474   :  { %v17300_v26 = vpop.f32.mrb[98].mxu1  ;;  %v6851_v56 = vpop.f32.mrb[183].mxu0 }
 0x475   :  { %v2781_v39 = vpop.f32.mrb[99].mxu1 }
 0x477   :  { %v6854_v27 = vpop.f32.mrb[184].mxu0 }
 0x478   :  { %v17302_v24 = vpop.f32.mrb[100].mxu1  ;;  %v6907_v5 = vmax.f32 %v6809_v28, %v6854_v27  ;;  %v6856_v2 = vpop.f32.mrb[185].mxu0 }
 0x479   :  { %v2786_v35 = vpop.f32.mrb[101].mxu1  ;;  %v6942_v27 = vpop.permute.xlu1 %6941 }
 0x47a   :  { %v6916_v50 = vmax.f32 %v6898_v52, %v6907_v5 }
 0x47b   :  { %v6859_v6 = vpop.f32.mrb[186].mxu0 }
 0x47c   :  { %v17309_v12 = vpop.f32.mrb[102].mxu1  ;;  %v6908_v41 = vmax.f32 %v6814_v30, %v6859_v6  ;;  %v6861_v38 = vpop.f32.mrb[187].mxu0  ;;  %v6979_v39 = vadd.f32 %v6937_v37, %v6916_v50 }
 0x47d   :  { %v2791_v56 = vpop.f32.mrb[103].mxu1  ;;  %v20244_v38 = vmax.f32 %v17131_v14, %v17186_v32 }
 0x47e   :  { %v6917_v28 = vmax.f32 %v20243_v48, %v6908_v41  ;;  %v6988_v52 = vmax.f32 %v6979_v39, 0.0  ;;  %v6947_v41 = vpop.permute.xlu0 %6946 }
 0x47f   :  { %v6864_v2 = vpop.f32.mrb[188].mxu0 }
 0x480   :  { %v6980_v16 = vadd.f32 %v6942_v27, %v6917_v28  ;;  %v17314_v35 = vpop.f32.mrb[104].mxu1  ;;  %v6909_v63 = vmax.f32 %v6819_v60, %v6864_v2  ;;  %v6866_v43 = vpop.f32.mrb[189].mxu0  ;;  %v20245_v60 = vmax.f32 %v17136_v3, %v17195_v15 }
 0x481   :  { %v2796_v53 = vpop.f32.mrb[105].mxu1 }
 0x482   :  { %v6989_v5 = vmax.f32 %v6980_v16, 0.0  ;;  %v6918_v30 = vmax.f32 %v20244_v38, %v6909_v63  ;;  %v6952_v16 = vpop.permute.xlu1 %6951  ;;  %v20246_v53 = vmax.f32 %v17141_v25, %v17204_v31 }
 0x483   :  { %v6869_v6 = vpop.f32.mrb[190].mxu0 }
 0x484   :  { %v17319_v37 = vpop.f32.mrb[106].mxu1  ;;  %v6910_v21 = vmax.f32 %v17268_v47, %v6869_v6  ;;  %v6871_v48 = vpop.f32.mrb[191].mxu0  ;;  %v17322_v13 = vpack.c.bf16 %v6989_v5, %v6988_v52  ;;  %v6981_v56 = vadd.f32 %v6947_v41, %v6918_v30 }
 0x485   :  { %v2801_v50 = vpop.f32.mrb[107].mxu1  ;;  %v6957_v6 = vpop.permute.xlu0 %6956 }
 0x486   :  { %v6919_v39 = vmax.f32 %v20245_v60, %v6910_v21  ;;  %v6990_v47 = vmax.f32 %v6981_v56, 0.0  ;;  %v6962_v50 = vpop.permute.xlu1 %6961 }
 0x487   :  { %v6874_v28 = vpop.f32.mrb[192].mxu0 }
 0x488   :  { %v6982_v27 = vadd.f32 %v6952_v16, %v6919_v39  ;;  %v17327_v14 = vpop.f32.mrb[108].mxu1  ;;  %v6911_v63 = vmax.f32 %v17274_v59, %v6874_v28  ;;  %v6876_v32 = vpop.f32.mrb[193].mxu0  ;;  %v20247_v59 = vmax.f32 %v17146_v57, %v17213_v19 }
 0x489   :  { %v2806_v2 = vpop.f32.mrb[109].mxu1 }
 0x48a   :  { %v6991_v43 = vmax.f32 %v6982_v27, 0.0  ;;  %v6920_v52 = vmax.f32 %v20246_v53, %v6911_v63  ;;  %v20248_v27 = vmax.f32 %v17151_v62, %v17226_v58 }
 0x48b   :  { %v6879_v5 = vpop.f32.mrb[194].mxu0 }
 0x48c   :  { %v17333_v38 = vpop.f32.mrb[110].mxu1  ;;  %v6912_v3 = vmax.f32 %v17280_v17, %v6879_v5  ;;  %v6881_v15 = vpop.f32.mrb[195].mxu0  ;;  %v17336_v30 = vpack.c.bf16 %v6991_v43, %v6990_v47  ;;  %v6983_v48 = vadd.f32 %v6957_v6, %v6920_v52 }
 0x48d   :  { %v2811_v21 = vpop.f32.mrb[111].mxu1  ;;  %v6967_v43 = vpop.permute.xlu0 %6966 }
 0x48e   :  { %v6921_v41 = vmax.f32 %v20247_v59, %v6912_v3  ;;  %v6992_v17 = vmax.f32 %v6983_v48, 0.0  ;;  %v6972_v3 = vpop.permute.xlu1 %6971 }
 0x48f   :  { %v6884_v56 = vpop.f32.mrb[196].mxu0 }
 0x490   :  { %v6984_v60 = vadd.f32 %v6962_v50, %v6921_v41  ;;  %v17341_v25 = vpop.f32.mrb[112].mxu1  ;;  %v6913_v31 = vmax.f32 %v17286_v54, %v6884_v56  ;;  %v6886_v39 = vpop.f32.mrb[197].mxu0  ;;  %v20249_v54 = vmax.f32 %v17156_v34, %v17235_v36  ;;  %v20250_v50 = vmax.f32 %v17161_v33, %v17244_v42 }
 0x491   :  { %v2816_v16 = vpop.f32.mrb[113].mxu1  ;;  %v20251_v34 = vmax.f32 %v17163_v1, %v17246_v49  ;;  %v20253_v33 = vmax.f32 %v17170_v9, %v17255_v8  ;;  %v20254_v49 = vld [vmem:[#allocation35_spill] sm:$0xff] }
 0x492   :  { %v6993_v28 = vmax.f32 %v6984_v60, 0.0  ;;  %v6922_v63 = vmax.f32 %v20248_v27, %v6913_v31 }
 0x493   :  { %v6889_v32 = vpop.f32.mrb[198].mxu0 }
 0x494   :  { %v17347_v2 = vpop.f32.mrb[114].mxu1  ;;  %v6914_v57 = vmax.f32 %v17292_v46, %v6889_v32  ;;  %v6891_v19 = vpop.f32.mrb[199].mxu0  ;;  %v17350_v47 = vpack.c.bf16 %v6993_v28, %v6992_v17  ;;  %v6985_v52 = vadd.f32 %v6967_v43, %v6922_v63  ;;  %v20252_v17 = vld [vmem:[#allocation32_spill] sm:$0xff] }
 0x495   :  { %v2821_v53 = vpop.f32.mrb[115].mxu1 }
 0x496   :  { %v6923_v5 = vmax.f32 %v20249_v54, %v6914_v57  ;;  %v6994_v59 = vmax.f32 %v6985_v52, 0.0 }
 0x497   :  { %v6894_v15 = vpop.f32.mrb[200].mxu0 }
 0x498   :  { %v6986_v6 = vadd.f32 %v6972_v3, %v6923_v5  ;;  %v2824_v62 = vpop.f32.mrb[116].mxu1  ;;  %v6915_v58 = vmax.f32 %v17298_v10, %v6894_v15  ;;  %v6896_v21 = vpop.f32.mrb[201].mxu0 }
 0x499   :  { %v2877_v48 = vmax.f32 %v17300_v26, %v2824_v62  ;;  %v2826_v46 = vpop.f32.mrb[117].mxu1 }
 0x49a   :  { %v6995_v41 = vmax.f32 %v6986_v6, 0.0  ;;  %v17360_v56 = vmax.f32 %v20250_v50, %v6915_v58  ;;  %v20256_v6 = vld [vmem:[#allocation34_spill] sm:$0xff] }
 0x49b   :  { %v2886_v36 = vmax.f32 %v20251_v34, %v2877_v48  ;;  %v17365_v60 = vpop.f32.mrb[202].mxu0  ;;  %v20259_v34 = vmax.f32 %v17197_v7, %v17270_v4  ;;  %v20262_v4 = vld [vmem:[#allocation39_spill] sm:$0xff] }
 0x49c   :  { %v2829_v31 = vpop.f32.mrb[118].mxu1  ;;  %v8333_v39 = vpop.f32.mrb[203].mxu0  ;;  %v17367_v10 = vpack.c.bf16 %v6995_v41, %v6994_v59 }
 0x49d   :  { %v2878_v26 = vmax.f32 %v17302_v24, %v2829_v31  ;;  %v2831_v16 = vpop.f32.mrb[119].mxu1  ;;  %v2949_v28 = vadd.f32 %v20252_v17, %v2886_v36  ;;  %v20255_v24 = vmax.f32 %v17179_v51, %v17260_v40  ;;  %v20258_v40 = vld [vmem:[#allocation37_spill] sm:$0xff]  ;;  %v20260_v17 = vld [vmem:[#allocation36_spill] sm:$0xff] }
 0x49f   :  { %v2887_v42 = vmax.f32 %v20253_v33, %v2878_v26  ;;  %v17374_v27 = vpop.f32.mrb[204].mxu0  ;;  %v2958_v43 = vmax.f32 %v2949_v28, 0.0 }
 0x4a0   :  { %v2834_v63 = vpop.f32.mrb[120].mxu1  ;;  %v8338_v1 = vpop.f32.mrb[205].mxu0 }
 0x4a1   :  { %v2950_v32 = vadd.f32 %v20254_v49, %v2887_v42  ;;  %v2879_v57 = vmax.f32 %v17309_v12, %v2834_v63  ;;  %v2836_v19 = vpop.f32.mrb[121].mxu1  ;;  %v20257_v12 = vmax.f32 %v17188_v23, %v17264_v29 }
 0x4a2   :  { %v20263_v19 = vmax.f32 %v17218_v61, %v17282_v18  ;;  %v20266_v18 = vld [vmem:[#allocation41_spill] sm:$0xff] }
 0x4a3   :  { %v2959_v53 = vmax.f32 %v2950_v32, 0.0  ;;  %v2888_v52 = vmax.f32 %v20255_v24, %v2879_v57  ;;  %v17381_v54 = vpop.f32.mrb[206].mxu0 }
 0x4a4   :  { %v2839_v5 = vpop.f32.mrb[122].mxu1  ;;  %v8343_v9 = vpop.f32.mrb[207].mxu0 }
 0x4a5   :  { %v2880_v8 = vmax.f32 %v17314_v35, %v2839_v5  ;;  %v2841_v3 = vpop.f32.mrb[123].mxu1  ;;  %v12122_v15 = vpack.c.bf16 %v2959_v53, %v2958_v43  ;;  %v2951_v62 = vadd.f32 %v20256_v6, %v2888_v52  ;;  %v20264_v9 = vld [vmem:[#allocation38_spill] sm:$0xff] }
 0x4a7   :  { %v2889_v58 = vmax.f32 %v20257_v12, %v2880_v8  ;;  %12123 = vmatprep.subr.bf16.mxu1 %v12122_v15  ;;  %v17388_v21 = vpop.f32.mrb[208].mxu0  ;;  %v2960_v35 = vmax.f32 %v2951_v62, 0.0 }
 0x4a8   :  { %v2844_v48 = vpop.f32.mrb[124].mxu1  ;;  %12125 = vmatpush3.bf16.msra.mxu1 %v12122_v15  ;;  %v8348_v51 = vpop.f32.mrb[209].mxu0 }
 0x4a9   :  { %v2952_v46 = vadd.f32 %v20258_v40, %v2889_v58  ;;  %v2881_v59 = vmax.f32 %v17319_v37, %v2844_v48  ;;  %v2846_v41 = vpop.f32.mrb[125].mxu1  ;;  %v20261_v37 = vmax.f32 %v17206_v45, %v17276_v11  ;;  %v20267_v51 = vmax.f32 %v17237_v22, %v17294_v0  ;;  %v10410_v22 = vld [vmem:[%s19500_s3 + $0x188] sm:$0xff]  ;;  %v10411_v0 = vld [vmem:[%s19500_s3 + $0x190] sm:$0xff] }
 0x4ab   :  { %v2961_v50 = vmax.f32 %v2952_v46, 0.0  ;;  %v2890_v36 = vmax.f32 %v20259_v34, %v2881_v59  ;;  %v17395_v31 = vpop.f32.mrb[210].mxu0  ;;  %v20268_v59 = vld [vmem:[#allocation40_spill] sm:$0xff] }
 0x4ac   :  { %v2849_v23 = vpop.f32.mrb[126].mxu1  ;;  %v8353_v29 = vpop.f32.mrb[211].mxu0 }
 0x4ad   :  { %v2882_v39 = vmax.f32 %v17327_v14, %v2849_v23  ;;  %v2851_v26 = vpop.f32.mrb[127].mxu1  ;;  %v12126_v16 = vpack.c.bf16 %v2961_v50, %v2960_v35  ;;  %v2953_v28 = vadd.f32 %v20260_v17, %v2890_v36  ;;  %v10413_v17 = vld [vmem:[%s19500_s3 + $0x1a0] sm:$0xff] }
 0x4ae   :  { %v10412_v26 = vld [vmem:[%s19500_s3 + $0x198] sm:$0xff] }
 0x4af   :  { %v2891_v33 = vmax.f32 %v20261_v37, %v2882_v39  ;;  %12127 = vmatprep.subr.bf16.mxu1 %v12126_v16  ;;  %v17402_v42 = vpop.f32.mrb[212].mxu0  ;;  %v2962_v14 = vmax.f32 %v2953_v28, 0.0  ;;  %v20269_v39 = vld [vmem:[#allocation96_spill] sm:$0xff] }
 0x4b0   :  { %v2854_v63 = vpop.f32.mrb[128].mxu1  ;;  %12129 = vmatpush3.bf16.msra.mxu1 %v12126_v16  ;;  %v8358_v7 = vpop.f32.mrb[213].mxu0  ;;  %v20270_v16 = vld [vmem:[#allocation97_spill] sm:$0xff] }
 0x4b1   :  { %v2954_v1 = vadd.f32 %v20262_v4, %v2891_v33  ;;  %v2883_v49 = vmax.f32 %v17333_v38, %v2854_v63  ;;  %v2856_v32 = vpop.f32.mrb[129].mxu1  ;;  %v20265_v38 = vmax.f32 %v17228_v55, %v17288_v20  ;;  %v10414_v63 = vld [vmem:[%s19500_s3 + $0x1a8] sm:$0xff]  ;;  %v20271_v7 = vld [vmem:[#allocation98_spill] sm:$0xff]  ;;  %v10415_v4 = vld [vmem:[%s19500_s3 + $0x1b0] sm:$0xff] }
 0x4b3   :  { %v2963_v57 = vmax.f32 %v2954_v1, 0.0  ;;  %v2892_v43 = vmax.f32 %v20263_v19, %v2883_v49  ;;  %v17409_v53 = vpop.f32.mrb[214].mxu0 }
 0x4b4   :  { %v2859_v45 = vpop.f32.mrb[130].mxu1  ;;  %v8363_v11 = vpop.f32.mrb[215].mxu0 }
 0x4b5   :  { %v2884_v24 = vmax.f32 %v17341_v25, %v2859_v45  ;;  %v2861_v52 = vpop.f32.mrb[131].mxu1  ;;  %v12130_v5 = vpack.c.bf16 %v2963_v57, %v2962_v14  ;;  %v2955_v8 = vadd.f32 %v20264_v9, %v2892_v43  ;;  %v20272_v14 = vld [vmem:[#allocation99_spill] sm:$0xff]  ;;  %v20273_v57 = vld [vmem:[#allocation26_spill] sm:$0xff]  ;;  %v20274_v45 = vld [vmem:[#allocation100_spill] sm:$0xff] }
 0x4b6   :  { %v3763_v19 = vadd.f32 %v20273_v57, %v20272_v14  ;;  %v10416_v43 = vld [vmem:[%s19500_s3 + $0x1b8] sm:$0xff]  ;;  %v10417_v11 = vld [vmem:[%s19500_s3 + $0x1c0] sm:$0xff]  ;;  %v10483_v57 = vld [vmem:[%s19500_s3 + $0x230] sm:$0xff] }
 0x4b7   :  { %v2893_v3 = vmax.f32 %v20265_v38, %v2884_v24  ;;  %12131 = vmatprep.subr.bf16.mxu1 %v12130_v5  ;;  %v17416_v15 = vpop.f32.mrb[216].mxu0  ;;  %v2964_v25 = vmax.f32 %v2955_v8, 0.0  ;;  %v10418_v8 = vld [vmem:[%s19500_s3 + $0x1c8] sm:$0xff]  ;;  %v10419_v38 = vld [vmem:[%s19500_s3 + $0x1d0] sm:$0xff]  ;;  %v20277_v14 = vld [vmem:[#allocation54_spill] sm:$0xff] }
 0x4b8   :  { %v2864_v6 = vpop.f32.mrb[132].mxu1  ;;  %12133 = vmatpush3.bf16.msra.mxu1 %v12130_v5  ;;  %v8368_v61 = vpop.f32.mrb[217].mxu0  ;;  %v3772_v9 = vmax.f32 %v3763_v19, 0.0 }
 0x4b9   :  { %v2956_v62 = vadd.f32 %v20266_v18, %v2893_v3  ;;  %v2885_v12 = vmax.f32 %v17347_v2, %v2864_v6  ;;  %v2866_v58 = vpop.f32.mrb[133].mxu1  ;;  %v10420_v18 = vld [vmem:[%s19500_s3 + $0x1d8] sm:$0xff] }
 0x4bb   :  { %v2965_v48 = vmax.f32 %v2956_v62, 0.0  ;;  %v2894_v40 = vmax.f32 %v20267_v51, %v2885_v12  ;;  %v17423_v46 = vpop.f32.mrb[218].mxu0  ;;  %v20275_v62 = vld [vmem:[#allocation29_spill] sm:$0xff]  ;;  %v10421_v12 = vld [vmem:[%s19500_s3 + $0x1e0] sm:$0xff]  ;;  %v10422_v51 = vld [vmem:[%s19500_s3 + $0x1e8] sm:$0xff] }
 0x4bc   :  { %v8373_v55 = vpop.f32.mrb[219].mxu0 }
 0x4bd   :  { %v12134_v20 = vpack.c.bf16 %v2965_v48, %v2964_v25  ;;  %v2957_v41 = vadd.f32 %v20268_v59, %v2894_v40  ;;  %v10423_v40 = vld [vmem:[%s19500_s3 + $0x1f0] sm:$0xff] }
 0x4bf   :  { %12135 = vmatprep.subr.bf16.mxu1 %v12134_v20  ;;  %v2966_v35 = vmax.f32 %v2957_v41, 0.0  ;;  %v17426_v50 = vpop.f32.mrb[220].mxu0  ;;  %v10424_v41 = vld [vmem:[%s19500_s3 + $0x1f8] sm:$0xff] }
 0x4c0   :  { %12137 = vmatpush3.bf16.msra.mxu1 %v12134_v20  ;;  %v8510_v2 = vmax.f32 %v17365_v60, %v17426_v50  ;;  %v8378_v34 = vpop.f32.mrb[221].mxu0  ;;  %v10551_v60 = vld [vmem:[%s19500_s3 + $0x2b0] sm:$0xff] }
 0x4c1   :  { %11477 = vmatprep.subr.mxu1 %v2966_v35 }
 0x4c3   :  { %v17436_v36 = vpop.f32.mrb[222].mxu0 }
 0x4c4   :  { %11478 = vmatpush3.msra.mxu1 %v2966_v35  ;;  %v8511_v23 = vmax.f32 %v17374_v27, %v17436_v36  ;;  %v8383_v29 = vpop.f32.mrb[223].mxu0  ;;  %v10477_v35 = vld [vmem:[%s19500_s3 + $0x200] sm:$0xff]  ;;  %v4846_v27 = vld [vmem:[%s19495_s2 + $0x1c8] sm:$0xff] }
 0x4c5   :  { %11480 = vmatmul.mubr.msk.f32.vlgmr.msra.gmra.mrb[0].mxu1 %vm597_vm1, %v10410_v22  ;;  %12175 = vmatprep.subr.bf16.mxu1 %v20269_v39  ;;  %v10478_v29 = vld [vmem:[%s19500_s3 + $0x208] sm:$0xff]  ;;  %v10553_v36 = vld [vmem:[%s19500_s3 + $0x2c0] sm:$0xff] }
 0x4c6   :  { %12177 = vmatpush3.bf16.msra.mxu1 %v20269_v39  ;;  %11482 = vmatprep.mubr.msk.f32.mxu1 %vm597_vm1, %v10411_v0  ;;  %v10479_v39 = vld [vmem:[%s19500_s3 + $0x210] sm:$0xff] }
 0x4c7   :  { %12179 = vmatprep.subr.bf16.mxu1 %v20270_v16  ;;  %v17451_v28 = vpop.f32.mrb[224].mxu0 }
 0x4c8   :  { %v8512_v37 = vmax.f32 %v17381_v54, %v17451_v28  ;;  %v8388_v33 = vpop.f32.mrb[225].mxu0  ;;  %v10555_v54 = vld [vmem:[%s19500_s3 + $0x2d0] sm:$0xff] }
 0x4c9   :  { %11483 = vmatmul.mubr.msk.f32.gmra.mrb[2].mxu1 %vm597_vm1, %v10412_v26  ;;  %v20276_v33 = vld [vmem:[#allocation63_spill] sm:$0xff] }
 0x4ca   :  { %12181 = vmatpush3.bf16.msra.mxu1 %v20270_v16  ;;  %11485 = vmatprep.mubr.msk.f32.mxu1 %vm597_vm1, %v10413_v17  ;;  %v10480_v17 = vld [vmem:[%s19500_s3 + $0x218] sm:$0xff] }
 0x4cb   :  { %12183 = vmatprep.subr.bf16.mxu1 %v20271_v7  ;;  %v17465_v1 = vpop.f32.mrb[226].mxu0 }
 0x4cc   :  { %v8513_v49 = vmax.f32 %v17388_v21, %v17465_v1  ;;  %v8393_v32 = vpop.f32.mrb[227].mxu0  ;;  %v4850_v21 = vld [vmem:[%s19495_s2 + $0x1e8] sm:$0xff]  ;;  %v10557_v1 = vld [vmem:[%s19500_s3 + $0x2e0] sm:$0xff] }
 0x4cd   :  { %11486 = vmatmul.mubr.msk.f32.gmra.mrb[4].mxu1 %vm597_vm1, %v10414_v63  ;;  %v10481_v63 = vld [vmem:[%s19500_s3 + $0x220] sm:$0xff]  ;;  %v10482_v32 = vld [vmem:[%s19500_s3 + $0x228] sm:$0xff] }
 0x4ce   :  { %12185 = vmatpush3.bf16.msra.mxu1 %v20271_v7  ;;  %11488 = vmatprep.mubr.msk.f32.mxu1 %vm597_vm1, %v10415_v4 }
 0x4cf   :  { %12187 = vmatprep.subr.bf16.mxu1 %v20274_v45  ;;  %v17481_v24 = vpop.f32.mrb[228].mxu0 }
 0x4d0   :  { %v8514_v52 = vmax.f32 %v17395_v31, %v17481_v24  ;;  %v8398_v5 = vpop.f32.mrb[229].mxu0  ;;  %v10559_v31 = vld [vmem:[%s19500_s3 + $0x2f0] sm:$0xff] }
 0x4d1   :  { %11489 = vmatmul.mubr.msk.f32.gmra.mrb[6].mxu1 %vm597_vm1, %v10416_v43 }
 0x4d2   :  { %12189 = vmatpush3.bf16.msra.mxu1 %v20274_v45  ;;  %11491 = vmatprep.mubr.msk.f32.mxu1 %vm597_vm1, %v10417_v11  ;;  %v20278_v45 = vld [vmem:[#allocation61_spill] sm:$0xff]  ;;  %v20279_v11 = vld [vmem:[#allocation15_spill] sm:$0xff] }
 0x4d3   :  { %11519 = vmatprep.subr.mxu1 %v3772_v9  ;;  %v17494_v3 = vpop.f32.mrb[230].mxu0  ;;  %v4569_v5 = vadd.f32 %v20279_v11, %v20278_v45  ;;  %v10492_v45 = vld [vmem:[%s19500_s3 + $0x278] sm:$0xff]  ;;  %v10545_v11 = vld [vmem:[%s19500_s3 + $0x280] sm:$0xff] }
 0x4d4   :  { %v8515_v6 = vmax.f32 %v17402_v42, %v17494_v3  ;;  %v8403_v61 = vpop.f32.mrb[231].mxu0  ;;  %v4854_v42 = vld [vmem:[%s19495_s2 + $0x208] sm:$0xff] }
 0x4d5   :  { %11492 = vmatmul.mubr.msk.f32.gmra.mrb[8].mxu1 %vm597_vm1, %v10418_v8  ;;  %v17577_v8 = vpop.permute.xlu0 %6976  ;;  %v10485_v61 = vld [vmem:[%s19500_s3 + $0x240] sm:$0xff]  ;;  %v17800_v3 = vld [vmem:[%s19496_s0 + $0x8] sm:$0xff] }
 0x4d6   :  { %11520 = vmatpush3.msra.mxu1 %v3772_v9  ;;  %11494 = vmatprep.mubr.msk.f32.mxu1 %vm597_vm1, %v10419_v38  ;;  %v10484_v9 = vld [vmem:[%s19500_s3 + $0x238] sm:$0xff]  ;;  %v20280_v38 = vld [vmem:[#allocation64_spill] sm:$0xff] }
 0x4d7   :  { %12227 = vmatprep.subr.bf16.mxu1 %v20275_v62  ;;  %v17507_v58 = vpop.f32.mrb[232].mxu0 }
 0x4d8   :  { %v8516_v25 = vmax.f32 %v17409_v53, %v17507_v58  ;;  %v8408_v48 = vpop.f32.mrb[233].mxu0 }
 0x4d9   :  { %11495 = vmatmul.mubr.msk.f32.gmra.mrb[10].mxu1 %vm597_vm1, %v10420_v18  ;;  %v4578_v48 = vmax.f32 %v4569_v5, 0.0  ;;  %v4837_v5 = vld [vmem:[%s19495_s2 + $0x180] sm:$0xff] }
 0x4da   :  { %11497 = vmatprep.mubr.msk.f32.mxu1 %vm597_vm1, %v10421_v12  ;;  %v17585_v12 = vpop.permute.xlu1 %7742 }
 0x4db   :  { %v17519_v55 = vpop.f32.mrb[234].mxu0  ;;  %20281 = vst [vmem:[#allocation74_spill] sm:$0xff] %v17585_v12  ;;  %v18199_v12 = vld [vmem:[%s19496_s0 + $0x1b0] sm:$0xff] }
 0x4dc   :  { %v8517_v20 = vmax.f32 %v17416_v15, %v17519_v55  ;;  %v8413_v59 = vpop.f32.mrb[235].mxu0  ;;  %20338 = vst [vmem:[#allocation66_spill] sm:$0xff] %v18199_v12 }
 0x4dd   :  { %11498 = vmatmul.mubr.msk.f32.gmra.mrb[12].mxu1 %vm597_vm1, %v10422_v51  ;;  %v10486_v51 = vld [vmem:[%s19500_s3 + $0x248] sm:$0xff] }
 0x4de   :  { %11500 = vmatprep.mubr.msk.f32.mxu1 %vm597_vm1, %v10423_v40  ;;  %v10487_v40 = vld [vmem:[%s19500_s3 + $0x250] sm:$0xff] }
 0x4df   :  { %v17531_v34 = vpop.f32.mrb[236].mxu0 }
 0x4e0   :  { %v8518_v22 = vmax.f32 %v17423_v46, %v17531_v34  ;;  %v8418_v0 = vpop.f32.mrb[237].mxu0  ;;  %v17848_v46 = vld [vmem:[%s19496_s0] sm:$0xff]  ;;  %v17853_v34 = vld [vmem:[%s19496_s0 + $0x18] sm:$0xff] }
 0x4e1   :  { %11501 = vmatmul.mubr.msk.f32.gmra.mrb[14].mxu1 %vm597_vm1, %v10424_v41  ;;  %v10488_v0 = vld [vmem:[%s19500_s3 + $0x258] sm:$0xff] }
 0x4e2   :  { %11521 = vmatprep.mubr.msk.f32.mxu1 %vm597_vm1, %v10477_v35  ;;  %v17598_v35 = vpop.permute.xlu0 %7747 }
 0x4e3   :  { %v17543_v26 = vpop.f32.mrb[238].mxu0  ;;  %20282 = vst [vmem:[#allocation47_spill] sm:$0xff] %v17598_v35  ;;  %v18191_v35 = vld [vmem:[%s19496_s0 + $0x1b8] sm:$0xff] }
 0x4e4   :  { %v8423_v16 = vpop.f32.mrb[239].mxu0  ;;  %20337 = vst [vmem:[#allocation42_spill] sm:$0xff] %v18191_v35 }
 0x4e5   :  { %11522 = vmatmul.mubr.msk.f32.vlgmr.msra.gmra.mrb[0].mxu1 %vm597_vm1, %v10478_v29  ;;  %v17605_v29 = vpop.permute.xlu1 %7752 }
 0x4e6   :  { %12229 = vmatpush3.bf16.msra.mxu1 %v20275_v62  ;;  %11524 = vmatprep.mubr.msk.f32.mxu1 %vm597_vm1, %v10479_v39  ;;  %20283 = vst [vmem:[#allocation93_spill] sm:$0xff] %v17605_v29  ;;  %v10489_v39 = vld [vmem:[%s19500_s3 + $0x260] sm:$0xff] }
 0x4e7   :  { %12231 = vmatprep.subr.bf16.mxu1 %v20276_v33  ;;  %v17555_v7 = vpop.f32.mrb[240].mxu0  ;;  %v18186_v29 = vld [vmem:[%s19496_s0 + $0x1a0] sm:$0xff] }
 0x4e8   :  { %v8428_v4 = vpop.f32.mrb[241].mxu0  ;;  %20336 = vst [vmem:[#allocation43_spill] sm:$0xff] %v18186_v29 }
 0x4e9   :  { %11525 = vmatmul.mubr.msk.f32.gmra.mrb[2].mxu1 %vm597_vm1, %v10480_v17  ;;  %v20284_v17 = vmov 0.0|0.0   ;;  %v17618_v4 = vpop.permute.xlu0 %7757 }
 0x4ea   :  { %12233 = vmatpush3.bf16.msra.mxu1 %v20276_v33  ;;  %11527 = vmatprep.mubr.msk.f32.mxu1 %vm597_vm1, %v10481_v63  ;;  %v10490_v63 = vld [vmem:[%s19500_s3 + $0x268] sm:$0xff]  ;;  %20285 = vst [vmem:[#allocation20_spill] sm:$0xff] %v17618_v4 }
 0x4eb   :  { %12235 = vmatprep.subr.bf16.mxu1 %v20277_v14  ;;  %v17567_v19 = vpop.f32.mrb[242].mxu0  ;;  %v18178_v4 = vld [vmem:[%s19496_s0 + $0x1a8] sm:$0xff] }
 0x4ec   :  { %v8433_v43 = vpop.f32.mrb[243].mxu0  ;;  %20335 = vst [vmem:[#allocation65_spill] sm:$0xff] %v18178_v4 }
 0x4ed   :  { %11528 = vmatmul.mubr.msk.f32.gmra.mrb[4].mxu1 %vm597_vm1, %v10482_v32  ;;  %v10491_v32 = vld [vmem:[%s19500_s3 + $0x270] sm:$0xff]  ;;  %v17625_v43 = vpop.permute.xlu1 %7762 }
 0x4ee   :  { %12237 = vmatpush3.bf16.msra.mxu1 %v20277_v14  ;;  %11530 = vmatprep.mubr.msk.f32.mxu1 %vm597_vm1, %v10483_v57  ;;  %20286 = vst [vmem:[#allocation13_spill] sm:$0xff] %v17625_v43  ;;  %v18173_v43 = vld [vmem:[%s19496_s0 + $0x190] sm:$0xff] }
 0x4ef   :  { %12239 = vmatprep.subr.bf16.mxu1 %v20280_v38  ;;  %v17583_v18 = vpop.f32.mrb[244].mxu0  ;;  %20334 = vst [vmem:[#allocation8_spill] sm:$0xff] %v18173_v43 }
 0x4f0   :  { %v8438_v62 = vpop.f32.mrb[245].mxu0 }
 0x4f1   :  { %11531 = vmatmul.mubr.msk.f32.gmra.mrb[6].mxu1 %vm597_vm1, %v10484_v9  ;;  %v4838_v9 = vld [vmem:[%s19495_s2 + $0x188] sm:$0xff]  ;;  %v17643_v62 = vpop.permute.xlu0 %7767 }
 0x4f2   :  { %12241 = vmatpush3.bf16.msra.mxu1 %v20280_v38  ;;  %11533 = vmatprep.mubr.msk.f32.mxu1 %vm597_vm1, %v10485_v61  ;;  %20287 = vst [vmem:[#allocation75_spill] sm:$0xff] %v17643_v62  ;;  %v18165_v62 = vld [vmem:[%s19496_s0 + $0x198] sm:$0xff] }
 0x4f3   :  { %11561 = vmatprep.subr.mxu1 %v4578_v48  ;;  %v17596_v59 = vpop.f32.mrb[246].mxu0  ;;  %20333 = vst [vmem:[#allocation7_spill] sm:$0xff] %v18165_v62 }
 0x4f4   :  { %v8443_v41 = vpop.f32.mrb[247].mxu0 }
 0x4f5   :  { %11534 = vmatmul.mubr.msk.f32.gmra.mrb[8].mxu1 %vm597_vm1, %v10486_v51  ;;  %v12243_v51 = vpack.c.bf16 %v4838_v9, %v4837_v5  ;;  %v4841_v5 = vld [vmem:[%s19495_s2 + $0x1a0] sm:$0xff]  ;;  %v4842_v9 = vld [vmem:[%s19495_s2 + $0x1a8] sm:$0xff] }
 0x4f6   :  { %11562 = vmatpush3.msra.mxu1 %v4578_v48  ;;  %11536 = vmatprep.mubr.msk.f32.mxu1 %vm597_vm1, %v10487_v40  ;;  %v10546_v48 = vld [vmem:[%s19500_s3 + $0x288] sm:$0xff]  ;;  %v17650_v40 = vpop.permute.xlu1 %7772 }
 0x4f7   :  { %v17610_v16 = vpop.f32.mrb[248].mxu0  ;;  %12242 = vmatprep.subr.bf16.mxu1 %v20284_v17  ;;  %20288 = vst [vmem:[#allocation23_spill] sm:$0xff] %v17650_v40  ;;  %v18160_v40 = vld [vmem:[%s19496_s0 + $0x180] sm:$0xff] }
 0x4f8   :  { %v8448_v33 = vpop.f32.mrb[249].mxu0  ;;  %20332 = vst [vmem:[#allocation59_spill] sm:$0xff] %v18160_v40 }
 0x4f9   :  { %11537 = vmatmul.mubr.msk.f32.gmra.mrb[10].mxu1 %vm597_vm1, %v10488_v0  ;;  %v4839_v0 = vld [vmem:[%s19495_s2 + $0x190] sm:$0xff] }
 0x4fa   :  { %11539 = vmatprep.mubr.msk.f32.mxu1 %vm597_vm1, %v10489_v39  ;;  %v4840_v39 = vld [vmem:[%s19495_s2 + $0x198] sm:$0xff]  ;;  %v10547_v33 = vld [vmem:[%s19500_s3 + $0x290] sm:$0xff] }
 0x4fb   :  { %v17623_v14 = vpop.f32.mrb[250].mxu0 }
 0x4fc   :  { %v8453_v57 = vpop.f32.mrb[251].mxu0 }
 0x4fd   :  { %11540 = vmatmul.mubr.msk.f32.gmra.mrb[12].mxu1 %vm597_vm1, %v10490_v63  ;;  %v10548_v57 = vld [vmem:[%s19500_s3 + $0x298] sm:$0xff] }
 0x4fe   :  { %11542 = vmatprep.mubr.msk.f32.mxu1 %vm597_vm1, %v10491_v32  ;;  %v12246_v32 = vpack.c.bf16 %v4840_v39, %v4839_v0  ;;  %v17681_v0 = vpop.permute.xlu1 %7782 }
 0x4ff   :  { %v17641_v38 = vpop.f32.mrb[252].mxu0  ;;  %20290 = vst [vmem:[#allocation94_spill] sm:$0xff] %v17681_v0  ;;  %v18147_v0 = vld [vmem:[%s19496_s0 + $0x170] sm:$0xff] }
 0x500   :  { %v8458_v61 = vpop.f32.mrb[253].mxu0  ;;  %20330 = vst [vmem:[#allocation58_spill] sm:$0xff] %v18147_v0 }
 0x501   :  { %11543 = vmatmul.mubr.msk.f32.gmra.mrb[14].mxu1 %vm597_vm1, %v10492_v45  ;;  %v17668_v45 = vpop.permute.xlu0 %7777  ;;  %v10549_v61 = vld [vmem:[%s19500_s3 + $0x2a0] sm:$0xff] }
 0x502   :  { %11563 = vmatprep.mubr.msk.f32.mxu1 %vm597_vm1, %v10545_v11  ;;  %20289 = vst [vmem:[#allocation3_spill] sm:$0xff] %v17668_v45  ;;  %v18152_v45 = vld [vmem:[%s19496_s0 + $0x188] sm:$0xff] }
 0x503   :  { %v17652_v41 = vpop.f32.mrb[254].mxu0  ;;  %20331 = vst [vmem:[#allocation6_spill] sm:$0xff] %v18152_v45 }
 0x504   :  { %v8463_v63 = vpop.f32.mrb[255].mxu0 }
 0x505   :  { %11564 = vmatmul.mubr.msk.f32.vlgmr.msra.gmra.mrb[0].mxu1 %vm597_vm1, %v10546_v48  ;;  %v10550_v63 = vld [vmem:[%s19500_s3 + $0x2a8] sm:$0xff] }
 0x506   :  { %12244 = vmatpush1.bf16.msra.mxu1 %v12243_v51  ;;  %11566 = vmatprep.mubr.msk.f32.mxu1 %vm597_vm1, %v10547_v33  ;;  %v12249_v33 = vpack.c.bf16 %v4842_v9, %v4841_v5 }
 0x507   :  { %12245 = vmatprep.subr.bf16.mxu1 %v20284_v17  ;;  %v8466_v11 = vpop.f32.mrb[0].mxu0 }
 0x508   :  { %v8519_v48 = vmax.f32 %v17543_v26, %v8466_v11  ;;  %v8468_v51 = vpop.f32.mrb[1].mxu0  ;;  %v4843_v11 = vld [vmem:[%s19495_s2 + $0x1b0] sm:$0xff] }
 0x509   :  { %11567 = vmatmul.mubr.msk.f32.gmra.mrb[2].mxu1 %vm597_vm1, %v10548_v57  ;;  %v8549_v57 = vpop.permute.xlu0 %8548  ;;  %v8554_v51 = vpop.permute.xlu1 %8553 }
 0x50a   :  { %12247 = vmatpush1.bf16.msra.mxu1 %v12246_v32  ;;  %v8528_v39 = vmax.f32 %v8510_v2, %v8519_v48  ;;  %11569 = vmatprep.mubr.msk.f32.mxu1 %vm597_vm1, %v10549_v61  ;;  %v4844_v32 = vld [vmem:[%s19495_s2 + $0x1b8] sm:$0xff] }
 0x50b   :  { %12248 = vmatprep.subr.bf16.mxu1 %v20284_v17  ;;  %v8471_v26 = vpop.f32.mrb[2].mxu0  ;;  %v12252_v61 = vpack.c.bf16 %v4844_v32, %v4843_v11  ;;  %v10552_v48 = vld [vmem:[%s19500_s3 + $0x2b8] sm:$0xff] }
 0x50c   :  { %v8520_v50 = vmax.f32 %v17555_v7, %v8471_v26  ;;  %v8473_v2 = vpop.f32.mrb[3].mxu0  ;;  %v8591_v5 = vadd.f32 %v8549_v57, %v8528_v39  ;;  %v4845_v39 = vld [vmem:[%s19495_s2 + $0x1c0] sm:$0xff]  ;;  %v4848_v57 = vld [vmem:[%s19495_s2 + $0x1d8] sm:$0xff] }
 0x50d   :  { %11570 = vmatmul.mubr.msk.f32.gmra.mrb[4].mxu1 %vm597_vm1, %v10550_v63  ;;  %v4847_v2 = vld [vmem:[%s19495_s2 + $0x1d0] sm:$0xff] }
 0x50e   :  { %12250 = vmatpush1.bf16.msra.mxu1 %v12249_v33  ;;  %v8529_v9 = vmax.f32 %v8511_v23, %v8520_v50  ;;  %11572 = vmatprep.mubr.msk.f32.mxu1 %vm597_vm1, %v10551_v60  ;;  %v8600_v26 = vmax.f32 %v8591_v5, 0.0  ;;  %v12255_v60 = vpack.c.bf16 %v4846_v27, %v4845_v39  ;;  %v10554_v50 = vld [vmem:[%s19500_s3 + $0x2c8] sm:$0xff]  ;;  %v4849_v27 = vld [vmem:[%s19495_s2 + $0x1e0] sm:$0xff] }
 0x50f   :  { %12251 = vmatprep.subr.bf16.mxu1 %v20284_v17  ;;  %v8476_v7 = vpop.f32.mrb[4].mxu0 }
 0x510   :  { %v8592_v23 = vadd.f32 %v8554_v51, %v8529_v9  ;;  %v8521_v33 = vmax.f32 %v17567_v19, %v8476_v7  ;;  %v8478_v63 = vpop.f32.mrb[5].mxu0  ;;  %v8559_v9 = vpop.permute.xlu0 %8558  ;;  %v12258_v51 = vpack.c.bf16 %v4848_v57, %v4847_v2  ;;  %v10556_v7 = vld [vmem:[%s19500_s3 + $0x2d8] sm:$0xff] }
 0x511   :  { %11573 = vmatmul.mubr.msk.f32.gmra.mrb[6].mxu1 %vm597_vm1, %v10552_v48 }
 0x512   :  { %v8601_v11 = vmax.f32 %v8592_v23, 0.0  ;;  %12253 = vmatpush1.bf16.msra.mxu1 %v12252_v61  ;;  %v8530_v32 = vmax.f32 %v8512_v37, %v8521_v33  ;;  %11575 = vmatprep.mubr.msk.f32.mxu1 %vm597_vm1, %v10553_v36 }
 0x513   :  { %12254 = vmatprep.subr.bf16.mxu1 %v20284_v17  ;;  %v8481_v19 = vpop.f32.mrb[6].mxu0 }
 0x514   :  { %v8522_v28 = vmax.f32 %v17583_v18, %v8481_v19  ;;  %v8483_v37 = vpop.f32.mrb[7].mxu0  ;;  %v17740_v5 = vpack.c.bf16 %v8601_v11, %v8600_v26  ;;  %v8593_v61 = vadd.f32 %v8559_v9, %v8530_v32  ;;  %v8564_v18 = vpop.permute.xlu1 %8563  ;;  %v12261_v11 = vpack.c.bf16 %v4850_v21, %v4849_v27  ;;  %v10558_v32 = vld [vmem:[%s19500_s3 + $0x2e8] sm:$0xff] }
 0x515   :  { %11576 = vmatmul.mubr.msk.f32.gmra.mrb[8].mxu1 %vm597_vm1, %v10554_v50  ;;  %v4852_v50 = vld [vmem:[%s19495_s2 + $0x1f8] sm:$0xff]  ;;  %v8569_v2 = vpop.permute.xlu0 %8568 }
 0x516   :  { %20291 = vst [vmem:[#allocation76_spill] sm:$0xff] %v17740_v5  ;;  %12256 = vmatpush1.bf16.msra.mxu1 %v12255_v60  ;;  %v8531_v48 = vmax.f32 %v8513_v49, %v8522_v28  ;;  %11578 = vmatprep.mubr.msk.f32.mxu1 %vm597_vm1, %v10555_v54  ;;  %v8602_v33 = vmax.f32 %v8593_v61, 0.0  ;;  %v4851_v60 = vld [vmem:[%s19495_s2 + $0x1f0] sm:$0xff]  ;;  %v10560_v37 = vld [vmem:[%s19500_s3 + $0x2f8] sm:$0xff]  ;;  %v4853_v61 = vld [vmem:[%s19495_s2 + $0x200] sm:$0xff] }
 0x517   :  { %12257 = vmatprep.subr.bf16.mxu1 %v20284_v17  ;;  %v8486_v39 = vpop.f32.mrb[8].mxu0  ;;  %v12264_v28 = vpack.c.bf16 %v4852_v50, %v4851_v60  ;;  %v12267_v27 = vpack.c.bf16 %v4854_v42, %v4853_v61  ;;  %v17913_v61 = vld [vmem:[%s19496_s0 + $0x50] sm:$0xff]  ;;  %v17918_v42 = vld [vmem:[%s19496_s0 + $0x68] sm:$0xff]  ;;  %v18139_v5 = vld [vmem:[%s19496_s0 + $0x178] sm:$0xff] }
 0x518   :  { %v8594_v49 = vadd.f32 %v8564_v18, %v8531_v48  ;;  %v8523_v36 = vmax.f32 %v17596_v59, %v8486_v39  ;;  %v8488_v23 = vpop.f32.mrb[9].mxu0  ;;  %20329 = vst [vmem:[#allocation5_spill] sm:$0xff] %v18139_v5 }
 0x519   :  { %11579 = vmatmul.mubr.msk.f32.gmra.mrb[10].mxu1 %vm597_vm1, %v10556_v7  ;;  %v8579_v58 = vpop.permute.xlu0 %8578 }
 0x51a   :  { %v8603_v63 = vmax.f32 %v8594_v49, 0.0  ;;  %12259 = vmatpush1.bf16.msra.mxu1 %v12258_v51  ;;  %v8532_v26 = vmax.f32 %v8514_v52, %v8523_v36  ;;  %11581 = vmatprep.mubr.msk.f32.mxu1 %vm597_vm1, %v10557_v1  ;;  %v4856_v1 = vld [vmem:[%s19495_s2 + $0x218] sm:$0xff] }
 0x51b   :  { %12260 = vmatprep.subr.bf16.mxu1 %v20284_v17  ;;  %v8491_v59 = vpop.f32.mrb[10].mxu0 }
 0x51c   :  { %v8524_v24 = vmax.f32 %v17610_v16, %v8491_v59  ;;  %v8493_v52 = vpop.f32.mrb[11].mxu0  ;;  %v17780_v19 = vpack.c.bf16 %v8603_v63, %v8602_v33  ;;  %v8595_v57 = vadd.f32 %v8569_v2, %v8532_v26  ;;  %v8574_v16 = vpop.permute.xlu1 %8573  ;;  %v17866_v2 = vld [vmem:[%s19496_s0 + $0x28] sm:$0xff] }
 0x51d   :  { %11582 = vmatmul.mubr.msk.f32.gmra.mrb[12].mxu1 %vm597_vm1, %v10558_v32 }
 0x51e   :  { %20292 = vst [vmem:[#allocation14_spill] sm:$0xff] %v17780_v19  ;;  %12262 = vmatpush1.bf16.msra.mxu1 %v12261_v11  ;;  %v8533_v54 = vmax.f32 %v8515_v6, %v8524_v24  ;;  %11584 = vmatprep.mubr.msk.f32.mxu1 %vm597_vm1, %v10559_v31  ;;  %v8604_v7 = vmax.f32 %v8595_v57, 0.0  ;;  %v4857_v11 = vld [vmem:[%s19495_s2 + $0x220] sm:$0xff]  ;;  %v4859_v31 = vld [vmem:[%s19495_s2 + $0x230] sm:$0xff] }
 0x51f   :  { %12263 = vmatprep.subr.bf16.mxu1 %v20284_v17  ;;  %v8496_v9 = vpop.f32.mrb[12].mxu0  ;;  %v17874_v57 = vld [vmem:[%s19496_s0 + $0x20] sm:$0xff] }
 0x520   :  { %v8596_v6 = vadd.f32 %v8574_v16, %v8533_v54  ;;  %v8525_v48 = vmax.f32 %v17623_v14, %v8496_v9  ;;  %v8498_v51 = vpop.f32.mrb[13].mxu0  ;;  %v4855_v14 = vld [vmem:[%s19495_s2 + $0x210] sm:$0xff]  ;;  %v8584_v63 = vpop.permute.xlu1 %8583  ;;  %v17879_v54 = vld [vmem:[%s19496_s0 + $0x38] sm:$0xff]  ;;  %v17900_v16 = vld [vmem:[%s19496_s0 + $0x40] sm:$0xff] }
 0x521   :  { %11585 = vmatmul.mubr.msk.f32.gmra.mrb[14].mxu1 %vm597_vm1, %v10560_v37  ;;  %v12270_v33 = vpack.c.bf16 %v4856_v1, %v4855_v14  ;;  %v17892_v37 = vld [vmem:[%s19496_s0 + $0x48] sm:$0xff]  ;;  %v17905_v9 = vld [vmem:[%s19496_s0 + $0x58] sm:$0xff]  ;;  %v17939_v51 = vld [vmem:[%s19496_s0 + $0x70] sm:$0xff] }
 0x522   :  { %v8605_v18 = vmax.f32 %v8596_v6, 0.0  ;;  %12265 = vmatpush1.bf16.msra.mxu1 %v12264_v28  ;;  %v8534_v39 = vmax.f32 %v8516_v25, %v8525_v48  ;;  %10577 = vmatprep.mubr.msk.f32.mxu1 %vm128_vm0, %v17800_v3  ;;  %v17887_v28 = vld [vmem:[%s19496_s0 + $0x30] sm:$0xff]  ;;  %v17926_v6 = vld [vmem:[%s19496_s0 + $0x60] sm:$0xff]  ;;  %v17931_v48 = vld [vmem:[%s19496_s0 + $0x78] sm:$0xff]  ;;  %20298 = vst [vmem:[#allocation67_spill] sm:$0xff] %v17939_v51 }
 0x523   :  { %12266 = vmatprep.subr.bf16.mxu1 %v20284_v17  ;;  %v8501_v21 = vpop.f32.mrb[14].mxu0  ;;  %20296 = vst [vmem:[#allocation79_spill] sm:$0xff] %v17926_v6  ;;  %20297 = vst [vmem:[#allocation9_spill] sm:$0xff] %v17931_v48  ;;  %v17978_v14 = vld [vmem:[%s19496_s0 + $0xa0] sm:$0xff]  ;;  %v17983_v1 = vld [vmem:[%s19496_s0 + $0xb8] sm:$0xff] }
 0x524   :  { %v8526_v49 = vmax.f32 %v17641_v38, %v8501_v21  ;;  %v8503_v36 = vpop.f32.mrb[15].mxu0  ;;  %v17817_v53 = vpack.c.bf16 %v8605_v18, %v8604_v7  ;;  %v8597_v25 = vadd.f32 %v8579_v58, %v8534_v39  ;;  %v4858_v38 = vld [vmem:[%s19495_s2 + $0x228] sm:$0xff]  ;;  %v17952_v18 = vld [vmem:[%s19496_s0 + $0x80] sm:$0xff]  ;;  %v17957_v39 = vld [vmem:[%s19496_s0 + $0x98] sm:$0xff]  ;;  %20304 = vst [vmem:[#allocation84_spill] sm:$0xff] %v17978_v14 }
 0x525   :  { %v17944_v7 = vld [vmem:[%s19496_s0 + $0x88] sm:$0xff]  ;;  %20300 = vst [vmem:[#allocation81_spill] sm:$0xff] %v17952_v18  ;;  %20301 = vst [vmem:[#allocation82_spill] sm:$0xff] %v17957_v39  ;;  %v18004_v58 = vld [vmem:[%s19496_s0 + $0xc0] sm:$0xff] }
 0x526   :  { %20293 = vst [vmem:[#allocation22_spill] sm:$0xff] %v17817_v53  ;;  %12268 = vmatpush1.bf16.msra.mxu1 %v12267_v27  ;;  %v8535_v23 = vmax.f32 %v8517_v20, %v8526_v49  ;;  %v8606_v50 = vmax.f32 %v8597_v25, 0.0  ;;  %v12273_v20 = vpack.c.bf16 %v4858_v38, %v4857_v11  ;;  %20299 = vst [vmem:[#allocation80_spill] sm:$0xff] %v17944_v7  ;;  %v17965_v27 = vld [vmem:[%s19496_s0 + $0x90] sm:$0xff]  ;;  %v17970_v21 = vld [vmem:[%s19496_s0 + $0xa8] sm:$0xff] }
 0x527   :  { %12269 = vmatprep.subr.bf16.mxu1 %v20284_v17  ;;  %v8506_v26 = vpop.f32.mrb[16].mxu0  ;;  %20302 = vst [vmem:[#allocation68_spill] sm:$0xff] %v17965_v27  ;;  %20303 = vst [vmem:[#allocation83_spill] sm:$0xff] %v17970_v21  ;;  %v17991_v49 = vld [vmem:[%s19496_s0 + $0xb0] sm:$0xff]  ;;  %v17996_v36 = vld [vmem:[%s19496_s0 + $0xc8] sm:$0xff] }
 0x528   :  { %v8598_v32 = vadd.f32 %v8584_v63, %v8535_v23  ;;  %v8527_v59 = vmax.f32 %v17652_v41, %v8506_v26  ;;  %v8508_v60 = vpop.f32.mrb[17].mxu0  ;;  %v4860_v41 = vld [vmem:[%s19495_s2 + $0x238] sm:$0xff]  ;;  %20305 = vst [vmem:[#allocation10_spill] sm:$0xff] %v17983_v1  ;;  %20306 = vst [vmem:[#allocation33_spill] sm:$0xff] %v17991_v49  ;;  %v18017_v23 = vld [vmem:[%s19496_s0 + $0xd0] sm:$0xff] }
 0x529   :  { %v12276_v52 = vpack.c.bf16 %v4860_v41, %v4859_v31  ;;  %20307 = vst [vmem:[#allocation70_spill] sm:$0xff] %v17996_v36  ;;  %20308 = vst [vmem:[#allocation85_spill] sm:$0xff] %v18004_v58  ;;  %v18009_v25 = vld [vmem:[%s19496_s0 + $0xd8] sm:$0xff]  ;;  %v18030_v63 = vld [vmem:[%s19496_s0 + $0xe0] sm:$0xff] }
 0x52a   :  { %v8607_v15 = vmax.f32 %v8598_v32, 0.0  ;;  %12271 = vmatpush1.bf16.msra.mxu1 %v12270_v33  ;;  %v17833_v55 = vmax.f32 %v8518_v22, %v8527_v59  ;;  %v17861_v22 = vld [vmem:[%s19496_s0 + $0x10] sm:$0xff]  ;;  %20309 = vst [vmem:[#allocation86_spill] sm:$0xff] %v18009_v25  ;;  %20310 = vst [vmem:[#allocation87_spill] sm:$0xff] %v18017_v23  ;;  %v18022_v33 = vld [vmem:[%s19496_s0 + $0xe8] sm:$0xff] }
 0x52b   :  { %12272 = vmatprep.subr.bf16.mxu1 %v20284_v17  ;;  %20311 = vst [vmem:[#allocation88_spill] sm:$0xff] %v18022_v33  ;;  %20312 = vst [vmem:[#allocation89_spill] sm:$0xff] %v18030_v63  ;;  %v18035_v26 = vld [vmem:[%s19496_s0 + $0xf8] sm:$0xff]  ;;  %v18043_v11 = vld [vmem:[%s19496_s0 + $0xf0] sm:$0xff] }
 0x52c   :  { %20294 = vst [vmem:[#allocation77_spill] sm:$0xff] %v17833_v55  ;;  %v17842_v24 = vpack.c.bf16 %v8607_v15, %v8606_v50  ;;  %20313 = vst [vmem:[#allocation90_spill] sm:$0xff] %v18035_v26  ;;  %v18048_v38 = vld [vmem:[%s19496_s0 + $0x108] sm:$0xff]  ;;  %v18056_v32 = vld [vmem:[%s19496_s0 + $0x100] sm:$0xff] }
 0x52d   :  { %20314 = vst [vmem:[#allocation91_spill] sm:$0xff] %v18043_v11  ;;  %20315 = vst [vmem:[#allocation95_spill] sm:$0xff] %v18048_v38  ;;  %v18061_v59 = vld [vmem:[%s19496_s0 + $0x118] sm:$0xff]  ;;  %v18069_v60 = vld [vmem:[%s19496_s0 + $0x110] sm:$0xff] }
 0x52e   :  { %20295 = vst [vmem:[#allocation78_spill] sm:$0xff] %v17842_v24  ;;  %12274 = vmatpush1.bf16.msra.mxu1 %v12273_v20  ;;  %20316 = vst [vmem:[#allocation101_spill] sm:$0xff] %v18056_v32  ;;  %v18074_v50 = vld [vmem:[%s19496_s0 + $0x128] sm:$0xff]  ;;  %v18082_v15 = vld [vmem:[%s19496_s0 + $0x120] sm:$0xff] }
 0x52f   :  { %12275 = vmatprep.subr.bf16.mxu1 %v20284_v17  ;;  %20317 = vst [vmem:[#allocation102_spill] sm:$0xff] %v18061_v59  ;;  %20318 = vst [vmem:[#allocation103_spill] sm:$0xff] %v18069_v60  ;;  %v18087_v20 = vld [vmem:[%s19496_s0 + $0x138] sm:$0xff]  ;;  %v18095_v31 = vld [vmem:[%s19496_s0 + $0x130] sm:$0xff] }
 0x530   :  { %20319 = vst [vmem:[#allocation104_spill] sm:$0xff] %v18074_v50  ;;  %20320 = vst [vmem:[#allocation25_spill] sm:$0xff] %v18082_v15  ;;  %v18100_v41 = vld [vmem:[%s19496_s0 + $0x148] sm:$0xff]  ;;  %v18113_v24 = vld [vmem:[%s19496_s0 + $0x158] sm:$0xff] }
 0x531   :  { %20321 = vst [vmem:[#allocation24_spill] sm:$0xff] %v18087_v20  ;;  %20322 = vst [vmem:[#allocation27_spill] sm:$0xff] %v18095_v31  ;;  %v18121_v55 = vld [vmem:[%s19496_s0 + $0x150] sm:$0xff]  ;;  %v18126_v53 = vld [vmem:[%s19496_s0 + $0x168] sm:$0xff] }
 0x532   :  { %12277 = vmatpush1.bf16.msra.mxu1 %v12276_v52  ;;  %20323 = vst [vmem:[#allocation28_spill] sm:$0xff] %v18100_v41  ;;  %v18108_v52 = vld [vmem:[%s19496_s0 + $0x140] sm:$0xff]  ;;  %20325 = vst [vmem:[#allocation30_spill] sm:$0xff] %v18113_v24 }
 0x533   :  { %20324 = vst [vmem:[#allocation31_spill] sm:$0xff] %v18108_v52  ;;  %20326 = vst [vmem:[#allocation52_spill] sm:$0xff] %v18121_v55  ;;  %v18134_v19 = vld [vmem:[%s19496_s0 + $0x160] sm:$0xff] }
 0x534   :  { %20327 = vst [vmem:[#allocation62_spill] sm:$0xff] %v18126_v53  ;;  %20328 = vst [vmem:[#allocation53_spill] sm:$0xff] %v18134_v19 }
 0x535   :  { %5106 = vmatmul.mubr.f32.vlgmr.msra.gmra.mrb[134].mxu1 %v17848_v46 }
 0x536   :  { %10578 = vmatprep.mubr.msk.f32.mxu1 %vm128_vm0, %v17853_v34 }
 0x539   :  { %5111 = vmatmul.mubr.f32.gmra.mrb[136].mxu1 %v17861_v22 }
 0x53a   :  { %10579 = vmatprep.mubr.msk.f32.mxu1 %vm128_vm0, %v17866_v2 }
 0x53d   :  { %5116 = vmatmul.mubr.f32.gmra.mrb[138].mxu1 %v17874_v57 }
 0x53e   :  { %10580 = vmatprep.mubr.msk.f32.mxu1 %vm128_vm0, %v17879_v54 }
 0x541   :  { %5121 = vmatmul.mubr.f32.gmra.mrb[140].mxu1 %v17887_v28 }
 0x542   :  { %10581 = vmatprep.mubr.msk.f32.mxu1 %vm128_vm0, %v17892_v37 }
 0x545   :  { %5126 = vmatmul.mubr.f32.gmra.mrb[142].mxu1 %v17900_v16 }
 0x546   :  { %10582 = vmatprep.mubr.msk.f32.mxu1 %vm128_vm0, %v17905_v9 }
 0x549   :  { %5131 = vmatmul.mubr.f32.gmra.mrb[144].mxu1 %v17913_v61 }
 0x54a   :  { %10583 = vmatprep.mubr.msk.f32.mxu1 %vm128_vm0, %v17918_v42 }
 0x54d   :  { %5136 = vmatmul.mubr.f32.gmra.mrb[146].mxu1 %v17926_v6 }
 0x54e   :  { %10584 = vmatprep.mubr.msk.f32.mxu1 %vm128_vm0, %v17931_v48 }
 0x551   :  { %5141 = vmatmul.mubr.f32.gmra.mrb[148].mxu1 %v17939_v51 }
 0x552   :  { %10585 = vmatprep.mubr.msk.f32.mxu1 %vm128_vm0, %v17944_v7 }
 0x555   :  { %5146 = vmatmul.mubr.f32.gmra.mrb[150].mxu1 %v17952_v18 }
 0x556   :  { %10586 = vmatprep.mubr.msk.f32.mxu1 %vm128_vm0, %v17957_v39  ;;  %v20356_v39 = vld [vmem:[#allocation55_spill] sm:$0xff] }
 0x559   :  { %5151 = vmatmul.mubr.f32.gmra.mrb[152].mxu1 %v17965_v27 }
 0x55a   :  { %10587 = vmatprep.mubr.msk.f32.mxu1 %vm128_vm0, %v17970_v21  ;;  %v20355_v21 = vld [vmem:[#allocation57_spill] sm:$0xff] }
 0x55d   :  { %5156 = vmatmul.mubr.f32.gmra.mrb[154].mxu1 %v17978_v14 }
 0x55e   :  { %10588 = vmatprep.mubr.msk.f32.mxu1 %vm128_vm0, %v17983_v1 }
 0x561   :  { %5161 = vmatmul.mubr.f32.gmra.mrb[156].mxu1 %v17991_v49 }
 0x562   :  { %10589 = vmatprep.mubr.msk.f32.mxu1 %vm128_vm0, %v17996_v36 }
 0x565   :  { %5166 = vmatmul.mubr.f32.gmra.mrb[158].mxu1 %v18004_v58 }
 0x566   :  { %10590 = vmatprep.mubr.msk.f32.mxu1 %vm128_vm0, %v18009_v25 }
 0x569   :  { %5171 = vmatmul.mubr.f32.gmra.mrb[160].mxu1 %v18017_v23 }
 0x56a   :  { %10591 = vmatprep.mubr.msk.f32.mxu1 %vm128_vm0, %v18022_v33 }
 0x56d   :  { %5176 = vmatmul.mubr.f32.gmra.mrb[162].mxu1 %v18030_v63 }
 0x56e   :  { %10592 = vmatprep.mubr.msk.f32.mxu1 %vm128_vm0, %v18035_v26 }
 0x571   :  { %5181 = vmatmul.mubr.f32.gmra.mrb[164].mxu1 %v18043_v11 }
 0x572   :  { %10593 = vmatprep.mubr.msk.f32.mxu1 %vm128_vm0, %v18048_v38 }
 0x575   :  { %5186 = vmatmul.mubr.f32.gmra.mrb[166].mxu1 %v18056_v32 }
 0x576   :  { %10594 = vmatprep.mubr.msk.f32.mxu1 %vm128_vm0, %v18061_v59 }
 0x579   :  { %5191 = vmatmul.mubr.f32.gmra.mrb[168].mxu1 %v18069_v60 }
 0x57a   :  { %10595 = vmatprep.mubr.msk.f32.mxu1 %vm128_vm0, %v18074_v50 }
 0x57d   :  { %5196 = vmatmul.mubr.f32.gmra.mrb[170].mxu1 %v18082_v15 }
 0x57e   :  { %10596 = vmatprep.mubr.msk.f32.mxu1 %vm128_vm0, %v18087_v20 }
 0x581   :  { %5201 = vmatmul.mubr.f32.gmra.mrb[172].mxu1 %v18095_v31 }
 0x582   :  { %10597 = vmatprep.mubr.msk.f32.mxu1 %vm128_vm0, %v18100_v41 }
 0x585   :  { %5206 = vmatmul.mubr.f32.gmra.mrb[174].mxu1 %v18108_v52 }
 0x586   :  { %10598 = vmatprep.mubr.msk.f32.mxu1 %vm128_vm0, %v18113_v24 }
 0x589   :  { %5211 = vmatmul.mubr.f32.gmra.mrb[176].mxu1 %v18121_v55 }
 0x58a   :  { %10599 = vmatprep.mubr.msk.f32.mxu1 %vm128_vm0, %v18126_v53 }
 0x58d   :  { %5216 = vmatmul.mubr.f32.gmra.mrb[178].mxu1 %v18134_v19 }
 0x58e   :  { %10600 = vmatprep.mubr.msk.f32.mxu1 %vm128_vm0, %v18139_v5 }
 0x591   :  { %5221 = vmatmul.mubr.f32.gmra.mrb[180].mxu1 %v18147_v0 }
 0x592   :  { %10601 = vmatprep.mubr.msk.f32.mxu1 %vm128_vm0, %v18152_v45 }
 0x595   :  { %5226 = vmatmul.mubr.f32.gmra.mrb[182].mxu1 %v18160_v40 }
 0x596   :  { %10602 = vmatprep.mubr.msk.f32.mxu1 %vm128_vm0, %v18165_v62 }
 0x599   :  { %5231 = vmatmul.mubr.f32.gmra.mrb[184].mxu1 %v18173_v43 }
 0x59a   :  { %10603 = vmatprep.mubr.msk.f32.mxu1 %vm128_vm0, %v18178_v4  ;;  %v18204_v4 = vld [vmem:[%s19496_s0 + $0x1c8] sm:$0xff] }
 0x59b   :  { %20339 = vst [vmem:[#allocation46_spill] sm:$0xff] %v18204_v4 }
 0x59d   :  { %5236 = vmatmul.mubr.f32.gmra.mrb[186].mxu1 %v18186_v29  ;;  %v18212_v29 = vld [vmem:[%s19496_s0 + $0x1c0] sm:$0xff] }
 0x59e   :  { %10604 = vmatprep.mubr.msk.f32.mxu1 %vm128_vm0, %v18191_v35  ;;  %20340 = vst [vmem:[#allocation44_spill] sm:$0xff] %v18212_v29  ;;  %v18217_v35 = vld [vmem:[%s19496_s0 + $0x1d8] sm:$0xff] }
 0x59f   :  { %20341 = vst [vmem:[#allocation51_spill] sm:$0xff] %v18217_v35 }
 0x5a1   :  { %5241 = vmatmul.mubr.f32.gmra.mrb[188].mxu1 %v18199_v12  ;;  %v18225_v12 = vld [vmem:[%s19496_s0 + $0x1d0] sm:$0xff] }
 0x5a2   :  { %10605 = vmatprep.mubr.msk.f32.mxu1 %vm128_vm0, %v18204_v4  ;;  %20342 = vst [vmem:[#allocation105_spill] sm:$0xff] %v18225_v12  ;;  %v18230_v4 = vld [vmem:[%s19496_s0 + $0x1e8] sm:$0xff] }
 0x5a3   :  { %20343 = vst [vmem:[#allocation60_spill] sm:$0xff] %v18230_v4 }
 0x5a5   :  { %5246 = vmatmul.mubr.f32.gmra.mrb[190].mxu1 %v18212_v29  ;;  %v18238_v29 = vld [vmem:[%s19496_s0 + $0x1e0] sm:$0xff] }
 0x5a6   :  { %10606 = vmatprep.mubr.msk.f32.mxu1 %vm128_vm0, %v18217_v35  ;;  %20344 = vst [vmem:[#allocation48_spill] sm:$0xff] %v18238_v29  ;;  %v18243_v35 = vld [vmem:[%s19496_s0 + $0x1f8] sm:$0xff] }
 0x5a7   :  { %20345 = vst [vmem:[#allocation17_spill] sm:$0xff] %v18243_v35 }
 0x5a9   :  { %5251 = vmatmul.mubr.f32.gmra.mrb[192].mxu1 %v18225_v12  ;;  %v18251_v12 = vld [vmem:[%s19496_s0 + $0x1f0] sm:$0xff] }
 0x5aa   :  { %10607 = vmatprep.mubr.msk.f32.mxu1 %vm128_vm0, %v18230_v4  ;;  %20346 = vst [vmem:[#allocation49_spill] sm:$0xff] %v18251_v12  ;;  %v18256_v4 = vld [vmem:[%s19496_s0 + $0x208] sm:$0xff] }
 0x5ab   :  { %20347 = vst [vmem:[#allocation45_spill] sm:$0xff] %v18256_v4 }
 0x5ad   :  { %5256 = vmatmul.mubr.f32.gmra.mrb[194].mxu1 %v18238_v29  ;;  %v18264_v29 = vld [vmem:[%s19496_s0 + $0x200] sm:$0xff] }
 0x5ae   :  { %10608 = vmatprep.mubr.msk.f32.mxu1 %vm128_vm0, %v18243_v35  ;;  %20348 = vst [vmem:[#allocation16_spill] sm:$0xff] %v18264_v29  ;;  %v18269_v35 = vld [vmem:[%s19496_s0 + $0x218] sm:$0xff] }
 0x5af   :  { %20349 = vst [vmem:[#allocation50_spill] sm:$0xff] %v18269_v35 }
 0x5b1   :  { %5261 = vmatmul.mubr.f32.gmra.mrb[196].mxu1 %v18251_v12  ;;  %v18277_v12 = vld [vmem:[%s19496_s0 + $0x210] sm:$0xff] }
 0x5b2   :  { %10609 = vmatprep.mubr.msk.f32.mxu1 %vm128_vm0, %v18256_v4  ;;  %20350 = vst [vmem:[#allocation106_spill] sm:$0xff] %v18277_v12  ;;  %v18282_v4 = vld [vmem:[%s19496_s0 + $0x228] sm:$0xff] }
 0x5b3   :  { %20351 = vst [vmem:[#allocation32_spill] sm:$0xff] %v18282_v4 }
 0x5b5   :  { %5266 = vmatmul.mubr.f32.gmra.mrb[198].mxu1 %v18264_v29  ;;  %v18290_v29 = vld [vmem:[%s19496_s0 + $0x220] sm:$0xff] }
 0x5b6   :  { %10610 = vmatprep.mubr.msk.f32.mxu1 %vm128_vm0, %v18269_v35  ;;  %20352 = vst [vmem:[#allocation35_spill] sm:$0xff] %v18290_v29  ;;  %v18295_v35 = vld [vmem:[%s19496_s0 + $0x238] sm:$0xff] }
 0x5b7   :  { %20353 = vst [vmem:[#allocation34_spill] sm:$0xff] %v18295_v35 }
 0x5b9   :  { %5271 = vmatmul.mubr.f32.gmra.mrb[200].mxu1 %v18277_v12  ;;  %v18303_v12 = vld [vmem:[%s19496_s0 + $0x230] sm:$0xff] }
 0x5ba   :  { %10611 = vmatprep.mubr.msk.f32.mxu1 %vm128_vm0, %v18282_v4  ;;  %20354 = vst [vmem:[#allocation37_spill] sm:$0xff] %v18303_v12 }
 0x5bd   :  { %5276 = vmatmul.mubr.f32.gmra.mrb[202].mxu1 %v18290_v29 }
 0x5be   :  { %10612 = vmatprep.mubr.msk.f32.mxu1 %vm128_vm0, %v18295_v35 }
 0x5c1   :  { %5281 = vmatmul.mubr.f32.gmra.mrb[204].mxu1 %v18303_v12  ;;  %v10613_v12 = vld [vmem:[%s19500_s3 + $0x300] sm:$0xff] }
 0x5c2   :  { %11605 = vmatprep.mubr.msk.f32.mxu1 %vm597_vm1, %v10613_v12 }
 0x608   :  { %v18306_v4 = vpop.f32.mrb[134].mxu1 }
 0x609   :  { %v5109_v43 = vpop.f32.mrb[135].mxu1 }
 0x60c   :  { %v18308_v62 = vpop.f32.mrb[136].mxu1 }
 0x60d   :  { %v5114_v40 = vpop.f32.mrb[137].mxu1 }
 0x610   :  { %v18310_v45 = vpop.f32.mrb[138].mxu1 }
 0x611   :  { %v5119_v0 = vpop.f32.mrb[139].mxu1 }
 0x614   :  { %v18312_v29 = vpop.f32.mrb[140].mxu1 }
 0x615   :  { %v5124_v5 = vpop.f32.mrb[141].mxu1 }
 0x618   :  { %v18314_v35 = vpop.f32.mrb[142].mxu1 }
 0x619   :  { %v5129_v19 = vpop.f32.mrb[143].mxu1 }
 0x61c   :  { %v18316_v53 = vpop.f32.mrb[144].mxu1 }
 0x61d   :  { %v5134_v55 = vpop.f32.mrb[145].mxu1 }
 0x620   :  { %v18321_v43 = vpop.f32.mrb[146].mxu1 }
 0x621   :  { %v5139_v40 = vpop.f32.mrb[147].mxu1 }
 0x624   :  { %v18324_v24 = vpop.f32.mrb[148].mxu1 }
 0x625   :  { %v5144_v0 = vpop.f32.mrb[149].mxu1 }
 0x628   :  { %v18326_v52 = vpop.f32.mrb[150].mxu1 }
 0x629   :  { %v5149_v5 = vpop.f32.mrb[151].mxu1 }
 0x62c   :  { %v5152_v41 = vpop.f32.mrb[152].mxu1 }
 0x62d   :  { %v5286_v19 = vmax.f32 %v18306_v4, %v5152_v41  ;;  %v5154_v31 = vpop.f32.mrb[153].mxu1 }
 0x630   :  { %v5157_v55 = vpop.f32.mrb[154].mxu1 }
 0x631   :  { %v5287_v20 = vmax.f32 %v18308_v62, %v5157_v55  ;;  %v5159_v15 = vpop.f32.mrb[155].mxu1 }
 0x634   :  { %v5162_v50 = vpop.f32.mrb[156].mxu1 }
 0x635   :  { %v5288_v60 = vmax.f32 %v18310_v45, %v5162_v50  ;;  %v5164_v59 = vpop.f32.mrb[157].mxu1 }
 0x638   :  { %v5167_v12 = vpop.f32.mrb[158].mxu1 }
 0x639   :  { %v5289_v40 = vmax.f32 %v18312_v29, %v5167_v12  ;;  %v5169_v32 = vpop.f32.mrb[159].mxu1 }
 0x63c   :  { %v18332_v0 = vpop.f32.mrb[160].mxu1 }
 0x63d   :  { %v5290_v5 = vmax.f32 %v18314_v35, %v18332_v0  ;;  %v5174_v38 = vpop.f32.mrb[161].mxu1 }
 0x640   :  { %v18336_v4 = vpop.f32.mrb[162].mxu1 }
 0x641   :  { %v5179_v15 = vpop.f32.mrb[163].mxu1 }
 0x644   :  { %v18340_v31 = vpop.f32.mrb[164].mxu1 }
 0x645   :  { %v5184_v59 = vpop.f32.mrb[165].mxu1 }
 0x648   :  { %v18344_v29 = vpop.f32.mrb[166].mxu1 }
 0x649   :  { %v5189_v50 = vpop.f32.mrb[167].mxu1 }
 0x64c   :  { %v18348_v35 = vpop.f32.mrb[168].mxu1 }
 0x64d   :  { %v5194_v41 = vpop.f32.mrb[169].mxu1 }
 0x650   :  { %v5197_v55 = vpop.f32.mrb[170].mxu1 }
 0x651   :  { %v5199_v12 = vpop.f32.mrb[171].mxu1 }
 0x654   :  { %v5202_v0 = vpop.f32.mrb[172].mxu1 }
 0x655   :  { %v5204_v15 = vpop.f32.mrb[173].mxu1 }
 0x658   :  { %v5207_v62 = vpop.f32.mrb[174].mxu1 }
 0x659   :  { %v5209_v11 = vpop.f32.mrb[175].mxu1 }
 0x65c   :  { %v5212_v45 = vpop.f32.mrb[176].mxu1 }
 0x65d   :  { %v5214_v59 = vpop.f32.mrb[177].mxu1 }
 0x660   :  { %v5217_v26 = vpop.f32.mrb[178].mxu1 }
 0x661   :  { %v5219_v63 = vpop.f32.mrb[179].mxu1 }
 0x664   :  { %v5222_v33 = vpop.f32.mrb[180].mxu1 }
 0x665   :  { %v5224_v23 = vpop.f32.mrb[181].mxu1 }
 0x668   :  { %v5227_v32 = vpop.f32.mrb[182].mxu1 }
 0x669   :  { %v5229_v50 = vpop.f32.mrb[183].mxu1 }
 0x66c   :  { %v5232_v25 = vpop.f32.mrb[184].mxu1 }
 0x66d   :  { %v5234_v58 = vpop.f32.mrb[185].mxu1 }
 0x670   :  { %v18352_v36 = vpop.f32.mrb[186].mxu1 }
 0x671   :  { %v5239_v38 = vpop.f32.mrb[187].mxu1 }
 0x674   :  { %v5242_v41 = vpop.f32.mrb[188].mxu1 }
 0x675   :  { %v5295_v49 = vmax.f32 %v5197_v55, %v5242_v41  ;;  %v5244_v12 = vpop.f32.mrb[189].mxu1  ;;  %v20357_v41 = vld [vmem:[#allocation56_spill] sm:$0xff] }
 0x677   :  { %v5304_v1 = vmax.f32 %v5286_v19, %v5295_v49 }
 0x678   :  { %v5247_v15 = vpop.f32.mrb[190].mxu1 }
 0x679   :  { %v5296_v14 = vmax.f32 %v5202_v0, %v5247_v15  ;;  %v5249_v11 = vpop.f32.mrb[191].mxu1  ;;  %v5367_v59 = vadd.f32 %v20355_v21, %v5304_v1  ;;  %v20358_v21 = vld [vmem:[#allocation4_spill] sm:$0xff] }
 0x67b   :  { %v5305_v27 = vmax.f32 %v5287_v20, %v5296_v14  ;;  %v5376_v7 = vmax.f32 %v5367_v59, 0.0 }
 0x67c   :  { %v5252_v63 = vpop.f32.mrb[192].mxu1 }
 0x67d   :  { %v5368_v23 = vadd.f32 %v20356_v39, %v5305_v27  ;;  %v5297_v18 = vmax.f32 %v5207_v62, %v5252_v63  ;;  %v5254_v50 = vpop.f32.mrb[193].mxu1 }
 0x67f   :  { %v5377_v58 = vmax.f32 %v5368_v23, 0.0  ;;  %v5306_v51 = vmax.f32 %v5288_v60, %v5297_v18 }
 0x680   :  { %v5257_v48 = vpop.f32.mrb[194].mxu1 }
 0x681   :  { %v5298_v38 = vmax.f32 %v5212_v45, %v5257_v48  ;;  %v5259_v6 = vpop.f32.mrb[195].mxu1  ;;  %v12278_v55 = vpack.c.bf16 %v5377_v58, %v5376_v7  ;;  %v5369_v49 = vadd.f32 %v20357_v41, %v5306_v51  ;;  %v20359_v48 = vld [vmem:[#allocation69_spill] sm:$0xff]  ;;  %v20360_v51 = vmax.f32 %v18316_v53, %v18336_v4  ;;  %v20361_v45 = vld [vmem:[#allocation19_spill] sm:$0xff] }
 0x682   :  { %v20363_v41 = vld [vmem:[#allocation11_spill] sm:$0xff]  ;;  %v20364_v4 = vmax.f32 %v18324_v24, %v18344_v29  ;;  %v10614_v29 = vld [vmem:[%s19500_s3 + $0x308] sm:$0xff] }
 0x683   :  { %v5307_v19 = vmax.f32 %v5289_v40, %v5298_v38  ;;  %12279 = vmatprep.subr.bf16.mxu1 %v12278_v55  ;;  %v5378_v39 = vmax.f32 %v5369_v49, 0.0 }
 0x684   :  { %v5262_v0 = vpop.f32.mrb[196].mxu1  ;;  %12281 = vmatpush3.bf16.msra.mxu1 %v12278_v55 }
 0x685   :  { %v5370_v14 = vadd.f32 %v20358_v21, %v5307_v19  ;;  %v5299_v1 = vmax.f32 %v5217_v26, %v5262_v0  ;;  %v5264_v20 = vpop.f32.mrb[197].mxu1 }
 0x687   :  { %v5379_v27 = vmax.f32 %v5370_v14, 0.0  ;;  %v5308_v62 = vmax.f32 %v5290_v5, %v5299_v1 }
 0x688   :  { %v5267_v12 = vpop.f32.mrb[198].mxu1 }
 0x689   :  { %v5300_v15 = vmax.f32 %v5222_v33, %v5267_v12  ;;  %v5269_v18 = vpop.f32.mrb[199].mxu1  ;;  %v12282_v60 = vpack.c.bf16 %v5379_v27, %v5378_v39  ;;  %v5371_v6 = vadd.f32 %v20359_v48, %v5308_v62  ;;  %v20362_v33 = vmax.f32 %v18321_v43, %v18340_v31  ;;  %v20367_v39 = vld [vmem:[#allocation18_spill] sm:$0xff]  ;;  %v10617_v62 = vld [vmem:[%s19500_s3 + $0x320] sm:$0xff]  ;;  %v20369_v12 = vld [vmem:[#allocation12_spill] sm:$0xff] }
 0x68a   :  { %v20370_v18 = vld [vmem:[#allocation21_spill] sm:$0xff] }
 0x68b   :  { %v5309_v7 = vmax.f32 %v20360_v51, %v5300_v15  ;;  %12283 = vmatprep.subr.bf16.mxu1 %v12282_v60  ;;  %v5380_v63 = vmax.f32 %v5371_v6, 0.0  ;;  %v10619_v15 = vld [vmem:[%s19500_s3 + $0x330] sm:$0xff]  ;;  %v10620_v6 = vld [vmem:[%s19500_s3 + $0x338] sm:$0xff]  ;;  %v20372_v51 = vld [vmem:[#allocation92_spill] sm:$0xff] }
 0x68c   :  { %v5272_v40 = vpop.f32.mrb[200].mxu1  ;;  %12285 = vmatpush3.bf16.msra.mxu1 %v12282_v60  ;;  %v20371_v60 = vld [vmem:[#allocation73_spill] sm:$0xff] }
 0x68d   :  { %v5372_v11 = vadd.f32 %v20361_v45, %v5309_v7  ;;  %v5301_v26 = vmax.f32 %v5227_v32, %v5272_v40  ;;  %v5274_v59 = vpop.f32.mrb[201].mxu1  ;;  %v20365_v32 = vld [vmem:[#allocation71_spill] sm:$0xff]  ;;  %v6181_v48 = vadd.f32 %v20371_v60, %v20370_v18  ;;  %v10622_v45 = vld [vmem:[%s19500_s3 + $0x348] sm:$0xff]  ;;  %v10756_v60 = vld [vmem:[%s19500_s3 + $0x438] sm:$0xff] }
 0x68e   :  { %v10621_v7 = vld [vmem:[%s19500_s3 + $0x340] sm:$0xff] }
 0x68f   :  { %v5381_v23 = vmax.f32 %v5372_v11, 0.0  ;;  %v5310_v5 = vmax.f32 %v20362_v33, %v5301_v26  ;;  %v6190_v40 = vmax.f32 %v6181_v48, 0.0  ;;  %v10623_v11 = vld [vmem:[%s19500_s3 + $0x350] sm:$0xff]  ;;  %v10624_v26 = vld [vmem:[%s19500_s3 + $0x358] sm:$0xff]  ;;  %v10625_v59 = vld [vmem:[%s19500_s3 + $0x360] sm:$0xff] }
 0x690   :  { %v5277_v50 = vpop.f32.mrb[202].mxu1  ;;  %v10628_v33 = vld [vmem:[%s19500_s3 + $0x378] sm:$0xff]  ;;  %v7263_v48 = vld [vmem:[%s19495_s2 + $0x280] sm:$0xff] }
 0x691   :  { %v5302_v58 = vmax.f32 %v5232_v25, %v5277_v50  ;;  %v5279_v38 = vpop.f32.mrb[203].mxu1  ;;  %v12286_v55 = vpack.c.bf16 %v5381_v23, %v5380_v63  ;;  %v5373_v53 = vadd.f32 %v20363_v41, %v5310_v5  ;;  %v20366_v25 = vmax.f32 %v18326_v52, %v18348_v35  ;;  %v10616_v52 = vld [vmem:[%s19500_s3 + $0x318] sm:$0xff]  ;;  %v20368_v35 = vld [vmem:[#allocation72_spill] sm:$0xff]  ;;  %v10627_v23 = vld [vmem:[%s19500_s3 + $0x370] sm:$0xff] }
 0x692   :  { %v10626_v63 = vld [vmem:[%s19500_s3 + $0x368] sm:$0xff]  ;;  %v10681_v5 = vld [vmem:[%s19500_s3 + $0x380] sm:$0xff]  ;;  %v10684_v38 = vld [vmem:[%s19500_s3 + $0x398] sm:$0xff] }
 0x693   :  { %v5311_v49 = vmax.f32 %v20364_v4, %v5302_v58  ;;  %12287 = vmatprep.subr.bf16.mxu1 %v12286_v55  ;;  %v5382_v43 = vmax.f32 %v5373_v53, 0.0  ;;  %v10682_v50 = vld [vmem:[%s19500_s3 + $0x388] sm:$0xff]  ;;  %v10683_v58 = vld [vmem:[%s19500_s3 + $0x390] sm:$0xff]  ;;  %v6987_v53 = vadd.f32 %v17577_v8, %v17360_v56  ;;  %v10689_v4 = vld [vmem:[%s19500_s3 + $0x3c0] sm:$0xff] }
 0x694   :  { %v5282_v19 = vpop.f32.mrb[204].mxu1  ;;  %12289 = vmatpush3.bf16.msra.mxu1 %v12286_v55  ;;  %v10685_v55 = vld [vmem:[%s19500_s3 + $0x3a0] sm:$0xff]  ;;  %v10687_v41 = vld [vmem:[%s19500_s3 + $0x3b0] sm:$0xff] }
 0x695   :  { %v5374_v0 = vadd.f32 %v20365_v32, %v5311_v49  ;;  %v5303_v21 = vmax.f32 %v18352_v36, %v5282_v19  ;;  %v5284_v14 = vpop.f32.mrb[205].mxu1  ;;  %v10615_v36 = vld [vmem:[%s19500_s3 + $0x310] sm:$0xff]  ;;  %v6996_v49 = vmax.f32 %v6987_v53, 0.0  ;;  %v10693_v8 = vld [vmem:[%s19500_s3 + $0x3e0] sm:$0xff]  ;;  %v10694_v19 = vld [vmem:[%s19500_s3 + $0x3e8] sm:$0xff] }
 0x696   :  { %v10691_v56 = vld [vmem:[%s19500_s3 + $0x3d0] sm:$0xff]  ;;  %v7255_v14 = vld [vmem:[%s19495_s2 + $0x240] sm:$0xff]  ;;  %v10764_v53 = vld [vmem:[%s19500_s3 + $0x478] sm:$0xff] }
 0x697   :  { %v5383_v31 = vmax.f32 %v5374_v0, 0.0  ;;  %v5312_v1 = vmax.f32 %v20366_v25, %v5303_v21  ;;  %v10695_v32 = vld [vmem:[%s19500_s3 + $0x3f0] sm:$0xff]  ;;  %v10696_v0 = vld [vmem:[%s19500_s3 + $0x3f8] sm:$0xff]  ;;  %v10749_v21 = vld [vmem:[%s19500_s3 + $0x400] sm:$0xff] }
 0x699   :  { %v12290_v20 = vpack.c.bf16 %v5383_v31, %v5382_v43  ;;  %v5375_v27 = vadd.f32 %v20367_v39, %v5312_v1  ;;  %v7256_v43 = vld [vmem:[%s19495_s2 + $0x248] sm:$0xff]  ;;  %v7257_v1 = vld [vmem:[%s19495_s2 + $0x250] sm:$0xff] }
 0x69a   :  { %v10750_v31 = vld [vmem:[%s19500_s3 + $0x408] sm:$0xff]  ;;  %v12399_v25 = vpack.c.bf16 %v7256_v43, %v7255_v14  ;;  %v10751_v39 = vld [vmem:[%s19500_s3 + $0x410] sm:$0xff]  ;;  %v20386_v43 = vld [vmem:[#allocation86_spill] sm:$0xff] }
 0x69b   :  { %12291 = vmatprep.subr.bf16.mxu1 %v12290_v20  ;;  %v5384_v24 = vmax.f32 %v5375_v27, 0.0  ;;  %v20385_v14 = vld [vmem:[#allocation85_spill] sm:$0xff] }
 0x69c   :  { %12293 = vmatpush3.bf16.msra.mxu1 %v12290_v20  ;;  %v7258_v20 = vld [vmem:[%s19495_s2 + $0x258] sm:$0xff] }
 0x69d   :  { %11603 = vmatprep.subr.mxu1 %v5384_v24  ;;  %v12402_v27 = vpack.c.bf16 %v7258_v20, %v7257_v1  ;;  %v20389_v1 = vld [vmem:[#allocation89_spill] sm:$0xff]  ;;  %v20390_v20 = vld [vmem:[#allocation90_spill] sm:$0xff] }
 0x6a0   :  { %11604 = vmatpush3.msra.mxu1 %v5384_v24  ;;  %v10752_v24 = vld [vmem:[%s19500_s3 + $0x418] sm:$0xff] }
 0x6a1   :  { %11606 = vmatmul.mubr.msk.f32.vlgmr.msra.gmra.mrb[0].mxu1 %vm597_vm1, %v10614_v29  ;;  %12331 = vmatprep.subr.bf16.mxu1 %v17071_v44  ;;  %v7259_v29 = vld [vmem:[%s19495_s2 + $0x260] sm:$0xff] }
 0x6a2   :  { %12333 = vmatpush3.bf16.msra.mxu1 %v17071_v44  ;;  %11608 = vmatprep.mubr.msk.f32.mxu1 %vm597_vm1, %v10615_v36  ;;  %v10618_v44 = vld [vmem:[%s19500_s3 + $0x328] sm:$0xff] }
 0x6a3   :  { %12335 = vmatprep.subr.bf16.mxu1 %v20368_v35  ;;  %v7260_v36 = vld [vmem:[%s19495_s2 + $0x268] sm:$0xff] }
 0x6a5   :  { %11609 = vmatmul.mubr.msk.f32.gmra.mrb[2].mxu1 %vm597_vm1, %v10616_v52  ;;  %v10753_v52 = vld [vmem:[%s19500_s3 + $0x420] sm:$0xff] }
 0x6a6   :  { %12337 = vmatpush3.bf16.msra.mxu1 %v20368_v35  ;;  %11611 = vmatprep.mubr.msk.f32.mxu1 %vm597_vm1, %v10617_v62  ;;  %v12405_v35 = vpack.c.bf16 %v7260_v36, %v7259_v29  ;;  %v10754_v62 = vld [vmem:[%s19500_s3 + $0x428] sm:$0xff]  ;;  %v20394_v29 = vld [vmem:[#allocation102_spill] sm:$0xff]  ;;  %v20395_v36 = vld [vmem:[#allocation103_spill] sm:$0xff] }
 0x6a7   :  { %12339 = vmatprep.subr.bf16.mxu1 %v20369_v12 }
 0x6a9   :  { %11612 = vmatmul.mubr.msk.f32.gmra.mrb[4].mxu1 %vm597_vm1, %v10618_v44  ;;  %v7261_v44 = vld [vmem:[%s19495_s2 + $0x270] sm:$0xff] }
 0x6aa   :  { %12341 = vmatpush3.bf16.msra.mxu1 %v20369_v12  ;;  %11614 = vmatprep.mubr.msk.f32.mxu1 %vm597_vm1, %v10619_v15  ;;  %v7262_v12 = vld [vmem:[%s19495_s2 + $0x278] sm:$0xff]  ;;  %v10755_v15 = vld [vmem:[%s19500_s3 + $0x430] sm:$0xff] }
 0x6ab   :  { %12343 = vmatprep.subr.bf16.mxu1 %v20372_v51  ;;  %v12408_v18 = vpack.c.bf16 %v7262_v12, %v7261_v44  ;;  %v20399_v44 = vld [vmem:[#allocation27_spill] sm:$0xff]  ;;  %v20400_v12 = vld [vmem:[#allocation28_spill] sm:$0xff] }
 0x6ad   :  { %11615 = vmatmul.mubr.msk.f32.gmra.mrb[6].mxu1 %vm597_vm1, %v10620_v6  ;;  %v7264_v6 = vld [vmem:[%s19495_s2 + $0x288] sm:$0xff] }
 0x6ae   :  { %12345 = vmatpush3.bf16.msra.mxu1 %v20372_v51  ;;  %11617 = vmatprep.mubr.msk.f32.mxu1 %vm597_vm1, %v10621_v7  ;;  %v10757_v51 = vld [vmem:[%s19500_s3 + $0x440] sm:$0xff]  ;;  %v12411_v7 = vpack.c.bf16 %v7264_v6, %v7263_v48  ;;  %v20404_v48 = vld [vmem:[#allocation62_spill] sm:$0xff]  ;;  %v20405_v6 = vld [vmem:[#allocation53_spill] sm:$0xff] }
 0x6af   :  { %11645 = vmatprep.subr.mxu1 %v6190_v40 }
 0x6b1   :  { %11618 = vmatmul.mubr.msk.f32.gmra.mrb[8].mxu1 %vm597_vm1, %v10622_v45  ;;  %v7265_v45 = vld [vmem:[%s19495_s2 + $0x290] sm:$0xff] }
 0x6b2   :  { %11646 = vmatpush3.msra.mxu1 %v6190_v40  ;;  %11620 = vmatprep.mubr.msk.f32.mxu1 %vm597_vm1, %v10623_v11  ;;  %v10758_v40 = vld [vmem:[%s19500_s3 + $0x448] sm:$0xff]  ;;  %v7266_v11 = vld [vmem:[%s19495_s2 + $0x298] sm:$0xff] }
 0x6b3   :  { %12383 = vmatprep.subr.bf16.mxu1 %v17322_v13 }
 0x6b5   :  { %11621 = vmatmul.mubr.msk.f32.gmra.mrb[10].mxu1 %vm597_vm1, %v10624_v26  ;;  %v10759_v26 = vld [vmem:[%s19500_s3 + $0x450] sm:$0xff] }
 0x6b6   :  { %11623 = vmatprep.mubr.msk.f32.mxu1 %vm597_vm1, %v10625_v59  ;;  %v12414_v59 = vpack.c.bf16 %v7266_v11, %v7265_v45  ;;  %v20409_v45 = vld [vmem:[#allocation59_spill] sm:$0xff] }
 0x6b7   :  { %v20410_v11 = vld [vmem:[#allocation7_spill] sm:$0xff] }
 0x6b9   :  { %11624 = vmatmul.mubr.msk.f32.gmra.mrb[12].mxu1 %vm597_vm1, %v10626_v63  ;;  %v10760_v63 = vld [vmem:[%s19500_s3 + $0x458] sm:$0xff] }
 0x6ba   :  { %11626 = vmatprep.mubr.msk.f32.mxu1 %vm597_vm1, %v10627_v23  ;;  %v7267_v23 = vld [vmem:[%s19495_s2 + $0x2a0] sm:$0xff] }
 0x6bd   :  { %11627 = vmatmul.mubr.msk.f32.gmra.mrb[14].mxu1 %vm597_vm1, %v10628_v33  ;;  %v7268_v33 = vld [vmem:[%s19495_s2 + $0x2a8] sm:$0xff] }
 0x6be   :  { %11647 = vmatprep.mubr.msk.f32.mxu1 %vm597_vm1, %v10681_v5  ;;  %v10761_v5 = vld [vmem:[%s19500_s3 + $0x460] sm:$0xff] }
 0x6c1   :  { %11648 = vmatmul.mubr.msk.f32.vlgmr.msra.gmra.mrb[0].mxu1 %vm597_vm1, %v10682_v50  ;;  %v12417_v50 = vpack.c.bf16 %v7268_v33, %v7267_v23  ;;  %v20414_v23 = vld [vmem:[#allocation42_spill] sm:$0xff] }
 0x6c2   :  { %12385 = vmatpush3.bf16.msra.mxu1 %v17322_v13  ;;  %11650 = vmatprep.mubr.msk.f32.mxu1 %vm597_vm1, %v10683_v58  ;;  %v10686_v13 = vld [vmem:[%s19500_s3 + $0x3a8] sm:$0xff]  ;;  %v20415_v33 = vld [vmem:[#allocation66_spill] sm:$0xff] }
 0x6c3   :  { %12387 = vmatprep.subr.bf16.mxu1 %v17336_v30  ;;  %v10762_v58 = vld [vmem:[%s19500_s3 + $0x468] sm:$0xff] }
 0x6c5   :  { %11651 = vmatmul.mubr.msk.f32.gmra.mrb[2].mxu1 %vm597_vm1, %v10684_v38  ;;  %v7269_v38 = vld [vmem:[%s19495_s2 + $0x2b0] sm:$0xff] }
 0x6c6   :  { %12389 = vmatpush3.bf16.msra.mxu1 %v17336_v30  ;;  %11653 = vmatprep.mubr.msk.f32.mxu1 %vm597_vm1, %v10685_v55  ;;  %v10688_v30 = vld [vmem:[%s19500_s3 + $0x3b8] sm:$0xff] }
 0x6c7   :  { %12391 = vmatprep.subr.bf16.mxu1 %v17350_v47  ;;  %v7270_v55 = vld [vmem:[%s19495_s2 + $0x2b8] sm:$0xff] }
 0x6c9   :  { %11654 = vmatmul.mubr.msk.f32.gmra.mrb[4].mxu1 %vm597_vm1, %v10686_v13  ;;  %v10763_v13 = vld [vmem:[%s19500_s3 + $0x470] sm:$0xff] }
 0x6ca   :  { %12393 = vmatpush3.bf16.msra.mxu1 %v17350_v47  ;;  %11656 = vmatprep.mubr.msk.f32.mxu1 %vm597_vm1, %v10687_v41  ;;  %v10690_v47 = vld [vmem:[%s19500_s3 + $0x3c8] sm:$0xff]  ;;  %v12420_v41 = vpack.c.bf16 %v7270_v55, %v7269_v38  ;;  %v20419_v38 = vld [vmem:[#allocation105_spill] sm:$0xff] }
 0x6cb   :  { %12395 = vmatprep.subr.bf16.mxu1 %v17367_v10  ;;  %v20420_v55 = vld [vmem:[#allocation60_spill] sm:$0xff] }
 0x6cd   :  { %11657 = vmatmul.mubr.msk.f32.gmra.mrb[6].mxu1 %vm597_vm1, %v10688_v30  ;;  %v7271_v30 = vld [vmem:[%s19495_s2 + $0x2c0] sm:$0xff] }
 0x6ce   :  { %12397 = vmatpush3.bf16.msra.mxu1 %v17367_v10  ;;  %11659 = vmatprep.mubr.msk.f32.mxu1 %vm597_vm1, %v10689_v4  ;;  %v10692_v10 = vld [vmem:[%s19500_s3 + $0x3d8] sm:$0xff]  ;;  %v7272_v4 = vld [vmem:[%s19495_s2 + $0x2c8] sm:$0xff] }
 0x6cf   :  { %11687 = vmatprep.subr.mxu1 %v6996_v49 }
 0x6d1   :  { %11660 = vmatmul.mubr.msk.f32.gmra.mrb[8].mxu1 %vm597_vm1, %v10690_v47  ;;  %v7273_v47 = vld [vmem:[%s19495_s2 + $0x2d0] sm:$0xff] }
 0x6d2   :  { %11688 = vmatpush3.msra.mxu1 %v6996_v49  ;;  %11662 = vmatprep.mubr.msk.f32.mxu1 %vm597_vm1, %v10691_v56  ;;  %v18646_v49 = vpack.c.bf16 %v7272_v4, %v7271_v30  ;;  %v7274_v56 = vld [vmem:[%s19495_s2 + $0x2d8] sm:$0xff]  ;;  %v20424_v30 = vld [vmem:[#allocation45_spill] sm:$0xff]  ;;  %v20425_v4 = vld [vmem:[#allocation16_spill] sm:$0xff] }
 0x6d3   :  { %12398 = vmatprep.subr.bf16.mxu1 %v20284_v17 }
 0x6d5   :  { %11663 = vmatmul.mubr.msk.f32.gmra.mrb[10].mxu1 %vm597_vm1, %v10692_v10  ;;  %v18658_v10 = vpack.c.bf16 %v7274_v56, %v7273_v47  ;;  %v20426_v47 = vld [vmem:[#allocation50_spill] sm:$0xff] }
 0x6d6   :  { %11665 = vmatprep.mubr.msk.f32.mxu1 %vm597_vm1, %v10693_v8  ;;  %v7276_v8 = vld [vmem:[%s19495_s2 + $0x2e8] sm:$0xff]  ;;  %v20427_v56 = vld [vmem:[#allocation106_spill] sm:$0xff] }
 0x6d9   :  { %11666 = vmatmul.mubr.msk.f32.gmra.mrb[12].mxu1 %vm597_vm1, %v10694_v19 }
 0x6da   :  { %11668 = vmatprep.mubr.msk.f32.mxu1 %vm597_vm1, %v10695_v32  ;;  %v7277_v32 = vld [vmem:[%s19495_s2 + $0x2f0] sm:$0xff] }
 0x6dd   :  { %11669 = vmatmul.mubr.msk.f32.gmra.mrb[14].mxu1 %vm597_vm1, %v10696_v0  ;;  %v7278_v0 = vld [vmem:[%s19495_s2 + $0x2f8] sm:$0xff] }
 0x6de   :  { %11689 = vmatprep.mubr.msk.f32.mxu1 %vm597_vm1, %v10749_v21  ;;  %v18678_v21 = vpack.c.bf16 %v7278_v0, %v7277_v32  ;;  %v20430_v32 = vld [vmem:[#allocation34_spill] sm:$0xff]  ;;  %v20431_v0 = vld [vmem:[#allocation37_spill] sm:$0xff] }
 0x6e1   :  { %11690 = vmatmul.mubr.msk.f32.vlgmr.msra.gmra.mrb[0].mxu1 %vm597_vm1, %v10750_v31  ;;  %v20387_v31 = vld [vmem:[#allocation87_spill] sm:$0xff] }
 0x6e2   :  { %12400 = vmatpush1.bf16.msra.mxu1 %v12399_v25  ;;  %11692 = vmatprep.mubr.msk.f32.mxu1 %vm597_vm1, %v10751_v39  ;;  %v20388_v25 = vld [vmem:[#allocation88_spill] sm:$0xff]  ;;  %v20391_v39 = vld [vmem:[#allocation91_spill] sm:$0xff] }
 0x6e3   :  { %12401 = vmatprep.subr.bf16.mxu1 %v20284_v17 }
 0x6e5   :  { %11693 = vmatmul.mubr.msk.f32.gmra.mrb[2].mxu1 %vm597_vm1, %v10752_v24  ;;  %v20393_v24 = vld [vmem:[#allocation101_spill] sm:$0xff] }
 0x6e6   :  { %12403 = vmatpush1.bf16.msra.mxu1 %v12402_v27  ;;  %11695 = vmatprep.mubr.msk.f32.mxu1 %vm597_vm1, %v10753_v52  ;;  %v20392_v27 = vld [vmem:[#allocation95_spill] sm:$0xff]  ;;  %v20396_v52 = vld [vmem:[#allocation104_spill] sm:$0xff] }
 0x6e7   :  { %12404 = vmatprep.subr.bf16.mxu1 %v20284_v17 }
 0x6e9   :  { %11696 = vmatmul.mubr.msk.f32.gmra.mrb[4].mxu1 %vm597_vm1, %v10754_v62  ;;  %v20398_v62 = vld [vmem:[#allocation24_spill] sm:$0xff] }
 0x6ea   :  { %12406 = vmatpush1.bf16.msra.mxu1 %v12405_v35  ;;  %11698 = vmatprep.mubr.msk.f32.mxu1 %vm597_vm1, %v10755_v15  ;;  %v20397_v35 = vld [vmem:[#allocation25_spill] sm:$0xff]  ;;  %v20401_v15 = vld [vmem:[#allocation31_spill] sm:$0xff] }
 0x6eb   :  { %12407 = vmatprep.subr.bf16.mxu1 %v20284_v17 }
 0x6ed   :  { %11699 = vmatmul.mubr.msk.f32.gmra.mrb[6].mxu1 %vm597_vm1, %v10756_v60  ;;  %v20403_v60 = vld [vmem:[#allocation52_spill] sm:$0xff] }
 0x6ee   :  { %12409 = vmatpush1.bf16.msra.mxu1 %v12408_v18  ;;  %11701 = vmatprep.mubr.msk.f32.mxu1 %vm597_vm1, %v10757_v51  ;;  %v20402_v18 = vld [vmem:[#allocation30_spill] sm:$0xff]  ;;  %v20406_v51 = vld [vmem:[#allocation5_spill] sm:$0xff] }
 0x6ef   :  { %12410 = vmatprep.subr.bf16.mxu1 %v20284_v17 }
 0x6f1   :  { %11702 = vmatmul.mubr.msk.f32.gmra.mrb[8].mxu1 %vm597_vm1, %v10758_v40  ;;  %v20408_v40 = vld [vmem:[#allocation6_spill] sm:$0xff] }
 0x6f2   :  { %12412 = vmatpush1.bf16.msra.mxu1 %v12411_v7  ;;  %11704 = vmatprep.mubr.msk.f32.mxu1 %vm597_vm1, %v10759_v26  ;;  %v20407_v7 = vld [vmem:[#allocation58_spill] sm:$0xff]  ;;  %v20411_v26 = vld [vmem:[#allocation8_spill] sm:$0xff] }
 0x6f3   :  { %12413 = vmatprep.subr.bf16.mxu1 %v20284_v17 }
 0x6f5   :  { %11705 = vmatmul.mubr.msk.f32.gmra.mrb[10].mxu1 %vm597_vm1, %v10760_v63  ;;  %v20413_v63 = vld [vmem:[#allocation43_spill] sm:$0xff] }
 0x6f6   :  { %12415 = vmatpush1.bf16.msra.mxu1 %v12414_v59  ;;  %11707 = vmatprep.mubr.msk.f32.mxu1 %vm597_vm1, %v10761_v5  ;;  %v20412_v59 = vld [vmem:[#allocation65_spill] sm:$0xff]  ;;  %v20416_v5 = vld [vmem:[#allocation46_spill] sm:$0xff] }
 0x6f7   :  { %12416 = vmatprep.subr.bf16.mxu1 %v20284_v17 }
 0x6f9   :  { %11708 = vmatmul.mubr.msk.f32.gmra.mrb[12].mxu1 %vm597_vm1, %v10762_v58  ;;  %v20418_v58 = vld [vmem:[#allocation51_spill] sm:$0xff] }
 0x6fa   :  { %12418 = vmatpush1.bf16.msra.mxu1 %v12417_v50  ;;  %11710 = vmatprep.mubr.msk.f32.mxu1 %vm597_vm1, %v10763_v13  ;;  %v20417_v50 = vld [vmem:[#allocation44_spill] sm:$0xff] }
 0x6fb   :  { %12419 = vmatprep.subr.bf16.mxu1 %v20284_v17  ;;  %v20421_v13 = vld [vmem:[#allocation48_spill] sm:$0xff] }
 0x6fd   :  { %11711 = vmatmul.mubr.msk.f32.gmra.mrb[14].mxu1 %vm597_vm1, %v10764_v53  ;;  %v20423_v53 = vld [vmem:[#allocation49_spill] sm:$0xff] }
 0x6fe   :  { %12421 = vmatpush1.bf16.msra.mxu1 %v12420_v41  ;;  %10781 = vmatprep.mubr.msk.f32.mxu1 %vm128_vm0, %v17800_v3  ;;  %v7275_v3 = vld [vmem:[%s19495_s2 + $0x2e0] sm:$0xff]  ;;  %v20422_v41 = vld [vmem:[#allocation17_spill] sm:$0xff] }
 0x6ff   :  { %12422 = vmatprep.subr.bf16.mxu1 %v20284_v17  ;;  %v18668_v19 = vpack.c.bf16 %v7276_v8, %v7275_v3  ;;  %v20428_v3 = vld [vmem:[#allocation32_spill] sm:$0xff]  ;;  %v20429_v8 = vld [vmem:[#allocation35_spill] sm:$0xff] }
 0x702   :  { %12424 = vmatpush1.bf16.msra.mxu1 %v18646_v49 }
 0x703   :  { %12425 = vmatprep.subr.bf16.mxu1 %v20284_v17 }
 0x706   :  { %12427 = vmatpush1.bf16.msra.mxu1 %v18658_v10 }
 0x707   :  { %12428 = vmatprep.subr.bf16.mxu1 %v20284_v17 }
 0x70a   :  { %12430 = vmatpush1.bf16.msra.mxu1 %v18668_v19 }
 0x70b   :  { %12431 = vmatprep.subr.bf16.mxu1 %v20284_v17 }
 0x70e   :  { %12433 = vmatpush1.bf16.msra.mxu1 %v18678_v21 }
 0x711   :  { %7524 = vmatmul.mubr.f32.vlgmr.msra.gmra.mrb[206].mxu1 %v17848_v46  ;;  %v20373_v46 = vld [vmem:[#allocation79_spill] sm:$0xff] }
 0x712   :  { %10782 = vmatprep.mubr.msk.f32.mxu1 %vm128_vm0, %v17853_v34  ;;  %v20374_v34 = vld [vmem:[#allocation9_spill] sm:$0xff] }
 0x715   :  { %7529 = vmatmul.mubr.f32.gmra.mrb[208].mxu1 %v17861_v22  ;;  %v20375_v22 = vld [vmem:[#allocation67_spill] sm:$0xff] }
 0x716   :  { %10783 = vmatprep.mubr.msk.f32.mxu1 %vm128_vm0, %v17866_v2  ;;  %v20376_v2 = vld [vmem:[#allocation80_spill] sm:$0xff] }
 0x719   :  { %7534 = vmatmul.mubr.f32.gmra.mrb[210].mxu1 %v17874_v57  ;;  %v20377_v57 = vld [vmem:[#allocation81_spill] sm:$0xff] }
 0x71a   :  { %10784 = vmatprep.mubr.msk.f32.mxu1 %vm128_vm0, %v17879_v54  ;;  %v20378_v54 = vld [vmem:[#allocation82_spill] sm:$0xff] }
 0x71d   :  { %7539 = vmatmul.mubr.f32.gmra.mrb[212].mxu1 %v17887_v28  ;;  %v20379_v28 = vld [vmem:[#allocation68_spill] sm:$0xff] }
 0x71e   :  { %10785 = vmatprep.mubr.msk.f32.mxu1 %vm128_vm0, %v17892_v37  ;;  %v20380_v37 = vld [vmem:[#allocation83_spill] sm:$0xff] }
 0x721   :  { %7544 = vmatmul.mubr.f32.gmra.mrb[214].mxu1 %v17900_v16  ;;  %v20381_v16 = vld [vmem:[#allocation84_spill] sm:$0xff] }
 0x722   :  { %10786 = vmatprep.mubr.msk.f32.mxu1 %vm128_vm0, %v17905_v9  ;;  %v20382_v9 = vld [vmem:[#allocation10_spill] sm:$0xff] }
 0x725   :  { %7549 = vmatmul.mubr.f32.gmra.mrb[216].mxu1 %v17913_v61  ;;  %v20383_v61 = vld [vmem:[#allocation33_spill] sm:$0xff] }
 0x726   :  { %10787 = vmatprep.mubr.msk.f32.mxu1 %vm128_vm0, %v17918_v42  ;;  %v20384_v42 = vld [vmem:[#allocation70_spill] sm:$0xff] }
 0x729   :  { %7554 = vmatmul.mubr.f32.gmra.mrb[218].mxu1 %v20373_v46 }
 0x72a   :  { %10788 = vmatprep.mubr.msk.f32.mxu1 %vm128_vm0, %v20374_v34 }
 0x72d   :  { %7559 = vmatmul.mubr.f32.gmra.mrb[220].mxu1 %v20375_v22 }
 0x72e   :  { %10789 = vmatprep.mubr.msk.f32.mxu1 %vm128_vm0, %v20376_v2 }
 0x731   :  { %7564 = vmatmul.mubr.f32.gmra.mrb[222].mxu1 %v20377_v57 }
 0x732   :  { %10790 = vmatprep.mubr.msk.f32.mxu1 %vm128_vm0, %v20378_v54 }
 0x735   :  { %7569 = vmatmul.mubr.f32.gmra.mrb[224].mxu1 %v20379_v28 }
 0x736   :  { %10791 = vmatprep.mubr.msk.f32.mxu1 %vm128_vm0, %v20380_v37 }
 0x739   :  { %7574 = vmatmul.mubr.f32.gmra.mrb[226].mxu1 %v20381_v16 }
 0x73a   :  { %10792 = vmatprep.mubr.msk.f32.mxu1 %vm128_vm0, %v20382_v9 }
 0x73d   :  { %7579 = vmatmul.mubr.f32.gmra.mrb[228].mxu1 %v20383_v61 }
 0x73e   :  { %10793 = vmatprep.mubr.msk.f32.mxu1 %vm128_vm0, %v20384_v42 }
 0x741   :  { %7584 = vmatmul.mubr.f32.gmra.mrb[230].mxu1 %v20385_v14  ;;  %v10817_v14 = vld [vmem:[%s19500_s3 + $0x480] sm:$0xff] }
 0x742   :  { %10794 = vmatprep.mubr.msk.f32.mxu1 %vm128_vm0, %v20386_v43 }
 0x745   :  { %7589 = vmatmul.mubr.f32.gmra.mrb[232].mxu1 %v20387_v31 }
 0x746   :  { %10795 = vmatprep.mubr.msk.f32.mxu1 %vm128_vm0, %v20388_v25 }
 0x749   :  { %7594 = vmatmul.mubr.f32.gmra.mrb[234].mxu1 %v20389_v1 }
 0x74a   :  { %10796 = vmatprep.mubr.msk.f32.mxu1 %vm128_vm0, %v20390_v20 }
 0x74d   :  { %7599 = vmatmul.mubr.f32.gmra.mrb[236].mxu1 %v20391_v39 }
 0x74e   :  { %10797 = vmatprep.mubr.msk.f32.mxu1 %vm128_vm0, %v20392_v27 }
 0x751   :  { %7604 = vmatmul.mubr.f32.gmra.mrb[238].mxu1 %v20393_v24 }
 0x752   :  { %10798 = vmatprep.mubr.msk.f32.mxu1 %vm128_vm0, %v20394_v29 }
 0x755   :  { %7609 = vmatmul.mubr.f32.gmra.mrb[240].mxu1 %v20395_v36 }
 0x756   :  { %10799 = vmatprep.mubr.msk.f32.mxu1 %vm128_vm0, %v20396_v52 }
 0x759   :  { %7614 = vmatmul.mubr.f32.gmra.mrb[242].mxu1 %v20397_v35 }
 0x75a   :  { %10800 = vmatprep.mubr.msk.f32.mxu1 %vm128_vm0, %v20398_v62 }
 0x75d   :  { %7619 = vmatmul.mubr.f32.gmra.mrb[244].mxu1 %v20399_v44 }
 0x75e   :  { %10801 = vmatprep.mubr.msk.f32.mxu1 %vm128_vm0, %v20400_v12 }
 0x761   :  { %7624 = vmatmul.mubr.f32.gmra.mrb[246].mxu1 %v20401_v15 }
 0x762   :  { %10802 = vmatprep.mubr.msk.f32.mxu1 %vm128_vm0, %v20402_v18 }
 0x765   :  { %7629 = vmatmul.mubr.f32.gmra.mrb[248].mxu1 %v20403_v60 }
 0x766   :  { %10803 = vmatprep.mubr.msk.f32.mxu1 %vm128_vm0, %v20404_v48 }
 0x769   :  { %7634 = vmatmul.mubr.f32.gmra.mrb[250].mxu1 %v20405_v6 }
 0x76a   :  { %10804 = vmatprep.mubr.msk.f32.mxu1 %vm128_vm0, %v20406_v51 }
 0x76d   :  { %7639 = vmatmul.mubr.f32.gmra.mrb[252].mxu1 %v20407_v7 }
 0x76e   :  { %10805 = vmatprep.mubr.msk.f32.mxu1 %vm128_vm0, %v20408_v40 }
 0x771   :  { %7644 = vmatmul.mubr.f32.gmra.mrb[254].mxu1 %v20409_v45 }
 0x772   :  { %10806 = vmatprep.mubr.msk.f32.mxu1 %vm128_vm0, %v20410_v11 }
 0x775   :  { %7649 = vmatmul.mubr.f32.gmra.mrb[16].mxu1 %v20411_v26 }
 0x776   :  { %10807 = vmatprep.mubr.msk.f32.mxu1 %vm128_vm0, %v20412_v59 }
 0x779   :  { %7654 = vmatmul.mubr.f32.gmra.mrb[18].mxu1 %v20413_v63 }
 0x77a   :  { %10808 = vmatprep.mubr.msk.f32.mxu1 %vm128_vm0, %v20414_v23 }
 0x77d   :  { %7659 = vmatmul.mubr.f32.gmra.mrb[20].mxu1 %v20415_v33 }
 0x77e   :  { %10809 = vmatprep.mubr.msk.f32.mxu1 %vm128_vm0, %v20416_v5 }
 0x781   :  { %7664 = vmatmul.mubr.f32.gmra.mrb[22].mxu1 %v20417_v50 }
 0x782   :  { %10810 = vmatprep.mubr.msk.f32.mxu1 %vm128_vm0, %v20418_v58 }
 0x785   :  { %7669 = vmatmul.mubr.f32.gmra.mrb[24].mxu1 %v20419_v38 }
 0x786   :  { %10811 = vmatprep.mubr.msk.f32.mxu1 %vm128_vm0, %v20420_v55 }
 0x789   :  { %7674 = vmatmul.mubr.f32.gmra.mrb[26].mxu1 %v20421_v13 }
 0x78a   :  { %10812 = vmatprep.mubr.msk.f32.mxu1 %vm128_vm0, %v20422_v41 }
 0x78d   :  { %7679 = vmatmul.mubr.f32.gmra.mrb[28].mxu1 %v20423_v53 }
 0x78e   :  { %10813 = vmatprep.mubr.msk.f32.mxu1 %vm128_vm0, %v20424_v30 }
 0x791   :  { %7684 = vmatmul.mubr.f32.gmra.mrb[30].mxu1 %v20425_v4 }
 0x792   :  { %10814 = vmatprep.mubr.msk.f32.mxu1 %vm128_vm0, %v20426_v47 }
 0x795   :  { %7689 = vmatmul.mubr.f32.gmra.mrb[32].mxu1 %v20427_v56 }
 0x796   :  { %10815 = vmatprep.mubr.msk.f32.mxu1 %vm128_vm0, %v20428_v3 }
 0x799   :  { %7694 = vmatmul.mubr.f32.gmra.mrb[34].mxu1 %v20429_v8 }
 0x79a   :  { %10816 = vmatprep.mubr.msk.f32.mxu1 %vm128_vm0, %v20430_v32 }
 0x79d   :  { %7699 = vmatmul.mubr.f32.gmra.mrb[36].mxu1 %v20431_v0 }
 0x79e   :  { %11731 = vmatprep.mubr.msk.f32.mxu1 %vm597_vm1, %v10817_v14 }
 0x7e4   :  { %v18788_v46 = vpop.f32.mrb[206].mxu1 }
 0x7e5   :  { %v7527_v34 = vpop.f32.mrb[207].mxu1 }
 0x7e8   :  { %v18790_v22 = vpop.f32.mrb[208].mxu1 }
 0x7e9   :  { %v7532_v2 = vpop.f32.mrb[209].mxu1 }
 0x7ec   :  { %v18792_v57 = vpop.f32.mrb[210].mxu1 }
 0x7ed   :  { %v7537_v54 = vpop.f32.mrb[211].mxu1 }
 0x7f0   :  { %v18794_v28 = vpop.f32.mrb[212].mxu1 }
 0x7f1   :  { %v7542_v37 = vpop.f32.mrb[213].mxu1 }
 0x7f4   :  { %v18796_v16 = vpop.f32.mrb[214].mxu1 }
 0x7f5   :  { %v7547_v9 = vpop.f32.mrb[215].mxu1 }
 0x7f8   :  { %v18798_v61 = vpop.f32.mrb[216].mxu1 }
 0x7f9   :  { %v7552_v42 = vpop.f32.mrb[217].mxu1 }
 0x7fc   :  { %v18803_v43 = vpop.f32.mrb[218].mxu1 }
 0x7fd   :  { %v7557_v31 = vpop.f32.mrb[219].mxu1 }
 0x7fe   :  { %v20432_v31 = vld [vmem:[#allocation74_spill] sm:$0xff] }
 0x800   :  { %v18806_v25 = vpop.f32.mrb[220].mxu1 }
 0x801   :  { %v7562_v1 = vpop.f32.mrb[221].mxu1 }
 0x804   :  { %v18808_v20 = vpop.f32.mrb[222].mxu1 }
 0x805   :  { %v7567_v39 = vpop.f32.mrb[223].mxu1 }
 0x808   :  { %v7570_v27 = vpop.f32.mrb[224].mxu1 }
 0x809   :  { %v7704_v24 = vmax.f32 %v18788_v46, %v7570_v27  ;;  %v7572_v29 = vpop.f32.mrb[225].mxu1 }
 0x80a   :  { %v20433_v29 = vld [vmem:[#allocation47_spill] sm:$0xff] }
 0x80c   :  { %v7575_v36 = vpop.f32.mrb[226].mxu1 }
 0x80d   :  { %v7705_v52 = vmax.f32 %v18790_v22, %v7575_v36  ;;  %v7577_v35 = vpop.f32.mrb[227].mxu1 }
 0x810   :  { %v7580_v62 = vpop.f32.mrb[228].mxu1 }
 0x811   :  { %v7706_v44 = vmax.f32 %v18792_v57, %v7580_v62  ;;  %v7582_v12 = vpop.f32.mrb[229].mxu1 }
 0x814   :  { %v7585_v15 = vpop.f32.mrb[230].mxu1 }
 0x815   :  { %v7707_v18 = vmax.f32 %v18794_v28, %v7585_v15  ;;  %v7587_v60 = vpop.f32.mrb[231].mxu1 }
 0x818   :  { %v18814_v48 = vpop.f32.mrb[232].mxu1 }
 0x819   :  { %v7708_v6 = vmax.f32 %v18796_v16, %v18814_v48  ;;  %v7592_v51 = vpop.f32.mrb[233].mxu1 }
 0x81c   :  { %v18818_v7 = vpop.f32.mrb[234].mxu1 }
 0x81d   :  { %v7709_v40 = vmax.f32 %v18798_v61, %v18818_v7  ;;  %v7597_v45 = vpop.f32.mrb[235].mxu1 }
 0x820   :  { %v18822_v11 = vpop.f32.mrb[236].mxu1 }
 0x821   :  { %v7710_v26 = vmax.f32 %v18803_v43, %v18822_v11  ;;  %v7602_v59 = vpop.f32.mrb[237].mxu1 }
 0x824   :  { %v18826_v63 = vpop.f32.mrb[238].mxu1 }
 0x825   :  { %v7711_v23 = vmax.f32 %v18806_v25, %v18826_v63  ;;  %v7607_v33 = vpop.f32.mrb[239].mxu1  ;;  %v10818_v63 = vld [vmem:[%s19500_s3 + $0x488] sm:$0xff] }
 0x826   :  { %v20434_v33 = vld [vmem:[#allocation93_spill] sm:$0xff] }
 0x828   :  { %v18830_v5 = vpop.f32.mrb[240].mxu1 }
 0x829   :  { %v7712_v50 = vmax.f32 %v18808_v20, %v18830_v5  ;;  %v7612_v58 = vpop.f32.mrb[241].mxu1  ;;  %v20441_v20 = vld [vmem:[#allocation76_spill] sm:$0xff]  ;;  %v10820_v5 = vld [vmem:[%s19500_s3 + $0x498] sm:$0xff] }
 0x82c   :  { %v7615_v38 = vpop.f32.mrb[242].mxu1 }
 0x82d   :  { %v7617_v55 = vpop.f32.mrb[243].mxu1 }
 0x82e   :  { %v20435_v55 = vld [vmem:[#allocation20_spill] sm:$0xff] }
 0x830   :  { %v7620_v13 = vpop.f32.mrb[244].mxu1 }
 0x831   :  { %v7622_v41 = vpop.f32.mrb[245].mxu1 }
 0x834   :  { %v7625_v53 = vpop.f32.mrb[246].mxu1 }
 0x835   :  { %v7627_v30 = vpop.f32.mrb[247].mxu1 }
 0x838   :  { %v7630_v4 = vpop.f32.mrb[248].mxu1 }
 0x839   :  { %v7632_v47 = vpop.f32.mrb[249].mxu1 }
 0x83c   :  { %v7635_v56 = vpop.f32.mrb[250].mxu1 }
 0x83d   :  { %v7637_v3 = vpop.f32.mrb[251].mxu1 }
 0x840   :  { %v7640_v8 = vpop.f32.mrb[252].mxu1 }
 0x841   :  { %v7642_v32 = vpop.f32.mrb[253].mxu1 }
 0x844   :  { %v7645_v0 = vpop.f32.mrb[254].mxu1 }
 0x845   :  { %v7647_v46 = vpop.f32.mrb[255].mxu1 }
 0x848   :  { %v7650_v34 = vpop.f32.mrb[16].mxu1 }
 0x849   :  { %v7652_v22 = vpop.f32.mrb[17].mxu1 }
 0x84c   :  { %v18834_v2 = vpop.f32.mrb[18].mxu1 }
 0x84d   :  { %v7657_v57 = vpop.f32.mrb[19].mxu1 }
 0x850   :  { %v7660_v54 = vpop.f32.mrb[20].mxu1 }
 0x851   :  { %v7713_v28 = vmax.f32 %v7615_v38, %v7660_v54  ;;  %v7662_v37 = vpop.f32.mrb[21].mxu1  ;;  %v20437_v54 = vld [vmem:[#allocation75_spill] sm:$0xff] }
 0x853   :  { %v7722_v16 = vmax.f32 %v7704_v24, %v7713_v28 }
 0x854   :  { %v7665_v9 = vpop.f32.mrb[22].mxu1 }
 0x855   :  { %v7714_v42 = vmax.f32 %v7620_v13, %v7665_v9  ;;  %v7667_v14 = vpop.f32.mrb[23].mxu1  ;;  %v7785_v1 = vadd.f32 %v20432_v31, %v7722_v16 }
 0x857   :  { %v7723_v39 = vmax.f32 %v7705_v52, %v7714_v42  ;;  %v7794_v12 = vmax.f32 %v7785_v1, 0.0  ;;  %v20438_v1 = vld [vmem:[#allocation23_spill] sm:$0xff] }
 0x858   :  { %v7670_v27 = vpop.f32.mrb[24].mxu1 }
 0x859   :  { %v7786_v36 = vadd.f32 %v20433_v29, %v7723_v39  ;;  %v7715_v35 = vmax.f32 %v7625_v53, %v7670_v27  ;;  %v7672_v62 = vpop.f32.mrb[25].mxu1 }
 0x85a   :  { %v10822_v62 = vld [vmem:[%s19500_s3 + $0x4a8] sm:$0xff] }
 0x85b   :  { %v7795_v15 = vmax.f32 %v7786_v36, 0.0  ;;  %v7724_v60 = vmax.f32 %v7706_v44, %v7715_v35  ;;  %v20440_v36 = vld [vmem:[#allocation94_spill] sm:$0xff] }
 0x85c   :  { %v7675_v48 = vpop.f32.mrb[26].mxu1 }
 0x85d   :  { %v7716_v51 = vmax.f32 %v7630_v4, %v7675_v48  ;;  %v7677_v45 = vpop.f32.mrb[27].mxu1  ;;  %v12434_v59 = vpack.c.bf16 %v7795_v15, %v7794_v12  ;;  %v7787_v24 = vadd.f32 %v20434_v33, %v7724_v60  ;;  %v20436_v4 = vld [vmem:[#allocation13_spill] sm:$0xff]  ;;  %v20443_v12 = vld [vmem:[#allocation22_spill] sm:$0xff]  ;;  %v8589_v60 = vpop.permute.xlu0 %8588  ;;  %v10825_v33 = vld [vmem:[%s19500_s3 + $0x4c0] sm:$0xff] }
 0x85e   :  { %v10823_v15 = vld [vmem:[%s19500_s3 + $0x4b0] sm:$0xff]  ;;  %v10824_v45 = vld [vmem:[%s19500_s3 + $0x4b8] sm:$0xff] }
 0x85f   :  { %v7725_v58 = vmax.f32 %v7707_v18, %v7716_v51  ;;  %12435 = vmatprep.subr.bf16.mxu1 %v12434_v59  ;;  %v7796_v30 = vmax.f32 %v7787_v24, 0.0  ;;  %v20444_v48 = vld [vmem:[#allocation77_spill] sm:$0xff] }
 0x860   :  { %v7680_v38 = vpop.f32.mrb[28].mxu1  ;;  %12437 = vmatpush3.bf16.msra.mxu1 %v12434_v59  ;;  %v8599_v51 = vadd.f32 %v8589_v60, %v20444_v48  ;;  %v20445_v59 = vld [vmem:[#allocation78_spill] sm:$0xff]  ;;  %v8901_v48 = vld [vmem:[%s19496_s0 + $0x50] sm:$0xff] }
 0x861   :  { %v7788_v52 = vadd.f32 %v20435_v55, %v7725_v58  ;;  %v7717_v13 = vmax.f32 %v7635_v56, %v7680_v38  ;;  %v7682_v41 = vpop.f32.mrb[29].mxu1  ;;  %v10826_v58 = vld [vmem:[%s19500_s3 + $0x4c8] sm:$0xff]  ;;  %v10827_v38 = vld [vmem:[%s19500_s3 + $0x4d0] sm:$0xff]  ;;  %v10828_v55 = vld [vmem:[%s19500_s3 + $0x4d8] sm:$0xff] }
 0x862   :  { %v8608_v24 = vmax.f32 %v8599_v51, 0.0  ;;  %v10831_v41 = vld [vmem:[%s19500_s3 + $0x4f0] sm:$0xff]  ;;  %v8902_v60 = vld [vmem:[%s19496_s0 + $0x58] sm:$0xff]  ;;  %v8904_v51 = vld [vmem:[%s19496_s0 + $0x68] sm:$0xff] }
 0x863   :  { %v7797_v53 = vmax.f32 %v7788_v52, 0.0  ;;  %v7726_v47 = vmax.f32 %v7708_v6, %v7717_v13  ;;  %v10829_v52 = vld [vmem:[%s19500_s3 + $0x4e0] sm:$0xff]  ;;  %v10830_v13 = vld [vmem:[%s19500_s3 + $0x4e8] sm:$0xff] }
 0x864   :  { %v7685_v3 = vpop.f32.mrb[30].mxu1 }
 0x865   :  { %v7718_v32 = vmax.f32 %v7640_v8, %v7685_v3  ;;  %v7687_v44 = vpop.f32.mrb[31].mxu1  ;;  %v12438_v46 = vpack.c.bf16 %v7797_v53, %v7796_v30  ;;  %v7789_v22 = vadd.f32 %v20436_v4, %v7726_v47  ;;  %v10832_v30 = vld [vmem:[%s19500_s3 + $0x4f8] sm:$0xff]  ;;  %v10885_v53 = vld [vmem:[%s19500_s3 + $0x500] sm:$0xff]  ;;  %v10886_v47 = vld [vmem:[%s19500_s3 + $0x508] sm:$0xff] }
 0x866   :  { %v10887_v3 = vld [vmem:[%s19500_s3 + $0x510] sm:$0xff]  ;;  %v10889_v44 = vld [vmem:[%s19500_s3 + $0x520] sm:$0xff] }
 0x867   :  { %v7727_v18 = vmax.f32 %v7709_v40, %v7718_v32  ;;  %12439 = vmatprep.subr.bf16.mxu1 %v12438_v46  ;;  %v7798_v16 = vmax.f32 %v7789_v22, 0.0  ;;  %v10888_v32 = vld [vmem:[%s19500_s3 + $0x518] sm:$0xff]  ;;  %v8875_v4 = vld [vmem:[%s19495_s2 + $0x300] sm:$0xff]  ;;  %v8876_v22 = vld [vmem:[%s19495_s2 + $0x308] sm:$0xff] }
 0x868   :  { %v7690_v57 = vpop.f32.mrb[32].mxu1  ;;  %12441 = vmatpush3.bf16.msra.mxu1 %v12438_v46  ;;  %v10891_v46 = vld [vmem:[%s19500_s3 + $0x530] sm:$0xff] }
 0x869   :  { %v7790_v28 = vadd.f32 %v20437_v54, %v7727_v18  ;;  %v7719_v56 = vmax.f32 %v7645_v0, %v7690_v57  ;;  %v7692_v37 = vpop.f32.mrb[33].mxu1  ;;  %v20439_v0 = vld [vmem:[#allocation3_spill] sm:$0xff]  ;;  %v12515_v18 = vpack.c.bf16 %v8876_v22, %v8875_v4  ;;  %v10894_v57 = vld [vmem:[%s19500_s3 + $0x548] sm:$0xff]  ;;  %v8877_v54 = vld [vmem:[%s19495_s2 + $0x310] sm:$0xff] }
 0x86a   :  { %v10896_v37 = vld [vmem:[%s19500_s3 + $0x558] sm:$0xff]  ;;  %v8924_v4 = vld [vmem:[%s19496_s0 + $0x108] sm:$0xff]  ;;  %v8923_v22 = vld [vmem:[%s19496_s0 + $0x100] sm:$0xff] }
 0x86b   :  { %v7799_v9 = vmax.f32 %v7790_v28, 0.0  ;;  %v7728_v6 = vmax.f32 %v7710_v26, %v7719_v56  ;;  %v8878_v28 = vld [vmem:[%s19495_s2 + $0x318] sm:$0xff] }
 0x86c   :  { %v7695_v8 = vpop.f32.mrb[34].mxu1  ;;  %v12518_v56 = vpack.c.bf16 %v8878_v28, %v8877_v54  ;;  %v8927_v54 = vld [vmem:[%s19496_s0 + $0x120] sm:$0xff]  ;;  %v8930_v28 = vld [vmem:[%s19496_s0 + $0x138] sm:$0xff] }
 0x86d   :  { %v7720_v42 = vmax.f32 %v7650_v34, %v7695_v8  ;;  %v7697_v14 = vpop.f32.mrb[35].mxu1  ;;  %v12442_v31 = vpack.c.bf16 %v7799_v9, %v7798_v16  ;;  %v7791_v61 = vadd.f32 %v20438_v1, %v7728_v6  ;;  %v8879_v16 = vld [vmem:[%s19495_s2 + $0x320] sm:$0xff]  ;;  %v8880_v9 = vld [vmem:[%s19495_s2 + $0x328] sm:$0xff]  ;;  %v10899_v1 = vld [vmem:[%s19500_s3 + $0x570] sm:$0xff] }
 0x86e   :  { %v10897_v6 = vld [vmem:[%s19500_s3 + $0x560] sm:$0xff]  ;;  %v12521_v8 = vpack.c.bf16 %v8880_v9, %v8879_v16  ;;  %v8881_v14 = vld [vmem:[%s19495_s2 + $0x330] sm:$0xff]  ;;  %v8934_v16 = vld [vmem:[%s19496_s0 + $0x158] sm:$0xff] }
 0x86f   :  { %v7729_v7 = vmax.f32 %v7711_v23, %v7720_v42  ;;  %12443 = vmatprep.subr.bf16.mxu1 %v12442_v31  ;;  %v7800_v43 = vmax.f32 %v7791_v61, 0.0  ;;  %v10819_v23 = vld [vmem:[%s19500_s3 + $0x490] sm:$0xff]  ;;  %v10898_v42 = vld [vmem:[%s19500_s3 + $0x568] sm:$0xff] }
 0x870   :  { %v7700_v40 = vpop.f32.mrb[36].mxu1  ;;  %12445 = vmatpush3.bf16.msra.mxu1 %v12442_v31  ;;  %v8882_v31 = vld [vmem:[%s19495_s2 + $0x338] sm:$0xff]  ;;  %v8933_v9 = vld [vmem:[%s19496_s0 + $0x150] sm:$0xff] }
 0x871   :  { %v7792_v39 = vadd.f32 %v20439_v0, %v7729_v7  ;;  %v7721_v27 = vmax.f32 %v18834_v2, %v7700_v40  ;;  %v7702_v29 = vpop.f32.mrb[37].mxu1  ;;  %v10821_v2 = vld [vmem:[%s19500_s3 + $0x4a0] sm:$0xff]  ;;  %v12524_v61 = vpack.c.bf16 %v8882_v31, %v8881_v14  ;;  %v10900_v7 = vld [vmem:[%s19500_s3 + $0x578] sm:$0xff]  ;;  %v8884_v0 = vld [vmem:[%s19495_s2 + $0x348] sm:$0xff] }
 0x872   :  { %v8883_v40 = vld [vmem:[%s19495_s2 + $0x340] sm:$0xff]  ;;  %v8885_v29 = vld [vmem:[%s19495_s2 + $0x350] sm:$0xff]  ;;  %v8940_v31 = vld [vmem:[%s19496_s0 + $0x188] sm:$0xff] }
 0x873   :  { %v7801_v11 = vmax.f32 %v7792_v39, 0.0  ;;  %v7730_v26 = vmax.f32 %v7712_v50, %v7721_v27  ;;  %v20442_v50 = vld [vmem:[#allocation14_spill] sm:$0xff]  ;;  %v8892_v39 = vld [vmem:[%s19496_s0 + $0x8] sm:$0xff]  ;;  %v12527_v27 = vpack.c.bf16 %v8884_v0, %v8883_v40  ;;  %v8937_v14 = vld [vmem:[%s19496_s0 + $0x170] sm:$0xff] }
 0x874   :  { %v8944_v40 = vld [vmem:[%s19496_s0 + $0x1a8] sm:$0xff]  ;;  %v8943_v0 = vld [vmem:[%s19496_s0 + $0x1a0] sm:$0xff] }
 0x875   :  { %v12446_v34 = vpack.c.bf16 %v7801_v11, %v7800_v43  ;;  %v7793_v35 = vadd.f32 %v20440_v36, %v7730_v26  ;;  %v8886_v43 = vld [vmem:[%s19495_s2 + $0x358] sm:$0xff]  ;;  %v8887_v26 = vld [vmem:[%s19495_s2 + $0x360] sm:$0xff] }
 0x876   :  { %v12530_v11 = vpack.c.bf16 %v8886_v43, %v8885_v29  ;;  %v8948_v29 = vld [vmem:[%s19496_s0 + $0x1c8] sm:$0xff]  ;;  %v8947_v43 = vld [vmem:[%s19496_s0 + $0x1c0] sm:$0xff] }
 0x877   :  { %12447 = vmatprep.subr.bf16.mxu1 %v12446_v34  ;;  %v7802_v25 = vmax.f32 %v7793_v35, 0.0  ;;  %v8889_v35 = vld [vmem:[%s19495_s2 + $0x370] sm:$0xff] }
 0x878   :  { %12449 = vmatpush3.bf16.msra.mxu1 %v12446_v34  ;;  %v8888_v34 = vld [vmem:[%s19495_s2 + $0x368] sm:$0xff] }
 0x879   :  { %11729 = vmatprep.subr.mxu1 %v7802_v25  ;;  %v12533_v36 = vpack.c.bf16 %v8888_v34, %v8887_v26  ;;  %v8949_v26 = vld [vmem:[%s19496_s0 + $0x1d0] sm:$0xff]  ;;  %v8952_v34 = vld [vmem:[%s19496_s0 + $0x1e8] sm:$0xff] }
 0x87c   :  { %11730 = vmatpush3.msra.mxu1 %v7802_v25  ;;  %v8890_v25 = vld [vmem:[%s19495_s2 + $0x378] sm:$0xff] }
 0x87d   :  { %11732 = vmatmul.mubr.msk.f32.vlgmr.msra.gmra.mrb[0].mxu1 %vm597_vm1, %v10818_v63  ;;  %12487 = vmatprep.subr.bf16.mxu1 %v20441_v20  ;;  %v12536_v63 = vpack.c.bf16 %v8890_v25, %v8889_v35  ;;  %v8954_v35 = vld [vmem:[%s19496_s0 + $0x1f8] sm:$0xff]  ;;  %v8953_v25 = vld [vmem:[%s19496_s0 + $0x1f0] sm:$0xff] }
 0x87e   :  { %12489 = vmatpush3.bf16.msra.mxu1 %v20441_v20  ;;  %11734 = vmatprep.mubr.msk.f32.mxu1 %vm597_vm1, %v10819_v23  ;;  %v8891_v23 = vld [vmem:[%s19496_s0] sm:$0xff]  ;;  %v8894_v20 = vld [vmem:[%s19496_s0 + $0x18] sm:$0xff] }
 0x87f   :  { %12491 = vmatprep.subr.bf16.mxu1 %v20442_v50 }
 0x881   :  { %11735 = vmatmul.mubr.msk.f32.gmra.mrb[2].mxu1 %vm597_vm1, %v10820_v5  ;;  %v8893_v5 = vld [vmem:[%s19496_s0 + $0x10] sm:$0xff] }
 0x882   :  { %12493 = vmatpush3.bf16.msra.mxu1 %v20442_v50  ;;  %11737 = vmatprep.mubr.msk.f32.mxu1 %vm597_vm1, %v10821_v2  ;;  %v8895_v50 = vld [vmem:[%s19496_s0 + $0x20] sm:$0xff]  ;;  %v8898_v2 = vld [vmem:[%s19496_s0 + $0x38] sm:$0xff] }
 0x883   :  { %12495 = vmatprep.subr.bf16.mxu1 %v20443_v12 }
 0x885   :  { %11738 = vmatmul.mubr.msk.f32.gmra.mrb[4].mxu1 %vm597_vm1, %v10822_v62  ;;  %v8897_v62 = vld [vmem:[%s19496_s0 + $0x30] sm:$0xff] }
 0x886   :  { %12497 = vmatpush3.bf16.msra.mxu1 %v20443_v12  ;;  %11740 = vmatprep.mubr.msk.f32.mxu1 %vm597_vm1, %v10823_v15  ;;  %v8900_v12 = vld [vmem:[%s19496_s0 + $0x48] sm:$0xff]  ;;  %v8899_v15 = vld [vmem:[%s19496_s0 + $0x40] sm:$0xff] }
 0x887   :  { %12499 = vmatprep.subr.bf16.mxu1 %v20445_v59 }
 0x889   :  { %11741 = vmatmul.mubr.msk.f32.gmra.mrb[6].mxu1 %vm597_vm1, %v10824_v45  ;;  %v8903_v45 = vld [vmem:[%s19496_s0 + $0x60] sm:$0xff] }
 0x88a   :  { %12501 = vmatpush3.bf16.msra.mxu1 %v20445_v59  ;;  %11743 = vmatprep.mubr.msk.f32.mxu1 %vm597_vm1, %v10825_v33  ;;  %v8906_v59 = vld [vmem:[%s19496_s0 + $0x78] sm:$0xff]  ;;  %v8905_v33 = vld [vmem:[%s19496_s0 + $0x70] sm:$0xff] }
 0x88b   :  { %11771 = vmatprep.subr.mxu1 %v8608_v24 }
 0x88d   :  { %11744 = vmatmul.mubr.msk.f32.gmra.mrb[8].mxu1 %vm597_vm1, %v10826_v58  ;;  %v8907_v58 = vld [vmem:[%s19496_s0 + $0x80] sm:$0xff] }
 0x88e   :  { %11772 = vmatpush3.msra.mxu1 %v8608_v24  ;;  %11746 = vmatprep.mubr.msk.f32.mxu1 %vm597_vm1, %v10827_v38  ;;  %v8908_v24 = vld [vmem:[%s19496_s0 + $0x88] sm:$0xff]  ;;  %v8910_v38 = vld [vmem:[%s19496_s0 + $0x98] sm:$0xff] }
 0x88f   :  { %12502 = vmatprep.subr.bf16.mxu1 %v20284_v17 }
 0x891   :  { %11747 = vmatmul.mubr.msk.f32.gmra.mrb[10].mxu1 %vm597_vm1, %v10828_v55  ;;  %v8909_v55 = vld [vmem:[%s19496_s0 + $0x90] sm:$0xff] }
 0x892   :  { %11749 = vmatprep.mubr.msk.f32.mxu1 %vm597_vm1, %v10829_v52  ;;  %v8912_v52 = vld [vmem:[%s19496_s0 + $0xa8] sm:$0xff] }
 0x895   :  { %11750 = vmatmul.mubr.msk.f32.gmra.mrb[12].mxu1 %vm597_vm1, %v10830_v13  ;;  %v8911_v13 = vld [vmem:[%s19496_s0 + $0xa0] sm:$0xff] }
 0x896   :  { %11752 = vmatprep.mubr.msk.f32.mxu1 %vm597_vm1, %v10831_v41  ;;  %v8914_v41 = vld [vmem:[%s19496_s0 + $0xb8] sm:$0xff] }
 0x899   :  { %11753 = vmatmul.mubr.msk.f32.gmra.mrb[14].mxu1 %vm597_vm1, %v10832_v30  ;;  %v8913_v30 = vld [vmem:[%s19496_s0 + $0xb0] sm:$0xff] }
 0x89a   :  { %11773 = vmatprep.mubr.msk.f32.mxu1 %vm597_vm1, %v10885_v53  ;;  %v8916_v53 = vld [vmem:[%s19496_s0 + $0xc8] sm:$0xff] }
 0x89d   :  { %11774 = vmatmul.mubr.msk.f32.vlgmr.msra.gmra.mrb[0].mxu1 %vm597_vm1, %v10886_v47  ;;  %v8915_v47 = vld [vmem:[%s19496_s0 + $0xc0] sm:$0xff] }
 0x89e   :  { %12504 = vmatpush1.bf16.msra.mxu1 %v18646_v49  ;;  %11776 = vmatprep.mubr.msk.f32.mxu1 %vm597_vm1, %v10887_v3  ;;  %v10890_v49 = vld [vmem:[%s19500_s3 + $0x528] sm:$0xff]  ;;  %v8918_v3 = vld [vmem:[%s19496_s0 + $0xd8] sm:$0xff] }
 0x89f   :  { %12505 = vmatprep.subr.bf16.mxu1 %v20284_v17 }
 0x8a1   :  { %11777 = vmatmul.mubr.msk.f32.gmra.mrb[2].mxu1 %vm597_vm1, %v10888_v32  ;;  %v8917_v32 = vld [vmem:[%s19496_s0 + $0xd0] sm:$0xff] }
 0x8a2   :  { %12507 = vmatpush1.bf16.msra.mxu1 %v18658_v10  ;;  %11779 = vmatprep.mubr.msk.f32.mxu1 %vm597_vm1, %v10889_v44  ;;  %v10892_v10 = vld [vmem:[%s19500_s3 + $0x538] sm:$0xff]  ;;  %v8920_v44 = vld [vmem:[%s19496_s0 + $0xe8] sm:$0xff] }
 0x8a3   :  { %12508 = vmatprep.subr.bf16.mxu1 %v20284_v17 }
 0x8a5   :  { %11780 = vmatmul.mubr.msk.f32.gmra.mrb[4].mxu1 %vm597_vm1, %v10890_v49  ;;  %v8919_v49 = vld [vmem:[%s19496_s0 + $0xe0] sm:$0xff] }
 0x8a6   :  { %12510 = vmatpush1.bf16.msra.mxu1 %v18668_v19  ;;  %11782 = vmatprep.mubr.msk.f32.mxu1 %vm597_vm1, %v10891_v46  ;;  %v10893_v19 = vld [vmem:[%s19500_s3 + $0x540] sm:$0xff]  ;;  %v8922_v46 = vld [vmem:[%s19496_s0 + $0xf8] sm:$0xff] }
 0x8a7   :  { %12511 = vmatprep.subr.bf16.mxu1 %v20284_v17 }
 0x8a9   :  { %11783 = vmatmul.mubr.msk.f32.gmra.mrb[6].mxu1 %vm597_vm1, %v10892_v10  ;;  %v8921_v10 = vld [vmem:[%s19496_s0 + $0xf0] sm:$0xff] }
 0x8aa   :  { %12513 = vmatpush1.bf16.msra.mxu1 %v18678_v21  ;;  %11785 = vmatprep.mubr.msk.f32.mxu1 %vm597_vm1, %v10893_v19  ;;  %v10895_v21 = vld [vmem:[%s19500_s3 + $0x550] sm:$0xff]  ;;  %v8926_v19 = vld [vmem:[%s19496_s0 + $0x118] sm:$0xff] }
 0x8ab   :  { %12514 = vmatprep.subr.bf16.mxu1 %v20284_v17 }
 0x8ad   :  { %11786 = vmatmul.mubr.msk.f32.gmra.mrb[8].mxu1 %vm597_vm1, %v10894_v57  ;;  %v8928_v57 = vld [vmem:[%s19496_s0 + $0x128] sm:$0xff] }
 0x8ae   :  { %12516 = vmatpush1.bf16.msra.mxu1 %v12515_v18  ;;  %11788 = vmatprep.mubr.msk.f32.mxu1 %vm597_vm1, %v10895_v21  ;;  %v8925_v18 = vld [vmem:[%s19496_s0 + $0x110] sm:$0xff] }
 0x8af   :  { %12517 = vmatprep.subr.bf16.mxu1 %v20284_v17  ;;  %v8929_v21 = vld [vmem:[%s19496_s0 + $0x130] sm:$0xff] }
 0x8b1   :  { %11789 = vmatmul.mubr.msk.f32.gmra.mrb[10].mxu1 %vm597_vm1, %v10896_v37  ;;  %v8931_v37 = vld [vmem:[%s19496_s0 + $0x140] sm:$0xff] }
 0x8b2   :  { %12519 = vmatpush1.bf16.msra.mxu1 %v12518_v56  ;;  %11791 = vmatprep.mubr.msk.f32.mxu1 %vm597_vm1, %v10897_v6  ;;  %v8932_v56 = vld [vmem:[%s19496_s0 + $0x148] sm:$0xff] }
 0x8b3   :  { %12520 = vmatprep.subr.bf16.mxu1 %v20284_v17  ;;  %v8936_v6 = vld [vmem:[%s19496_s0 + $0x168] sm:$0xff] }
 0x8b5   :  { %11792 = vmatmul.mubr.msk.f32.gmra.mrb[12].mxu1 %vm597_vm1, %v10898_v42  ;;  %v8938_v42 = vld [vmem:[%s19496_s0 + $0x178] sm:$0xff] }
 0x8b6   :  { %12522 = vmatpush1.bf16.msra.mxu1 %v12521_v8  ;;  %11794 = vmatprep.mubr.msk.f32.mxu1 %vm597_vm1, %v10899_v1  ;;  %v8935_v8 = vld [vmem:[%s19496_s0 + $0x160] sm:$0xff] }
 0x8b7   :  { %12523 = vmatprep.subr.bf16.mxu1 %v20284_v17  ;;  %v8939_v1 = vld [vmem:[%s19496_s0 + $0x180] sm:$0xff] }
 0x8b9   :  { %11795 = vmatmul.mubr.msk.f32.gmra.mrb[14].mxu1 %vm597_vm1, %v10900_v7  ;;  %v8941_v7 = vld [vmem:[%s19496_s0 + $0x190] sm:$0xff] }
 0x8ba   :  { %12525 = vmatpush1.bf16.msra.mxu1 %v12524_v61  ;;  %10917 = vmatprep.mubr.msk.f32.mxu1 %vm128_vm0, %v8892_v39  ;;  %v8942_v61 = vld [vmem:[%s19496_s0 + $0x198] sm:$0xff] }
 0x8bb   :  { %12526 = vmatprep.subr.bf16.mxu1 %v20284_v17  ;;  %v8946_v39 = vld [vmem:[%s19496_s0 + $0x1b8] sm:$0xff] }
 0x8be   :  { %12528 = vmatpush1.bf16.msra.mxu1 %v12527_v27  ;;  %v8945_v27 = vld [vmem:[%s19496_s0 + $0x1b0] sm:$0xff] }
 0x8bf   :  { %12529 = vmatprep.subr.bf16.mxu1 %v20284_v17 }
 0x8c2   :  { %12531 = vmatpush1.bf16.msra.mxu1 %v12530_v11  ;;  %v8950_v11 = vld [vmem:[%s19496_s0 + $0x1d8] sm:$0xff] }
 0x8c3   :  { %12532 = vmatprep.subr.bf16.mxu1 %v20284_v17 }
 0x8c6   :  { %12534 = vmatpush1.bf16.msra.mxu1 %v12533_v36  ;;  %v8951_v36 = vld [vmem:[%s19496_s0 + $0x1e0] sm:$0xff] }
 0x8c7   :  { %12535 = vmatprep.subr.bf16.mxu1 %v20284_v17  ;;  %v8896_v17 = vld [vmem:[%s19496_s0 + $0x28] sm:$0xff] }
 0x8ca   :  { %12537 = vmatpush1.bf16.msra.mxu1 %v12536_v63  ;;  %v8956_v63 = vld [vmem:[%s19496_s0 + $0x208] sm:$0xff] }
 0x8cd   :  { %9136 = vmatmul.mubr.f32.vlgmr.msra.gmra.mrb[38].mxu1 %v8891_v23  ;;  %v8955_v23 = vld [vmem:[%s19496_s0 + $0x200] sm:$0xff] }
 0x8ce   :  { %10918 = vmatprep.mubr.msk.f32.mxu1 %vm128_vm0, %v8894_v20  ;;  %v8958_v20 = vld [vmem:[%s19496_s0 + $0x218] sm:$0xff] }
 0x8d1   :  { %9141 = vmatmul.mubr.f32.gmra.mrb[40].mxu1 %v8893_v5  ;;  %v8957_v5 = vld [vmem:[%s19496_s0 + $0x210] sm:$0xff] }
 0x8d2   :  { %10919 = vmatprep.mubr.msk.f32.mxu1 %vm128_vm0, %v8896_v17  ;;  %v8960_v17 = vld [vmem:[%s19496_s0 + $0x228] sm:$0xff] }
 0x8d5   :  { %9146 = vmatmul.mubr.f32.gmra.mrb[42].mxu1 %v8895_v50  ;;  %v8959_v50 = vld [vmem:[%s19496_s0 + $0x220] sm:$0xff] }
 0x8d6   :  { %10920 = vmatprep.mubr.msk.f32.mxu1 %vm128_vm0, %v8898_v2  ;;  %v8962_v2 = vld [vmem:[%s19496_s0 + $0x238] sm:$0xff] }
 0x8d9   :  { %9151 = vmatmul.mubr.f32.gmra.mrb[44].mxu1 %v8897_v62  ;;  %v8961_v62 = vld [vmem:[%s19496_s0 + $0x230] sm:$0xff] }
 0x8da   :  { %10921 = vmatprep.mubr.msk.f32.mxu1 %vm128_vm0, %v8900_v12 }
 0x8dd   :  { %9156 = vmatmul.mubr.f32.gmra.mrb[46].mxu1 %v8899_v15 }
 0x8de   :  { %10922 = vmatprep.mubr.msk.f32.mxu1 %vm128_vm0, %v8902_v60 }
 0x8e1   :  { %9161 = vmatmul.mubr.f32.gmra.mrb[48].mxu1 %v8901_v48 }
 0x8e2   :  { %10923 = vmatprep.mubr.msk.f32.mxu1 %vm128_vm0, %v8904_v51 }
 0x8e5   :  { %9166 = vmatmul.mubr.f32.gmra.mrb[50].mxu1 %v8903_v45 }
 0x8e6   :  { %10924 = vmatprep.mubr.msk.f32.mxu1 %vm128_vm0, %v8906_v59 }
 0x8e9   :  { %9171 = vmatmul.mubr.f32.gmra.mrb[52].mxu1 %v8905_v33 }
 0x8ea   :  { %10925 = vmatprep.mubr.msk.f32.mxu1 %vm128_vm0, %v8908_v24 }
 0x8ed   :  { %9176 = vmatmul.mubr.f32.gmra.mrb[54].mxu1 %v8907_v58 }
 0x8ee   :  { %10926 = vmatprep.mubr.msk.f32.mxu1 %vm128_vm0, %v8910_v38 }
 0x8f1   :  { %9181 = vmatmul.mubr.f32.gmra.mrb[56].mxu1 %v8909_v55 }
 0x8f2   :  { %10927 = vmatprep.mubr.msk.f32.mxu1 %vm128_vm0, %v8912_v52  ;;  %v10953_v52 = vld [vmem:[%s19500_s3 + $0x580] sm:$0xff] }
 0x8f5   :  { %9186 = vmatmul.mubr.f32.gmra.mrb[58].mxu1 %v8911_v13 }
 0x8f6   :  { %10928 = vmatprep.mubr.msk.f32.mxu1 %vm128_vm0, %v8914_v41 }
 0x8f9   :  { %9191 = vmatmul.mubr.f32.gmra.mrb[60].mxu1 %v8913_v30 }
 0x8fa   :  { %10929 = vmatprep.mubr.msk.f32.mxu1 %vm128_vm0, %v8916_v53 }
 0x8fd   :  { %9196 = vmatmul.mubr.f32.gmra.mrb[62].mxu1 %v8915_v47 }
 0x8fe   :  { %10930 = vmatprep.mubr.msk.f32.mxu1 %vm128_vm0, %v8918_v3 }
 0x901   :  { %9201 = vmatmul.mubr.f32.gmra.mrb[64].mxu1 %v8917_v32 }
 0x902   :  { %10931 = vmatprep.mubr.msk.f32.mxu1 %vm128_vm0, %v8920_v44 }
 0x905   :  { %9206 = vmatmul.mubr.f32.gmra.mrb[66].mxu1 %v8919_v49 }
 0x906   :  { %10932 = vmatprep.mubr.msk.f32.mxu1 %vm128_vm0, %v8922_v46 }
 0x909   :  { %9211 = vmatmul.mubr.f32.gmra.mrb[68].mxu1 %v8921_v10 }
 0x90a   :  { %10933 = vmatprep.mubr.msk.f32.mxu1 %vm128_vm0, %v8924_v4 }
 0x90d   :  { %9216 = vmatmul.mubr.f32.gmra.mrb[70].mxu1 %v8923_v22 }
 0x90e   :  { %10934 = vmatprep.mubr.msk.f32.mxu1 %vm128_vm0, %v8926_v19 }
 0x911   :  { %9221 = vmatmul.mubr.f32.gmra.mrb[72].mxu1 %v8925_v18 }
 0x912   :  { %10935 = vmatprep.mubr.msk.f32.mxu1 %vm128_vm0, %v8928_v57 }
 0x915   :  { %9226 = vmatmul.mubr.f32.gmra.mrb[74].mxu1 %v8927_v54 }
 0x916   :  { %10936 = vmatprep.mubr.msk.f32.mxu1 %vm128_vm0, %v8930_v28 }
 0x919   :  { %9231 = vmatmul.mubr.f32.gmra.mrb[76].mxu1 %v8929_v21 }
 0x91a   :  { %10937 = vmatprep.mubr.msk.f32.mxu1 %vm128_vm0, %v8932_v56 }
 0x91d   :  { %9236 = vmatmul.mubr.f32.gmra.mrb[78].mxu1 %v8931_v37 }
 0x91e   :  { %10938 = vmatprep.mubr.msk.f32.mxu1 %vm128_vm0, %v8934_v16 }
 0x921   :  { %9241 = vmatmul.mubr.f32.gmra.mrb[80].mxu1 %v8933_v9 }
 0x922   :  { %10939 = vmatprep.mubr.msk.f32.mxu1 %vm128_vm0, %v8936_v6 }
 0x925   :  { %9246 = vmatmul.mubr.f32.gmra.mrb[82].mxu1 %v8935_v8 }
 0x926   :  { %10940 = vmatprep.mubr.msk.f32.mxu1 %vm128_vm0, %v8938_v42 }
 0x929   :  { %9251 = vmatmul.mubr.f32.gmra.mrb[84].mxu1 %v8937_v14 }
 0x92a   :  { %10941 = vmatprep.mubr.msk.f32.mxu1 %vm128_vm0, %v8940_v31 }
 0x92d   :  { %9256 = vmatmul.mubr.f32.gmra.mrb[86].mxu1 %v8939_v1 }
 0x92e   :  { %10942 = vmatprep.mubr.msk.f32.mxu1 %vm128_vm0, %v8942_v61 }
 0x931   :  { %9261 = vmatmul.mubr.f32.gmra.mrb[88].mxu1 %v8941_v7 }
 0x932   :  { %10943 = vmatprep.mubr.msk.f32.mxu1 %vm128_vm0, %v8944_v40 }
 0x935   :  { %9266 = vmatmul.mubr.f32.gmra.mrb[90].mxu1 %v8943_v0 }
 0x936   :  { %10944 = vmatprep.mubr.msk.f32.mxu1 %vm128_vm0, %v8946_v39 }
 0x939   :  { %9271 = vmatmul.mubr.f32.gmra.mrb[92].mxu1 %v8945_v27 }
 0x93a   :  { %10945 = vmatprep.mubr.msk.f32.mxu1 %vm128_vm0, %v8948_v29 }
 0x93d   :  { %9276 = vmatmul.mubr.f32.gmra.mrb[94].mxu1 %v8947_v43 }
 0x93e   :  { %10946 = vmatprep.mubr.msk.f32.mxu1 %vm128_vm0, %v8950_v11 }
 0x941   :  { %9281 = vmatmul.mubr.f32.gmra.mrb[96].mxu1 %v8949_v26 }
 0x942   :  { %10947 = vmatprep.mubr.msk.f32.mxu1 %vm128_vm0, %v8952_v34 }
 0x945   :  { %9286 = vmatmul.mubr.f32.gmra.mrb[98].mxu1 %v8951_v36 }
 0x946   :  { %10948 = vmatprep.mubr.msk.f32.mxu1 %vm128_vm0, %v8954_v35 }
 0x949   :  { %9291 = vmatmul.mubr.f32.gmra.mrb[100].mxu1 %v8953_v25 }
 0x94a   :  { %10949 = vmatprep.mubr.msk.f32.mxu1 %vm128_vm0, %v8956_v63 }
 0x94d   :  { %9296 = vmatmul.mubr.f32.gmra.mrb[102].mxu1 %v8955_v23 }
 0x94e   :  { %10950 = vmatprep.mubr.msk.f32.mxu1 %vm128_vm0, %v8958_v20 }
 0x951   :  { %9301 = vmatmul.mubr.f32.gmra.mrb[104].mxu1 %v8957_v5 }
 0x952   :  { %10951 = vmatprep.mubr.msk.f32.mxu1 %vm128_vm0, %v8960_v17 }
 0x955   :  { %9306 = vmatmul.mubr.f32.gmra.mrb[106].mxu1 %v8959_v50 }
 0x956   :  { %10952 = vmatprep.mubr.msk.f32.mxu1 %vm128_vm0, %v8962_v2 }
 0x959   :  { %9311 = vmatmul.mubr.f32.gmra.mrb[108].mxu1 %v8961_v62 }
 0x95a   :  { %11815 = vmatprep.mubr.msk.f32.mxu1 %vm597_vm1, %v10953_v52  ;;  %v9360_v52 = vpop.permute.xlu0 %9359 }
 0x9a0   :  { %v19307_v12 = vpop.f32.mrb[38].mxu1 }
 0x9a1   :  { %v9139_v15 = vpop.f32.mrb[39].mxu1 }
 0x9a4   :  { %v19309_v60 = vpop.f32.mrb[40].mxu1 }
 0x9a5   :  { %v9144_v48 = vpop.f32.mrb[41].mxu1 }
 0x9a8   :  { %v19311_v51 = vpop.f32.mrb[42].mxu1 }
 0x9a9   :  { %v9149_v45 = vpop.f32.mrb[43].mxu1 }
 0x9ac   :  { %v19313_v59 = vpop.f32.mrb[44].mxu1 }
 0x9ad   :  { %v9154_v33 = vpop.f32.mrb[45].mxu1 }
 0x9ae   :  { %v9355_v33 = vpop.permute.xlu1 %9354 }
 0x9b0   :  { %v19315_v24 = vpop.f32.mrb[46].mxu1 }
 0x9b1   :  { %v9159_v58 = vpop.f32.mrb[47].mxu1 }
 0x9b4   :  { %v19317_v38 = vpop.f32.mrb[48].mxu1 }
 0x9b5   :  { %v9164_v55 = vpop.f32.mrb[49].mxu1 }
 0x9b8   :  { %v19322_v13 = vpop.f32.mrb[50].mxu1 }
 0x9b9   :  { %v9169_v41 = vpop.f32.mrb[51].mxu1 }
 0x9bc   :  { %v19325_v30 = vpop.f32.mrb[52].mxu1 }
 0x9bd   :  { %v9174_v53 = vpop.f32.mrb[53].mxu1 }
 0x9c0   :  { %v19327_v47 = vpop.f32.mrb[54].mxu1 }
 0x9c1   :  { %v9179_v3 = vpop.f32.mrb[55].mxu1 }
 0x9c4   :  { %v9182_v32 = vpop.f32.mrb[56].mxu1 }
 0x9c5   :  { %v9316_v44 = vmax.f32 %v19307_v12, %v9182_v32  ;;  %v9184_v49 = vpop.f32.mrb[57].mxu1 }
 0x9c8   :  { %v9187_v46 = vpop.f32.mrb[58].mxu1 }
 0x9c9   :  { %v9317_v10 = vmax.f32 %v19309_v60, %v9187_v46  ;;  %v9189_v4 = vpop.f32.mrb[59].mxu1 }
 0x9cc   :  { %v9192_v22 = vpop.f32.mrb[60].mxu1 }
 0x9cd   :  { %v9318_v19 = vmax.f32 %v19311_v51, %v9192_v22  ;;  %v9194_v18 = vpop.f32.mrb[61].mxu1 }
 0x9d0   :  { %v9197_v57 = vpop.f32.mrb[62].mxu1 }
 0x9d1   :  { %v9319_v54 = vmax.f32 %v19313_v59, %v9197_v57  ;;  %v9199_v28 = vpop.f32.mrb[63].mxu1 }
 0x9d4   :  { %v19333_v21 = vpop.f32.mrb[64].mxu1 }
 0x9d5   :  { %v9320_v56 = vmax.f32 %v19315_v24, %v19333_v21  ;;  %v9204_v37 = vpop.f32.mrb[65].mxu1 }
 0x9d6   :  { %v9365_v37 = vpop.permute.xlu1 %9364 }
 0x9d8   :  { %v19337_v16 = vpop.f32.mrb[66].mxu1 }
 0x9d9   :  { %v9321_v9 = vmax.f32 %v19317_v38, %v19337_v16  ;;  %v9209_v6 = vpop.f32.mrb[67].mxu1 }
 0x9dc   :  { %v19341_v8 = vpop.f32.mrb[68].mxu1 }
 0x9dd   :  { %v9322_v42 = vmax.f32 %v19322_v13, %v19341_v8  ;;  %v9214_v14 = vpop.f32.mrb[69].mxu1 }
 0x9de   :  { %v9370_v14 = vpop.permute.xlu0 %9369 }
 0x9e0   :  { %v19345_v31 = vpop.f32.mrb[70].mxu1 }
 0x9e1   :  { %v9323_v1 = vmax.f32 %v19325_v30, %v19345_v31  ;;  %v9219_v61 = vpop.f32.mrb[71].mxu1  ;;  %v10954_v31 = vld [vmem:[%s19500_s3 + $0x588] sm:$0xff] }
 0x9e4   :  { %v19349_v7 = vpop.f32.mrb[72].mxu1 }
 0x9e5   :  { %v9324_v40 = vmax.f32 %v19327_v47, %v19349_v7  ;;  %v9224_v0 = vpop.f32.mrb[73].mxu1  ;;  %v10956_v47 = vld [vmem:[%s19500_s3 + $0x598] sm:$0xff]  ;;  %v10957_v7 = vld [vmem:[%s19500_s3 + $0x5a0] sm:$0xff] }
 0x9e8   :  { %v9227_v39 = vpop.f32.mrb[74].mxu1 }
 0x9e9   :  { %v9229_v27 = vpop.f32.mrb[75].mxu1 }
 0x9ec   :  { %v9232_v29 = vpop.f32.mrb[76].mxu1 }
 0x9ed   :  { %v9234_v43 = vpop.f32.mrb[77].mxu1 }
 0x9f0   :  { %v9237_v11 = vpop.f32.mrb[78].mxu1 }
 0x9f1   :  { %v9239_v26 = vpop.f32.mrb[79].mxu1 }
 0x9f4   :  { %v9242_v34 = vpop.f32.mrb[80].mxu1 }
 0x9f5   :  { %v9244_v36 = vpop.f32.mrb[81].mxu1 }
 0x9f6   :  { %v9375_v36 = vpop.permute.xlu1 %9374 }
 0x9f8   :  { %v9247_v35 = vpop.f32.mrb[82].mxu1 }
 0x9f9   :  { %v9249_v25 = vpop.f32.mrb[83].mxu1 }
 0x9fa   :  { %v9385_v38 = vpop.permute.xlu1 %9384 }
 0x9fc   :  { %v9252_v63 = vpop.f32.mrb[84].mxu1 }
 0x9fd   :  { %v9254_v23 = vpop.f32.mrb[85].mxu1 }
 0x9fe   :  { %v9380_v23 = vpop.permute.xlu0 %9379 }
 0xa00   :  { %v9257_v20 = vpop.f32.mrb[86].mxu1 }
 0xa01   :  { %v9259_v5 = vpop.f32.mrb[87].mxu1 }
 0xa04   :  { %v19353_v17 = vpop.f32.mrb[88].mxu1 }
 0xa05   :  { %v9264_v50 = vpop.f32.mrb[89].mxu1 }
 0xa08   :  { %v19355_v2 = vpop.f32.mrb[90].mxu1 }
 0xa09   :  { %v9269_v62 = vpop.f32.mrb[91].mxu1 }
 0xa0c   :  { %v9272_v12 = vpop.f32.mrb[92].mxu1 }
 0xa0d   :  { %v9325_v15 = vmax.f32 %v9227_v39, %v9272_v12  ;;  %v9274_v60 = vpop.f32.mrb[93].mxu1 }
 0xa0f   :  { %v9334_v48 = vmax.f32 %v9316_v44, %v9325_v15 }
 0xa10   :  { %v9277_v51 = vpop.f32.mrb[94].mxu1 }
 0xa11   :  { %v9326_v45 = vmax.f32 %v9232_v29, %v9277_v51  ;;  %v9279_v59 = vpop.f32.mrb[95].mxu1  ;;  %v9397_v58 = vadd.f32 %v9355_v33, %v9334_v48 }
 0xa12   :  { %v9395_v59 = vpop.permute.xlu1 %9394 }
 0xa13   :  { %v9335_v55 = vmax.f32 %v9317_v10, %v9326_v45  ;;  %v9406_v49 = vmax.f32 %v9397_v58, 0.0 }
 0xa14   :  { %v9282_v41 = vpop.f32.mrb[96].mxu1 }
 0xa15   :  { %v9398_v53 = vadd.f32 %v9360_v52, %v9335_v55  ;;  %v9327_v3 = vmax.f32 %v9237_v11, %v9282_v41  ;;  %v9284_v32 = vpop.f32.mrb[97].mxu1  ;;  %v10960_v55 = vld [vmem:[%s19500_s3 + $0x5b8] sm:$0xff]  ;;  %v10961_v52 = vld [vmem:[%s19500_s3 + $0x5c0] sm:$0xff]  ;;  %v10962_v41 = vld [vmem:[%s19500_s3 + $0x5c8] sm:$0xff] }
 0xa16   :  { %v10965_v32 = vld [vmem:[%s19500_s3 + $0x5e0] sm:$0xff] }
 0xa17   :  { %v9407_v46 = vmax.f32 %v9398_v53, 0.0  ;;  %v9336_v4 = vmax.f32 %v9318_v19, %v9327_v3  ;;  %v10963_v53 = vld [vmem:[%s19500_s3 + $0x5d0] sm:$0xff]  ;;  %v10964_v3 = vld [vmem:[%s19500_s3 + $0x5d8] sm:$0xff] }
 0xa18   :  { %v9287_v22 = vpop.f32.mrb[98].mxu1 }
 0xa19   :  { %v9328_v18 = vmax.f32 %v9242_v34, %v9287_v22  ;;  %v9289_v57 = vpop.f32.mrb[99].mxu1  ;;  %v12538_v28 = vpack.c.bf16 %v9407_v46, %v9406_v49  ;;  %v9399_v44 = vadd.f32 %v9365_v37, %v9336_v4  ;;  %v10966_v49 = vld [vmem:[%s19500_s3 + $0x5e8] sm:$0xff]  ;;  %v10967_v46 = vld [vmem:[%s19500_s3 + $0x5f0] sm:$0xff]  ;;  %v10968_v4 = vld [vmem:[%s19500_s3 + $0x5f8] sm:$0xff] }
 0xa1a   :  { %v9817_v22 = vld [vmem:[%s19501_s5] sm:$0xff] }
 0xa1b   :  { %v9337_v6 = vmax.f32 %v9319_v54, %v9328_v18  ;;  %12539 = vmatprep.subr.bf16.mxu1 %v12538_v28  ;;  %v9408_v27 = vmax.f32 %v9399_v44, 0.0  ;;  %11871 = vmatprep.mubr.f32.mxu0 %v9817_v22  ;;  %v9713_v18 = vpop.permute.xlu1 %9712 }
 0xa1c   :  { %v9292_v61 = vpop.f32.mrb[100].mxu1  ;;  %12541 = vmatpush3.bf16.msra.mxu1 %v12538_v28 }
 0xa1d   :  { %v9400_v10 = vadd.f32 %v9370_v14, %v9337_v6  ;;  %v9329_v0 = vmax.f32 %v9247_v35, %v9292_v61  ;;  %v9294_v39 = vpop.f32.mrb[101].mxu1 }
 0xa1f   :  { %v9409_v29 = vmax.f32 %v9400_v10, 0.0  ;;  %v9338_v19 = vmax.f32 %v9320_v56, %v9329_v0  ;;  %v9723_v28 = vpop.permute.xlu1 %9722 }
 0xa20   :  { %v9297_v43 = vpop.f32.mrb[102].mxu1 }
 0xa21   :  { %v9330_v11 = vmax.f32 %v9252_v63, %v9297_v43  ;;  %v9299_v26 = vpop.f32.mrb[103].mxu1  ;;  %v12542_v34 = vpack.c.bf16 %v9409_v29, %v9408_v27  ;;  %v9401_v25 = vadd.f32 %v9375_v36, %v9338_v19 }
 0xa23   :  { %v9339_v54 = vmax.f32 %v9321_v9, %v9330_v11  ;;  %12543 = vmatprep.subr.bf16.mxu1 %v12542_v34  ;;  %v9410_v12 = vmax.f32 %v9401_v25, 0.0  ;;  %v9733_v44 = vpop.permute.xlu1 %9732 }
 0xa24   :  { %v9302_v35 = vpop.f32.mrb[104].mxu1  ;;  %12545 = vmatpush3.bf16.msra.mxu1 %v12542_v34 }
 0xa25   :  { %v9402_v5 = vadd.f32 %v9380_v23, %v9339_v54  ;;  %v9331_v50 = vmax.f32 %v9257_v20, %v9302_v35  ;;  %v9304_v62 = vpop.f32.mrb[105].mxu1  ;;  %v9390_v20 = vpop.permute.xlu0 %9389 }
 0xa27   :  { %v9411_v24 = vmax.f32 %v9402_v5, 0.0  ;;  %v9340_v21 = vmax.f32 %v9322_v42, %v9331_v50  ;;  %v9743_v27 = vpop.permute.xlu1 %9742 }
 0xa28   :  { %v9307_v56 = vpop.f32.mrb[106].mxu1 }
 0xa29   :  { %v9332_v63 = vmax.f32 %v19353_v17, %v9307_v56  ;;  %v9309_v15 = vpop.f32.mrb[107].mxu1  ;;  %v12546_v60 = vpack.c.bf16 %v9411_v24, %v9410_v12  ;;  %v9403_v16 = vadd.f32 %v9385_v38, %v9340_v21  ;;  %v9708_v57 = vpop.permute.xlu0 %9707 }
 0xa2b   :  { %v9341_v9 = vmax.f32 %v9323_v1, %v9332_v63  ;;  %12547 = vmatprep.subr.bf16.mxu1 %v12546_v60  ;;  %v9412_v8 = vmax.f32 %v9403_v16, 0.0  ;;  %v10955_v1 = vld [vmem:[%s19500_s3 + $0x590] sm:$0xff]  ;;  %v9753_v50 = vpop.permute.xlu1 %9752 }
 0xa2c   :  { %v9312_v48 = vpop.f32.mrb[108].mxu1  ;;  %12549 = vmatpush3.bf16.msra.mxu1 %v12546_v60 }
 0xa2d   :  { %v9404_v51 = vadd.f32 %v9390_v20, %v9341_v9  ;;  %v9333_v45 = vmax.f32 %v19355_v2, %v9312_v48  ;;  %v9314_v13 = vpop.f32.mrb[109].mxu1  ;;  %v10959_v2 = vld [vmem:[%s19500_s3 + $0x5b0] sm:$0xff]  ;;  %v9718_v37 = vpop.permute.xlu0 %9717 }
 0xa2f   :  { %v9413_v42 = vmax.f32 %v9404_v51, 0.0  ;;  %v9342_v17 = vmax.f32 %v9324_v40, %v9333_v45  ;;  %v10958_v40 = vld [vmem:[%s19500_s3 + $0x5a8] sm:$0xff]  ;;  %v9763_v20 = vpop.permute.xlu1 %9762 }
 0xa31   :  { %v12550_v33 = vpack.c.bf16 %v9413_v42, %v9412_v8  ;;  %v9405_v58 = vadd.f32 %v9395_v59, %v9342_v17  ;;  %v9728_v6 = vpop.permute.xlu0 %9727 }
 0xa33   :  { %12551 = vmatprep.subr.bf16.mxu1 %v12550_v33  ;;  %v9414_v30 = vmax.f32 %v9405_v58, 0.0 }
 0xa34   :  { %12553 = vmatpush3.bf16.msra.mxu1 %v12550_v33 }
 0xa35   :  { %11813 = vmatprep.subr.mxu1 %v9414_v30  ;;  %v9738_v43 = vpop.permute.xlu0 %9737 }
 0xa38   :  { %11814 = vmatpush3.msra.mxu1 %v9414_v30 }
 0xa39   :  { %11816 = vmatmul.mubr.msk.f32.vlgmr.msra.gmra.mrb[0].mxu1 %vm597_vm1, %v10954_v31  ;;  %v9748_v24 = vpop.permute.xlu0 %9747 }
 0xa3a   :  { %11818 = vmatprep.mubr.msk.f32.mxu1 %vm597_vm1, %v10955_v1  ;;  %v9773_v1 = vpop.permute.xlu1 %9772 }
 0xa3d   :  { %11819 = vmatmul.mubr.msk.f32.gmra.mrb[2].mxu1 %vm597_vm1, %v10956_v47  ;;  %v9758_v45 = vpop.permute.xlu0 %9757 }
 0xa3e   :  { %11821 = vmatprep.mubr.msk.f32.mxu1 %vm597_vm1, %v10957_v7 }
 0xa41   :  { %11822 = vmatmul.mubr.msk.f32.gmra.mrb[4].mxu1 %vm597_vm1, %v10958_v40  ;;  %v9768_v40 = vpop.permute.xlu0 %9767 }
 0xa42   :  { %11824 = vmatprep.mubr.msk.f32.mxu1 %vm597_vm1, %v10959_v2 }
 0xa45   :  { %11825 = vmatmul.mubr.msk.f32.gmra.mrb[6].mxu1 %vm597_vm1, %v10960_v55 }
 0xa46   :  { %11827 = vmatprep.mubr.msk.f32.mxu1 %vm597_vm1, %v10961_v52 }
 0xa49   :  { %11828 = vmatmul.mubr.msk.f32.gmra.mrb[8].mxu1 %vm597_vm1, %v10962_v41 }
 0xa4a   :  { %11830 = vmatprep.mubr.msk.f32.mxu1 %vm597_vm1, %v10963_v53 }
 0xa4d   :  { %11831 = vmatmul.mubr.msk.f32.gmra.mrb[10].mxu1 %vm597_vm1, %v10964_v3 }
 0xa4e   :  { %11833 = vmatprep.mubr.msk.f32.mxu1 %vm597_vm1, %v10965_v32 }
 0xa51   :  { %11834 = vmatmul.mubr.msk.f32.gmra.mrb[12].mxu1 %vm597_vm1, %v10966_v49 }
 0xa52   :  { %11836 = vmatprep.mubr.msk.f32.mxu1 %vm597_vm1, %v10967_v46  ;;  %v9783_v46 = vpop.permute.xlu1 %9782 }
 0xa55   :  { %11837 = vmatmul.mubr.msk.f32.gmra.mrb[14].mxu1 %vm597_vm1, %v10968_v4 }
 0xb0c   :  { %v11817_v14 = vpop.f32.mrb[0].mxu1 }
 0xb0d   :  { %v9786_v61 = vadd.f32 %v11817_v14, %v9713_v18  ;;  %v9546_v10 = vpop.f32.mrb[1].mxu1  ;;  %v9778_v18 = vpop.permute.xlu0 %9777 }
 0xb0e   :  { %v9785_v0 = vadd.f32 %v9708_v57, %v9546_v10  ;;  %v9818_v10 = vld [vmem:[%s19501_s5 + $0x8] sm:$0xff] }
 0xb0f   :  { %v9802_v39 = vmax.f32 %v9786_v61, 0.0 }
 0xb10   :  { %v9801_v29 = vmax.f32 %v9785_v0, 0.0  ;;  %v11820_v19 = vpop.f32.mrb[2].mxu1  ;;  %v9819_v0 = vld [vmem:[%s19501_s5 + $0x10] sm:$0xff] }
 0xb11   :  { %v9788_v11 = vadd.f32 %v11820_v19, %v9723_v28  ;;  %v9556_v26 = vpop.f32.mrb[3].mxu1  ;;  %v9823_v19 = vld [vmem:[%s19501_s5 + $0x30] sm:$0xff] }
 0xb12   :  { %v12554_v34 = vpack.c.bf16 %v9802_v39, %v9801_v29  ;;  %v9787_v36 = vadd.f32 %v9718_v37, %v9556_v26  ;;  %v9820_v39 = vld [vmem:[%s19501_s5 + $0x18] sm:$0xff]  ;;  %v9822_v29 = vld [vmem:[%s19501_s5 + $0x28] sm:$0xff] }
 0xb13   :  { %v9804_v25 = vmax.f32 %v9788_v11, 0.0  ;;  %v9825_v11 = vld [vmem:[%s19501_s5 + $0x40] sm:$0xff]  ;;  %v9826_v26 = vld [vmem:[%s19501_s5 + $0x48] sm:$0xff] }
 0xb14   :  { %v9803_v54 = vmax.f32 %v9787_v36, 0.0  ;;  %v11823_v23 = vpop.f32.mrb[4].mxu1  ;;  %12555 = vmatprep.subr.bf16.mxu0 %v12554_v34  ;;  %v9828_v36 = vld [vmem:[%s19501_s5 + $0x58] sm:$0xff] }
 0xb15   :  { %v9790_v35 = vadd.f32 %v11823_v23, %v9733_v44  ;;  %v9566_v5 = vpop.f32.mrb[5].mxu1  ;;  %12557 = vmatpush3.bf16.msra.mxu0 %v12554_v34  ;;  %v9827_v34 = vld [vmem:[%s19501_s5 + $0x50] sm:$0xff] }
 0xb16   :  { %v12558_v62 = vpack.c.bf16 %v9804_v25, %v9803_v54  ;;  %v9789_v12 = vadd.f32 %v9728_v6, %v9566_v5  ;;  %v9829_v25 = vld [vmem:[%s19501_s5 + $0x60] sm:$0xff]  ;;  %v9830_v54 = vld [vmem:[%s19501_s5 + $0x68] sm:$0xff]  ;;  %v9831_v23 = vld [vmem:[%s19501_s5 + $0x70] sm:$0xff] }
 0xb17   :  { %v9806_v21 = vmax.f32 %v9790_v35, 0.0  ;;  %v9832_v35 = vld [vmem:[%s19501_s5 + $0x78] sm:$0xff]  ;;  %v10090_v5 = vld [vmem:[%s19502_s7] sm:$0xff] }
 0xb18   :  { %v9805_v56 = vmax.f32 %v9789_v12, 0.0  ;;  %v11826_v63 = vpop.f32.mrb[6].mxu1  ;;  %12559 = vmatprep.subr.bf16.mxu0 %v12558_v62 }
 0xb19   :  { %v9792_v15 = vadd.f32 %v11826_v63, %v9743_v27  ;;  %v9576_v60 = vpop.f32.mrb[7].mxu1  ;;  %12561 = vmatpush3.bf16.msra.mxu0 %v12558_v62  ;;  %v9821_v27 = vld [vmem:[%s19501_s5 + $0x20] sm:$0xff]  ;;  %v9852_v62 = vpop.permute.xlu0 %9851 }
 0xb1a   :  { %v12562_v38 = vpack.c.bf16 %v9806_v21, %v9805_v56  ;;  %v9791_v16 = vadd.f32 %v9738_v43, %v9576_v60  ;;  %v9824_v43 = vld [vmem:[%s19501_s5 + $0x38] sm:$0xff] }
 0xb1b   :  { %v9808_v9 = vmax.f32 %v9792_v15, 0.0 }
 0xb1c   :  { %v9807_v48 = vmax.f32 %v9791_v16, 0.0  ;;  %v11829_v51 = vpop.f32.mrb[8].mxu1  ;;  %12563 = vmatprep.subr.bf16.mxu0 %v12562_v38 }
 0xb1d   :  { %v9794_v13 = vadd.f32 %v11829_v51, %v9753_v50  ;;  %v9586_v8 = vpop.f32.mrb[9].mxu1  ;;  %12565 = vmatpush3.bf16.msra.mxu0 %v12562_v38  ;;  %v9857_v50 = vpop.permute.xlu1 %9856 }
 0xb1e   :  { %v12566_v42 = vpack.c.bf16 %v9808_v9, %v9807_v48  ;;  %v9793_v17 = vadd.f32 %v9748_v24, %v9586_v8  ;;  %v9862_v24 = vpop.permute.xlu0 %9861 }
 0xb1f   :  { %v9810_v59 = vmax.f32 %v9794_v13, 0.0 }
 0xb20   :  { %v9809_v33 = vmax.f32 %v9793_v17, 0.0  ;;  %v11832_v58 = vpop.f32.mrb[10].mxu1  ;;  %12567 = vmatprep.subr.bf16.mxu0 %v12566_v42 }
 0xb21   :  { %v9796_v30 = vadd.f32 %v11832_v58, %v9763_v20  ;;  %v9596_v31 = vpop.f32.mrb[11].mxu1  ;;  %12569 = vmatpush3.bf16.msra.mxu0 %v12566_v42  ;;  %v9867_v12 = vpop.permute.xlu1 %9866 }
 0xb22   :  { %v12570_v47 = vpack.c.bf16 %v9810_v59, %v9809_v33  ;;  %v9795_v7 = vadd.f32 %v9758_v45, %v9596_v31  ;;  %v9872_v56 = vpop.permute.xlu0 %9871 }
 0xb23   :  { %v9812_v2 = vmax.f32 %v9796_v30, 0.0 }
 0xb24   :  { %v9811_v55 = vmax.f32 %v9795_v7, 0.0  ;;  %v11835_v52 = vpop.f32.mrb[12].mxu1  ;;  %12571 = vmatprep.subr.bf16.mxu0 %v12570_v47 }
 0xb25   :  { %v9798_v41 = vadd.f32 %v11835_v52, %v9773_v1  ;;  %v9606_v53 = vpop.f32.mrb[13].mxu1  ;;  %12573 = vmatpush3.bf16.msra.mxu0 %v12570_v47  ;;  %v9877_v21 = vpop.permute.xlu1 %9876 }
 0xb26   :  { %v12574_v3 = vpack.c.bf16 %v9812_v2, %v9811_v55  ;;  %v9797_v32 = vadd.f32 %v9768_v40, %v9606_v53  ;;  %v9882_v51 = vpop.permute.xlu0 %9881 }
 0xb27   :  { %v9814_v49 = vmax.f32 %v9798_v41, 0.0 }
 0xb28   :  { %v9813_v4 = vmax.f32 %v9797_v32, 0.0  ;;  %v11838_v22 = vpop.f32.mrb[14].mxu1  ;;  %12575 = vmatprep.subr.bf16.mxu0 %v12574_v3 }
 0xb29   :  { %v9800_v57 = vadd.f32 %v11838_v22, %v9783_v46  ;;  %v9616_v28 = vpop.f32.mrb[15].mxu1  ;;  %12577 = vmatpush3.bf16.msra.mxu0 %v12574_v3  ;;  %v9887_v9 = vpop.permute.xlu1 %9886 }
 0xb2a   :  { %v12578_v37 = vpack.c.bf16 %v9814_v49, %v9813_v4  ;;  %v9799_v44 = vadd.f32 %v9778_v18, %v9616_v28  ;;  %v9892_v7 = vpop.permute.xlu0 %9891 }
 0xb2b   :  { %v9816_v6 = vmax.f32 %v9800_v57, 0.0 }
 0xb2c   :  { %v9815_v14 = vmax.f32 %v9799_v44, 0.0  ;;  %12579 = vmatprep.subr.bf16.mxu0 %v12578_v37 }
 0xb2d   :  { %12581 = vmatpush3.bf16.msra.mxu0 %v12578_v37  ;;  %v9897_v31 = vpop.permute.xlu1 %9896 }
 0xb2e   :  { %v12582_v61 = vpack.c.bf16 %v9816_v6, %v9815_v14  ;;  %v9902_v22 = vpop.permute.xlu0 %9901 }
 0xb30   :  { %12583 = vmatprep.subr.bf16.mxu0 %v12582_v61 }
 0xb31   :  { %12585 = vmatpush3.bf16.msra.mxu0 %v12582_v61  ;;  %v9907_v49 = vpop.permute.xlu1 %9906 }
 0xb34   :  { %11872 = vmatmul.mubr.f32.vlgmr.msra.gmra.mrb[18].mxu0 %v9818_v10 }
 0xb35   :  { %11874 = vmatprep.mubr.f32.mxu0 %v9819_v0  ;;  %v9917_v0 = vpop.permute.xlu1 %9916 }
 0xb38   :  { %11875 = vmatmul.mubr.f32.gmra.mrb[20].mxu0 %v9820_v39 }
 0xb39   :  { %11877 = vmatprep.mubr.f32.mxu0 %v9821_v27 }
 0xb3c   :  { %11878 = vmatmul.mubr.f32.gmra.mrb[22].mxu0 %v9822_v29  ;;  %v9912_v29 = vpop.permute.xlu0 %9911 }
 0xb3d   :  { %11880 = vmatprep.mubr.f32.mxu0 %v9823_v19 }
 0xb40   :  { %11881 = vmatmul.mubr.f32.gmra.mrb[24].mxu0 %v9824_v43 }
 0xb41   :  { %11883 = vmatprep.mubr.f32.mxu0 %v9825_v11 }
 0xb44   :  { %11884 = vmatmul.mubr.f32.gmra.mrb[26].mxu0 %v9826_v26 }
 0xb45   :  { %11886 = vmatprep.mubr.f32.mxu0 %v9827_v34 }
 0xb48   :  { %11887 = vmatmul.mubr.f32.gmra.mrb[28].mxu0 %v9828_v36 }
 0xb49   :  { %11889 = vmatprep.mubr.f32.mxu0 %v9829_v25 }
 0xb4c   :  { %11890 = vmatmul.mubr.f32.gmra.mrb[30].mxu0 %v9830_v54 }
 0xb4d   :  { %11892 = vmatprep.mubr.f32.mxu0 %v9831_v23  ;;  %v9927_v23 = vpop.permute.xlu1 %9926 }
 0xb50   :  { %11893 = vmatmul.mubr.f32.gmra.mrb[32].mxu0 %v9832_v35 }
 0xb51   :  { %11927 = vmatprep.mubr.f32.mxu0 %v10090_v5 }
 0xc07   :  { %v11873_v63 = vpop.f32.mrb[18].mxu0 }
 0xc08   :  { %v10001_v15 = vadd.f32 %v11873_v63, %v9857_v50  ;;  %v9995_v60 = vpop.f32.mrb[19].mxu0  ;;  %v9922_v50 = vpop.permute.xlu0 %9921 }
 0xc09   :  { %v9996_v38 = vadd.f32 %v9995_v60, %v9852_v62  ;;  %v10091_v60 = vld [vmem:[%s19502_s7 + $0x8] sm:$0xff] }
 0xc0a   :  { %v10075_v16 = vmax.f32 %v10001_v15, 0.0 }
 0xc0b   :  { %v10074_v20 = vmax.f32 %v9996_v38, 0.0  ;;  %v11876_v48 = vpop.f32.mrb[20].mxu0  ;;  %v10102_v38 = vpop.permute.xlu1 %10101 }
 0xc0c   :  { %v10011_v45 = vadd.f32 %v11876_v48, %v9867_v12  ;;  %v10005_v13 = vpop.f32.mrb[21].mxu0 }
 0xc0d   :  { %v12586_v8 = vpack.c.bf16 %v10075_v16, %v10074_v20  ;;  %v10006_v42 = vadd.f32 %v10005_v13, %v9862_v24 }
 0xc0e   :  { %v10077_v17 = vmax.f32 %v10011_v45, 0.0 }
 0xc0f   :  { %v10076_v59 = vmax.f32 %v10006_v42, 0.0  ;;  %v11879_v33 = vpop.f32.mrb[22].mxu0  ;;  %12587 = vmatprep.subr.bf16.mxu0 %v12586_v8 }
 0xc10   :  { %v10021_v58 = vadd.f32 %v11879_v33, %v9877_v21  ;;  %v10015_v30 = vpop.f32.mrb[23].mxu0  ;;  %12589 = vmatpush3.bf16.msra.mxu0 %v12586_v8 }
 0xc11   :  { %v12590_v1 = vpack.c.bf16 %v10077_v17, %v10076_v59  ;;  %v10016_v47 = vadd.f32 %v10015_v30, %v9872_v56 }
 0xc12   :  { %v10079_v40 = vmax.f32 %v10021_v58, 0.0 }
 0xc13   :  { %v10078_v2 = vmax.f32 %v10016_v47, 0.0  ;;  %v11882_v55 = vpop.f32.mrb[24].mxu0  ;;  %12591 = vmatprep.subr.bf16.mxu0 %v12590_v1 }
 0xc14   :  { %v10031_v52 = vadd.f32 %v11882_v55, %v9887_v9  ;;  %v10025_v41 = vpop.f32.mrb[25].mxu0  ;;  %12593 = vmatpush3.bf16.msra.mxu0 %v12590_v1  ;;  %v10097_v9 = vpop.permute.xlu0 %10096 }
 0xc15   :  { %v12594_v53 = vpack.c.bf16 %v10079_v40, %v10078_v2  ;;  %v10026_v3 = vadd.f32 %v10025_v41, %v9882_v51 }
 0xc16   :  { %v10081_v32 = vmax.f32 %v10031_v52, 0.0 }
 0xc17   :  { %v10080_v46 = vmax.f32 %v10026_v3, 0.0  ;;  %v11885_v4 = vpop.f32.mrb[26].mxu0  ;;  %12595 = vmatprep.subr.bf16.mxu0 %v12594_v53 }
 0xc18   :  { %v10041_v18 = vadd.f32 %v11885_v4, %v9897_v31  ;;  %v10035_v57 = vpop.f32.mrb[27].mxu0  ;;  %12597 = vmatpush3.bf16.msra.mxu0 %v12594_v53 }
 0xc19   :  { %v12598_v28 = vpack.c.bf16 %v10081_v32, %v10080_v46  ;;  %v10036_v37 = vadd.f32 %v10035_v57, %v9892_v7 }
 0xc1a   :  { %v10083_v44 = vmax.f32 %v10041_v18, 0.0 }
 0xc1b   :  { %v10082_v6 = vmax.f32 %v10036_v37, 0.0  ;;  %v11888_v14 = vpop.f32.mrb[28].mxu0  ;;  %12599 = vmatprep.subr.bf16.mxu0 %v12598_v28 }
 0xc1c   :  { %v10051_v61 = vadd.f32 %v11888_v14, %v9907_v49  ;;  %v10045_v10 = vpop.f32.mrb[29].mxu0  ;;  %12601 = vmatpush3.bf16.msra.mxu0 %v12598_v28 }
 0xc1d   :  { %v12602_v39 = vpack.c.bf16 %v10083_v44, %v10082_v6  ;;  %v10046_v27 = vadd.f32 %v10045_v10, %v9902_v22 }
 0xc1e   :  { %v10085_v19 = vmax.f32 %v10051_v61, 0.0 }
 0xc1f   :  { %v10084_v43 = vmax.f32 %v10046_v27, 0.0  ;;  %v11891_v11 = vpop.f32.mrb[30].mxu0  ;;  %12603 = vmatprep.subr.bf16.mxu0 %v12602_v39 }
 0xc20   :  { %v10061_v26 = vadd.f32 %v11891_v11, %v9917_v0  ;;  %v10055_v34 = vpop.f32.mrb[31].mxu0  ;;  %12605 = vmatpush3.bf16.msra.mxu0 %v12602_v39 }
 0xc21   :  { %v12606_v36 = vpack.c.bf16 %v10085_v19, %v10084_v43  ;;  %v10056_v25 = vadd.f32 %v10055_v34, %v9912_v29 }
 0xc22   :  { %v10087_v54 = vmax.f32 %v10061_v26, 0.0 }
 0xc23   :  { %v10086_v35 = vmax.f32 %v10056_v25, 0.0  ;;  %v11894_v5 = vpop.f32.mrb[32].mxu0  ;;  %12607 = vmatprep.subr.bf16.mxu0 %v12606_v36 }
 0xc24   :  { %v10071_v62 = vadd.f32 %v11894_v5, %v9927_v23  ;;  %v10065_v12 = vpop.f32.mrb[33].mxu0  ;;  %12609 = vmatpush3.bf16.msra.mxu0 %v12606_v36 }
 0xc25   :  { %v12610_v24 = vpack.c.bf16 %v10087_v54, %v10086_v35  ;;  %v10066_v21 = vadd.f32 %v10065_v12, %v9922_v50 }
 0xc26   :  { %v10089_v56 = vmax.f32 %v10071_v62, 0.0 }
 0xc27   :  { %v10088_v63 = vmax.f32 %v10066_v21, 0.0  ;;  %12611 = vmatprep.subr.bf16.mxu0 %v12610_v24 }
 0xc28   :  { %12613 = vmatpush3.bf16.msra.mxu0 %v12610_v24 }
 0xc29   :  { %v12614_v15 = vpack.c.bf16 %v10089_v56, %v10088_v63 }
 0xc2b   :  { %12615 = vmatprep.subr.bf16.mxu0 %v12614_v15 }
 0xc2c   :  { %12617 = vmatpush3.bf16.msra.mxu0 %v12614_v15 }
 0xc2f   :  { %11928 = vmatmul.mubr.f32.vlgmr.msra.gmra.mrb[34].mxu0 %v10091_v60 }
 0xd02   :  { %v11929_v16 = vpop.f32.mrb[34].mxu0 }
 0xd03   :  { %v10176_v20 = vadd.f32 %v11929_v16, %v10102_v38  ;;  %v10170_v48 = vpop.f32.mrb[35].mxu0 }
 0xd04   :  { %v10171_v51 = vadd.f32 %v10170_v48, %v10097_v9 }
 0xd05   :  { %10180 = vst [vmem:[%s19503_s9 + $0x8] sm:$0xff] %v10176_v20 }
 0xd06   :  { %10179 = vst [vmem:[%s19503_s9] sm:$0xff] %v10171_v51 }

</bundles_post_ra>
